<compile_context>
chip_gen: v5e
topology: v5e:2x2
jax: 0.10.0
libtpu: 0.0.40
codegen_flags: <defaults>
</compile_context>

<pallas_src>
import jax
import jax.numpy as jnp
from jax.experimental import pallas as pl
from jax.experimental.pallas import tpu as pltpu


NUM_LAYERS = 3
NUM_CLASSES = 3
HP = 128     # per-gate lane padding: each gate (r/z/n) occupies a full 128-lane slab
NCP = 128    # padded classifier output lanes (lane-dense, unmasked stores)


# --------------------------- fused GRU + head kernel ---------------------------

def _fused_gru_kernel(x_ref, h0_ref, wih0_ref, wih12_ref, whh_ref,
                      bih_ref, bhh_ref, wcls_ref, bcls_ref,
                      logits_ref, ht_ref,
                      seq_scr, gi_scr):
    """All shapes are padded/lane-aligned:
       x_ref      (T*Bp, F)        time-major flattened input (batch padded to Bp)
       h0_ref     (L, Bp, Hp)      initial hidden states
       wih0_ref   (F, 3*Hp)        layer-0 input weights   (gate g at cols [g*Hp, g*Hp+H))
       wih12_ref  (L-1, Hp, 3*Hp)  layer-1/2 input weights
       whh_ref    (L, Hp, 3*Hp)    recurrent weights
       bih_ref    (L, 1, 3*Hp)     input biases
       bhh_ref    (L, 1, 3*Hp)     recurrent biases
       wcls_ref   (Hp, Ncp)        classifier weight (real block at [:H, :3])
       bcls_ref   (1, Ncp)
       logits_ref (T*Bp, Ncp)      output logits (lane-dense)
       ht_ref     (L, Bp, Hp)      final hidden state per layer
       seq_scr    (T*Bp, Hp)       VMEM: current layer's input/output sequence
       gi_scr     (T*Bp, 3*Hp)     VMEM: precomputed input-side gates for all steps
    """
    L, Bp, Hp = h0_ref.shape
    TB = gi_scr.shape[0]
    T = TB // Bp

    for layer in range(L):  # static unroll over the 3 layers
        # ---- 1) one big MXU matmul: input-side gates for ALL time steps ----
        if layer == 0:
            xin = x_ref[...]                       # (T*Bp, F)
            w_ih = wih0_ref[...]                   # (F, 3*Hp)
        else:
            xin = seq_scr[...]                     # previous layer's full output seq
            w_ih = wih12_ref[layer - 1]            # (Hp, 3*Hp)
        gi_scr[...] = (jnp.dot(xin, w_ih, preferred_element_type=jnp.float32)
                       + bih_ref[layer])           # (T*Bp, 3*Hp)

        w_hh = whh_ref[layer]                      # (Hp, 3*Hp), loop-invariant
        b_hh = bhh_ref[layer]                      # (1, 3*Hp)

        # ---- 2) serial recurrence: only the W_hh matmul is on the critical path ----
        def step(t, h_prev):
            off = pl.multiple_of(t * Bp, Bp)                     # tile-aligned sublane offset
            gi = gi_scr[pl.ds(off, Bp), :]                       # (Bp, 3*Hp)
            gh = jnp.dot(h_prev, w_hh,
                         preferred_element_type=jnp.float32) + b_hh
            # lane-aligned gate slabs (each is a full 128-lane view, no lane shuffles)
            r = jax.nn.sigmoid(gi[:, 0:Hp] + gh[:, 0:Hp])
            z = jax.nn.sigmoid(gi[:, Hp:2 * Hp] + gh[:, Hp:2 * Hp])
            n = jnp.tanh(gi[:, 2 * Hp:3 * Hp] + r * gh[:, 2 * Hp:3 * Hp])
            h_new = (1.0 - z) * n + z * h_prev
            seq_scr[pl.ds(off, Bp), :] = h_new                   # this layer's output @ t
            return h_new

        h_last = jax.lax.fori_loop(0, T, step, h0_ref[layer], unroll=True)
        ht_ref[layer] = h_last                                   # written once per layer

    # ---- 3) fused classifier head: one matmul over all (t, b), lane-dense store ----
    logits_ref[...] = (jnp.dot(seq_scr[...], wcls_ref[...],
                               preferred_element_type=jnp.float32)
                       + bcls_ref[...])


def _fused_forward(x2d, h0p, w_ih0, w_ih12, w_hh, b_ih, b_hh, w_cls, b_cls):
    TB, F = x2d.shape
    L, Bp, Hp = h0p.shape
    G = 3 * Hp
    Ncp = w_cls.shape[1]

    return pl.pallas_call(
        _fused_gru_kernel,
        out_shape=(jax.ShapeDtypeStruct((TB, Ncp), jnp.float32),
                   jax.ShapeDtypeStruct((L, Bp, Hp), jnp.float32)),
        grid_spec=pltpu.PrefetchScalarGridSpec(
            num_scalar_prefetch=0,
            grid=(1,),  # everything (weights + activations) is VMEM-resident
            in_specs=[
                pl.BlockSpec((TB, F), lambda i: (0, 0)),          # x (time-major, padded)
                pl.BlockSpec((L, Bp, Hp), lambda i: (0, 0, 0)),   # h0
                pl.BlockSpec((F, G), lambda i: (0, 0)),           # W_ih layer 0
                pl.BlockSpec((L - 1, Hp, G), lambda i: (0, 0, 0)),# W_ih layers 1..2
                pl.BlockSpec((L, Hp, G), lambda i: (0, 0, 0)),    # W_hh
                pl.BlockSpec((L, 1, G), lambda i: (0, 0, 0)),     # b_ih
                pl.BlockSpec((L, 1, G), lambda i: (0, 0, 0)),     # b_hh
                pl.BlockSpec((Hp, Ncp), lambda i: (0, 0)),        # classifier W
                pl.BlockSpec((1, Ncp), lambda i: (0, 0)),         # classifier b
            ],
            out_specs=[
                pl.BlockSpec((TB, Ncp), lambda i: (0, 0)),        # logits
                pl.BlockSpec((L, Bp, Hp), lambda i: (0, 0, 0)),   # final hidden states
            ],
            scratch_shapes=[
                pltpu.VMEM((TB, Hp), jnp.float32),                # inter-layer sequence
                pltpu.VMEM((TB, G), jnp.float32),                 # precomputed input gates
            ],
        ),
        compiler_params=pltpu.CompilerParams(
            dimension_semantics=("arbitrary",)),
    )(x2d, h0p, w_ih0, w_ih12, w_hh, b_ih, b_hh, w_cls, b_cls)


# ------------------------------ parameter handling ------------------------------

def init_params(key, num_feat=4, hidden_size=32):
    """PyTorch-style init (uniform(-1/sqrt(H), 1/sqrt(H))) + lane-aligned packing."""
    H = hidden_size
    bound = 1.0 / float(H) ** 0.5
    keys = jax.random.split(key, NUM_LAYERS * 4 + 2)
    raw = {}
    ki = 0
    for layer in range(NUM_LAYERS):
        in_dim = num_feat if layer == 0 else H
        raw[f"w_ih_{layer}"] = jax.random.uniform(
            keys[ki], (3 * H, in_dim), minval=-bound, maxval=bound, dtype=jnp.float32); ki += 1
        raw[f"w_hh_{layer}"] = jax.random.uniform(
            keys[ki], (3 * H, H), minval=-bound, maxval=bound, dtype=jnp.float32); ki += 1
        raw[f"b_ih_{layer}"] = jax.random.uniform(
            keys[ki], (3 * H,), minval=-bound, maxval=bound, dtype=jnp.float32); ki += 1
        raw[f"b_hh_{layer}"] = jax.random.uniform(
            keys[ki], (3 * H,), minval=-bound, maxval=bound, dtype=jnp.float32); ki += 1
    raw["w_cls"] = jax.random.uniform(
        keys[ki], (NUM_CLASSES, H), minval=-bound, maxval=bound, dtype=jnp.float32); ki += 1
    raw["b_cls"] = jax.random.uniform(
        keys[ki], (NUM_CLASSES,), minval=-bound, maxval=bound, dtype=jnp.float32)

    def pack_w(w, in_pad):
        # w: (3H, in) PyTorch layout -> (in_pad, 3*HP); gate g occupies cols [g*HP, g*HP+H)
        in_dim = w.shape[1]
        wt = w.T
        out = jnp.zeros((in_pad, 3 * HP), jnp.float32)
        for g in range(3):
            out = out.at[:in_dim, g * HP:g * HP + H].set(wt[:, g * H:(g + 1) * H])
        return out

    def pack_b(b):
        out = jnp.zeros((1, 3 * HP), jnp.float32)
        for g in range(3):
            out = out.at[0, g * HP:g * HP + H].set(b[g * H:(g + 1) * H])
        return out

    params = {"hidden_size": H, "num_feat": num_feat, "raw": raw}
    params["w_ih0"] = pack_w(raw["w_ih_0"], num_feat)                               # (F, 3*HP)
    params["w_ih12"] = jnp.stack(
        [pack_w(raw[f"w_ih_{l}"], HP) for l in range(1, NUM_LAYERS)], axis=0)       # (2, HP, 3*HP)
    params["w_hh"] = jnp.stack(
        [pack_w(raw[f"w_hh_{l}"], HP) for l in range(NUM_LAYERS)], axis=0)          # (3, HP, 3*HP)
    params["b_ih"] = jnp.stack(
        [pack_b(raw[f"b_ih_{l}"]) for l in range(NUM_LAYERS)], axis=0)              # (3, 1, 3*HP)
    params["b_hh"] = jnp.stack(
        [pack_b(raw[f"b_hh_{l}"]) for l in range(NUM_LAYERS)], axis=0)              # (3, 1, 3*HP)
    params["w_cls"] = jnp.zeros((HP, NCP), jnp.float32).at[:H, :NUM_CLASSES].set(
        raw["w_cls"].T)                                                             # (HP, NCP)
    params["b_cls"] = jnp.zeros((1, NCP), jnp.float32).at[0, :NUM_CLASSES].set(
        raw["b_cls"])                                                               # (1, NCP)
    return params


# --------------------------------- model wrapper ---------------------------------

def gru_classifier_forward(params, x_btf, h0=None):
    """x_btf: (B, T, F) f32; optional h0 (num_layers, B, H).
    Returns (outs (B, T, 3), ht (num_layers, B, H)) like the PyTorch module."""
    B, T, F = x_btf.shape
    H = params["hidden_size"]
    L = NUM_LAYERS
    Bp = ((B + 7) // 8) * 8        # pad batch to a full 8-sublane tile

    # Time-major + batch-padded + flattened view of the input (tiny, one-off XLA ops).
    xm = jnp.transpose(x_btf.astype(jnp.float32), (1, 0, 2))        # (T, B, F)
    xm = jnp.pad(xm, ((0, 0), (0, Bp - B), (0, 0)))                 # (T, Bp, F)
    x2d = xm.reshape(T * Bp, F)

    if h0 is None:
        h0p = jnp.zeros((L, Bp, HP), jnp.float32)
    else:
        h0p = jnp.zeros((L, Bp, HP), jnp.float32).at[:, :B, :H].set(
            h0.astype(jnp.float32))

    logits2d, htp = _fused_forward(
        x2d, h0p,
        params["w_ih0"], params["w_ih12"], params["w_hh"],
        params["b_ih"], params["b_hh"],
        params["w_cls"], params["b_cls"])

    outs = logits2d.reshape(T, Bp, NCP)[:, :B, :NUM_CLASSES]        # (T, B, 3)
    outs = jnp.transpose(outs, (1, 0, 2))                           # (B, T, 3)
    ht = htp[:, :B, :H]                                             # (L, B, H)
    return outs, ht


# ----------------------------- pure-JAX reference -----------------------------

def _reference_forward(raw, x_btf, h0, H):
    """Straight jnp implementation of the eval-mode PyTorch GRU + Linear head."""
    B, T, _ = x_btf.shape
    hp = jax.lax.Precision.HIGHEST
    layer_in = x_btf
    h_finals = []
    for layer in range(NUM_LAYERS):
        w_ih, w_hh = raw[f"w_ih_{layer}"], raw[f"w_hh_{layer}"]
        b_ih, b_hh = raw[f"b_ih_{layer}"], raw[f"b_hh_{layer}"]
        h = h0[layer]
        outs = []
        for t in range(T):
            x_t = layer_in[:, t, :]
            gi = jnp.dot(x_t, w_ih.T, precision=hp) + b_ih
            gh = jnp.dot(h, w_hh.T, precision=hp) + b_hh
            i_r, i_z, i_n = jnp.split(gi, 3, axis=1)
            h_r, h_z, h_n = jnp.split(gh, 3, axis=1)
            r = jax.nn.sigmoid(i_r + h_r)
            z = jax.nn.sigmoid(i_z + h_z)
            n = jnp.tanh(i_n + r * h_n)
            h = (1.0 - z) * n + z * h
            outs.append(h)
        layer_in = jnp.stack(outs, axis=1)        # (B, T, H)
        h_finals.append(h)
    logits = jnp.dot(layer_in.reshape(B * T, H), raw["w_cls"].T,
                     precision=hp) + raw["b_cls"]
    return logits.reshape(B, T, NUM_CLASSES), jnp.stack(h_finals, axis=0)


# --------------------------------------- main ---------------------------------------

if __name__ == "__main__":
    key = jax.random.PRNGKey(0)
    k_param, k_x = jax.random.split(key)

    B, T, F, H = 2, 8, 4, 32
    params = init_params(k_param, num_feat=F, hidden_size=H)
    x = jax.random.normal(k_x, (B, T, F), dtype=jnp.float32)

    outs, ht = gru_classifier_forward(params, x)
    jax.block_until_ready((outs, ht))

    assert outs.shape == (B, T, NUM_CLASSES), outs.shape
    assert ht.shape == (NUM_LAYERS, B, H), ht.shape

    # Correctness check against a pure-JAX reference (generous tolerance for MXU
    # accumulation-order / precision differences).
    ref_outs, ref_ht = _reference_forward(
        params["raw"], x, jnp.zeros((NUM_LAYERS, B, H), jnp.float32), H)
    assert jnp.allclose(outs, ref_outs, atol=2e-2, rtol=2e-2), \
        float(jnp.max(jnp.abs(outs - ref_outs)))
    assert jnp.allclose(ht, ref_ht, atol=2e-2, rtol=2e-2), \
        float(jnp.max(jnp.abs(ht - ref_ht)))

    print("KERNEL_OK")
</pallas_src>

<mosaic_0001>
module attributes {stable_mosaic.version = 11 : i64} {
  func.func @_fused_gru_kernel(%arg0: i32, %arg1: memref<64x4xf32, #tpu.memory_space<vmem>>, %arg2: memref<3x8x128xf32, #tpu.memory_space<vmem>>, %arg3: memref<4x384xf32, #tpu.memory_space<vmem>>, %arg4: memref<2x128x384xf32, #tpu.memory_space<vmem>>, %arg5: memref<3x128x384xf32, #tpu.memory_space<vmem>>, %arg6: memref<3x1x384xf32, #tpu.memory_space<vmem>>, %arg7: memref<3x1x384xf32, #tpu.memory_space<vmem>>, %arg8: memref<128x128xf32, #tpu.memory_space<vmem>>, %arg9: memref<1x128xf32, #tpu.memory_space<vmem>>, %arg10: memref<64x128xf32, #tpu.memory_space<vmem>>, %arg11: memref<3x8x128xf32, #tpu.memory_space<vmem>>, %arg12: memref<64x128xf32, #tpu.memory_space<vmem>>, %arg13: memref<64x384xf32, #tpu.memory_space<vmem>>) attributes {dimension_semantics = [#tpu.dimension_semantics<arbitrary>], iteration_bounds = array<i64: 1>, scalar_prefetch = 0 : i64, scratch_operands = 2 : i64, tpu.core_type = #tpu.core_type<tc>, window_params = [{pipeline_mode = #tpu.pipeline_mode<synchronous>, transform_indices = @transform_0, window_bounds = array<i64: 64, 4>}, {pipeline_mode = #tpu.pipeline_mode<synchronous>, transform_indices = @transform_1, window_bounds = array<i64: 3, 8, 128>}, {pipeline_mode = #tpu.pipeline_mode<synchronous>, transform_indices = @transform_2, window_bounds = array<i64: 4, 384>}, {pipeline_mode = #tpu.pipeline_mode<synchronous>, transform_indices = @transform_3, window_bounds = array<i64: 2, 128, 384>}, {pipeline_mode = #tpu.pipeline_mode<synchronous>, transform_indices = @transform_4, window_bounds = array<i64: 3, 128, 384>}, {pipeline_mode = #tpu.pipeline_mode<synchronous>, transform_indices = @transform_5, window_bounds = array<i64: 3, 1, 384>}, {pipeline_mode = #tpu.pipeline_mode<synchronous>, transform_indices = @transform_6, window_bounds = array<i64: 3, 1, 384>}, {pipeline_mode = #tpu.pipeline_mode<synchronous>, transform_indices = @transform_7, window_bounds = array<i64: 128, 128>}, {pipeline_mode = #tpu.pipeline_mode<synchronous>, transform_indices = @transform_8, window_bounds = array<i64: 1, 128>}, {pipeline_mode = #tpu.pipeline_mode<synchronous>, transform_indices = @transform_9, window_bounds = array<i64: 64, 128>}, {pipeline_mode = #tpu.pipeline_mode<synchronous>, transform_indices = @transform_10, window_bounds = array<i64: 3, 8, 128>}]} {
    %c0 = arith.constant 0 : index
    %c0_0 = arith.constant 0 : index
    %0 = vector.load %arg1[%c0, %c0_0] : memref<64x4xf32, #tpu.memory_space<vmem>>, vector<64x4xf32>
    %c0_1 = arith.constant 0 : index
    %c0_2 = arith.constant 0 : index
    %1 = vector.load %arg3[%c0_1, %c0_2] : memref<4x384xf32, #tpu.memory_space<vmem>>, vector<4x384xf32>
    %cst = arith.constant dense<0.000000e+00> : vector<64x384xf32>
    %2 = tpu.matmul %0, %1, %cst {dimension_numbers = #tpu.dot_dimension_numbers<[1], [0], [0], [1], [0, 0, 1, 1], [], []>} : vector<64x4xf32>, vector<4x384xf32>, vector<64x384xf32> -> vector<64x384xf32>
    %c0_3 = arith.constant 0 : index
    %c0_4 = arith.constant 0 : index
    %c0_5 = arith.constant 0 : index
    %3 = vector.load %arg6[%c0_3, %c0_4, %c0_5] : memref<3x1x384xf32, #tpu.memory_space<vmem>>, vector<1x1x384xf32>
    %4 = vector.shape_cast %3 : vector<1x1x384xf32> to vector<1x384xf32>
    %5 = vector.broadcast %4 : vector<1x384xf32> to vector<64x384xf32>
    %6 = arith.addf %2, %5 : vector<64x384xf32>
    %c0_6 = arith.constant 0 : index
    %c0_7 = arith.constant 0 : index
    %7 = vector.load %arg13[%c0_6, %c0_7] : memref<64x384xf32, #tpu.memory_space<vmem>>, vector<64x384xf32>
    tpu.vector_store %arg13[%c0_6, %c0_7], %6 {strides = array<i32>} : memref<64x384xf32, #tpu.memory_space<vmem>>, vector<64x384xf32>,
    %c0_8 = arith.constant 0 : index
    %c0_9 = arith.constant 0 : index
    %c0_10 = arith.constant 0 : index
    %8 = vector.load %arg5[%c0_8, %c0_9, %c0_10] : memref<3x128x384xf32, #tpu.memory_space<vmem>>, vector<1x128x384xf32>
    %9 = vector.shape_cast %8 : vector<1x128x384xf32> to vector<128x384xf32>
    %c0_11 = arith.constant 0 : index
    %c0_12 = arith.constant 0 : index
    %c0_13 = arith.constant 0 : index
    %10 = vector.load %arg7[%c0_11, %c0_12, %c0_13] : memref<3x1x384xf32, #tpu.memory_space<vmem>>, vector<1x1x384xf32>
    %11 = vector.shape_cast %10 : vector<1x1x384xf32> to vector<1x384xf32>
    %c0_14 = arith.constant 0 : index
    %c0_15 = arith.constant 0 : index
    %c0_16 = arith.constant 0 : index
    %12 = vector.load %arg2[%c0_14, %c0_15, %c0_16] : memref<3x8x128xf32, #tpu.memory_space<vmem>>, vector<1x8x128xf32>
    %13 = vector.shape_cast %12 : vector<1x8x128xf32> to vector<8x128xf32>
    %c0_i32 = arith.constant 0 : i32
    %c8_i32 = arith.constant 8 : i32
    %14 = arith.muli %c0_i32, %c8_i32 : i32
    %15 = tpu.assume_multiple %14, 8 : i32
    %16 = arith.index_cast %15 : i32 to index
    %c0_17 = arith.constant 0 : index
    %17 = vector.load %arg13[%16, %c0_17] : memref<64x384xf32, #tpu.memory_space<vmem>>, vector<8x384xf32>
    %cst_18 = arith.constant dense<0.000000e+00> : vector<8x384xf32>
    %18 = tpu.matmul %13, %9, %cst_18 {dimension_numbers = #tpu.dot_dimension_numbers<[1], [0], [0], [1], [0, 0, 1, 1], [], []>} : vector<8x128xf32>, vector<128x384xf32>, vector<8x384xf32> -> vector<8x384xf32>
    %19 = vector.broadcast %11 : vector<1x384xf32> to vector<8x384xf32>
    %20 = arith.addf %18, %19 : vector<8x384xf32>
    %21 = vector.extract_strided_slice %17 {offsets = [0, 0], sizes = [8, 128], strides = [1, 1]} : vector<8x384xf32> to vector<8x128xf32>
    %22 = vector.extract_strided_slice %20 {offsets = [0, 0], sizes = [8, 128], strides = [1, 1]} : vector<8x384xf32> to vector<8x128xf32>
    %23 = arith.addf %21, %22 : vector<8x128xf32>
    %24 = arith.negf %23 : vector<8x128xf32>
    %25 = math.exp %24 : vector<8x128xf32>
    %cst_19 = arith.constant 1.000000e+00 : f32
    %26 = vector.broadcast %cst_19 : f32 to vector<8x128xf32>
    %27 = arith.addf %26, %25 : vector<8x128xf32>
    %28 = arith.divf %26, %27 : vector<8x128xf32>
    %29 = vector.extract_strided_slice %17 {offsets = [0, 128], sizes = [8, 128], strides = [1, 1]} : vector<8x384xf32> to vector<8x128xf32>
    %30 = vector.extract_strided_slice %20 {offsets = [0, 128], sizes = [8, 128], strides = [1, 1]} : vector<8x384xf32> to vector<8x128xf32>
    %31 = arith.addf %29, %30 : vector<8x128xf32>
    %32 = arith.negf %31 : vector<8x128xf32>
    %33 = math.exp %32 : vector<8x128xf32>
    %cst_20 = arith.constant 1.000000e+00 : f32
    %34 = vector.broadcast %cst_20 : f32 to vector<8x128xf32>
    %35 = arith.addf %34, %33 : vector<8x128xf32>
    %36 = arith.divf %34, %35 : vector<8x128xf32>
    %37 = vector.extract_strided_slice %17 {offsets = [0, 256], sizes = [8, 128], strides = [1, 1]} : vector<8x384xf32> to vector<8x128xf32>
    %38 = vector.extract_strided_slice %20 {offsets = [0, 256], sizes = [8, 128], strides = [1, 1]} : vector<8x384xf32> to vector<8x128xf32>
    %39 = arith.mulf %28, %38 : vector<8x128xf32>
    %40 = arith.addf %37, %39 : vector<8x128xf32>
    %41 = math.tanh %40 : vector<8x128xf32>
    %cst_21 = arith.constant 1.000000e+00 : f32
    %42 = vector.broadcast %cst_21 : f32 to vector<8x128xf32>
    %43 = arith.subf %42, %36 : vector<8x128xf32>
    %44 = arith.mulf %43, %41 : vector<8x128xf32>
    %45 = arith.mulf %36, %13 : vector<8x128xf32>
    %46 = arith.addf %44, %45 : vector<8x128xf32>
    %47 = arith.index_cast %15 : i32 to index
    %c0_22 = arith.constant 0 : index
    %48 = vector.load %arg12[%47, %c0_22] : memref<64x128xf32, #tpu.memory_space<vmem>>, vector<8x128xf32>
    tpu.vector_store %arg12[%47, %c0_22], %46 {strides = array<i32>} : memref<64x128xf32, #tpu.memory_space<vmem>>, vector<8x128xf32>,
    %c1_i32 = arith.constant 1 : i32
    %c8_i32_23 = arith.constant 8 : i32
    %49 = arith.muli %c1_i32, %c8_i32_23 : i32
    %50 = tpu.assume_multiple %49, 8 : i32
    %51 = arith.index_cast %50 : i32 to index
    %c0_24 = arith.constant 0 : index
    %52 = vector.load %arg13[%51, %c0_24] : memref<64x384xf32, #tpu.memory_space<vmem>>, vector<8x384xf32>
    %cst_25 = arith.constant dense<0.000000e+00> : vector<8x384xf32>
    %53 = tpu.matmul %46, %9, %cst_25 {dimension_numbers = #tpu.dot_dimension_numbers<[1], [0], [0], [1], [0, 0, 1, 1], [], []>} : vector<8x128xf32>, vector<128x384xf32>, vector<8x384xf32> -> vector<8x384xf32>
    %54 = vector.broadcast %11 : vector<1x384xf32> to vector<8x384xf32>
    %55 = arith.addf %53, %54 : vector<8x384xf32>
    %56 = vector.extract_strided_slice %52 {offsets = [0, 0], sizes = [8, 128], strides = [1, 1]} : vector<8x384xf32> to vector<8x128xf32>
    %57 = vector.extract_strided_slice %55 {offsets = [0, 0], sizes = [8, 128], strides = [1, 1]} : vector<8x384xf32> to vector<8x128xf32>
    %58 = arith.addf %56, %57 : vector<8x128xf32>
    %59 = arith.negf %58 : vector<8x128xf32>
    %60 = math.exp %59 : vector<8x128xf32>
    %cst_26 = arith.constant 1.000000e+00 : f32
    %61 = vector.broadcast %cst_26 : f32 to vector<8x128xf32>
    %62 = arith.addf %61, %60 : vector<8x128xf32>
    %63 = arith.divf %61, %62 : vector<8x128xf32>
    %64 = vector.extract_strided_slice %52 {offsets = [0, 128], sizes = [8, 128], strides = [1, 1]} : vector<8x384xf32> to vector<8x128xf32>
    %65 = vector.extract_strided_slice %55 {offsets = [0, 128], sizes = [8, 128], strides = [1, 1]} : vector<8x384xf32> to vector<8x128xf32>
    %66 = arith.addf %64, %65 : vector<8x128xf32>
    %67 = arith.negf %66 : vector<8x128xf32>
    %68 = math.exp %67 : vector<8x128xf32>
    %cst_27 = arith.constant 1.000000e+00 : f32
    %69 = vector.broadcast %cst_27 : f32 to vector<8x128xf32>
    %70 = arith.addf %69, %68 : vector<8x128xf32>
    %71 = arith.divf %69, %70 : vector<8x128xf32>
    %72 = vector.extract_strided_slice %52 {offsets = [0, 256], sizes = [8, 128], strides = [1, 1]} : vector<8x384xf32> to vector<8x128xf32>
    %73 = vector.extract_strided_slice %55 {offsets = [0, 256], sizes = [8, 128], strides = [1, 1]} : vector<8x384xf32> to vector<8x128xf32>
    %74 = arith.mulf %63, %73 : vector<8x128xf32>
    %75 = arith.addf %72, %74 : vector<8x128xf32>
    %76 = math.tanh %75 : vector<8x128xf32>
    %cst_28 = arith.constant 1.000000e+00 : f32
    %77 = vector.broadcast %cst_28 : f32 to vector<8x128xf32>
    %78 = arith.subf %77, %71 : vector<8x128xf32>
    %79 = arith.mulf %78, %76 : vector<8x128xf32>
    %80 = arith.mulf %71, %46 : vector<8x128xf32>
    %81 = arith.addf %79, %80 : vector<8x128xf32>
    %82 = arith.index_cast %50 : i32 to index
    %c0_29 = arith.constant 0 : index
    %83 = vector.load %arg12[%82, %c0_29] : memref<64x128xf32, #tpu.memory_space<vmem>>, vector<8x128xf32>
    tpu.vector_store %arg12[%82, %c0_29], %81 {strides = array<i32>} : memref<64x128xf32, #tpu.memory_space<vmem>>, vector<8x128xf32>,
    %c2_i32 = arith.constant 2 : i32
    %c8_i32_30 = arith.constant 8 : i32
    %84 = arith.muli %c2_i32, %c8_i32_30 : i32
    %85 = tpu.assume_multiple %84, 8 : i32
    %86 = arith.index_cast %85 : i32 to index
    %c0_31 = arith.constant 0 : index
    %87 = vector.load %arg13[%86, %c0_31] : memref<64x384xf32, #tpu.memory_space<vmem>>, vector<8x384xf32>
    %cst_32 = arith.constant dense<0.000000e+00> : vector<8x384xf32>
    %88 = tpu.matmul %81, %9, %cst_32 {dimension_numbers = #tpu.dot_dimension_numbers<[1], [0], [0], [1], [0, 0, 1, 1], [], []>} : vector<8x128xf32>, vector<128x384xf32>, vector<8x384xf32> -> vector<8x384xf32>
    %89 = vector.broadcast %11 : vector<1x384xf32> to vector<8x384xf32>
    %90 = arith.addf %88, %89 : vector<8x384xf32>
    %91 = vector.extract_strided_slice %87 {offsets = [0, 0], sizes = [8, 128], strides = [1, 1]} : vector<8x384xf32> to vector<8x128xf32>
    %92 = vector.extract_strided_slice %90 {offsets = [0, 0], sizes = [8, 128], strides = [1, 1]} : vector<8x384xf32> to vector<8x128xf32>
    %93 = arith.addf %91, %92 : vector<8x128xf32>
    %94 = arith.negf %93 : vector<8x128xf32>
    %95 = math.exp %94 : vector<8x128xf32>
    %cst_33 = arith.constant 1.000000e+00 : f32
    %96 = vector.broadcast %cst_33 : f32 to vector<8x128xf32>
    %97 = arith.addf %96, %95 : vector<8x128xf32>
    %98 = arith.divf %96, %97 : vector<8x128xf32>
    %99 = vector.extract_strided_slice %87 {offsets = [0, 128], sizes = [8, 128], strides = [1, 1]} : vector<8x384xf32> to vector<8x128xf32>
    %100 = vector.extract_strided_slice %90 {offsets = [0, 128], sizes = [8, 128], strides = [1, 1]} : vector<8x384xf32> to vector<8x128xf32>
    %101 = arith.addf %99, %100 : vector<8x128xf32>
    %102 = arith.negf %101 : vector<8x128xf32>
    %103 = math.exp %102 : vector<8x128xf32>
    %cst_34 = arith.constant 1.000000e+00 : f32
    %104 = vector.broadcast %cst_34 : f32 to vector<8x128xf32>
    %105 = arith.addf %104, %103 : vector<8x128xf32>
    %106 = arith.divf %104, %105 : vector<8x128xf32>
    %107 = vector.extract_strided_slice %87 {offsets = [0, 256], sizes = [8, 128], strides = [1, 1]} : vector<8x384xf32> to vector<8x128xf32>
    %108 = vector.extract_strided_slice %90 {offsets = [0, 256], sizes = [8, 128], strides = [1, 1]} : vector<8x384xf32> to vector<8x128xf32>
    %109 = arith.mulf %98, %108 : vector<8x128xf32>
    %110 = arith.addf %107, %109 : vector<8x128xf32>
    %111 = math.tanh %110 : vector<8x128xf32>
    %cst_35 = arith.constant 1.000000e+00 : f32
    %112 = vector.broadcast %cst_35 : f32 to vector<8x128xf32>
    %113 = arith.subf %112, %106 : vector<8x128xf32>
    %114 = arith.mulf %113, %111 : vector<8x128xf32>
    %115 = arith.mulf %106, %81 : vector<8x128xf32>
    %116 = arith.addf %114, %115 : vector<8x128xf32>
    %117 = arith.index_cast %85 : i32 to index
    %c0_36 = arith.constant 0 : index
    %118 = vector.load %arg12[%117, %c0_36] : memref<64x128xf32, #tpu.memory_space<vmem>>, vector<8x128xf32>
    tpu.vector_store %arg12[%117, %c0_36], %116 {strides = array<i32>} : memref<64x128xf32, #tpu.memory_space<vmem>>, vector<8x128xf32>,
    %c3_i32 = arith.constant 3 : i32
    %c8_i32_37 = arith.constant 8 : i32
    %119 = arith.muli %c3_i32, %c8_i32_37 : i32
    %120 = tpu.assume_multiple %119, 8 : i32
    %121 = arith.index_cast %120 : i32 to index
    %c0_38 = arith.constant 0 : index
    %122 = vector.load %arg13[%121, %c0_38] : memref<64x384xf32, #tpu.memory_space<vmem>>, vector<8x384xf32>
    %cst_39 = arith.constant dense<0.000000e+00> : vector<8x384xf32>
    %123 = tpu.matmul %116, %9, %cst_39 {dimension_numbers = #tpu.dot_dimension_numbers<[1], [0], [0], [1], [0, 0, 1, 1], [], []>} : vector<8x128xf32>, vector<128x384xf32>, vector<8x384xf32> -> vector<8x384xf32>
    %124 = vector.broadcast %11 : vector<1x384xf32> to vector<8x384xf32>
    %125 = arith.addf %123, %124 : vector<8x384xf32>
    %126 = vector.extract_strided_slice %122 {offsets = [0, 0], sizes = [8, 128], strides = [1, 1]} : vector<8x384xf32> to vector<8x128xf32>
    %127 = vector.extract_strided_slice %125 {offsets = [0, 0], sizes = [8, 128], strides = [1, 1]} : vector<8x384xf32> to vector<8x128xf32>
    %128 = arith.addf %126, %127 : vector<8x128xf32>
    %129 = arith.negf %128 : vector<8x128xf32>
    %130 = math.exp %129 : vector<8x128xf32>
    %cst_40 = arith.constant 1.000000e+00 : f32
    %131 = vector.broadcast %cst_40 : f32 to vector<8x128xf32>
    %132 = arith.addf %131, %130 : vector<8x128xf32>
    %133 = arith.divf %131, %132 : vector<8x128xf32>
    %134 = vector.extract_strided_slice %122 {offsets = [0, 128], sizes = [8, 128], strides = [1, 1]} : vector<8x384xf32> to vector<8x128xf32>
    %135 = vector.extract_strided_slice %125 {offsets = [0, 128], sizes = [8, 128], strides = [1, 1]} : vector<8x384xf32> to vector<8x128xf32>
    %136 = arith.addf %134, %135 : vector<8x128xf32>
    %137 = arith.negf %136 : vector<8x128xf32>
    %138 = math.exp %137 : vector<8x128xf32>
    %cst_41 = arith.constant 1.000000e+00 : f32
    %139 = vector.broadcast %cst_41 : f32 to vector<8x128xf32>
    %140 = arith.addf %139, %138 : vector<8x128xf32>
    %141 = arith.divf %139, %140 : vector<8x128xf32>
    %142 = vector.extract_strided_slice %122 {offsets = [0, 256], sizes = [8, 128], strides = [1, 1]} : vector<8x384xf32> to vector<8x128xf32>
    %143 = vector.extract_strided_slice %125 {offsets = [0, 256], sizes = [8, 128], strides = [1, 1]} : vector<8x384xf32> to vector<8x128xf32>
    %144 = arith.mulf %133, %143 : vector<8x128xf32>
    %145 = arith.addf %142, %144 : vector<8x128xf32>
    %146 = math.tanh %145 : vector<8x128xf32>
    %cst_42 = arith.constant 1.000000e+00 : f32
    %147 = vector.broadcast %cst_42 : f32 to vector<8x128xf32>
    %148 = arith.subf %147, %141 : vector<8x128xf32>
    %149 = arith.mulf %148, %146 : vector<8x128xf32>
    %150 = arith.mulf %141, %116 : vector<8x128xf32>
    %151 = arith.addf %149, %150 : vector<8x128xf32>
    %152 = arith.index_cast %120 : i32 to index
    %c0_43 = arith.constant 0 : index
    %153 = vector.load %arg12[%152, %c0_43] : memref<64x128xf32, #tpu.memory_space<vmem>>, vector<8x128xf32>
    tpu.vector_store %arg12[%152, %c0_43], %151 {strides = array<i32>} : memref<64x128xf32, #tpu.memory_space<vmem>>, vector<8x128xf32>,
    %c4_i32 = arith.constant 4 : i32
    %c8_i32_44 = arith.constant 8 : i32
    %154 = arith.muli %c4_i32, %c8_i32_44 : i32
    %155 = tpu.assume_multiple %154, 8 : i32
    %156 = arith.index_cast %155 : i32 to index
    %c0_45 = arith.constant 0 : index
    %157 = vector.load %arg13[%156, %c0_45] : memref<64x384xf32, #tpu.memory_space<vmem>>, vector<8x384xf32>
    %cst_46 = arith.constant dense<0.000000e+00> : vector<8x384xf32>
    %158 = tpu.matmul %151, %9, %cst_46 {dimension_numbers = #tpu.dot_dimension_numbers<[1], [0], [0], [1], [0, 0, 1, 1], [], []>} : vector<8x128xf32>, vector<128x384xf32>, vector<8x384xf32> -> vector<8x384xf32>
    %159 = vector.broadcast %11 : vector<1x384xf32> to vector<8x384xf32>
    %160 = arith.addf %158, %159 : vector<8x384xf32>
    %161 = vector.extract_strided_slice %157 {offsets = [0, 0], sizes = [8, 128], strides = [1, 1]} : vector<8x384xf32> to vector<8x128xf32>
    %162 = vector.extract_strided_slice %160 {offsets = [0, 0], sizes = [8, 128], strides = [1, 1]} : vector<8x384xf32> to vector<8x128xf32>
    %163 = arith.addf %161, %162 : vector<8x128xf32>
    %164 = arith.negf %163 : vector<8x128xf32>
    %165 = math.exp %164 : vector<8x128xf32>
    %cst_47 = arith.constant 1.000000e+00 : f32
    %166 = vector.broadcast %cst_47 : f32 to vector<8x128xf32>
    %167 = arith.addf %166, %165 : vector<8x128xf32>
    %168 = arith.divf %166, %167 : vector<8x128xf32>
    %169 = vector.extract_strided_slice %157 {offsets = [0, 128], sizes = [8, 128], strides = [1, 1]} : vector<8x384xf32> to vector<8x128xf32>
    %170 = vector.extract_strided_slice %160 {offsets = [0, 128], sizes = [8, 128], strides = [1, 1]} : vector<8x384xf32> to vector<8x128xf32>
    %171 = arith.addf %169, %170 : vector<8x128xf32>
    %172 = arith.negf %171 : vector<8x128xf32>
    %173 = math.exp %172 : vector<8x128xf32>
    %cst_48 = arith.constant 1.000000e+00 : f32
    %174 = vector.broadcast %cst_48 : f32 to vector<8x128xf32>
    %175 = arith.addf %174, %173 : vector<8x128xf32>
    %176 = arith.divf %174, %175 : vector<8x128xf32>
    %177 = vector.extract_strided_slice %157 {offsets = [0, 256], sizes = [8, 128], strides = [1, 1]} : vector<8x384xf32> to vector<8x128xf32>
    %178 = vector.extract_strided_slice %160 {offsets = [0, 256], sizes = [8, 128], strides = [1, 1]} : vector<8x384xf32> to vector<8x128xf32>
    %179 = arith.mulf %168, %178 : vector<8x128xf32>
    %180 = arith.addf %177, %179 : vector<8x128xf32>
    %181 = math.tanh %180 : vector<8x128xf32>
    %cst_49 = arith.constant 1.000000e+00 : f32
    %182 = vector.broadcast %cst_49 : f32 to vector<8x128xf32>
    %183 = arith.subf %182, %176 : vector<8x128xf32>
    %184 = arith.mulf %183, %181 : vector<8x128xf32>
    %185 = arith.mulf %176, %151 : vector<8x128xf32>
    %186 = arith.addf %184, %185 : vector<8x128xf32>
    %187 = arith.index_cast %155 : i32 to index
    %c0_50 = arith.constant 0 : index
    %188 = vector.load %arg12[%187, %c0_50] : memref<64x128xf32, #tpu.memory_space<vmem>>, vector<8x128xf32>
    tpu.vector_store %arg12[%187, %c0_50], %186 {strides = array<i32>} : memref<64x128xf32, #tpu.memory_space<vmem>>, vector<8x128xf32>,
    %c5_i32 = arith.constant 5 : i32
    %c8_i32_51 = arith.constant 8 : i32
    %189 = arith.muli %c5_i32, %c8_i32_51 : i32
    %190 = tpu.assume_multiple %189, 8 : i32
    %191 = arith.index_cast %190 : i32 to index
    %c0_52 = arith.constant 0 : index
    %192 = vector.load %arg13[%191, %c0_52] : memref<64x384xf32, #tpu.memory_space<vmem>>, vector<8x384xf32>
    %cst_53 = arith.constant dense<0.000000e+00> : vector<8x384xf32>
    %193 = tpu.matmul %186, %9, %cst_53 {dimension_numbers = #tpu.dot_dimension_numbers<[1], [0], [0], [1], [0, 0, 1, 1], [], []>} : vector<8x128xf32>, vector<128x384xf32>, vector<8x384xf32> -> vector<8x384xf32>
    %194 = vector.broadcast %11 : vector<1x384xf32> to vector<8x384xf32>
    %195 = arith.addf %193, %194 : vector<8x384xf32>
    %196 = vector.extract_strided_slice %192 {offsets = [0, 0], sizes = [8, 128], strides = [1, 1]} : vector<8x384xf32> to vector<8x128xf32>
    %197 = vector.extract_strided_slice %195 {offsets = [0, 0], sizes = [8, 128], strides = [1, 1]} : vector<8x384xf32> to vector<8x128xf32>
    %198 = arith.addf %196, %197 : vector<8x128xf32>
    %199 = arith.negf %198 : vector<8x128xf32>
    %200 = math.exp %199 : vector<8x128xf32>
    %cst_54 = arith.constant 1.000000e+00 : f32
    %201 = vector.broadcast %cst_54 : f32 to vector<8x128xf32>
    %202 = arith.addf %201, %200 : vector<8x128xf32>
    %203 = arith.divf %201, %202 : vector<8x128xf32>
    %204 = vector.extract_strided_slice %192 {offsets = [0, 128], sizes = [8, 128], strides = [1, 1]} : vector<8x384xf32> to vector<8x128xf32>
    %205 = vector.extract_strided_slice %195 {offsets = [0, 128], sizes = [8, 128], strides = [1, 1]} : vector<8x384xf32> to vector<8x128xf32>
    %206 = arith.addf %204, %205 : vector<8x128xf32>
    %207 = arith.negf %206 : vector<8x128xf32>
    %208 = math.exp %207 : vector<8x128xf32>
    %cst_55 = arith.constant 1.000000e+00 : f32
    %209 = vector.broadcast %cst_55 : f32 to vector<8x128xf32>
    %210 = arith.addf %209, %208 : vector<8x128xf32>
    %211 = arith.divf %209, %210 : vector<8x128xf32>
    %212 = vector.extract_strided_slice %192 {offsets = [0, 256], sizes = [8, 128], strides = [1, 1]} : vector<8x384xf32> to vector<8x128xf32>
    %213 = vector.extract_strided_slice %195 {offsets = [0, 256], sizes = [8, 128], strides = [1, 1]} : vector<8x384xf32> to vector<8x128xf32>
    %214 = arith.mulf %203, %213 : vector<8x128xf32>
    %215 = arith.addf %212, %214 : vector<8x128xf32>
    %216 = math.tanh %215 : vector<8x128xf32>
    %cst_56 = arith.constant 1.000000e+00 : f32
    %217 = vector.broadcast %cst_56 : f32 to vector<8x128xf32>
    %218 = arith.subf %217, %211 : vector<8x128xf32>
    %219 = arith.mulf %218, %216 : vector<8x128xf32>
    %220 = arith.mulf %211, %186 : vector<8x128xf32>
    %221 = arith.addf %219, %220 : vector<8x128xf32>
    %222 = arith.index_cast %190 : i32 to index
    %c0_57 = arith.constant 0 : index
    %223 = vector.load %arg12[%222, %c0_57] : memref<64x128xf32, #tpu.memory_space<vmem>>, vector<8x128xf32>
    tpu.vector_store %arg12[%222, %c0_57], %221 {strides = array<i32>} : memref<64x128xf32, #tpu.memory_space<vmem>>, vector<8x128xf32>,
    %c6_i32 = arith.constant 6 : i32
    %c8_i32_58 = arith.constant 8 : i32
    %224 = arith.muli %c6_i32, %c8_i32_58 : i32
    %225 = tpu.assume_multiple %224, 8 : i32
    %226 = arith.index_cast %225 : i32 to index
    %c0_59 = arith.constant 0 : index
    %227 = vector.load %arg13[%226, %c0_59] : memref<64x384xf32, #tpu.memory_space<vmem>>, vector<8x384xf32>
    %cst_60 = arith.constant dense<0.000000e+00> : vector<8x384xf32>
    %228 = tpu.matmul %221, %9, %cst_60 {dimension_numbers = #tpu.dot_dimension_numbers<[1], [0], [0], [1], [0, 0, 1, 1], [], []>} : vector<8x128xf32>, vector<128x384xf32>, vector<8x384xf32> -> vector<8x384xf32>
    %229 = vector.broadcast %11 : vector<1x384xf32> to vector<8x384xf32>
    %230 = arith.addf %228, %229 : vector<8x384xf32>
    %231 = vector.extract_strided_slice %227 {offsets = [0, 0], sizes = [8, 128], strides = [1, 1]} : vector<8x384xf32> to vector<8x128xf32>
    %232 = vector.extract_strided_slice %230 {offsets = [0, 0], sizes = [8, 128], strides = [1, 1]} : vector<8x384xf32> to vector<8x128xf32>
    %233 = arith.addf %231, %232 : vector<8x128xf32>
    %234 = arith.negf %233 : vector<8x128xf32>
    %235 = math.exp %234 : vector<8x128xf32>
    %cst_61 = arith.constant 1.000000e+00 : f32
    %236 = vector.broadcast %cst_61 : f32 to vector<8x128xf32>
    %237 = arith.addf %236, %235 : vector<8x128xf32>
    %238 = arith.divf %236, %237 : vector<8x128xf32>
    %239 = vector.extract_strided_slice %227 {offsets = [0, 128], sizes = [8, 128], strides = [1, 1]} : vector<8x384xf32> to vector<8x128xf32>
    %240 = vector.extract_strided_slice %230 {offsets = [0, 128], sizes = [8, 128], strides = [1, 1]} : vector<8x384xf32> to vector<8x128xf32>
    %241 = arith.addf %239, %240 : vector<8x128xf32>
    %242 = arith.negf %241 : vector<8x128xf32>
    %243 = math.exp %242 : vector<8x128xf32>
    %cst_62 = arith.constant 1.000000e+00 : f32
    %244 = vector.broadcast %cst_62 : f32 to vector<8x128xf32>
    %245 = arith.addf %244, %243 : vector<8x128xf32>
    %246 = arith.divf %244, %245 : vector<8x128xf32>
    %247 = vector.extract_strided_slice %227 {offsets = [0, 256], sizes = [8, 128], strides = [1, 1]} : vector<8x384xf32> to vector<8x128xf32>
    %248 = vector.extract_strided_slice %230 {offsets = [0, 256], sizes = [8, 128], strides = [1, 1]} : vector<8x384xf32> to vector<8x128xf32>
    %249 = arith.mulf %238, %248 : vector<8x128xf32>
    %250 = arith.addf %247, %249 : vector<8x128xf32>
    %251 = math.tanh %250 : vector<8x128xf32>
    %cst_63 = arith.constant 1.000000e+00 : f32
    %252 = vector.broadcast %cst_63 : f32 to vector<8x128xf32>
    %253 = arith.subf %252, %246 : vector<8x128xf32>
    %254 = arith.mulf %253, %251 : vector<8x128xf32>
    %255 = arith.mulf %246, %221 : vector<8x128xf32>
    %256 = arith.addf %254, %255 : vector<8x128xf32>
    %257 = arith.index_cast %225 : i32 to index
    %c0_64 = arith.constant 0 : index
    %258 = vector.load %arg12[%257, %c0_64] : memref<64x128xf32, #tpu.memory_space<vmem>>, vector<8x128xf32>
    tpu.vector_store %arg12[%257, %c0_64], %256 {strides = array<i32>} : memref<64x128xf32, #tpu.memory_space<vmem>>, vector<8x128xf32>,
    %c7_i32 = arith.constant 7 : i32
    %c8_i32_65 = arith.constant 8 : i32
    %259 = arith.muli %c7_i32, %c8_i32_65 : i32
    %260 = tpu.assume_multiple %259, 8 : i32
    %261 = arith.index_cast %260 : i32 to index
    %c0_66 = arith.constant 0 : index
    %262 = vector.load %arg13[%261, %c0_66] : memref<64x384xf32, #tpu.memory_space<vmem>>, vector<8x384xf32>
    %cst_67 = arith.constant dense<0.000000e+00> : vector<8x384xf32>
    %263 = tpu.matmul %256, %9, %cst_67 {dimension_numbers = #tpu.dot_dimension_numbers<[1], [0], [0], [1], [0, 0, 1, 1], [], []>} : vector<8x128xf32>, vector<128x384xf32>, vector<8x384xf32> -> vector<8x384xf32>
    %264 = vector.broadcast %11 : vector<1x384xf32> to vector<8x384xf32>
    %265 = arith.addf %263, %264 : vector<8x384xf32>
    %266 = vector.extract_strided_slice %262 {offsets = [0, 0], sizes = [8, 128], strides = [1, 1]} : vector<8x384xf32> to vector<8x128xf32>
    %267 = vector.extract_strided_slice %265 {offsets = [0, 0], sizes = [8, 128], strides = [1, 1]} : vector<8x384xf32> to vector<8x128xf32>
    %268 = arith.addf %266, %267 : vector<8x128xf32>
    %269 = arith.negf %268 : vector<8x128xf32>
    %270 = math.exp %269 : vector<8x128xf32>
    %cst_68 = arith.constant 1.000000e+00 : f32
    %271 = vector.broadcast %cst_68 : f32 to vector<8x128xf32>
    %272 = arith.addf %271, %270 : vector<8x128xf32>
    %273 = arith.divf %271, %272 : vector<8x128xf32>
    %274 = vector.extract_strided_slice %262 {offsets = [0, 128], sizes = [8, 128], strides = [1, 1]} : vector<8x384xf32> to vector<8x128xf32>
    %275 = vector.extract_strided_slice %265 {offsets = [0, 128], sizes = [8, 128], strides = [1, 1]} : vector<8x384xf32> to vector<8x128xf32>
    %276 = arith.addf %274, %275 : vector<8x128xf32>
    %277 = arith.negf %276 : vector<8x128xf32>
    %278 = math.exp %277 : vector<8x128xf32>
    %cst_69 = arith.constant 1.000000e+00 : f32
    %279 = vector.broadcast %cst_69 : f32 to vector<8x128xf32>
    %280 = arith.addf %279, %278 : vector<8x128xf32>
    %281 = arith.divf %279, %280 : vector<8x128xf32>
    %282 = vector.extract_strided_slice %262 {offsets = [0, 256], sizes = [8, 128], strides = [1, 1]} : vector<8x384xf32> to vector<8x128xf32>
    %283 = vector.extract_strided_slice %265 {offsets = [0, 256], sizes = [8, 128], strides = [1, 1]} : vector<8x384xf32> to vector<8x128xf32>
    %284 = arith.mulf %273, %283 : vector<8x128xf32>
    %285 = arith.addf %282, %284 : vector<8x128xf32>
    %286 = math.tanh %285 : vector<8x128xf32>
    %cst_70 = arith.constant 1.000000e+00 : f32
    %287 = vector.broadcast %cst_70 : f32 to vector<8x128xf32>
    %288 = arith.subf %287, %281 : vector<8x128xf32>
    %289 = arith.mulf %288, %286 : vector<8x128xf32>
    %290 = arith.mulf %281, %256 : vector<8x128xf32>
    %291 = arith.addf %289, %290 : vector<8x128xf32>
    %292 = arith.index_cast %260 : i32 to index
    %c0_71 = arith.constant 0 : index
    %293 = vector.load %arg12[%292, %c0_71] : memref<64x128xf32, #tpu.memory_space<vmem>>, vector<8x128xf32>
    tpu.vector_store %arg12[%292, %c0_71], %291 {strides = array<i32>} : memref<64x128xf32, #tpu.memory_space<vmem>>, vector<8x128xf32>,
    %c8_i32_72 = arith.constant 8 : i32
    %c0_73 = arith.constant 0 : index
    %c0_74 = arith.constant 0 : index
    %c0_75 = arith.constant 0 : index
    %294 = vector.load %arg11[%c0_73, %c0_74, %c0_75] : memref<3x8x128xf32, #tpu.memory_space<vmem>>, vector<1x8x128xf32>
    %295 = vector.shape_cast %294 : vector<1x8x128xf32> to vector<8x128xf32>
    %296 = vector.shape_cast %291 : vector<8x128xf32> to vector<1x8x128xf32>
    tpu.vector_store %arg11[%c0_73, %c0_74, %c0_75], %296 {strides = array<i32>} : memref<3x8x128xf32, #tpu.memory_space<vmem>>, vector<1x8x128xf32>,
    %c0_76 = arith.constant 0 : index
    %c0_77 = arith.constant 0 : index
    %297 = vector.load %arg12[%c0_76, %c0_77] : memref<64x128xf32, #tpu.memory_space<vmem>>, vector<64x128xf32>
    %c0_78 = arith.constant 0 : index
    %c0_79 = arith.constant 0 : index
    %c0_80 = arith.constant 0 : index
    %298 = vector.load %arg4[%c0_78, %c0_79, %c0_80] : memref<2x128x384xf32, #tpu.memory_space<vmem>>, vector<1x128x384xf32>
    %299 = vector.shape_cast %298 : vector<1x128x384xf32> to vector<128x384xf32>
    %cst_81 = arith.constant dense<0.000000e+00> : vector<64x384xf32>
    %300 = tpu.matmul %297, %299, %cst_81 {dimension_numbers = #tpu.dot_dimension_numbers<[1], [0], [0], [1], [0, 0, 1, 1], [], []>} : vector<64x128xf32>, vector<128x384xf32>, vector<64x384xf32> -> vector<64x384xf32>
    %c1 = arith.constant 1 : index
    %c0_82 = arith.constant 0 : index
    %c0_83 = arith.constant 0 : index
    %301 = vector.load %arg6[%c1, %c0_82, %c0_83] : memref<3x1x384xf32, #tpu.memory_space<vmem>>, vector<1x1x384xf32>
    %302 = vector.shape_cast %301 : vector<1x1x384xf32> to vector<1x384xf32>
    %303 = vector.broadcast %302 : vector<1x384xf32> to vector<64x384xf32>
    %304 = arith.addf %300, %303 : vector<64x384xf32>
    %c0_84 = arith.constant 0 : index
    %c0_85 = arith.constant 0 : index
    %305 = vector.load %arg13[%c0_84, %c0_85] : memref<64x384xf32, #tpu.memory_space<vmem>>, vector<64x384xf32>
    tpu.vector_store %arg13[%c0_84, %c0_85], %304 {strides = array<i32>} : memref<64x384xf32, #tpu.memory_space<vmem>>, vector<64x384xf32>,
    %c1_86 = arith.constant 1 : index
    %c0_87 = arith.constant 0 : index
    %c0_88 = arith.constant 0 : index
    %306 = vector.load %arg5[%c1_86, %c0_87, %c0_88] : memref<3x128x384xf32, #tpu.memory_space<vmem>>, vector<1x128x384xf32>
    %307 = vector.shape_cast %306 : vector<1x128x384xf32> to vector<128x384xf32>
    %c1_89 = arith.constant 1 : index
    %c0_90 = arith.constant 0 : index
    %c0_91 = arith.constant 0 : index
    %308 = vector.load %arg7[%c1_89, %c0_90, %c0_91] : memref<3x1x384xf32, #tpu.memory_space<vmem>>, vector<1x1x384xf32>
    %309 = vector.shape_cast %308 : vector<1x1x384xf32> to vector<1x384xf32>
    %c1_92 = arith.constant 1 : index
    %c0_93 = arith.constant 0 : index
    %c0_94 = arith.constant 0 : index
    %310 = vector.load %arg2[%c1_92, %c0_93, %c0_94] : memref<3x8x128xf32, #tpu.memory_space<vmem>>, vector<1x8x128xf32>
    %311 = vector.shape_cast %310 : vector<1x8x128xf32> to vector<8x128xf32>
    %c0_i32_95 = arith.constant 0 : i32
    %c8_i32_96 = arith.constant 8 : i32
    %312 = arith.muli %c0_i32_95, %c8_i32_96 : i32
    %313 = tpu.assume_multiple %312, 8 : i32
    %314 = arith.index_cast %313 : i32 to index
    %c0_97 = arith.constant 0 : index
    %315 = vector.load %arg13[%314, %c0_97] : memref<64x384xf32, #tpu.memory_space<vmem>>, vector<8x384xf32>
    %cst_98 = arith.constant dense<0.000000e+00> : vector<8x384xf32>
    %316 = tpu.matmul %311, %307, %cst_98 {dimension_numbers = #tpu.dot_dimension_numbers<[1], [0], [0], [1], [0, 0, 1, 1], [], []>} : vector<8x128xf32>, vector<128x384xf32>, vector<8x384xf32> -> vector<8x384xf32>
    %317 = vector.broadcast %309 : vector<1x384xf32> to vector<8x384xf32>
    %318 = arith.addf %316, %317 : vector<8x384xf32>
    %319 = vector.extract_strided_slice %315 {offsets = [0, 0], sizes = [8, 128], strides = [1, 1]} : vector<8x384xf32> to vector<8x128xf32>
    %320 = vector.extract_strided_slice %318 {offsets = [0, 0], sizes = [8, 128], strides = [1, 1]} : vector<8x384xf32> to vector<8x128xf32>
    %321 = arith.addf %319, %320 : vector<8x128xf32>
    %322 = arith.negf %321 : vector<8x128xf32>
    %323 = math.exp %322 : vector<8x128xf32>
    %cst_99 = arith.constant 1.000000e+00 : f32
    %324 = vector.broadcast %cst_99 : f32 to vector<8x128xf32>
    %325 = arith.addf %324, %323 : vector<8x128xf32>
    %326 = arith.divf %324, %325 : vector<8x128xf32>
    %327 = vector.extract_strided_slice %315 {offsets = [0, 128], sizes = [8, 128], strides = [1, 1]} : vector<8x384xf32> to vector<8x128xf32>
    %328 = vector.extract_strided_slice %318 {offsets = [0, 128], sizes = [8, 128], strides = [1, 1]} : vector<8x384xf32> to vector<8x128xf32>
    %329 = arith.addf %327, %328 : vector<8x128xf32>
    %330 = arith.negf %329 : vector<8x128xf32>
    %331 = math.exp %330 : vector<8x128xf32>
    %cst_100 = arith.constant 1.000000e+00 : f32
    %332 = vector.broadcast %cst_100 : f32 to vector<8x128xf32>
    %333 = arith.addf %332, %331 : vector<8x128xf32>
    %334 = arith.divf %332, %333 : vector<8x128xf32>
    %335 = vector.extract_strided_slice %315 {offsets = [0, 256], sizes = [8, 128], strides = [1, 1]} : vector<8x384xf32> to vector<8x128xf32>
    %336 = vector.extract_strided_slice %318 {offsets = [0, 256], sizes = [8, 128], strides = [1, 1]} : vector<8x384xf32> to vector<8x128xf32>
    %337 = arith.mulf %326, %336 : vector<8x128xf32>
    %338 = arith.addf %335, %337 : vector<8x128xf32>
    %339 = math.tanh %338 : vector<8x128xf32>
    %cst_101 = arith.constant 1.000000e+00 : f32
    %340 = vector.broadcast %cst_101 : f32 to vector<8x128xf32>
    %341 = arith.subf %340, %334 : vector<8x128xf32>
    %342 = arith.mulf %341, %339 : vector<8x128xf32>
    %343 = arith.mulf %334, %311 : vector<8x128xf32>
    %344 = arith.addf %342, %343 : vector<8x128xf32>
    %345 = arith.index_cast %313 : i32 to index
    %c0_102 = arith.constant 0 : index
    %346 = vector.load %arg12[%345, %c0_102] : memref<64x128xf32, #tpu.memory_space<vmem>>, vector<8x128xf32>
    tpu.vector_store %arg12[%345, %c0_102], %344 {strides = array<i32>} : memref<64x128xf32, #tpu.memory_space<vmem>>, vector<8x128xf32>,
    %c1_i32_103 = arith.constant 1 : i32
    %c8_i32_104 = arith.constant 8 : i32
    %347 = arith.muli %c1_i32_103, %c8_i32_104 : i32
    %348 = tpu.assume_multiple %347, 8 : i32
    %349 = arith.index_cast %348 : i32 to index
    %c0_105 = arith.constant 0 : index
    %350 = vector.load %arg13[%349, %c0_105] : memref<64x384xf32, #tpu.memory_space<vmem>>, vector<8x384xf32>
    %cst_106 = arith.constant dense<0.000000e+00> : vector<8x384xf32>
    %351 = tpu.matmul %344, %307, %cst_106 {dimension_numbers = #tpu.dot_dimension_numbers<[1], [0], [0], [1], [0, 0, 1, 1], [], []>} : vector<8x128xf32>, vector<128x384xf32>, vector<8x384xf32> -> vector<8x384xf32>
    %352 = vector.broadcast %309 : vector<1x384xf32> to vector<8x384xf32>
    %353 = arith.addf %351, %352 : vector<8x384xf32>
    %354 = vector.extract_strided_slice %350 {offsets = [0, 0], sizes = [8, 128], strides = [1, 1]} : vector<8x384xf32> to vector<8x128xf32>
    %355 = vector.extract_strided_slice %353 {offsets = [0, 0], sizes = [8, 128], strides = [1, 1]} : vector<8x384xf32> to vector<8x128xf32>
    %356 = arith.addf %354, %355 : vector<8x128xf32>
    %357 = arith.negf %356 : vector<8x128xf32>
    %358 = math.exp %357 : vector<8x128xf32>
    %cst_107 = arith.constant 1.000000e+00 : f32
    %359 = vector.broadcast %cst_107 : f32 to vector<8x128xf32>
    %360 = arith.addf %359, %358 : vector<8x128xf32>
    %361 = arith.divf %359, %360 : vector<8x128xf32>
    %362 = vector.extract_strided_slice %350 {offsets = [0, 128], sizes = [8, 128], strides = [1, 1]} : vector<8x384xf32> to vector<8x128xf32>
    %363 = vector.extract_strided_slice %353 {offsets = [0, 128], sizes = [8, 128], strides = [1, 1]} : vector<8x384xf32> to vector<8x128xf32>
    %364 = arith.addf %362, %363 : vector<8x128xf32>
    %365 = arith.negf %364 : vector<8x128xf32>
    %366 = math.exp %365 : vector<8x128xf32>
    %cst_108 = arith.constant 1.000000e+00 : f32
    %367 = vector.broadcast %cst_108 : f32 to vector<8x128xf32>
    %368 = arith.addf %367, %366 : vector<8x128xf32>
    %369 = arith.divf %367, %368 : vector<8x128xf32>
    %370 = vector.extract_strided_slice %350 {offsets = [0, 256], sizes = [8, 128], strides = [1, 1]} : vector<8x384xf32> to vector<8x128xf32>
    %371 = vector.extract_strided_slice %353 {offsets = [0, 256], sizes = [8, 128], strides = [1, 1]} : vector<8x384xf32> to vector<8x128xf32>
    %372 = arith.mulf %361, %371 : vector<8x128xf32>
    %373 = arith.addf %370, %372 : vector<8x128xf32>
    %374 = math.tanh %373 : vector<8x128xf32>
    %cst_109 = arith.constant 1.000000e+00 : f32
    %375 = vector.broadcast %cst_109 : f32 to vector<8x128xf32>
    %376 = arith.subf %375, %369 : vector<8x128xf32>
    %377 = arith.mulf %376, %374 : vector<8x128xf32>
    %378 = arith.mulf %369, %344 : vector<8x128xf32>
    %379 = arith.addf %377, %378 : vector<8x128xf32>
    %380 = arith.index_cast %348 : i32 to index
    %c0_110 = arith.constant 0 : index
    %381 = vector.load %arg12[%380, %c0_110] : memref<64x128xf32, #tpu.memory_space<vmem>>, vector<8x128xf32>
    tpu.vector_store %arg12[%380, %c0_110], %379 {strides = array<i32>} : memref<64x128xf32, #tpu.memory_space<vmem>>, vector<8x128xf32>,
    %c2_i32_111 = arith.constant 2 : i32
    %c8_i32_112 = arith.constant 8 : i32
    %382 = arith.muli %c2_i32_111, %c8_i32_112 : i32
    %383 = tpu.assume_multiple %382, 8 : i32
    %384 = arith.index_cast %383 : i32 to index
    %c0_113 = arith.constant 0 : index
    %385 = vector.load %arg13[%384, %c0_113] : memref<64x384xf32, #tpu.memory_space<vmem>>, vector<8x384xf32>
    %cst_114 = arith.constant dense<0.000000e+00> : vector<8x384xf32>
    %386 = tpu.matmul %379, %307, %cst_114 {dimension_numbers = #tpu.dot_dimension_numbers<[1], [0], [0], [1], [0, 0, 1, 1], [], []>} : vector<8x128xf32>, vector<128x384xf32>, vector<8x384xf32> -> vector<8x384xf32>
    %387 = vector.broadcast %309 : vector<1x384xf32> to vector<8x384xf32>
    %388 = arith.addf %386, %387 : vector<8x384xf32>
    %389 = vector.extract_strided_slice %385 {offsets = [0, 0], sizes = [8, 128], strides = [1, 1]} : vector<8x384xf32> to vector<8x128xf32>
    %390 = vector.extract_strided_slice %388 {offsets = [0, 0], sizes = [8, 128], strides = [1, 1]} : vector<8x384xf32> to vector<8x128xf32>
    %391 = arith.addf %389, %390 : vector<8x128xf32>
    %392 = arith.negf %391 : vector<8x128xf32>
    %393 = math.exp %392 : vector<8x128xf32>
    %cst_115 = arith.constant 1.000000e+00 : f32
    %394 = vector.broadcast %cst_115 : f32 to vector<8x128xf32>
    %395 = arith.addf %394, %393 : vector<8x128xf32>
    %396 = arith.divf %394, %395 : vector<8x128xf32>
    %397 = vector.extract_strided_slice %385 {offsets = [0, 128], sizes = [8, 128], strides = [1, 1]} : vector<8x384xf32> to vector<8x128xf32>
    %398 = vector.extract_strided_slice %388 {offsets = [0, 128], sizes = [8, 128], strides = [1, 1]} : vector<8x384xf32> to vector<8x128xf32>
    %399 = arith.addf %397, %398 : vector<8x128xf32>
    %400 = arith.negf %399 : vector<8x128xf32>
    %401 = math.exp %400 : vector<8x128xf32>
    %cst_116 = arith.constant 1.000000e+00 : f32
    %402 = vector.broadcast %cst_116 : f32 to vector<8x128xf32>
    %403 = arith.addf %402, %401 : vector<8x128xf32>
    %404 = arith.divf %402, %403 : vector<8x128xf32>
    %405 = vector.extract_strided_slice %385 {offsets = [0, 256], sizes = [8, 128], strides = [1, 1]} : vector<8x384xf32> to vector<8x128xf32>
    %406 = vector.extract_strided_slice %388 {offsets = [0, 256], sizes = [8, 128], strides = [1, 1]} : vector<8x384xf32> to vector<8x128xf32>
    %407 = arith.mulf %396, %406 : vector<8x128xf32>
    %408 = arith.addf %405, %407 : vector<8x128xf32>
    %409 = math.tanh %408 : vector<8x128xf32>
    %cst_117 = arith.constant 1.000000e+00 : f32
    %410 = vector.broadcast %cst_117 : f32 to vector<8x128xf32>
    %411 = arith.subf %410, %404 : vector<8x128xf32>
    %412 = arith.mulf %411, %409 : vector<8x128xf32>
    %413 = arith.mulf %404, %379 : vector<8x128xf32>
    %414 = arith.addf %412, %413 : vector<8x128xf32>
    %415 = arith.index_cast %383 : i32 to index
    %c0_118 = arith.constant 0 : index
    %416 = vector.load %arg12[%415, %c0_118] : memref<64x128xf32, #tpu.memory_space<vmem>>, vector<8x128xf32>
    tpu.vector_store %arg12[%415, %c0_118], %414 {strides = array<i32>} : memref<64x128xf32, #tpu.memory_space<vmem>>, vector<8x128xf32>,
    %c3_i32_119 = arith.constant 3 : i32
    %c8_i32_120 = arith.constant 8 : i32
    %417 = arith.muli %c3_i32_119, %c8_i32_120 : i32
    %418 = tpu.assume_multiple %417, 8 : i32
    %419 = arith.index_cast %418 : i32 to index
    %c0_121 = arith.constant 0 : index
    %420 = vector.load %arg13[%419, %c0_121] : memref<64x384xf32, #tpu.memory_space<vmem>>, vector<8x384xf32>
    %cst_122 = arith.constant dense<0.000000e+00> : vector<8x384xf32>
    %421 = tpu.matmul %414, %307, %cst_122 {dimension_numbers = #tpu.dot_dimension_numbers<[1], [0], [0], [1], [0, 0, 1, 1], [], []>} : vector<8x128xf32>, vector<128x384xf32>, vector<8x384xf32> -> vector<8x384xf32>
    %422 = vector.broadcast %309 : vector<1x384xf32> to vector<8x384xf32>
    %423 = arith.addf %421, %422 : vector<8x384xf32>
    %424 = vector.extract_strided_slice %420 {offsets = [0, 0], sizes = [8, 128], strides = [1, 1]} : vector<8x384xf32> to vector<8x128xf32>
    %425 = vector.extract_strided_slice %423 {offsets = [0, 0], sizes = [8, 128], strides = [1, 1]} : vector<8x384xf32> to vector<8x128xf32>
    %426 = arith.addf %424, %425 : vector<8x128xf32>
    %427 = arith.negf %426 : vector<8x128xf32>
    %428 = math.exp %427 : vector<8x128xf32>
    %cst_123 = arith.constant 1.000000e+00 : f32
    %429 = vector.broadcast %cst_123 : f32 to vector<8x128xf32>
    %430 = arith.addf %429, %428 : vector<8x128xf32>
    %431 = arith.divf %429, %430 : vector<8x128xf32>
    %432 = vector.extract_strided_slice %420 {offsets = [0, 128], sizes = [8, 128], strides = [1, 1]} : vector<8x384xf32> to vector<8x128xf32>
    %433 = vector.extract_strided_slice %423 {offsets = [0, 128], sizes = [8, 128], strides = [1, 1]} : vector<8x384xf32> to vector<8x128xf32>
    %434 = arith.addf %432, %433 : vector<8x128xf32>
    %435 = arith.negf %434 : vector<8x128xf32>
    %436 = math.exp %435 : vector<8x128xf32>
    %cst_124 = arith.constant 1.000000e+00 : f32
    %437 = vector.broadcast %cst_124 : f32 to vector<8x128xf32>
    %438 = arith.addf %437, %436 : vector<8x128xf32>
    %439 = arith.divf %437, %438 : vector<8x128xf32>
    %440 = vector.extract_strided_slice %420 {offsets = [0, 256], sizes = [8, 128], strides = [1, 1]} : vector<8x384xf32> to vector<8x128xf32>
    %441 = vector.extract_strided_slice %423 {offsets = [0, 256], sizes = [8, 128], strides = [1, 1]} : vector<8x384xf32> to vector<8x128xf32>
    %442 = arith.mulf %431, %441 : vector<8x128xf32>
    %443 = arith.addf %440, %442 : vector<8x128xf32>
    %444 = math.tanh %443 : vector<8x128xf32>
    %cst_125 = arith.constant 1.000000e+00 : f32
    %445 = vector.broadcast %cst_125 : f32 to vector<8x128xf32>
    %446 = arith.subf %445, %439 : vector<8x128xf32>
    %447 = arith.mulf %446, %444 : vector<8x128xf32>
    %448 = arith.mulf %439, %414 : vector<8x128xf32>
    %449 = arith.addf %447, %448 : vector<8x128xf32>
    %450 = arith.index_cast %418 : i32 to index
    %c0_126 = arith.constant 0 : index
    %451 = vector.load %arg12[%450, %c0_126] : memref<64x128xf32, #tpu.memory_space<vmem>>, vector<8x128xf32>
    tpu.vector_store %arg12[%450, %c0_126], %449 {strides = array<i32>} : memref<64x128xf32, #tpu.memory_space<vmem>>, vector<8x128xf32>,
    %c4_i32_127 = arith.constant 4 : i32
    %c8_i32_128 = arith.constant 8 : i32
    %452 = arith.muli %c4_i32_127, %c8_i32_128 : i32
    %453 = tpu.assume_multiple %452, 8 : i32
    %454 = arith.index_cast %453 : i32 to index
    %c0_129 = arith.constant 0 : index
    %455 = vector.load %arg13[%454, %c0_129] : memref<64x384xf32, #tpu.memory_space<vmem>>, vector<8x384xf32>
    %cst_130 = arith.constant dense<0.000000e+00> : vector<8x384xf32>
    %456 = tpu.matmul %449, %307, %cst_130 {dimension_numbers = #tpu.dot_dimension_numbers<[1], [0], [0], [1], [0, 0, 1, 1], [], []>} : vector<8x128xf32>, vector<128x384xf32>, vector<8x384xf32> -> vector<8x384xf32>
    %457 = vector.broadcast %309 : vector<1x384xf32> to vector<8x384xf32>
    %458 = arith.addf %456, %457 : vector<8x384xf32>
    %459 = vector.extract_strided_slice %455 {offsets = [0, 0], sizes = [8, 128], strides = [1, 1]} : vector<8x384xf32> to vector<8x128xf32>
    %460 = vector.extract_strided_slice %458 {offsets = [0, 0], sizes = [8, 128], strides = [1, 1]} : vector<8x384xf32> to vector<8x128xf32>
    %461 = arith.addf %459, %460 : vector<8x128xf32>
    %462 = arith.negf %461 : vector<8x128xf32>
    %463 = math.exp %462 : vector<8x128xf32>
    %cst_131 = arith.constant 1.000000e+00 : f32
    %464 = vector.broadcast %cst_131 : f32 to vector<8x128xf32>
    %465 = arith.addf %464, %463 : vector<8x128xf32>
    %466 = arith.divf %464, %465 : vector<8x128xf32>
    %467 = vector.extract_strided_slice %455 {offsets = [0, 128], sizes = [8, 128], strides = [1, 1]} : vector<8x384xf32> to vector<8x128xf32>
    %468 = vector.extract_strided_slice %458 {offsets = [0, 128], sizes = [8, 128], strides = [1, 1]} : vector<8x384xf32> to vector<8x128xf32>
    %469 = arith.addf %467, %468 : vector<8x128xf32>
    %470 = arith.negf %469 : vector<8x128xf32>
    %471 = math.exp %470 : vector<8x128xf32>
    %cst_132 = arith.constant 1.000000e+00 : f32
    %472 = vector.broadcast %cst_132 : f32 to vector<8x128xf32>
    %473 = arith.addf %472, %471 : vector<8x128xf32>
    %474 = arith.divf %472, %473 : vector<8x128xf32>
    %475 = vector.extract_strided_slice %455 {offsets = [0, 256], sizes = [8, 128], strides = [1, 1]} : vector<8x384xf32> to vector<8x128xf32>
    %476 = vector.extract_strided_slice %458 {offsets = [0, 256], sizes = [8, 128], strides = [1, 1]} : vector<8x384xf32> to vector<8x128xf32>
    %477 = arith.mulf %466, %476 : vector<8x128xf32>
    %478 = arith.addf %475, %477 : vector<8x128xf32>
    %479 = math.tanh %478 : vector<8x128xf32>
    %cst_133 = arith.constant 1.000000e+00 : f32
    %480 = vector.broadcast %cst_133 : f32 to vector<8x128xf32>
    %481 = arith.subf %480, %474 : vector<8x128xf32>
    %482 = arith.mulf %481, %479 : vector<8x128xf32>
    %483 = arith.mulf %474, %449 : vector<8x128xf32>
    %484 = arith.addf %482, %483 : vector<8x128xf32>
    %485 = arith.index_cast %453 : i32 to index
    %c0_134 = arith.constant 0 : index
    %486 = vector.load %arg12[%485, %c0_134] : memref<64x128xf32, #tpu.memory_space<vmem>>, vector<8x128xf32>
    tpu.vector_store %arg12[%485, %c0_134], %484 {strides = array<i32>} : memref<64x128xf32, #tpu.memory_space<vmem>>, vector<8x128xf32>,
    %c5_i32_135 = arith.constant 5 : i32
    %c8_i32_136 = arith.constant 8 : i32
    %487 = arith.muli %c5_i32_135, %c8_i32_136 : i32
    %488 = tpu.assume_multiple %487, 8 : i32
    %489 = arith.index_cast %488 : i32 to index
    %c0_137 = arith.constant 0 : index
    %490 = vector.load %arg13[%489, %c0_137] : memref<64x384xf32, #tpu.memory_space<vmem>>, vector<8x384xf32>
    %cst_138 = arith.constant dense<0.000000e+00> : vector<8x384xf32>
    %491 = tpu.matmul %484, %307, %cst_138 {dimension_numbers = #tpu.dot_dimension_numbers<[1], [0], [0], [1], [0, 0, 1, 1], [], []>} : vector<8x128xf32>, vector<128x384xf32>, vector<8x384xf32> -> vector<8x384xf32>
    %492 = vector.broadcast %309 : vector<1x384xf32> to vector<8x384xf32>
    %493 = arith.addf %491, %492 : vector<8x384xf32>
    %494 = vector.extract_strided_slice %490 {offsets = [0, 0], sizes = [8, 128], strides = [1, 1]} : vector<8x384xf32> to vector<8x128xf32>
    %495 = vector.extract_strided_slice %493 {offsets = [0, 0], sizes = [8, 128], strides = [1, 1]} : vector<8x384xf32> to vector<8x128xf32>
    %496 = arith.addf %494, %495 : vector<8x128xf32>
    %497 = arith.negf %496 : vector<8x128xf32>
    %498 = math.exp %497 : vector<8x128xf32>
    %cst_139 = arith.constant 1.000000e+00 : f32
    %499 = vector.broadcast %cst_139 : f32 to vector<8x128xf32>
    %500 = arith.addf %499, %498 : vector<8x128xf32>
    %501 = arith.divf %499, %500 : vector<8x128xf32>
    %502 = vector.extract_strided_slice %490 {offsets = [0, 128], sizes = [8, 128], strides = [1, 1]} : vector<8x384xf32> to vector<8x128xf32>
    %503 = vector.extract_strided_slice %493 {offsets = [0, 128], sizes = [8, 128], strides = [1, 1]} : vector<8x384xf32> to vector<8x128xf32>
    %504 = arith.addf %502, %503 : vector<8x128xf32>
    %505 = arith.negf %504 : vector<8x128xf32>
    %506 = math.exp %505 : vector<8x128xf32>
    %cst_140 = arith.constant 1.000000e+00 : f32
    %507 = vector.broadcast %cst_140 : f32 to vector<8x128xf32>
    %508 = arith.addf %507, %506 : vector<8x128xf32>
    %509 = arith.divf %507, %508 : vector<8x128xf32>
    %510 = vector.extract_strided_slice %490 {offsets = [0, 256], sizes = [8, 128], strides = [1, 1]} : vector<8x384xf32> to vector<8x128xf32>
    %511 = vector.extract_strided_slice %493 {offsets = [0, 256], sizes = [8, 128], strides = [1, 1]} : vector<8x384xf32> to vector<8x128xf32>
    %512 = arith.mulf %501, %511 : vector<8x128xf32>
    %513 = arith.addf %510, %512 : vector<8x128xf32>
    %514 = math.tanh %513 : vector<8x128xf32>
    %cst_141 = arith.constant 1.000000e+00 : f32
    %515 = vector.broadcast %cst_141 : f32 to vector<8x128xf32>
    %516 = arith.subf %515, %509 : vector<8x128xf32>
    %517 = arith.mulf %516, %514 : vector<8x128xf32>
    %518 = arith.mulf %509, %484 : vector<8x128xf32>
    %519 = arith.addf %517, %518 : vector<8x128xf32>
    %520 = arith.index_cast %488 : i32 to index
    %c0_142 = arith.constant 0 : index
    %521 = vector.load %arg12[%520, %c0_142] : memref<64x128xf32, #tpu.memory_space<vmem>>, vector<8x128xf32>
    tpu.vector_store %arg12[%520, %c0_142], %519 {strides = array<i32>} : memref<64x128xf32, #tpu.memory_space<vmem>>, vector<8x128xf32>,
    %c6_i32_143 = arith.constant 6 : i32
    %c8_i32_144 = arith.constant 8 : i32
    %522 = arith.muli %c6_i32_143, %c8_i32_144 : i32
    %523 = tpu.assume_multiple %522, 8 : i32
    %524 = arith.index_cast %523 : i32 to index
    %c0_145 = arith.constant 0 : index
    %525 = vector.load %arg13[%524, %c0_145] : memref<64x384xf32, #tpu.memory_space<vmem>>, vector<8x384xf32>
    %cst_146 = arith.constant dense<0.000000e+00> : vector<8x384xf32>
    %526 = tpu.matmul %519, %307, %cst_146 {dimension_numbers = #tpu.dot_dimension_numbers<[1], [0], [0], [1], [0, 0, 1, 1], [], []>} : vector<8x128xf32>, vector<128x384xf32>, vector<8x384xf32> -> vector<8x384xf32>
    %527 = vector.broadcast %309 : vector<1x384xf32> to vector<8x384xf32>
    %528 = arith.addf %526, %527 : vector<8x384xf32>
    %529 = vector.extract_strided_slice %525 {offsets = [0, 0], sizes = [8, 128], strides = [1, 1]} : vector<8x384xf32> to vector<8x128xf32>
    %530 = vector.extract_strided_slice %528 {offsets = [0, 0], sizes = [8, 128], strides = [1, 1]} : vector<8x384xf32> to vector<8x128xf32>
    %531 = arith.addf %529, %530 : vector<8x128xf32>
    %532 = arith.negf %531 : vector<8x128xf32>
    %533 = math.exp %532 : vector<8x128xf32>
    %cst_147 = arith.constant 1.000000e+00 : f32
    %534 = vector.broadcast %cst_147 : f32 to vector<8x128xf32>
    %535 = arith.addf %534, %533 : vector<8x128xf32>
    %536 = arith.divf %534, %535 : vector<8x128xf32>
    %537 = vector.extract_strided_slice %525 {offsets = [0, 128], sizes = [8, 128], strides = [1, 1]} : vector<8x384xf32> to vector<8x128xf32>
    %538 = vector.extract_strided_slice %528 {offsets = [0, 128], sizes = [8, 128], strides = [1, 1]} : vector<8x384xf32> to vector<8x128xf32>
    %539 = arith.addf %537, %538 : vector<8x128xf32>
    %540 = arith.negf %539 : vector<8x128xf32>
    %541 = math.exp %540 : vector<8x128xf32>
    %cst_148 = arith.constant 1.000000e+00 : f32
    %542 = vector.broadcast %cst_148 : f32 to vector<8x128xf32>
    %543 = arith.addf %542, %541 : vector<8x128xf32>
    %544 = arith.divf %542, %543 : vector<8x128xf32>
    %545 = vector.extract_strided_slice %525 {offsets = [0, 256], sizes = [8, 128], strides = [1, 1]} : vector<8x384xf32> to vector<8x128xf32>
    %546 = vector.extract_strided_slice %528 {offsets = [0, 256], sizes = [8, 128], strides = [1, 1]} : vector<8x384xf32> to vector<8x128xf32>
    %547 = arith.mulf %536, %546 : vector<8x128xf32>
    %548 = arith.addf %545, %547 : vector<8x128xf32>
    %549 = math.tanh %548 : vector<8x128xf32>
    %cst_149 = arith.constant 1.000000e+00 : f32
    %550 = vector.broadcast %cst_149 : f32 to vector<8x128xf32>
    %551 = arith.subf %550, %544 : vector<8x128xf32>
    %552 = arith.mulf %551, %549 : vector<8x128xf32>
    %553 = arith.mulf %544, %519 : vector<8x128xf32>
    %554 = arith.addf %552, %553 : vector<8x128xf32>
    %555 = arith.index_cast %523 : i32 to index
    %c0_150 = arith.constant 0 : index
    %556 = vector.load %arg12[%555, %c0_150] : memref<64x128xf32, #tpu.memory_space<vmem>>, vector<8x128xf32>
    tpu.vector_store %arg12[%555, %c0_150], %554 {strides = array<i32>} : memref<64x128xf32, #tpu.memory_space<vmem>>, vector<8x128xf32>,
    %c7_i32_151 = arith.constant 7 : i32
    %c8_i32_152 = arith.constant 8 : i32
    %557 = arith.muli %c7_i32_151, %c8_i32_152 : i32
    %558 = tpu.assume_multiple %557, 8 : i32
    %559 = arith.index_cast %558 : i32 to index
    %c0_153 = arith.constant 0 : index
    %560 = vector.load %arg13[%559, %c0_153] : memref<64x384xf32, #tpu.memory_space<vmem>>, vector<8x384xf32>
    %cst_154 = arith.constant dense<0.000000e+00> : vector<8x384xf32>
    %561 = tpu.matmul %554, %307, %cst_154 {dimension_numbers = #tpu.dot_dimension_numbers<[1], [0], [0], [1], [0, 0, 1, 1], [], []>} : vector<8x128xf32>, vector<128x384xf32>, vector<8x384xf32> -> vector<8x384xf32>
    %562 = vector.broadcast %309 : vector<1x384xf32> to vector<8x384xf32>
    %563 = arith.addf %561, %562 : vector<8x384xf32>
    %564 = vector.extract_strided_slice %560 {offsets = [0, 0], sizes = [8, 128], strides = [1, 1]} : vector<8x384xf32> to vector<8x128xf32>
    %565 = vector.extract_strided_slice %563 {offsets = [0, 0], sizes = [8, 128], strides = [1, 1]} : vector<8x384xf32> to vector<8x128xf32>
    %566 = arith.addf %564, %565 : vector<8x128xf32>
    %567 = arith.negf %566 : vector<8x128xf32>
    %568 = math.exp %567 : vector<8x128xf32>
    %cst_155 = arith.constant 1.000000e+00 : f32
    %569 = vector.broadcast %cst_155 : f32 to vector<8x128xf32>
    %570 = arith.addf %569, %568 : vector<8x128xf32>
    %571 = arith.divf %569, %570 : vector<8x128xf32>
    %572 = vector.extract_strided_slice %560 {offsets = [0, 128], sizes = [8, 128], strides = [1, 1]} : vector<8x384xf32> to vector<8x128xf32>
    %573 = vector.extract_strided_slice %563 {offsets = [0, 128], sizes = [8, 128], strides = [1, 1]} : vector<8x384xf32> to vector<8x128xf32>
    %574 = arith.addf %572, %573 : vector<8x128xf32>
    %575 = arith.negf %574 : vector<8x128xf32>
    %576 = math.exp %575 : vector<8x128xf32>
    %cst_156 = arith.constant 1.000000e+00 : f32
    %577 = vector.broadcast %cst_156 : f32 to vector<8x128xf32>
    %578 = arith.addf %577, %576 : vector<8x128xf32>
    %579 = arith.divf %577, %578 : vector<8x128xf32>
    %580 = vector.extract_strided_slice %560 {offsets = [0, 256], sizes = [8, 128], strides = [1, 1]} : vector<8x384xf32> to vector<8x128xf32>
    %581 = vector.extract_strided_slice %563 {offsets = [0, 256], sizes = [8, 128], strides = [1, 1]} : vector<8x384xf32> to vector<8x128xf32>
    %582 = arith.mulf %571, %581 : vector<8x128xf32>
    %583 = arith.addf %580, %582 : vector<8x128xf32>
    %584 = math.tanh %583 : vector<8x128xf32>
    %cst_157 = arith.constant 1.000000e+00 : f32
    %585 = vector.broadcast %cst_157 : f32 to vector<8x128xf32>
    %586 = arith.subf %585, %579 : vector<8x128xf32>
    %587 = arith.mulf %586, %584 : vector<8x128xf32>
    %588 = arith.mulf %579, %554 : vector<8x128xf32>
    %589 = arith.addf %587, %588 : vector<8x128xf32>
    %590 = arith.index_cast %558 : i32 to index
    %c0_158 = arith.constant 0 : index
    %591 = vector.load %arg12[%590, %c0_158] : memref<64x128xf32, #tpu.memory_space<vmem>>, vector<8x128xf32>
    tpu.vector_store %arg12[%590, %c0_158], %589 {strides = array<i32>} : memref<64x128xf32, #tpu.memory_space<vmem>>, vector<8x128xf32>,
    %c8_i32_159 = arith.constant 8 : i32
    %c1_160 = arith.constant 1 : index
    %c0_161 = arith.constant 0 : index
    %c0_162 = arith.constant 0 : index
    %592 = vector.load %arg11[%c1_160, %c0_161, %c0_162] : memref<3x8x128xf32, #tpu.memory_space<vmem>>, vector<1x8x128xf32>
    %593 = vector.shape_cast %592 : vector<1x8x128xf32> to vector<8x128xf32>
    %594 = vector.shape_cast %589 : vector<8x128xf32> to vector<1x8x128xf32>
    tpu.vector_store %arg11[%c1_160, %c0_161, %c0_162], %594 {strides = array<i32>} : memref<3x8x128xf32, #tpu.memory_space<vmem>>, vector<1x8x128xf32>,
    %c0_163 = arith.constant 0 : index
    %c0_164 = arith.constant 0 : index
    %595 = vector.load %arg12[%c0_163, %c0_164] : memref<64x128xf32, #tpu.memory_space<vmem>>, vector<64x128xf32>
    %c1_165 = arith.constant 1 : index
    %c0_166 = arith.constant 0 : index
    %c0_167 = arith.constant 0 : index
    %596 = vector.load %arg4[%c1_165, %c0_166, %c0_167] : memref<2x128x384xf32, #tpu.memory_space<vmem>>, vector<1x128x384xf32>
    %597 = vector.shape_cast %596 : vector<1x128x384xf32> to vector<128x384xf32>
    %cst_168 = arith.constant dense<0.000000e+00> : vector<64x384xf32>
    %598 = tpu.matmul %595, %597, %cst_168 {dimension_numbers = #tpu.dot_dimension_numbers<[1], [0], [0], [1], [0, 0, 1, 1], [], []>} : vector<64x128xf32>, vector<128x384xf32>, vector<64x384xf32> -> vector<64x384xf32>
    %c2 = arith.constant 2 : index
    %c0_169 = arith.constant 0 : index
    %c0_170 = arith.constant 0 : index
    %599 = vector.load %arg6[%c2, %c0_169, %c0_170] : memref<3x1x384xf32, #tpu.memory_space<vmem>>, vector<1x1x384xf32>
    %600 = vector.shape_cast %599 : vector<1x1x384xf32> to vector<1x384xf32>
    %601 = vector.broadcast %600 : vector<1x384xf32> to vector<64x384xf32>
    %602 = arith.addf %598, %601 : vector<64x384xf32>
    %c0_171 = arith.constant 0 : index
    %c0_172 = arith.constant 0 : index
    %603 = vector.load %arg13[%c0_171, %c0_172] : memref<64x384xf32, #tpu.memory_space<vmem>>, vector<64x384xf32>
    tpu.vector_store %arg13[%c0_171, %c0_172], %602 {strides = array<i32>} : memref<64x384xf32, #tpu.memory_space<vmem>>, vector<64x384xf32>,
    %c2_173 = arith.constant 2 : index
    %c0_174 = arith.constant 0 : index
    %c0_175 = arith.constant 0 : index
    %604 = vector.load %arg5[%c2_173, %c0_174, %c0_175] : memref<3x128x384xf32, #tpu.memory_space<vmem>>, vector<1x128x384xf32>
    %605 = vector.shape_cast %604 : vector<1x128x384xf32> to vector<128x384xf32>
    %c2_176 = arith.constant 2 : index
    %c0_177 = arith.constant 0 : index
    %c0_178 = arith.constant 0 : index
    %606 = vector.load %arg7[%c2_176, %c0_177, %c0_178] : memref<3x1x384xf32, #tpu.memory_space<vmem>>, vector<1x1x384xf32>
    %607 = vector.shape_cast %606 : vector<1x1x384xf32> to vector<1x384xf32>
    %c2_179 = arith.constant 2 : index
    %c0_180 = arith.constant 0 : index
    %c0_181 = arith.constant 0 : index
    %608 = vector.load %arg2[%c2_179, %c0_180, %c0_181] : memref<3x8x128xf32, #tpu.memory_space<vmem>>, vector<1x8x128xf32>
    %609 = vector.shape_cast %608 : vector<1x8x128xf32> to vector<8x128xf32>
    %c0_i32_182 = arith.constant 0 : i32
    %c8_i32_183 = arith.constant 8 : i32
    %610 = arith.muli %c0_i32_182, %c8_i32_183 : i32
    %611 = tpu.assume_multiple %610, 8 : i32
    %612 = arith.index_cast %611 : i32 to index
    %c0_184 = arith.constant 0 : index
    %613 = vector.load %arg13[%612, %c0_184] : memref<64x384xf32, #tpu.memory_space<vmem>>, vector<8x384xf32>
    %cst_185 = arith.constant dense<0.000000e+00> : vector<8x384xf32>
    %614 = tpu.matmul %609, %605, %cst_185 {dimension_numbers = #tpu.dot_dimension_numbers<[1], [0], [0], [1], [0, 0, 1, 1], [], []>} : vector<8x128xf32>, vector<128x384xf32>, vector<8x384xf32> -> vector<8x384xf32>
    %615 = vector.broadcast %607 : vector<1x384xf32> to vector<8x384xf32>
    %616 = arith.addf %614, %615 : vector<8x384xf32>
    %617 = vector.extract_strided_slice %613 {offsets = [0, 0], sizes = [8, 128], strides = [1, 1]} : vector<8x384xf32> to vector<8x128xf32>
    %618 = vector.extract_strided_slice %616 {offsets = [0, 0], sizes = [8, 128], strides = [1, 1]} : vector<8x384xf32> to vector<8x128xf32>
    %619 = arith.addf %617, %618 : vector<8x128xf32>
    %620 = arith.negf %619 : vector<8x128xf32>
    %621 = math.exp %620 : vector<8x128xf32>
    %cst_186 = arith.constant 1.000000e+00 : f32
    %622 = vector.broadcast %cst_186 : f32 to vector<8x128xf32>
    %623 = arith.addf %622, %621 : vector<8x128xf32>
    %624 = arith.divf %622, %623 : vector<8x128xf32>
    %625 = vector.extract_strided_slice %613 {offsets = [0, 128], sizes = [8, 128], strides = [1, 1]} : vector<8x384xf32> to vector<8x128xf32>
    %626 = vector.extract_strided_slice %616 {offsets = [0, 128], sizes = [8, 128], strides = [1, 1]} : vector<8x384xf32> to vector<8x128xf32>
    %627 = arith.addf %625, %626 : vector<8x128xf32>
    %628 = arith.negf %627 : vector<8x128xf32>
    %629 = math.exp %628 : vector<8x128xf32>
    %cst_187 = arith.constant 1.000000e+00 : f32
    %630 = vector.broadcast %cst_187 : f32 to vector<8x128xf32>
    %631 = arith.addf %630, %629 : vector<8x128xf32>
    %632 = arith.divf %630, %631 : vector<8x128xf32>
    %633 = vector.extract_strided_slice %613 {offsets = [0, 256], sizes = [8, 128], strides = [1, 1]} : vector<8x384xf32> to vector<8x128xf32>
    %634 = vector.extract_strided_slice %616 {offsets = [0, 256], sizes = [8, 128], strides = [1, 1]} : vector<8x384xf32> to vector<8x128xf32>
    %635 = arith.mulf %624, %634 : vector<8x128xf32>
    %636 = arith.addf %633, %635 : vector<8x128xf32>
    %637 = math.tanh %636 : vector<8x128xf32>
    %cst_188 = arith.constant 1.000000e+00 : f32
    %638 = vector.broadcast %cst_188 : f32 to vector<8x128xf32>
    %639 = arith.subf %638, %632 : vector<8x128xf32>
    %640 = arith.mulf %639, %637 : vector<8x128xf32>
    %641 = arith.mulf %632, %609 : vector<8x128xf32>
    %642 = arith.addf %640, %641 : vector<8x128xf32>
    %643 = arith.index_cast %611 : i32 to index
    %c0_189 = arith.constant 0 : index
    %644 = vector.load %arg12[%643, %c0_189] : memref<64x128xf32, #tpu.memory_space<vmem>>, vector<8x128xf32>
    tpu.vector_store %arg12[%643, %c0_189], %642 {strides = array<i32>} : memref<64x128xf32, #tpu.memory_space<vmem>>, vector<8x128xf32>,
    %c1_i32_190 = arith.constant 1 : i32
    %c8_i32_191 = arith.constant 8 : i32
    %645 = arith.muli %c1_i32_190, %c8_i32_191 : i32
    %646 = tpu.assume_multiple %645, 8 : i32
    %647 = arith.index_cast %646 : i32 to index
    %c0_192 = arith.constant 0 : index
    %648 = vector.load %arg13[%647, %c0_192] : memref<64x384xf32, #tpu.memory_space<vmem>>, vector<8x384xf32>
    %cst_193 = arith.constant dense<0.000000e+00> : vector<8x384xf32>
    %649 = tpu.matmul %642, %605, %cst_193 {dimension_numbers = #tpu.dot_dimension_numbers<[1], [0], [0], [1], [0, 0, 1, 1], [], []>} : vector<8x128xf32>, vector<128x384xf32>, vector<8x384xf32> -> vector<8x384xf32>
    %650 = vector.broadcast %607 : vector<1x384xf32> to vector<8x384xf32>
    %651 = arith.addf %649, %650 : vector<8x384xf32>
    %652 = vector.extract_strided_slice %648 {offsets = [0, 0], sizes = [8, 128], strides = [1, 1]} : vector<8x384xf32> to vector<8x128xf32>
    %653 = vector.extract_strided_slice %651 {offsets = [0, 0], sizes = [8, 128], strides = [1, 1]} : vector<8x384xf32> to vector<8x128xf32>
    %654 = arith.addf %652, %653 : vector<8x128xf32>
    %655 = arith.negf %654 : vector<8x128xf32>
    %656 = math.exp %655 : vector<8x128xf32>
    %cst_194 = arith.constant 1.000000e+00 : f32
    %657 = vector.broadcast %cst_194 : f32 to vector<8x128xf32>
    %658 = arith.addf %657, %656 : vector<8x128xf32>
    %659 = arith.divf %657, %658 : vector<8x128xf32>
    %660 = vector.extract_strided_slice %648 {offsets = [0, 128], sizes = [8, 128], strides = [1, 1]} : vector<8x384xf32> to vector<8x128xf32>
    %661 = vector.extract_strided_slice %651 {offsets = [0, 128], sizes = [8, 128], strides = [1, 1]} : vector<8x384xf32> to vector<8x128xf32>
    %662 = arith.addf %660, %661 : vector<8x128xf32>
    %663 = arith.negf %662 : vector<8x128xf32>
    %664 = math.exp %663 : vector<8x128xf32>
    %cst_195 = arith.constant 1.000000e+00 : f32
    %665 = vector.broadcast %cst_195 : f32 to vector<8x128xf32>
    %666 = arith.addf %665, %664 : vector<8x128xf32>
    %667 = arith.divf %665, %666 : vector<8x128xf32>
    %668 = vector.extract_strided_slice %648 {offsets = [0, 256], sizes = [8, 128], strides = [1, 1]} : vector<8x384xf32> to vector<8x128xf32>
    %669 = vector.extract_strided_slice %651 {offsets = [0, 256], sizes = [8, 128], strides = [1, 1]} : vector<8x384xf32> to vector<8x128xf32>
    %670 = arith.mulf %659, %669 : vector<8x128xf32>
    %671 = arith.addf %668, %670 : vector<8x128xf32>
    %672 = math.tanh %671 : vector<8x128xf32>
    %cst_196 = arith.constant 1.000000e+00 : f32
    %673 = vector.broadcast %cst_196 : f32 to vector<8x128xf32>
    %674 = arith.subf %673, %667 : vector<8x128xf32>
    %675 = arith.mulf %674, %672 : vector<8x128xf32>
    %676 = arith.mulf %667, %642 : vector<8x128xf32>
    %677 = arith.addf %675, %676 : vector<8x128xf32>
    %678 = arith.index_cast %646 : i32 to index
    %c0_197 = arith.constant 0 : index
    %679 = vector.load %arg12[%678, %c0_197] : memref<64x128xf32, #tpu.memory_space<vmem>>, vector<8x128xf32>
    tpu.vector_store %arg12[%678, %c0_197], %677 {strides = array<i32>} : memref<64x128xf32, #tpu.memory_space<vmem>>, vector<8x128xf32>,
    %c2_i32_198 = arith.constant 2 : i32
    %c8_i32_199 = arith.constant 8 : i32
    %680 = arith.muli %c2_i32_198, %c8_i32_199 : i32
    %681 = tpu.assume_multiple %680, 8 : i32
    %682 = arith.index_cast %681 : i32 to index
    %c0_200 = arith.constant 0 : index
    %683 = vector.load %arg13[%682, %c0_200] : memref<64x384xf32, #tpu.memory_space<vmem>>, vector<8x384xf32>
    %cst_201 = arith.constant dense<0.000000e+00> : vector<8x384xf32>
    %684 = tpu.matmul %677, %605, %cst_201 {dimension_numbers = #tpu.dot_dimension_numbers<[1], [0], [0], [1], [0, 0, 1, 1], [], []>} : vector<8x128xf32>, vector<128x384xf32>, vector<8x384xf32> -> vector<8x384xf32>
    %685 = vector.broadcast %607 : vector<1x384xf32> to vector<8x384xf32>
    %686 = arith.addf %684, %685 : vector<8x384xf32>
    %687 = vector.extract_strided_slice %683 {offsets = [0, 0], sizes = [8, 128], strides = [1, 1]} : vector<8x384xf32> to vector<8x128xf32>
    %688 = vector.extract_strided_slice %686 {offsets = [0, 0], sizes = [8, 128], strides = [1, 1]} : vector<8x384xf32> to vector<8x128xf32>
    %689 = arith.addf %687, %688 : vector<8x128xf32>
    %690 = arith.negf %689 : vector<8x128xf32>
    %691 = math.exp %690 : vector<8x128xf32>
    %cst_202 = arith.constant 1.000000e+00 : f32
    %692 = vector.broadcast %cst_202 : f32 to vector<8x128xf32>
    %693 = arith.addf %692, %691 : vector<8x128xf32>
    %694 = arith.divf %692, %693 : vector<8x128xf32>
    %695 = vector.extract_strided_slice %683 {offsets = [0, 128], sizes = [8, 128], strides = [1, 1]} : vector<8x384xf32> to vector<8x128xf32>
    %696 = vector.extract_strided_slice %686 {offsets = [0, 128], sizes = [8, 128], strides = [1, 1]} : vector<8x384xf32> to vector<8x128xf32>
    %697 = arith.addf %695, %696 : vector<8x128xf32>
    %698 = arith.negf %697 : vector<8x128xf32>
    %699 = math.exp %698 : vector<8x128xf32>
    %cst_203 = arith.constant 1.000000e+00 : f32
    %700 = vector.broadcast %cst_203 : f32 to vector<8x128xf32>
    %701 = arith.addf %700, %699 : vector<8x128xf32>
    %702 = arith.divf %700, %701 : vector<8x128xf32>
    %703 = vector.extract_strided_slice %683 {offsets = [0, 256], sizes = [8, 128], strides = [1, 1]} : vector<8x384xf32> to vector<8x128xf32>
    %704 = vector.extract_strided_slice %686 {offsets = [0, 256], sizes = [8, 128], strides = [1, 1]} : vector<8x384xf32> to vector<8x128xf32>
    %705 = arith.mulf %694, %704 : vector<8x128xf32>
    %706 = arith.addf %703, %705 : vector<8x128xf32>
    %707 = math.tanh %706 : vector<8x128xf32>
    %cst_204 = arith.constant 1.000000e+00 : f32
    %708 = vector.broadcast %cst_204 : f32 to vector<8x128xf32>
    %709 = arith.subf %708, %702 : vector<8x128xf32>
    %710 = arith.mulf %709, %707 : vector<8x128xf32>
    %711 = arith.mulf %702, %677 : vector<8x128xf32>
    %712 = arith.addf %710, %711 : vector<8x128xf32>
    %713 = arith.index_cast %681 : i32 to index
    %c0_205 = arith.constant 0 : index
    %714 = vector.load %arg12[%713, %c0_205] : memref<64x128xf32, #tpu.memory_space<vmem>>, vector<8x128xf32>
    tpu.vector_store %arg12[%713, %c0_205], %712 {strides = array<i32>} : memref<64x128xf32, #tpu.memory_space<vmem>>, vector<8x128xf32>,
    %c3_i32_206 = arith.constant 3 : i32
    %c8_i32_207 = arith.constant 8 : i32
    %715 = arith.muli %c3_i32_206, %c8_i32_207 : i32
    %716 = tpu.assume_multiple %715, 8 : i32
    %717 = arith.index_cast %716 : i32 to index
    %c0_208 = arith.constant 0 : index
    %718 = vector.load %arg13[%717, %c0_208] : memref<64x384xf32, #tpu.memory_space<vmem>>, vector<8x384xf32>
    %cst_209 = arith.constant dense<0.000000e+00> : vector<8x384xf32>
    %719 = tpu.matmul %712, %605, %cst_209 {dimension_numbers = #tpu.dot_dimension_numbers<[1], [0], [0], [1], [0, 0, 1, 1], [], []>} : vector<8x128xf32>, vector<128x384xf32>, vector<8x384xf32> -> vector<8x384xf32>
    %720 = vector.broadcast %607 : vector<1x384xf32> to vector<8x384xf32>
    %721 = arith.addf %719, %720 : vector<8x384xf32>
    %722 = vector.extract_strided_slice %718 {offsets = [0, 0], sizes = [8, 128], strides = [1, 1]} : vector<8x384xf32> to vector<8x128xf32>
    %723 = vector.extract_strided_slice %721 {offsets = [0, 0], sizes = [8, 128], strides = [1, 1]} : vector<8x384xf32> to vector<8x128xf32>
    %724 = arith.addf %722, %723 : vector<8x128xf32>
    %725 = arith.negf %724 : vector<8x128xf32>
    %726 = math.exp %725 : vector<8x128xf32>
    %cst_210 = arith.constant 1.000000e+00 : f32
    %727 = vector.broadcast %cst_210 : f32 to vector<8x128xf32>
    %728 = arith.addf %727, %726 : vector<8x128xf32>
    %729 = arith.divf %727, %728 : vector<8x128xf32>
    %730 = vector.extract_strided_slice %718 {offsets = [0, 128], sizes = [8, 128], strides = [1, 1]} : vector<8x384xf32> to vector<8x128xf32>
    %731 = vector.extract_strided_slice %721 {offsets = [0, 128], sizes = [8, 128], strides = [1, 1]} : vector<8x384xf32> to vector<8x128xf32>
    %732 = arith.addf %730, %731 : vector<8x128xf32>
    %733 = arith.negf %732 : vector<8x128xf32>
    %734 = math.exp %733 : vector<8x128xf32>
    %cst_211 = arith.constant 1.000000e+00 : f32
    %735 = vector.broadcast %cst_211 : f32 to vector<8x128xf32>
    %736 = arith.addf %735, %734 : vector<8x128xf32>
    %737 = arith.divf %735, %736 : vector<8x128xf32>
    %738 = vector.extract_strided_slice %718 {offsets = [0, 256], sizes = [8, 128], strides = [1, 1]} : vector<8x384xf32> to vector<8x128xf32>
    %739 = vector.extract_strided_slice %721 {offsets = [0, 256], sizes = [8, 128], strides = [1, 1]} : vector<8x384xf32> to vector<8x128xf32>
    %740 = arith.mulf %729, %739 : vector<8x128xf32>
    %741 = arith.addf %738, %740 : vector<8x128xf32>
    %742 = math.tanh %741 : vector<8x128xf32>
    %cst_212 = arith.constant 1.000000e+00 : f32
    %743 = vector.broadcast %cst_212 : f32 to vector<8x128xf32>
    %744 = arith.subf %743, %737 : vector<8x128xf32>
    %745 = arith.mulf %744, %742 : vector<8x128xf32>
    %746 = arith.mulf %737, %712 : vector<8x128xf32>
    %747 = arith.addf %745, %746 : vector<8x128xf32>
    %748 = arith.index_cast %716 : i32 to index
    %c0_213 = arith.constant 0 : index
    %749 = vector.load %arg12[%748, %c0_213] : memref<64x128xf32, #tpu.memory_space<vmem>>, vector<8x128xf32>
    tpu.vector_store %arg12[%748, %c0_213], %747 {strides = array<i32>} : memref<64x128xf32, #tpu.memory_space<vmem>>, vector<8x128xf32>,
    %c4_i32_214 = arith.constant 4 : i32
    %c8_i32_215 = arith.constant 8 : i32
    %750 = arith.muli %c4_i32_214, %c8_i32_215 : i32
    %751 = tpu.assume_multiple %750, 8 : i32
    %752 = arith.index_cast %751 : i32 to index
    %c0_216 = arith.constant 0 : index
    %753 = vector.load %arg13[%752, %c0_216] : memref<64x384xf32, #tpu.memory_space<vmem>>, vector<8x384xf32>
    %cst_217 = arith.constant dense<0.000000e+00> : vector<8x384xf32>
    %754 = tpu.matmul %747, %605, %cst_217 {dimension_numbers = #tpu.dot_dimension_numbers<[1], [0], [0], [1], [0, 0, 1, 1], [], []>} : vector<8x128xf32>, vector<128x384xf32>, vector<8x384xf32> -> vector<8x384xf32>
    %755 = vector.broadcast %607 : vector<1x384xf32> to vector<8x384xf32>
    %756 = arith.addf %754, %755 : vector<8x384xf32>
    %757 = vector.extract_strided_slice %753 {offsets = [0, 0], sizes = [8, 128], strides = [1, 1]} : vector<8x384xf32> to vector<8x128xf32>
    %758 = vector.extract_strided_slice %756 {offsets = [0, 0], sizes = [8, 128], strides = [1, 1]} : vector<8x384xf32> to vector<8x128xf32>
    %759 = arith.addf %757, %758 : vector<8x128xf32>
    %760 = arith.negf %759 : vector<8x128xf32>
    %761 = math.exp %760 : vector<8x128xf32>
    %cst_218 = arith.constant 1.000000e+00 : f32
    %762 = vector.broadcast %cst_218 : f32 to vector<8x128xf32>
    %763 = arith.addf %762, %761 : vector<8x128xf32>
    %764 = arith.divf %762, %763 : vector<8x128xf32>
    %765 = vector.extract_strided_slice %753 {offsets = [0, 128], sizes = [8, 128], strides = [1, 1]} : vector<8x384xf32> to vector<8x128xf32>
    %766 = vector.extract_strided_slice %756 {offsets = [0, 128], sizes = [8, 128], strides = [1, 1]} : vector<8x384xf32> to vector<8x128xf32>
    %767 = arith.addf %765, %766 : vector<8x128xf32>
    %768 = arith.negf %767 : vector<8x128xf32>
    %769 = math.exp %768 : vector<8x128xf32>
    %cst_219 = arith.constant 1.000000e+00 : f32
    %770 = vector.broadcast %cst_219 : f32 to vector<8x128xf32>
    %771 = arith.addf %770, %769 : vector<8x128xf32>
    %772 = arith.divf %770, %771 : vector<8x128xf32>
    %773 = vector.extract_strided_slice %753 {offsets = [0, 256], sizes = [8, 128], strides = [1, 1]} : vector<8x384xf32> to vector<8x128xf32>
    %774 = vector.extract_strided_slice %756 {offsets = [0, 256], sizes = [8, 128], strides = [1, 1]} : vector<8x384xf32> to vector<8x128xf32>
    %775 = arith.mulf %764, %774 : vector<8x128xf32>
    %776 = arith.addf %773, %775 : vector<8x128xf32>
    %777 = math.tanh %776 : vector<8x128xf32>
    %cst_220 = arith.constant 1.000000e+00 : f32
    %778 = vector.broadcast %cst_220 : f32 to vector<8x128xf32>
    %779 = arith.subf %778, %772 : vector<8x128xf32>
    %780 = arith.mulf %779, %777 : vector<8x128xf32>
    %781 = arith.mulf %772, %747 : vector<8x128xf32>
    %782 = arith.addf %780, %781 : vector<8x128xf32>
    %783 = arith.index_cast %751 : i32 to index
    %c0_221 = arith.constant 0 : index
    %784 = vector.load %arg12[%783, %c0_221] : memref<64x128xf32, #tpu.memory_space<vmem>>, vector<8x128xf32>
    tpu.vector_store %arg12[%783, %c0_221], %782 {strides = array<i32>} : memref<64x128xf32, #tpu.memory_space<vmem>>, vector<8x128xf32>,
    %c5_i32_222 = arith.constant 5 : i32
    %c8_i32_223 = arith.constant 8 : i32
    %785 = arith.muli %c5_i32_222, %c8_i32_223 : i32
    %786 = tpu.assume_multiple %785, 8 : i32
    %787 = arith.index_cast %786 : i32 to index
    %c0_224 = arith.constant 0 : index
    %788 = vector.load %arg13[%787, %c0_224] : memref<64x384xf32, #tpu.memory_space<vmem>>, vector<8x384xf32>
    %cst_225 = arith.constant dense<0.000000e+00> : vector<8x384xf32>
    %789 = tpu.matmul %782, %605, %cst_225 {dimension_numbers = #tpu.dot_dimension_numbers<[1], [0], [0], [1], [0, 0, 1, 1], [], []>} : vector<8x128xf32>, vector<128x384xf32>, vector<8x384xf32> -> vector<8x384xf32>
    %790 = vector.broadcast %607 : vector<1x384xf32> to vector<8x384xf32>
    %791 = arith.addf %789, %790 : vector<8x384xf32>
    %792 = vector.extract_strided_slice %788 {offsets = [0, 0], sizes = [8, 128], strides = [1, 1]} : vector<8x384xf32> to vector<8x128xf32>
    %793 = vector.extract_strided_slice %791 {offsets = [0, 0], sizes = [8, 128], strides = [1, 1]} : vector<8x384xf32> to vector<8x128xf32>
    %794 = arith.addf %792, %793 : vector<8x128xf32>
    %795 = arith.negf %794 : vector<8x128xf32>
    %796 = math.exp %795 : vector<8x128xf32>
    %cst_226 = arith.constant 1.000000e+00 : f32
    %797 = vector.broadcast %cst_226 : f32 to vector<8x128xf32>
    %798 = arith.addf %797, %796 : vector<8x128xf32>
    %799 = arith.divf %797, %798 : vector<8x128xf32>
    %800 = vector.extract_strided_slice %788 {offsets = [0, 128], sizes = [8, 128], strides = [1, 1]} : vector<8x384xf32> to vector<8x128xf32>
    %801 = vector.extract_strided_slice %791 {offsets = [0, 128], sizes = [8, 128], strides = [1, 1]} : vector<8x384xf32> to vector<8x128xf32>
    %802 = arith.addf %800, %801 : vector<8x128xf32>
    %803 = arith.negf %802 : vector<8x128xf32>
    %804 = math.exp %803 : vector<8x128xf32>
    %cst_227 = arith.constant 1.000000e+00 : f32
    %805 = vector.broadcast %cst_227 : f32 to vector<8x128xf32>
    %806 = arith.addf %805, %804 : vector<8x128xf32>
    %807 = arith.divf %805, %806 : vector<8x128xf32>
    %808 = vector.extract_strided_slice %788 {offsets = [0, 256], sizes = [8, 128], strides = [1, 1]} : vector<8x384xf32> to vector<8x128xf32>
    %809 = vector.extract_strided_slice %791 {offsets = [0, 256], sizes = [8, 128], strides = [1, 1]} : vector<8x384xf32> to vector<8x128xf32>
    %810 = arith.mulf %799, %809 : vector<8x128xf32>
    %811 = arith.addf %808, %810 : vector<8x128xf32>
    %812 = math.tanh %811 : vector<8x128xf32>
    %cst_228 = arith.constant 1.000000e+00 : f32
    %813 = vector.broadcast %cst_228 : f32 to vector<8x128xf32>
    %814 = arith.subf %813, %807 : vector<8x128xf32>
    %815 = arith.mulf %814, %812 : vector<8x128xf32>
    %816 = arith.mulf %807, %782 : vector<8x128xf32>
    %817 = arith.addf %815, %816 : vector<8x128xf32>
    %818 = arith.index_cast %786 : i32 to index
    %c0_229 = arith.constant 0 : index
    %819 = vector.load %arg12[%818, %c0_229] : memref<64x128xf32, #tpu.memory_space<vmem>>, vector<8x128xf32>
    tpu.vector_store %arg12[%818, %c0_229], %817 {strides = array<i32>} : memref<64x128xf32, #tpu.memory_space<vmem>>, vector<8x128xf32>,
    %c6_i32_230 = arith.constant 6 : i32
    %c8_i32_231 = arith.constant 8 : i32
    %820 = arith.muli %c6_i32_230, %c8_i32_231 : i32
    %821 = tpu.assume_multiple %820, 8 : i32
    %822 = arith.index_cast %821 : i32 to index
    %c0_232 = arith.constant 0 : index
    %823 = vector.load %arg13[%822, %c0_232] : memref<64x384xf32, #tpu.memory_space<vmem>>, vector<8x384xf32>
    %cst_233 = arith.constant dense<0.000000e+00> : vector<8x384xf32>
    %824 = tpu.matmul %817, %605, %cst_233 {dimension_numbers = #tpu.dot_dimension_numbers<[1], [0], [0], [1], [0, 0, 1, 1], [], []>} : vector<8x128xf32>, vector<128x384xf32>, vector<8x384xf32> -> vector<8x384xf32>
    %825 = vector.broadcast %607 : vector<1x384xf32> to vector<8x384xf32>
    %826 = arith.addf %824, %825 : vector<8x384xf32>
    %827 = vector.extract_strided_slice %823 {offsets = [0, 0], sizes = [8, 128], strides = [1, 1]} : vector<8x384xf32> to vector<8x128xf32>
    %828 = vector.extract_strided_slice %826 {offsets = [0, 0], sizes = [8, 128], strides = [1, 1]} : vector<8x384xf32> to vector<8x128xf32>
    %829 = arith.addf %827, %828 : vector<8x128xf32>
    %830 = arith.negf %829 : vector<8x128xf32>
    %831 = math.exp %830 : vector<8x128xf32>
    %cst_234 = arith.constant 1.000000e+00 : f32
    %832 = vector.broadcast %cst_234 : f32 to vector<8x128xf32>
    %833 = arith.addf %832, %831 : vector<8x128xf32>
    %834 = arith.divf %832, %833 : vector<8x128xf32>
    %835 = vector.extract_strided_slice %823 {offsets = [0, 128], sizes = [8, 128], strides = [1, 1]} : vector<8x384xf32> to vector<8x128xf32>
    %836 = vector.extract_strided_slice %826 {offsets = [0, 128], sizes = [8, 128], strides = [1, 1]} : vector<8x384xf32> to vector<8x128xf32>
    %837 = arith.addf %835, %836 : vector<8x128xf32>
    %838 = arith.negf %837 : vector<8x128xf32>
    %839 = math.exp %838 : vector<8x128xf32>
    %cst_235 = arith.constant 1.000000e+00 : f32
    %840 = vector.broadcast %cst_235 : f32 to vector<8x128xf32>
    %841 = arith.addf %840, %839 : vector<8x128xf32>
    %842 = arith.divf %840, %841 : vector<8x128xf32>
    %843 = vector.extract_strided_slice %823 {offsets = [0, 256], sizes = [8, 128], strides = [1, 1]} : vector<8x384xf32> to vector<8x128xf32>
    %844 = vector.extract_strided_slice %826 {offsets = [0, 256], sizes = [8, 128], strides = [1, 1]} : vector<8x384xf32> to vector<8x128xf32>
    %845 = arith.mulf %834, %844 : vector<8x128xf32>
    %846 = arith.addf %843, %845 : vector<8x128xf32>
    %847 = math.tanh %846 : vector<8x128xf32>
    %cst_236 = arith.constant 1.000000e+00 : f32
    %848 = vector.broadcast %cst_236 : f32 to vector<8x128xf32>
    %849 = arith.subf %848, %842 : vector<8x128xf32>
    %850 = arith.mulf %849, %847 : vector<8x128xf32>
    %851 = arith.mulf %842, %817 : vector<8x128xf32>
    %852 = arith.addf %850, %851 : vector<8x128xf32>
    %853 = arith.index_cast %821 : i32 to index
    %c0_237 = arith.constant 0 : index
    %854 = vector.load %arg12[%853, %c0_237] : memref<64x128xf32, #tpu.memory_space<vmem>>, vector<8x128xf32>
    tpu.vector_store %arg12[%853, %c0_237], %852 {strides = array<i32>} : memref<64x128xf32, #tpu.memory_space<vmem>>, vector<8x128xf32>,
    %c7_i32_238 = arith.constant 7 : i32
    %c8_i32_239 = arith.constant 8 : i32
    %855 = arith.muli %c7_i32_238, %c8_i32_239 : i32
    %856 = tpu.assume_multiple %855, 8 : i32
    %857 = arith.index_cast %856 : i32 to index
    %c0_240 = arith.constant 0 : index
    %858 = vector.load %arg13[%857, %c0_240] : memref<64x384xf32, #tpu.memory_space<vmem>>, vector<8x384xf32>
    %cst_241 = arith.constant dense<0.000000e+00> : vector<8x384xf32>
    %859 = tpu.matmul %852, %605, %cst_241 {dimension_numbers = #tpu.dot_dimension_numbers<[1], [0], [0], [1], [0, 0, 1, 1], [], []>} : vector<8x128xf32>, vector<128x384xf32>, vector<8x384xf32> -> vector<8x384xf32>
    %860 = vector.broadcast %607 : vector<1x384xf32> to vector<8x384xf32>
    %861 = arith.addf %859, %860 : vector<8x384xf32>
    %862 = vector.extract_strided_slice %858 {offsets = [0, 0], sizes = [8, 128], strides = [1, 1]} : vector<8x384xf32> to vector<8x128xf32>
    %863 = vector.extract_strided_slice %861 {offsets = [0, 0], sizes = [8, 128], strides = [1, 1]} : vector<8x384xf32> to vector<8x128xf32>
    %864 = arith.addf %862, %863 : vector<8x128xf32>
    %865 = arith.negf %864 : vector<8x128xf32>
    %866 = math.exp %865 : vector<8x128xf32>
    %cst_242 = arith.constant 1.000000e+00 : f32
    %867 = vector.broadcast %cst_242 : f32 to vector<8x128xf32>
    %868 = arith.addf %867, %866 : vector<8x128xf32>
    %869 = arith.divf %867, %868 : vector<8x128xf32>
    %870 = vector.extract_strided_slice %858 {offsets = [0, 128], sizes = [8, 128], strides = [1, 1]} : vector<8x384xf32> to vector<8x128xf32>
    %871 = vector.extract_strided_slice %861 {offsets = [0, 128], sizes = [8, 128], strides = [1, 1]} : vector<8x384xf32> to vector<8x128xf32>
    %872 = arith.addf %870, %871 : vector<8x128xf32>
    %873 = arith.negf %872 : vector<8x128xf32>
    %874 = math.exp %873 : vector<8x128xf32>
    %cst_243 = arith.constant 1.000000e+00 : f32
    %875 = vector.broadcast %cst_243 : f32 to vector<8x128xf32>
    %876 = arith.addf %875, %874 : vector<8x128xf32>
    %877 = arith.divf %875, %876 : vector<8x128xf32>
    %878 = vector.extract_strided_slice %858 {offsets = [0, 256], sizes = [8, 128], strides = [1, 1]} : vector<8x384xf32> to vector<8x128xf32>
    %879 = vector.extract_strided_slice %861 {offsets = [0, 256], sizes = [8, 128], strides = [1, 1]} : vector<8x384xf32> to vector<8x128xf32>
    %880 = arith.mulf %869, %879 : vector<8x128xf32>
    %881 = arith.addf %878, %880 : vector<8x128xf32>
    %882 = math.tanh %881 : vector<8x128xf32>
    %cst_244 = arith.constant 1.000000e+00 : f32
    %883 = vector.broadcast %cst_244 : f32 to vector<8x128xf32>
    %884 = arith.subf %883, %877 : vector<8x128xf32>
    %885 = arith.mulf %884, %882 : vector<8x128xf32>
    %886 = arith.mulf %877, %852 : vector<8x128xf32>
    %887 = arith.addf %885, %886 : vector<8x128xf32>
    %888 = arith.index_cast %856 : i32 to index
    %c0_245 = arith.constant 0 : index
    %889 = vector.load %arg12[%888, %c0_245] : memref<64x128xf32, #tpu.memory_space<vmem>>, vector<8x128xf32>
    tpu.vector_store %arg12[%888, %c0_245], %887 {strides = array<i32>} : memref<64x128xf32, #tpu.memory_space<vmem>>, vector<8x128xf32>,
    %c8_i32_246 = arith.constant 8 : i32
    %c2_247 = arith.constant 2 : index
    %c0_248 = arith.constant 0 : index
    %c0_249 = arith.constant 0 : index
    %890 = vector.load %arg11[%c2_247, %c0_248, %c0_249] : memref<3x8x128xf32, #tpu.memory_space<vmem>>, vector<1x8x128xf32>
    %891 = vector.shape_cast %890 : vector<1x8x128xf32> to vector<8x128xf32>
    %892 = vector.shape_cast %887 : vector<8x128xf32> to vector<1x8x128xf32>
    tpu.vector_store %arg11[%c2_247, %c0_248, %c0_249], %892 {strides = array<i32>} : memref<3x8x128xf32, #tpu.memory_space<vmem>>, vector<1x8x128xf32>,
    %c0_250 = arith.constant 0 : index
    %c0_251 = arith.constant 0 : index
    %893 = vector.load %arg12[%c0_250, %c0_251] : memref<64x128xf32, #tpu.memory_space<vmem>>, vector<64x128xf32>
    %c0_252 = arith.constant 0 : index
    %c0_253 = arith.constant 0 : index
    %894 = vector.load %arg8[%c0_252, %c0_253] : memref<128x128xf32, #tpu.memory_space<vmem>>, vector<128x128xf32>
    %cst_254 = arith.constant dense<0.000000e+00> : vector<64x128xf32>
    %895 = tpu.matmul %893, %894, %cst_254 {dimension_numbers = #tpu.dot_dimension_numbers<[1], [0], [0], [1], [0, 0, 1, 1], [], []>} : vector<64x128xf32>, vector<128x128xf32>, vector<64x128xf32> -> vector<64x128xf32>
    %c0_255 = arith.constant 0 : index
    %c0_256 = arith.constant 0 : index
    %896 = vector.load %arg9[%c0_255, %c0_256] : memref<1x128xf32, #tpu.memory_space<vmem>>, vector<1x128xf32>
    %897 = vector.broadcast %896 : vector<1x128xf32> to vector<64x128xf32>
    %898 = arith.addf %895, %897 : vector<64x128xf32>
    %c0_257 = arith.constant 0 : index
    %c0_258 = arith.constant 0 : index
    %899 = vector.load %arg10[%c0_257, %c0_258] : memref<64x128xf32, #tpu.memory_space<vmem>>, vector<64x128xf32>
    tpu.vector_store %arg10[%c0_257, %c0_258], %898 {strides = array<i32>} : memref<64x128xf32, #tpu.memory_space<vmem>>, vector<64x128xf32>,
    return
  }
  func.func @transform_0(%arg0: i32) -> (i32, i32) {
    %c0_i32 = arith.constant 0 : i32
    %c0_i32_0 = arith.constant 0 : i32
    %c0_i32_1 = arith.constant 0 : i32
    return %c0_i32, %c0_i32_0 : i32, i32
  }
  func.func @transform_1(%arg0: i32) -> (i32, i32, i32) {
    %c0_i32 = arith.constant 0 : i32
    %c0_i32_0 = arith.constant 0 : i32
    %c0_i32_1 = arith.constant 0 : i32
    %c0_i32_2 = arith.constant 0 : i32
    return %c0_i32, %c0_i32_0, %c0_i32_1 : i32, i32, i32
  }
  func.func @transform_2(%arg0: i32) -> (i32, i32) {
    %c0_i32 = arith.constant 0 : i32
    %c0_i32_0 = arith.constant 0 : i32
    %c0_i32_1 = arith.constant 0 : i32
    return %c0_i32, %c0_i32_0 : i32, i32
  }
  func.func @transform_3(%arg0: i32) -> (i32, i32, i32) {
    %c0_i32 = arith.constant 0 : i32
    %c0_i32_0 = arith.constant 0 : i32
    %c0_i32_1 = arith.constant 0 : i32
    %c0_i32_2 = arith.constant 0 : i32
    return %c0_i32, %c0_i32_0, %c0_i32_1 : i32, i32, i32
  }
  func.func @transform_4(%arg0: i32) -> (i32, i32, i32) {
    %c0_i32 = arith.constant 0 : i32
    %c0_i32_0 = arith.constant 0 : i32
    %c0_i32_1 = arith.constant 0 : i32
    %c0_i32_2 = arith.constant 0 : i32
    return %c0_i32, %c0_i32_0, %c0_i32_1 : i32, i32, i32
  }
  func.func @transform_5(%arg0: i32) -> (i32, i32, i32) {
    %c0_i32 = arith.constant 0 : i32
    %c0_i32_0 = arith.constant 0 : i32
    %c0_i32_1 = arith.constant 0 : i32
    %c0_i32_2 = arith.constant 0 : i32
    return %c0_i32, %c0_i32_0, %c0_i32_1 : i32, i32, i32
  }
  func.func @transform_6(%arg0: i32) -> (i32, i32, i32) {
    %c0_i32 = arith.constant 0 : i32
    %c0_i32_0 = arith.constant 0 : i32
    %c0_i32_1 = arith.constant 0 : i32
    %c0_i32_2 = arith.constant 0 : i32
    return %c0_i32, %c0_i32_0, %c0_i32_1 : i32, i32, i32
  }
  func.func @transform_7(%arg0: i32) -> (i32, i32) {
    %c0_i32 = arith.constant 0 : i32
    %c0_i32_0 = arith.constant 0 : i32
    %c0_i32_1 = arith.constant 0 : i32
    return %c0_i32, %c0_i32_0 : i32, i32
  }
  func.func @transform_8(%arg0: i32) -> (i32, i32) {
    %c0_i32 = arith.constant 0 : i32
    %c0_i32_0 = arith.constant 0 : i32
    %c0_i32_1 = arith.constant 0 : i32
    return %c0_i32, %c0_i32_0 : i32, i32
  }
  func.func @transform_9(%arg0: i32) -> (i32, i32) {
    %c0_i32 = arith.constant 0 : i32
    %c0_i32_0 = arith.constant 0 : i32
    %c0_i32_1 = arith.constant 0 : i32
    return %c0_i32, %c0_i32_0 : i32, i32
  }
  func.func @transform_10(%arg0: i32) -> (i32, i32, i32) {
    %c0_i32 = arith.constant 0 : i32
    %c0_i32_0 = arith.constant 0 : i32
    %c0_i32_1 = arith.constant 0 : i32
    %c0_i32_2 = arith.constant 0 : i32
    return %c0_i32, %c0_i32_0, %c0_i32_1 : i32, i32, i32
  }
}

</mosaic_0001>

<bundles_post_ra>
// kernel: tpu_custom_call.1
= control target key start
LH: loop header
LB: loop body
LE: loop exit
PB: predicated region body
PF: predicated region fallthrough
CT: control target
= control target key end

     0   :  { %16 = vsyncpa [#allocation5], 0  ;;  %s6813_s0 = inlined_call_operand.vmem [shape: f32[64,4], index: 0, kind: input, shape index: {}]   ;;  %s6814_s1 = inlined_call_operand.vmem [shape: f32[3,8,128], index: 1, kind: input, shape index: {}]   ;;  %s6815_s2 = inlined_call_operand.vmem [shape: f32[4,384], index: 2, kind: input, shape index: {}]   ;;  %s6816_s3 = inlined_call_operand.hbm [shape: f32[2,128,384], index: 3, kind: input, shape index: {}]   ;;  %s6817_s4 = inlined_call_operand.hbm [shape: f32[3,128,384], index: 4, kind: input, shape index: {}]   ;;  %s6818_s5 = inlined_call_operand.vmem [shape: f32[3,1,384], index: 5, kind: input, shape index: {}]   ;;  %s6819_s6 = inlined_call_operand.vmem [shape: f32[3,1,384], index: 6, kind: input, shape index: {}]   ;;  %s6820_s7 = inlined_call_operand.hbm [shape: f32[128,128], index: 7, kind: input, shape index: {}]   ;;  %s6821_s8 = inlined_call_operand.vmem [shape: f32[1,128], index: 8, kind: input, shape index: {}]   ;;  %s6822_s9 = inlined_call_operand.hbm [shape: f32[64,128], index: 9, kind: output, shape index: {0}]   ;;  %s6823_s10 = inlined_call_operand.hbm [shape: f32[3,8,128], index: 10, kind: output, shape index: {1}]  }
   0x1   :  { %17 = vsyncpa [#allocation8], 0 }
   0x2   :  { %18 = vsyncpa [#allocation6], 0 }
   0x3   :  { %19 = vsyncpa [#allocation12], 0  ;;  %s43_s15 = sshll.u32 %s6817_s4, 4  ;;  %s4316_s16 = smov [#allocation7]   ;;  %s44_s15 = int_to_ptr.hbm [resolvable:$true] %s43_s15 }
   0x4   :  { %s45_s17 = sshll.u32 %s4316_s16, 4  ;;  %s30_s20 = sshll.u32 %s6816_s3, 4  ;;  %s46_s17 = int_to_ptr.vmem [resolvable:$true] %s45_s17  ;;  %s31_s20 = int_to_ptr.hbm [resolvable:$true] %s30_s20 }
   0x5   :  { %s4317_s21 = smov 384   ;;  %s4318_s22 = smov 24  }
   0x6   :  { %51 = dma.hbm_to_vmem [thread:$0]  %s44_s15, 18432, %s46_s17, [#allocation8], %s4317_s21, %s4317_s21, %s4318_s22  }
   0x7   :  { %s4319_s23 = smov [#allocation4]   ;;  %s60_s27 = sshll.u32 %s6820_s7, 4  ;;  %s61_s27 = int_to_ptr.hbm [resolvable:$true] %s60_s27 }
   0x8   :  { %s32_s24 = sshll.u32 %s4319_s23, 4  ;;  %s4320_s4 = smov [#allocation9]   ;;  %s33_s24 = int_to_ptr.vmem [resolvable:$true] %s32_s24 }
   0x9   :  { %38 = dma.hbm_to_vmem [thread:$0]  %s31_s20, 12288, %s33_s24, [#allocation5], %s4317_s21, %s4317_s21, %s4318_s22  }
   0xa   :  { %s62_s28 = sshll.u32 %s4320_s4, 4  ;;  %s4321_s29 = smov 128   ;;  %s63_s28 = int_to_ptr.vmem [resolvable:$true] %s62_s28 }
   0xb   :  { %s4322_s30 = smov 8  }
   0xc   :  { %68 = dma.hbm_to_vmem [thread:$0]  %s61_s27, 2048, %s63_s28, [#allocation8], %s4321_s29, %s4321_s29, %s4322_s30  }
   0xd   :  { %4308 = dma.done.wait [#allocation5], 12288  }
   0xe   :  { %4309 = vsyncadd [#allocation5], 4294955008 }
   0xf   :  { %4310 = dma.done.wait [#allocation8], 20480  }
  0x10   :  { %4311 = vsyncadd [#allocation8], 4294946816  ;;  %v92_v0 = vld [vmem:[%s6815_s2 + $0x8] sm:$0xf]  ;;  %v91_v1 = vld [vmem:[%s6815_s2] sm:$0xff]  ;;  %vm134_vm0 = vcmask 1043456  }
  0x11   :  { %105 = vst [vmem:[#allocation1 + $0x10] ss:$2 sm:$0xff] %v92_v0  ;;  %v4401_v2 = vld [vmem:[%s6813_s0 + $0x20] sm:$0xff]  ;;  %vm109_vm1 = vcmask 31744   ;;  %v4403_v4 = vld [vmem:[#allocation7 + $0x168] sm:$0xff]  ;;  %v4416_v8 = vld [vmem:[#allocation7 + $0x150] sm:$0xff] }
  0x12   :  { %103 = vst [vmem:[#allocation1] ss:$2 sm:$0xff] %v91_v1  ;;  %v4408_v5 = vld [vmem:[%s6813_s0] sm:$0xff]  ;;  %v4422_v9 = vld [vmem:[#allocation7 + $0x160] sm:$0xff]  ;;  %v4427_v11 = vld [vmem:[#allocation7 + $0x170] sm:$0xff]  ;;  %s3686_s25 = sshll.u32 %s6823_s10, 4  ;;  %s3687_s25 = int_to_ptr.hbm [resolvable:$true] %s3686_s25 }
  0x13   :  { %v4411_v7 = vld [vmem:[#allocation7 + $0x178] sm:$0xff]  ;;  %v4432_v12 = vld [vmem:[#allocation7 + $0x148] sm:$0xff]  ;;  %v4435_v13 = vld [vmem:[#allocation7 + $0x120] sm:$0xff]  ;;  %s4324_s26 = smov [#allocation10]   ;;  %s3673_s28 = sshll.u32 %s6822_s9, 4  ;;  %s3674_s28 = int_to_ptr.hbm [resolvable:$true] %s3673_s28 }
  0x14   :  { %v4424_v10 = vld [vmem:[#allocation7 + $0x138] sm:$0xff]  ;;  %v4444_v15 = vld [vmem:[%s6813_s0 + $0x28] sm:$0xff]  ;;  %v4446_v16 = vld [vmem:[#allocation7 + $0x108] sm:$0xff]  ;;  %s3671_s27 = sshll.u32 %s4324_s26, 4  ;;  %s3672_s27 = int_to_ptr.vmem [resolvable:$true] %s3671_s27 }
  0x15   :  { %v4438_v14 = vld [vmem:[#allocation7 + $0x158] sm:$0xff]  ;;  %v4452_v17 = vld [vmem:[%s6813_s0 + $0x8] sm:$0xff]  ;;  %v4457_v19 = vld [vmem:[#allocation7 + $0x130] sm:$0xff] }
  0x16   :  { %v4455_v18 = vld [vmem:[#allocation7 + $0x140] sm:$0xff]  ;;  %v4463_v20 = vld [vmem:[#allocation7 + $0xf0] sm:$0xff]  ;;  %v4469_v21 = vld [vmem:[#allocation7 + $0x128] sm:$0xff] }
  0x17   :  { %v4471_v22 = vld [vmem:[#allocation7 + $0xd8] sm:$0xff]  ;;  %v4478_v24 = vld [vmem:[#allocation7 + $0xc0] sm:$0xff]  ;;  %v4480_v25 = vld [vmem:[#allocation7 + $0x110] sm:$0xff] }
  0x18   :  { %v108_v3 = vld.sshfl [vmem:[#allocation1 + $0x10] sm:$0xff pattern:$0x75316420]  ;;  %v4473_v23 = vld [vmem:[#allocation7 + $0x118] sm:$0xff]  ;;  %v4498_v29 = vld [vmem:[#allocation7 + $0x100] sm:$0xff] }
  0x19   :  { %3793 = vmatpush.msk.msra.mxu3 %vm134_vm0, %v108_v3  ;;  %v106_v6 = vld.sshfl [vmem:[#allocation1] sm:$0xff pattern:$0x75316420]  ;;  %3730 = vmatpush.msk.msra.mxu2 %vm134_vm0, %v108_v3  ;;  %v4488_v26 = vld [vmem:[%s6813_s0 + $0x30] sm:$0xff]  ;;  %v4506_v31 = vld [vmem:[#allocation7 + $0x90] sm:$0xff] }
  0x1a   :  { %3735 = vmatmul.msk.f32.vlgmr.msra.gmra.mxu3 %vm109_vm1, %v4401_v2  ;;  %3712 = vmatpush.msk.msra.mxu0 %vm134_vm0, %v106_v6  ;;  %v4491_v27 = vld [vmem:[#allocation7 + $0xa8] sm:$0xff]  ;;  %v4501_v30 = vld [vmem:[#allocation7 + $0xf8] sm:$0xff]  ;;  %v4512_v32 = vld [vmem:[#allocation7 + $0xe0] sm:$0xff] }
  0x1b   :  { %351 = vmatpush.msrb.mxu3 %v4403_v4  ;;  %3713 = vmatmul.msk.f32.vlgmr.msra.gmra.mxu0 %vm109_vm1, %v4408_v5  ;;  %v4496_v28 = vld [vmem:[%s6813_s0 + $0x10] sm:$0xff]  ;;  %v4516_v34 = vld [vmem:[#allocation7 + $0x78] sm:$0xff]  ;;  %v4523_v36 = vld [vmem:[#allocation7 + $0xd0] sm:$0xff] }
  0x1c   :  { %391 = vmatpush.msrb.mxu0 %v4411_v7  ;;  %3731 = vmatmul.msk.f32.vlgmr.msra.gmra.mxu2 %vm109_vm1, %v4408_v5  ;;  %v4514_v33 = vld [vmem:[#allocation7 + $0xe8] sm:$0xff]  ;;  %v4525_v37 = vld [vmem:[#allocation7 + $0x60] sm:$0xff]  ;;  %v4533_v38 = vld [vmem:[%s6813_s0 + $0x38] sm:$0xff] }
  0x1d   :  { %352 = vmatpush.msrb.mxu3 %v4416_v8  ;;  %485 = vmatpush.msrb.mxu2 %v4427_v11  ;;  %v4521_v35 = vld [vmem:[#allocation7 + $0xc8] sm:$0xff]  ;;  %v4535_v39 = vld [vmem:[#allocation7 + $0xb0] sm:$0xff]  ;;  %v4537_v40 = vld [vmem:[#allocation7 + $0xb8] sm:$0xff] }
  0x1e   :  { %392 = vmatpush.msrb.mxu0 %v4422_v9  ;;  %v4541_v41 = vld [vmem:[#allocation7 + $0x48] sm:$0xff]  ;;  %v4546_v42 = vld [vmem:[%s6813_s0 + $0x18] sm:$0xff]  ;;  %v4551_v43 = vld [vmem:[#allocation7 + $0xa0] sm:$0xff] }
  0x1f   :  { %353 = vmatpush.msrb.mxu3 %v4424_v10  ;;  %486 = vmatpush.msrb.mxu2 %v4438_v14  ;;  %v4555_v44 = vld [vmem:[#allocation7 + $0x30] sm:$0xff]  ;;  %v4561_v45 = vld [vmem:[#allocation7 + $0x98] sm:$0xff]  ;;  %v4563_v46 = vld [vmem:[#allocation7 + $0x88] sm:$0xff] }
  0x20   :  { %393 = vmatpush.msrb.mxu0 %v4432_v12  ;;  %6904 = vst [vmem:[#allocation17_spill] sm:$0xff] %v4555_v44  ;;  %v4565_v47 = vld [vmem:[#allocation7 + $0x18] sm:$0xff]  ;;  %v4570_v48 = vld [vmem:[#allocation7 + $0x80] sm:$0xff]  ;;  %v4572_v49 = vld [vmem:[#allocation7 + $0x70] sm:$0xff] }
  0x21   :  { %354 = vmatpush.msrb.mxu3 %v4435_v13  ;;  %487 = vmatpush.msrb.mxu2 %v4455_v18  ;;  %6905 = vst [vmem:[#allocation18_spill] sm:$0xff] %v4565_v47  ;;  %v4574_v50 = vld [vmem:[#allocation7] sm:$0xff]  ;;  %v4579_v51 = vld [vmem:[#allocation7 + $0x68] sm:$0xff]  ;;  %v4581_v52 = vld [vmem:[#allocation7 + $0x58] sm:$0xff] }
  0x22   :  { %3736 = vmatmul.msk.f32.gmra.mxu3 %vm109_vm1, %v4444_v15  ;;  %394 = vmatpush.msrb.mxu0 %v4457_v19  ;;  %6906 = vst [vmem:[#allocation19_spill] sm:$0xff] %v4574_v50  ;;  %v4588_v53 = vld [vmem:[%s6814_s1] sm:$0xff]  ;;  %v4593_v54 = vld [vmem:[#allocation7 + $0x40] sm:$0xff]  ;;  %v4595_v55 = vld [vmem:[#allocation7 + $0x28] sm:$0xff] }
  0x23   :  { %355 = vmatpush.msrb.mxu3 %v4446_v16  ;;  %3714 = vmatmul.msk.f32.gmra.mxu0 %vm109_vm1, %v4452_v17  ;;  %6907 = vst [vmem:[#allocation20_spill] sm:$0xff] %v4593_v54  ;;  %v107_v56 = vld.sshfl [vmem:[#allocation1 + $0x8] sm:$0xff pattern:$0x75316420]  ;;  %v4602_v57 = vld [vmem:[#allocation7 + $0x10] sm:$0xff]  ;;  %v4611_v59 = vld [vmem:[#allocation7 + $0x38] sm:$0xff] }
  0x24   :  { %488 = vmatpush.msrb.mxu2 %v4469_v21  ;;  %395 = vmatpush.msrb.mxu0 %v4473_v23  ;;  %6908 = vst [vmem:[#allocation21_spill] sm:$0xff] %v4595_v55  ;;  %v4605_v58 = vld [vmem:[#allocation7 + $0x50] sm:$0xff]  ;;  %v4618_v60 = vld [vmem:[#allocation7 + $0x20] sm:$0xff]  ;;  %v4624_v61 = vld [vmem:[#allocation7 + $0x8] sm:$0xff] }
  0x25   :  { %356 = vmatpush.msrb.mxu3 %v4463_v20  ;;  %3732 = vmatmul.msk.f32.gmra.mxu2 %vm109_vm1, %v4452_v17  ;;  %6909 = vst [vmem:[#allocation22_spill] sm:$0xff] %v4602_v57 }
  0x26   :  { %489 = vmatpush.msrb.mxu2 %v4480_v25  ;;  %396 = vmatpush.msrb.mxu0 %v4498_v29  ;;  %6910 = vst [vmem:[#allocation23_spill] sm:$0xff] %v4605_v58 }
  0x27   :  { %357 = vmatpush.msrb.mxu3 %v4471_v22  ;;  %3721 = vmatpush.msk.msra.mxu1 %vm134_vm0, %v107_v56  ;;  %6911 = vst [vmem:[#allocation24_spill] sm:$0xff] %v4611_v59 }
  0x28   :  { %490 = vmatpush.msrb.mxu2 %v4501_v30  ;;  %397 = vmatpush.msrb.mxu0 %v4514_v33  ;;  %6912 = vst [vmem:[#allocation25_spill] sm:$0xff] %v4618_v60 }
  0x29   :  { %358 = vmatpush.msrb.mxu3 %v4478_v24  ;;  %3722 = vmatmul.msk.f32.vlgmr.msra.gmra.mxu1 %vm109_vm1, %v4408_v5  ;;  %6913 = vst [vmem:[#allocation26_spill] sm:$0xff] %v4624_v61 }
  0x2a   :  { %3737 = vmatmul.msk.f32.gmra.mxu3 %vm109_vm1, %v4488_v26  ;;  %491 = vmatpush.msrb.mxu2 %v4512_v32 }
  0x2b   :  { %359 = vmatpush.msrb.mxu3 %v4491_v27  ;;  %3715 = vmatmul.msk.f32.gmra.mxu0 %vm109_vm1, %v4496_v28 }
  0x2c   :  { %398 = vmatpush.msrb.mxu0 %v4523_v36  ;;  %492 = vmatpush.msrb.mxu2 %v4521_v35 }
  0x2d   :  { %360 = vmatpush.msrb.mxu3 %v4506_v31  ;;  %3733 = vmatmul.msk.f32.gmra.mxu2 %vm109_vm1, %v4496_v28 }
  0x2e   :  { %399 = vmatpush.msrb.mxu0 %v4537_v40  ;;  %493 = vmatpush.msrb.mxu2 %v4535_v39 }
  0x2f   :  { %361 = vmatpush.msrb.mxu3 %v4516_v34  ;;  %465 = vmatpush.msrb.mxu1 %v4403_v4 }
  0x30   :  { %400 = vmatpush.msrb.mxu0 %v4551_v43  ;;  %494 = vmatpush.msrb.mxu2 %v4561_v45 }
  0x31   :  { %362 = vmatpush.msrb.mxu3 %v4525_v37  ;;  %466 = vmatpush.msrb.mxu1 %v4416_v8 }
  0x32   :  { %3738 = vmatmul.msk.f32.gmra.mxu3 %vm109_vm1, %v4533_v38  ;;  %401 = vmatpush.msrb.mxu0 %v4563_v46 }
  0x33   :  { %363 = vmatpush.msrb.mxu3 %v4541_v41  ;;  %3716 = vmatmul.msk.f32.gmra.mxu0 %vm109_vm1, %v4546_v42 }
  0x34   :  { %402 = vmatpush.msrb.mxu0 %v4572_v49  ;;  %495 = vmatpush.msrb.mxu2 %v4570_v48 }
  0x35   :  { %364 = vmatpush.msrb.mxu3 %v4555_v44  ;;  %3734 = vmatmul.msk.f32.gmra.mxu2 %vm109_vm1, %v4546_v42 }
  0x36   :  { %403 = vmatpush.msrb.mxu0 %v4581_v52  ;;  %496 = vmatpush.msrb.mxu2 %v4579_v51 }
  0x37   :  { %365 = vmatpush.msrb.mxu3 %v4565_v47  ;;  %467 = vmatpush.msrb.mxu1 %v4424_v10 }
  0x38   :  { %404 = vmatpush.msrb.mxu0 %v4593_v54  ;;  %497 = vmatpush.msrb.mxu2 %v4605_v58 }
  0x39   :  { %366 = vmatpush.msrb.mxu3 %v4574_v50  ;;  %468 = vmatpush.msrb.mxu1 %v4435_v13 }
  0x3a   :  { %367 = vmatmul.f32.vlgmr.msrb.gmra.mxu3 %v4588_v53  ;;  %405 = vmatpush.msrb.mxu0 %v4595_v55 }
  0x3b   :  { %371 = vmatpush.msra.mxu3 %v4427_v11  ;;  %3717 = vmatmul.msk.f32.gmra.mxu0 %vm109_vm1, %v4401_v2 }
  0x3c   :  { %406 = vmatpush.msrb.mxu0 %v4602_v57  ;;  %498 = vmatpush.msrb.mxu2 %v4611_v59 }
  0x3d   :  { %372 = vmatpush.msra.mxu3 %v4438_v14  ;;  %3723 = vmatmul.msk.f32.gmra.mxu1 %vm109_vm1, %v4452_v17  ;;  %v336_v17 = vld [vmem:[%s6819_s6] sm:$0x7] }
  0x3e   :  { %499 = vmatpush.msrb.mxu2 %v4618_v60  ;;  %580 = vmatpush.msra.mxu0 %v4403_v4 }
  0x3f   :  { %373 = vmatpush.msra.mxu3 %v4455_v18  ;;  %469 = vmatpush.msrb.mxu1 %v4446_v16 }
  0x40   :  { %500 = vmatpush.msrb.mxu2 %v4624_v61  ;;  %581 = vmatpush.msra.mxu0 %v4416_v8 }
  0x41   :  { %374 = vmatpush.msra.mxu3 %v4469_v21  ;;  %470 = vmatpush.msrb.mxu1 %v4463_v20 }
  0x42   :  { %620 = vmatpush.msra.mxu2 %v4411_v7  ;;  %582 = vmatpush.msra.mxu0 %v4424_v10 }
  0x43   :  { %375 = vmatpush.msra.mxu3 %v4480_v25  ;;  %3718 = vmatmul.msk.f32.gmra.mxu0 %vm109_vm1, %v4444_v15 }
  0x44   :  { %621 = vmatpush.msra.mxu2 %v4422_v9  ;;  %471 = vmatpush.msrb.mxu1 %v4471_v22 }
  0x45   :  { %376 = vmatpush.msra.mxu3 %v4501_v30  ;;  %583 = vmatpush.msra.mxu0 %v4435_v13 }
  0x46   :  { %622 = vmatpush.msra.mxu2 %v4432_v12  ;;  %472 = vmatpush.msrb.mxu1 %v4478_v24 }
  0x47   :  { %377 = vmatpush.msra.mxu3 %v4512_v32  ;;  %3724 = vmatmul.msk.f32.gmra.mxu1 %vm109_vm1, %v4496_v28  ;;  %v4792_v28 = vperm.slane %v336_v17, 0 }
  0x48   :  { %623 = vmatpush.msra.mxu2 %v4457_v19  ;;  %584 = vmatpush.msra.mxu0 %v4446_v16 }
  0x49   :  { %378 = vmatpush.msra.mxu3 %v4521_v35  ;;  %473 = vmatpush.msrb.mxu1 %v4491_v27  ;;  %6922 = vst [vmem:[#allocation35_spill] sm:$0xff] %v4792_v28 }
  0x4a   :  { %624 = vmatpush.msra.mxu2 %v4473_v23  ;;  %585 = vmatpush.msra.mxu0 %v4463_v20 }
  0x4b   :  { %379 = vmatpush.msra.mxu3 %v4535_v39  ;;  %3719 = vmatmul.msk.f32.gmra.mxu0 %vm109_vm1, %v4488_v26 }
  0x4c   :  { %625 = vmatpush.msra.mxu2 %v4498_v29  ;;  %474 = vmatpush.msrb.mxu1 %v4506_v31 }
  0x4d   :  { %380 = vmatpush.msra.mxu3 %v4561_v45  ;;  %586 = vmatpush.msra.mxu0 %v4471_v22 }
  0x4e   :  { %626 = vmatpush.msra.mxu2 %v4514_v33  ;;  %475 = vmatpush.msrb.mxu1 %v4516_v34 }
  0x4f   :  { %381 = vmatpush.msra.mxu3 %v4570_v48  ;;  %3725 = vmatmul.msk.f32.gmra.mxu1 %vm109_vm1, %v4546_v42 }
  0x50   :  { %627 = vmatpush.msra.mxu2 %v4523_v36  ;;  %476 = vmatpush.msrb.mxu1 %v4525_v37 }
  0x51   :  { %382 = vmatpush.msra.mxu3 %v4579_v51  ;;  %587 = vmatpush.msra.mxu0 %v4478_v24 }
  0x52   :  { %477 = vmatpush.msrb.mxu1 %v4541_v41  ;;  %628 = vmatpush.msra.mxu2 %v4537_v40 }
  0x53   :  { %383 = vmatpush.msra.mxu3 %v4605_v58  ;;  %3720 = vmatmul.msk.f32.gmra.mxu0 %vm109_vm1, %v4533_v38 }
  0x54   :  { %588 = vmatpush.msra.mxu0 %v4491_v27  ;;  %478 = vmatpush.msrb.mxu1 %v4555_v44 }
  0x55   :  { %384 = vmatpush.msra.mxu3 %v4611_v59  ;;  %629 = vmatpush.msra.mxu2 %v4551_v43 }
  0x56   :  { %479 = vmatpush.msrb.mxu1 %v4565_v47  ;;  %589 = vmatpush.msra.mxu0 %v4506_v31 }
  0x57   :  { %385 = vmatpush.msra.mxu3 %v4618_v60  ;;  %3726 = vmatmul.msk.f32.gmra.mxu1 %vm109_vm1, %v4401_v2 }
  0x58   :  { %480 = vmatpush.msrb.mxu1 %v4574_v50  ;;  %590 = vmatpush.msra.mxu0 %v4516_v34 }
  0x59   :  { %386 = vmatpush.msra.mxu3 %v4624_v61  ;;  %630 = vmatpush.msra.mxu2 %v4563_v46 }
  0x5a   :  { %387 = vmatmul.f32.vlgmr.msra.gmra.mxu3 %v4588_v53  ;;  %600 = vmatpush.msra.mxu1 %v4427_v11 }
  0x5b   :  { %505 = vmatpush.msrb.mxu3 %v4411_v7  ;;  %407 = vmatmul.f32.vlgmr.msrb.gmra.mxu0 %v4588_v53 }
  0x5c   :  { %591 = vmatpush.msra.mxu0 %v4525_v37  ;;  %601 = vmatpush.msra.mxu1 %v4438_v14 }
  0x5d   :  { %506 = vmatpush.msrb.mxu3 %v4422_v9  ;;  %631 = vmatpush.msra.mxu2 %v4572_v49 }
  0x5e   :  { %592 = vmatpush.msra.mxu0 %v4541_v41  ;;  %602 = vmatpush.msra.mxu1 %v4455_v18 }
  0x5f   :  { %507 = vmatpush.msrb.mxu3 %v4432_v12  ;;  %632 = vmatpush.msra.mxu2 %v4581_v52 }
  0x60   :  { %593 = vmatpush.msra.mxu0 %v4555_v44  ;;  %603 = vmatpush.msra.mxu1 %v4469_v21 }
  0x61   :  { %508 = vmatpush.msrb.mxu3 %v4457_v19  ;;  %3727 = vmatmul.msk.f32.gmra.mxu1 %vm109_vm1, %v4444_v15  ;;  %v93_v15 = vld [vmem:[%s6818_s5] sm:$0x7] }
  0x62   :  { %633 = vmatpush.msra.mxu2 %v4593_v54  ;;  %604 = vmatpush.msra.mxu1 %v4480_v25 }
  0x63   :  { %509 = vmatpush.msrb.mxu3 %v4473_v23  ;;  %594 = vmatpush.msra.mxu0 %v4565_v47 }
  0x64   :  { %634 = vmatpush.msra.mxu2 %v4595_v55  ;;  %605 = vmatpush.msra.mxu1 %v4501_v30 }
  0x65   :  { %510 = vmatpush.msrb.mxu3 %v4498_v29  ;;  %595 = vmatpush.msra.mxu0 %v4574_v50 }
  0x66   :  { %635 = vmatpush.msra.mxu2 %v4602_v57  ;;  %606 = vmatpush.msra.mxu1 %v4512_v32 }
  0x67   :  { %511 = vmatpush.msrb.mxu3 %v4514_v33  ;;  %715 = vmatpush.msrb.mxu0 %v4427_v11 }
  0x68   :  { %607 = vmatpush.msra.mxu1 %v4521_v35 }
  0x69   :  { %512 = vmatpush.msrb.mxu3 %v4523_v36  ;;  %3728 = vmatmul.msk.f32.gmra.mxu1 %vm109_vm1, %v4488_v26  ;;  %v4790_v26 = vperm.slane %v93_v15, 0 }
  0x6a   :  { %716 = vmatpush.msrb.mxu0 %v4438_v14  ;;  %608 = vmatpush.msra.mxu1 %v4535_v39 }
  0x6b   :  { %513 = vmatpush.msrb.mxu3 %v4537_v40  ;;  %6921 = vst [vmem:[#allocation34_spill] sm:$0xff] %v4790_v26 }
  0x6c   :  { %717 = vmatpush.msrb.mxu0 %v4455_v18  ;;  %609 = vmatpush.msra.mxu1 %v4561_v45 }
  0x6d   :  { %514 = vmatpush.msrb.mxu3 %v4551_v43 }
  0x6e   :  { %718 = vmatpush.msrb.mxu0 %v4469_v21  ;;  %610 = vmatpush.msra.mxu1 %v4570_v48 }
  0x6f   :  { %515 = vmatpush.msrb.mxu3 %v4563_v46 }
  0x70   :  { %719 = vmatpush.msrb.mxu0 %v4480_v25  ;;  %611 = vmatpush.msra.mxu1 %v4579_v51 }
  0x71   :  { %516 = vmatpush.msrb.mxu3 %v4572_v49  ;;  %3729 = vmatmul.msk.f32.gmra.mxu1 %vm109_vm1, %v4533_v38 }
  0x72   :  { %720 = vmatpush.msrb.mxu0 %v4501_v30  ;;  %612 = vmatpush.msra.mxu1 %v4605_v58 }
  0x73   :  { %517 = vmatpush.msrb.mxu3 %v4581_v52 }
  0x74   :  { %721 = vmatpush.msrb.mxu0 %v4512_v32  ;;  %613 = vmatpush.msra.mxu1 %v4611_v59 }
  0x75   :  { %518 = vmatpush.msrb.mxu3 %v4593_v54 }
  0x76   :  { %722 = vmatpush.msrb.mxu0 %v4521_v35  ;;  %614 = vmatpush.msra.mxu1 %v4618_v60 }
  0x77   :  { %519 = vmatpush.msrb.mxu3 %v4595_v55 }
  0x78   :  { %723 = vmatpush.msrb.mxu0 %v4535_v39  ;;  %615 = vmatpush.msra.mxu1 %v4624_v61 }
  0x79   :  { %520 = vmatpush.msrb.mxu3 %v4602_v57 }
  0x7a   :  { %724 = vmatpush.msrb.mxu0 %v4561_v45 }
  0x7b   :  { %695 = vmatpush.msra.mxu3 %v4403_v4 }
  0x7c   :  { %725 = vmatpush.msrb.mxu0 %v4570_v48 }
  0x7d   :  { %696 = vmatpush.msra.mxu3 %v4416_v8 }
  0x7e   :  { %726 = vmatpush.msrb.mxu0 %v4579_v51 }
  0x7f   :  { %697 = vmatpush.msra.mxu3 %v4424_v10 }
  0x80   :  { %727 = vmatpush.msrb.mxu0 %v4605_v58 }
  0x81   :  { %698 = vmatpush.msra.mxu3 %v4435_v13 }
  0x82   :  { %728 = vmatpush.msrb.mxu0 %v4611_v59 }
  0x83   :  { %699 = vmatpush.msra.mxu3 %v4446_v16 }
  0x84   :  { %729 = vmatpush.msrb.mxu0 %v4618_v60  ;;  %v4804_v60 = vperm.slane %v336_v17, 1 }
  0x85   :  { %700 = vmatpush.msra.mxu3 %v4463_v20 }
  0x86   :  { %730 = vmatpush.msrb.mxu0 %v4624_v61  ;;  %6927 = vst [vmem:[#allocation40_spill] sm:$0xff] %v4804_v60 }
  0x87   :  { %701 = vmatpush.msra.mxu3 %v4471_v22 }
  0x89   :  { %702 = vmatpush.msra.mxu3 %v4478_v24 }
  0x8b   :  { %703 = vmatpush.msra.mxu3 %v4491_v27 }
  0x8d   :  { %704 = vmatpush.msra.mxu3 %v4506_v31 }
  0x8f   :  { %705 = vmatpush.msra.mxu3 %v4516_v34 }
  0x91   :  { %706 = vmatpush.msra.mxu3 %v4525_v37 }
  0x93   :  { %707 = vmatpush.msra.mxu3 %v4541_v41 }
  0x95   :  { %708 = vmatpush.msra.mxu3 %v4555_v44 }
  0x97   :  { %709 = vmatpush.msra.mxu3 %v4565_v47 }
  0x98   :  { %v158_v62 = vpop.f32.mrf.mxu0 }
  0x99   :  { %710 = vmatpush.msra.mxu3 %v4574_v50  ;;  %v159_v42 = vadd.f32 %v158_v62, %v4790_v26  ;;  %v4802_v50 = vperm.slane %v93_v15, 1  ;;  %v4810_v26 = vperm.slane %v336_v17, 2 }
  0x9b   :  { %6926 = vst [vmem:[#allocation39_spill] sm:$0xff] %v4802_v50 }
  0x9d   :  { %v4770_v63 = vpop.f32.mrf.mxu3 }
  0x9e   :  { %6914 = vst [vmem:[#allocation27_spill] sm:$0xff] %v4770_v63 }
  0xa0   :  { %v4772_v0 = vpop.f32.mrf.mxu0 }
  0xa1   :  { %6915 = vst [vmem:[#allocation28_spill] sm:$0xff] %v4772_v0 }
  0xa5   :  { %v4774_v1 = vpop.f32.mrf.mxu3 }
  0xa6   :  { %6916 = vst [vmem:[#allocation29_spill] sm:$0xff] %v4774_v1  ;;  %v199_v57 = vpop.f32.mrf.mxu1 }
  0xa8   :  { %v4776_v2 = vpop.f32.mrf.mxu0 }
  0xa9   :  { %6917 = vst [vmem:[#allocation30_spill] sm:$0xff] %v4776_v2 }
  0xad   :  { %v4778_v3 = vpop.f32.mrf.mxu3 }
  0xae   :  { %6918 = vst [vmem:[#allocation31_spill] sm:$0xff] %v4778_v3 }
  0xb0   :  { %v4782_v6 = vpop.f32.mrf.mxu0 }
  0xb1   :  { %6920 = vst [vmem:[#allocation33_spill] sm:$0xff] %v4782_v6 }
  0xb5   :  { %v4780_v5 = vpop.f32.mrf.mxu3 }
  0xb6   :  { %6919 = vst [vmem:[#allocation32_spill] sm:$0xff] %v4780_v5 }
  0xb8   :  { %v4796_v5 = vpop.f32.mrf.mxu0 }
  0xb9   :  { %6923 = vst [vmem:[#allocation36_spill] sm:$0xff] %v4796_v5 }
  0xbd   :  { %v368_v38 = vpop.f32.mrf.mxu3 }
  0xbe   :  { %v369_v56 = vadd.f32 %v368_v38, %v4792_v28  ;;  %v200_v38 = vadd.f32 %v199_v57, %v4802_v50 }
  0xc0   :  { %v411_v3 = vadd.f32 %v369_v56, %v159_v42  ;;  %v4798_v6 = vpop.f32.mrf.mxu0 }
  0xc1   :  { %6924 = vst [vmem:[#allocation37_spill] sm:$0xff] %v4798_v6 }
  0xc2   :  { %v3739_v1 = vmul.f32 -1.442695, %v411_v3 }
  0xc4   :  { %3804 = vpow2.f32 %v3739_v1 }
  0xc8   :  { %v4800_v0 = vpop.f32.mrf.mxu0 }
  0xc9   :  { %6925 = vst [vmem:[#allocation38_spill] sm:$0xff] %v4800_v0 }
  0xca   :  { %v3805_v63 = vpop.eup %3804 }
  0xcb   :  { %v415_v2 = vadd.f32 1.0, %v3805_v63 }
  0xcd   :  { %3806 = vrcp.f32 %v415_v2  ;;  %v427_v28 = vand.u32 2147483648, %v415_v2  ;;  %vm421_vm3 = vweird.f32 %v415_v2  ;;  %v425_v47 = vand.u32 2147483647, %v415_v2 }
  0xcf   :  { %vm426_vm5 = vcmp.eq.f32.partialorder %v425_v47, 8.507059e+37 }
  0xd0   :  { %v4808_v42 = vpop.f32.mrf.mxu0 }
  0xd1   :  { %6928 = vst [vmem:[#allocation41_spill] sm:$0xff] %v4808_v42 }
  0xd3   :  { %v3807_v61 = vpop.eup %3806 }
  0xd4   :  { %v417_v62 = vmul.f32 %v3807_v61, %v415_v2  ;;  %vm422_vm2 = vweird.f32 %v3807_v61 }
  0xd5   :  { %vm423_vm4 = vmor %vm421_vm3, %vm422_vm2 }
  0xd6   :  { %v418_v1 = vsub.f32 1.0, %v417_v62 }
  0xd8   :  { %v419_v6 = vmul.f32 %v3807_v61, %v418_v1  ;;  %v408_v59 = vpop.f32.mrf.mxu0  ;;  %v4813_v1 = vperm.slane %v93_v15, 2 }
  0xd9   :  { %v409_v62 = vadd.f32 %v408_v59, %v4810_v26 }
  0xda   :  { %v420_v0 = vadd.f32 %v3807_v61, %v419_v6 }
  0xdc   :  { %v424_v50 = vsel %vm423_vm4, %v3807_v61, %v420_v0 }
  0xdd   :  { %v388_v5 = vpop.f32.mrf.mxu3 }
  0xde   :  { %v389_v3 = vadd.f32 %v388_v5, %v4804_v60  ;;  %v428_v5 = vor.u32 1.1754944e-38, %v427_v28 }
  0xe0   :  { %v431_v56 = vadd.f32 %v389_v3, %v200_v38  ;;  %v429_v38 = vsel %vm426_vm5, %v428_v5, %v424_v50  ;;  %v240_v3 = vpop.f32.mrf.mxu2 }
  0xe1   :  { %v451_v6 = vmul.f32 %v429_v38, %v409_v62  ;;  %v241_v17 = vadd.f32 %v240_v3, %v4813_v1  ;;  %v6935_v38 = vld [vmem:[#allocation22_spill] sm:$0xff]  ;;  %v6936_v3 = vld [vmem:[#allocation19_spill] sm:$0xff] }
  0xe2   :  { %v3740_v63 = vmul.f32 -1.442695, %v431_v56 }
  0xe3   :  { %v452_v2 = vadd.f32 %v451_v6, %v241_v17  ;;  %v6937_v6 = vld [vmem:[#allocation26_spill] sm:$0xff]  ;;  %v202_v17 = vpop.f32.mrf.mxu1 }
  0xe4   :  { %3808 = vpow2.f32 %v3740_v63 }
  0xea   :  { %v3809_v55 = vpop.eup %3808 }
  0xeb   :  { %v435_v57 = vadd.f32 1.0, %v3809_v55 }
  0xed   :  { %3810 = vrcp.f32 %v435_v57  ;;  %v447_v60 = vand.u32 2147483648, %v435_v57  ;;  %v445_v55 = vand.u32 2147483647, %v435_v57  ;;  %vm441_vm7 = vweird.f32 %v435_v57 }
  0xee   :  { %3812 = vtanh.f32 %v452_v2 }
  0xef   :  { %v448_v47 = vor.u32 1.1754944e-38, %v447_v60  ;;  %vm446_vm9 = vcmp.eq.f32.partialorder %v445_v55, 8.507059e+37  ;;  %v6932_v60 = vld [vmem:[#allocation21_spill] sm:$0xff] }
  0xf3   :  { %v3811_v56 = vpop.eup %3810 }
  0xf4   :  { %v437_v63 = vmul.f32 %v3811_v56, %v435_v57  ;;  %vm442_vm6 = vweird.f32 %v3811_v56  ;;  %v3813_v15 = vpop.eup %3812  ;;  %v6934_v57 = vld [vmem:[#allocation25_spill] sm:$0xff] }
  0xf5   :  { %vm443_vm8 = vmor %vm441_vm7, %vm442_vm6 }
  0xf6   :  { %v438_v42 = vsub.f32 1.0, %v437_v63 }
  0xf8   :  { %v439_v44 = vmul.f32 %v3811_v56, %v438_v42  ;;  %v6933_v42 = vld [vmem:[#allocation18_spill] sm:$0xff] }
  0xfa   :  { %v440_v61 = vadd.f32 %v3811_v56, %v439_v44  ;;  %v6930_v44 = vld [vmem:[#allocation17_spill] sm:$0xff] }
  0xfc   :  { %v444_v50 = vsel %vm443_vm8, %v3811_v56, %v440_v61  ;;  %v4870_v56 = vpop.f32.mrf.mxu1  ;;  %v243_v61 = vpop.f32.mrf.mxu2 }
  0xfd   :  { %v449_v59 = vsel %vm446_vm9, %v448_v47, %v444_v50  ;;  %6938 = vst [vmem:[#allocation43_spill] sm:$0xff] %v4870_v56  ;;  %v6948_v56 = vld [vmem:[#allocation35_spill] sm:$0xff] }
  0xfe   :  { %v454_v0 = vsub.f32 1.0, %v449_v59  ;;  %v456_v5 = vmul.f32 %v449_v59, %v4588_v53  ;;  %v6931_v53 = vld [vmem:[#allocation24_spill] sm:$0xff] }
 0x100   :  { %v455_v28 = vmul.f32 %v3813_v15, %v454_v0 }
 0x102   :  { %v4817_v62 = vadd.f32 %v456_v5, %v455_v28  ;;  %v6946_v28 = vld [vmem:[#allocation34_spill] sm:$0xff]  ;;  %v6947_v5 = vld [vmem:[#allocation28_spill] sm:$0xff] }
 0x104   :  { %6929 = vst [vmem:[#allocation42_spill] sm:$0xff] %v4817_v62  ;;  %481 = vmatmul.f32.vlgmr.msrb.gmra.mxu1 %v4817_v62  ;;  %501 = vmatmul.f32.vlgmr.msrb.gmra.mxu2 %v4817_v62  ;;  %v4872_v63 = vpop.f32.mrf.mxu1  ;;  %v4880_v50 = vpop.f32.mrf.mxu2 }
 0x105   :  { %521 = vmatmul.f32.vlgmr.msrb.gmra.mxu3 %v4817_v62  ;;  %735 = vmatpush.msrb.mxu1 %v4411_v7  ;;  %6939 = vst [vmem:[#allocation44_spill] sm:$0xff] %v4872_v63 }
 0x106   :  { %810 = vmatpush.msrb.mxu2 %v4403_v4  ;;  %830 = vmatpush.msrb.mxu3 %v4427_v11  ;;  %6943 = vst [vmem:[#allocation48_spill] sm:$0xff] %v4880_v50 }
 0x107   :  { %736 = vmatpush.msrb.mxu1 %v4422_v9 }
 0x108   :  { %811 = vmatpush.msrb.mxu2 %v4416_v8  ;;  %831 = vmatpush.msrb.mxu3 %v4438_v14 }
 0x109   :  { %737 = vmatpush.msrb.mxu1 %v4432_v12 }
 0x10a   :  { %812 = vmatpush.msrb.mxu2 %v4424_v10  ;;  %832 = vmatpush.msrb.mxu3 %v4455_v18 }
 0x10b   :  { %738 = vmatpush.msrb.mxu1 %v4457_v19 }
 0x10c   :  { %813 = vmatpush.msrb.mxu2 %v4435_v13  ;;  %833 = vmatpush.msrb.mxu3 %v4469_v21  ;;  %v4874_v2 = vpop.f32.mrf.mxu1  ;;  %v4884_v0 = vpop.f32.mrf.mxu2 }
 0x10d   :  { %739 = vmatpush.msrb.mxu1 %v4473_v23  ;;  %6940 = vst [vmem:[#allocation45_spill] sm:$0xff] %v4874_v2 }
 0x10e   :  { %814 = vmatpush.msrb.mxu2 %v4446_v16  ;;  %834 = vmatpush.msrb.mxu3 %v4480_v25  ;;  %6945 = vst [vmem:[#allocation50_spill] sm:$0xff] %v4884_v0 }
 0x10f   :  { %740 = vmatpush.msrb.mxu1 %v4498_v29 }
 0x110   :  { %815 = vmatpush.msrb.mxu2 %v4463_v20  ;;  %835 = vmatpush.msrb.mxu3 %v4501_v30 }
 0x111   :  { %741 = vmatpush.msrb.mxu1 %v4514_v33 }
 0x112   :  { %816 = vmatpush.msrb.mxu2 %v4471_v22  ;;  %836 = vmatpush.msrb.mxu3 %v4512_v32 }
 0x113   :  { %742 = vmatpush.msrb.mxu1 %v4523_v36 }
 0x114   :  { %817 = vmatpush.msrb.mxu2 %v4478_v24  ;;  %837 = vmatpush.msrb.mxu3 %v4521_v35  ;;  %v4876_v55 = vpop.f32.mrf.mxu1 }
 0x115   :  { %743 = vmatpush.msrb.mxu1 %v4537_v40  ;;  %6941 = vst [vmem:[#allocation46_spill] sm:$0xff] %v4876_v55 }
 0x116   :  { %818 = vmatpush.msrb.mxu2 %v4491_v27  ;;  %838 = vmatpush.msrb.mxu3 %v4535_v39 }
 0x117   :  { %744 = vmatpush.msrb.mxu1 %v4551_v43 }
 0x118   :  { %819 = vmatpush.msrb.mxu2 %v4506_v31  ;;  %839 = vmatpush.msrb.mxu3 %v4561_v45 }
 0x119   :  { %745 = vmatpush.msrb.mxu1 %v4563_v46 }
 0x11a   :  { %820 = vmatpush.msrb.mxu2 %v4516_v34  ;;  %840 = vmatpush.msrb.mxu3 %v4570_v48 }
 0x11b   :  { %746 = vmatpush.msrb.mxu1 %v4572_v49 }
 0x11c   :  { %821 = vmatpush.msrb.mxu2 %v4525_v37  ;;  %841 = vmatpush.msrb.mxu3 %v4579_v51  ;;  %v4878_v47 = vpop.f32.mrf.mxu1 }
 0x11d   :  { %747 = vmatpush.msrb.mxu1 %v4581_v52  ;;  %6942 = vst [vmem:[#allocation47_spill] sm:$0xff] %v4878_v47 }
 0x11e   :  { %822 = vmatpush.msrb.mxu2 %v4541_v41  ;;  %842 = vmatpush.msrb.mxu3 %v4605_v58 }
 0x11f   :  { %748 = vmatpush.msrb.mxu1 %v4593_v54 }
 0x120   :  { %823 = vmatpush.msrb.mxu2 %v6930_v44  ;;  %843 = vmatpush.msrb.mxu3 %v6931_v53 }
 0x121   :  { %749 = vmatpush.msrb.mxu1 %v6932_v60 }
 0x122   :  { %824 = vmatpush.msrb.mxu2 %v6933_v42  ;;  %844 = vmatpush.msrb.mxu3 %v6934_v57  ;;  %v6949_v57 = vld [vmem:[#allocation39_spill] sm:$0xff]  ;;  %v6950_v42 = vld [vmem:[#allocation40_spill] sm:$0xff] }
 0x123   :  { %750 = vmatpush.msrb.mxu1 %v6935_v38  ;;  %v203_v55 = vadd.f32 %v202_v17, %v6949_v57 }
 0x124   :  { %825 = vmatpush.msrb.mxu2 %v6936_v3  ;;  %845 = vmatpush.msrb.mxu3 %v6937_v6  ;;  %v4882_v59 = vpop.f32.mrf.mxu1  ;;  %v162_v6 = vadd.f32 %v6947_v5, %v6946_v28 }
 0x125   :  { %6944 = vst [vmem:[#allocation49_spill] sm:$0xff] %v4882_v59 }
 0x181   :  { %v482_v15 = vpop.f32.mrf.mxu1 }
 0x182   :  { %v483_v3 = vadd.f32 %v482_v15, %v6948_v56 }
 0x184   :  { %v525_v63 = vadd.f32 %v483_v3, %v162_v6 }
 0x186   :  { %v3741_v38 = vmul.f32 -1.442695, %v525_v63 }
 0x187   :  { %v502_v2 = vpop.f32.mrf.mxu2 }
 0x188   :  { %3814 = vpow2.f32 %v3741_v38  ;;  %v503_v47 = vadd.f32 %v502_v2, %v6950_v42  ;;  %v522_v38 = vpop.f32.mrf.mxu3 }
 0x18a   :  { %v545_v60 = vadd.f32 %v503_v47, %v203_v55 }
 0x18c   :  { %v3742_v50 = vmul.f32 -1.442695, %v545_v60 }
 0x18e   :  { %v3815_v53 = vpop.eup %3814  ;;  %3816 = vpow2.f32 %v3742_v50  ;;  %v244_v50 = vadd.f32 %v243_v61, %v4813_v1 }
 0x18f   :  { %v529_v59 = vadd.f32 1.0, %v3815_v53  ;;  %v523_v53 = vadd.f32 %v522_v38, %v4810_v26 }
 0x191   :  { %3818 = vrcp.f32 %v529_v59  ;;  %v541_v3 = vand.u32 2147483648, %v529_v59  ;;  %v539_v63 = vand.u32 2147483647, %v529_v59  ;;  %vm535_vm11 = vweird.f32 %v529_v59 }
 0x193   :  { %v542_v60 = vor.u32 1.1754944e-38, %v541_v3  ;;  %vm540_vm13 = vcmp.eq.f32.partialorder %v539_v63, 8.507059e+37 }
 0x194   :  { %v3817_v0 = vpop.eup %3816 }
 0x195   :  { %v549_v44 = vadd.f32 1.0, %v3817_v0 }
 0x197   :  { %v3819_v54 = vpop.eup %3818  ;;  %3820 = vrcp.f32 %v549_v44  ;;  %v559_v57 = vand.u32 2147483647, %v549_v44  ;;  %vm555_vm15 = vweird.f32 %v549_v44 }
 0x198   :  { %v531_v5 = vmul.f32 %v3819_v54, %v529_v59  ;;  %vm536_vm10 = vweird.f32 %v3819_v54 }
 0x199   :  { %vm537_vm12 = vmor %vm535_vm11, %vm536_vm10  ;;  %vm560_vm1 = vcmp.eq.f32.partialorder %v559_v57, 8.507059e+37 }
 0x19a   :  { %v532_v15 = vsub.f32 1.0, %v531_v5 }
 0x19c   :  { %v533_v6 = vmul.f32 %v3819_v54, %v532_v15  ;;  %v561_v15 = vand.u32 2147483648, %v549_v44 }
 0x19d   :  { %v3821_v17 = vpop.eup %3820 }
 0x19e   :  { %v551_v56 = vmul.f32 %v3821_v17, %v549_v44  ;;  %v534_v2 = vadd.f32 %v3819_v54, %v533_v6  ;;  %vm556_vm14 = vweird.f32 %v3821_v17  ;;  %v562_v59 = vor.u32 1.1754944e-38, %v561_v15 }
 0x19f   :  { %vm557_vm0 = vmor %vm555_vm15, %vm556_vm14 }
 0x1a0   :  { %v552_v55 = vsub.f32 1.0, %v551_v56  ;;  %v538_v47 = vsel %vm537_vm12, %v3819_v54, %v534_v2 }
 0x1a1   :  { %v543_v0 = vsel %vm540_vm13, %v542_v60, %v538_v47 }
 0x1a2   :  { %v553_v5 = vmul.f32 %v3821_v17, %v552_v55  ;;  %v565_v42 = vmul.f32 %v543_v0, %v523_v53 }
 0x1a4   :  { %v554_v28 = vadd.f32 %v3821_v17, %v553_v5  ;;  %v566_v58 = vadd.f32 %v565_v42, %v244_v50  ;;  %v6968_v50 = vld [vmem:[#allocation48_spill] sm:$0xff] }
 0x1a5   :  { %v247_v0 = vadd.f32 %v6968_v50, %v4813_v1  ;;  %v5061_v50 = vld [vmem:[#allocation7 + $0x70] sm:$0xff] }
 0x1a6   :  { %v558_v6 = vsel %vm557_vm0, %v3821_v17, %v554_v28  ;;  %3822 = vtanh.f32 %v566_v58 }
 0x1a7   :  { %v563_v56 = vsel %vm560_vm1, %v562_v59, %v558_v6 }
 0x1a8   :  { %v568_v3 = vsub.f32 1.0, %v563_v56  ;;  %v570_v61 = vmul.f32 %v563_v56, %v4817_v62 }
 0x1ac   :  { %v3823_v54 = vpop.eup %3822 }
 0x1ad   :  { %v569_v63 = vmul.f32 %v3823_v54, %v568_v3 }
 0x1af   :  { %v4894_v38 = vadd.f32 %v570_v61, %v569_v63 }
 0x1b1   :  { %6951 = vst [vmem:[#allocation28_spill] sm:$0xff] %v4894_v38  ;;  %596 = vmatmul.f32.vlgmr.msra.gmra.mxu0 %v4894_v38  ;;  %616 = vmatmul.f32.vlgmr.msra.gmra.mxu1 %v4894_v38 }
 0x1b2   :  { %636 = vmatmul.f32.vlgmr.msra.gmra.mxu2 %v4894_v38  ;;  %850 = vmatpush.msra.mxu0 %v4411_v7  ;;  %v6953_v7 = vld [vmem:[#allocation20_spill] sm:$0xff] }
 0x1b3   :  { %925 = vmatpush.msra.mxu1 %v4403_v4  ;;  %945 = vmatpush.msra.mxu2 %v4427_v11  ;;  %v6952_v4 = vld [vmem:[#allocation23_spill] sm:$0xff]  ;;  %v6957_v11 = vld [vmem:[#allocation18_spill] sm:$0xff] }
 0x1b4   :  { %851 = vmatpush.msra.mxu0 %v4422_v9  ;;  %v6955_v9 = vld [vmem:[#allocation24_spill] sm:$0xff] }
 0x1b5   :  { %926 = vmatpush.msra.mxu1 %v4416_v8  ;;  %946 = vmatpush.msra.mxu2 %v4438_v14  ;;  %v6954_v8 = vld [vmem:[#allocation17_spill] sm:$0xff]  ;;  %v6960_v14 = vld [vmem:[#allocation19_spill] sm:$0xff] }
 0x1b6   :  { %852 = vmatpush.msra.mxu0 %v4432_v12  ;;  %v6958_v12 = vld [vmem:[#allocation25_spill] sm:$0xff] }
 0x1b7   :  { %927 = vmatpush.msra.mxu1 %v4424_v10  ;;  %947 = vmatpush.msra.mxu2 %v4455_v18  ;;  %v6956_v10 = vld [vmem:[#allocation21_spill] sm:$0xff] }
 0x1b8   :  { %853 = vmatpush.msra.mxu0 %v4457_v19 }
 0x1b9   :  { %928 = vmatpush.msra.mxu1 %v4435_v13  ;;  %948 = vmatpush.msra.mxu2 %v4469_v21  ;;  %v6959_v13 = vld [vmem:[#allocation22_spill] sm:$0xff] }
 0x1ba   :  { %854 = vmatpush.msra.mxu0 %v4473_v23  ;;  %v6963_v21 = vld [vmem:[#allocation30_spill] sm:$0xff]  ;;  %v6964_v23 = vld [vmem:[#allocation39_spill] sm:$0xff] }
 0x1bb   :  { %929 = vmatpush.msra.mxu1 %v4446_v16  ;;  %949 = vmatpush.msra.mxu2 %v4480_v25  ;;  %v6961_v16 = vld [vmem:[#allocation26_spill] sm:$0xff] }
 0x1bc   :  { %855 = vmatpush.msra.mxu0 %v4498_v29 }
 0x1bd   :  { %930 = vmatpush.msra.mxu1 %v4463_v20  ;;  %950 = vmatpush.msra.mxu2 %v4501_v30  ;;  %v6962_v20 = vld [vmem:[#allocation34_spill] sm:$0xff]  ;;  %v6967_v30 = vld [vmem:[#allocation40_spill] sm:$0xff] }
 0x1be   :  { %856 = vmatpush.msra.mxu0 %v4514_v33 }
 0x1bf   :  { %931 = vmatpush.msra.mxu1 %v4471_v22  ;;  %951 = vmatpush.msra.mxu2 %v4512_v32  ;;  %v165_v22 = vadd.f32 %v6963_v21, %v6962_v20  ;;  %v4968_v21 = vld [vmem:[#allocation7 + $0x170] sm:$0xff] }
 0x1c0   :  { %857 = vmatpush.msra.mxu0 %v4523_v36 }
 0x1c1   :  { %932 = vmatpush.msra.mxu1 %v4478_v24  ;;  %952 = vmatpush.msra.mxu2 %v4521_v35  ;;  %v6965_v24 = vld [vmem:[#allocation43_spill] sm:$0xff] }
 0x1c2   :  { %858 = vmatpush.msra.mxu0 %v4537_v40  ;;  %v206_v25 = vadd.f32 %v6965_v24, %v6964_v23  ;;  %v4974_v24 = vld [vmem:[#allocation7 + $0x150] sm:$0xff] }
 0x1c3   :  { %933 = vmatpush.msra.mxu1 %v4491_v27  ;;  %953 = vmatpush.msra.mxu2 %v4535_v39  ;;  %v6966_v27 = vld [vmem:[#allocation35_spill] sm:$0xff] }
 0x1c4   :  { %859 = vmatpush.msra.mxu0 %v4551_v43 }
 0x1c5   :  { %934 = vmatpush.msra.mxu1 %v4506_v31  ;;  %954 = vmatpush.msra.mxu2 %v4561_v45 }
 0x1c6   :  { %860 = vmatpush.msra.mxu0 %v4563_v46 }
 0x1c7   :  { %935 = vmatpush.msra.mxu1 %v4516_v34  ;;  %955 = vmatpush.msra.mxu2 %v4570_v48 }
 0x1c8   :  { %861 = vmatpush.msra.mxu0 %v4572_v49 }
 0x1c9   :  { %936 = vmatpush.msra.mxu1 %v4525_v37  ;;  %956 = vmatpush.msra.mxu2 %v4579_v51 }
 0x1ca   :  { %862 = vmatpush.msra.mxu0 %v4581_v52 }
 0x1cb   :  { %937 = vmatpush.msra.mxu1 %v4541_v41  ;;  %957 = vmatpush.msra.mxu2 %v6952_v4 }
 0x1cc   :  { %863 = vmatpush.msra.mxu0 %v6953_v7 }
 0x1cd   :  { %938 = vmatpush.msra.mxu1 %v6954_v8  ;;  %958 = vmatpush.msra.mxu2 %v6955_v9 }
 0x1ce   :  { %864 = vmatpush.msra.mxu0 %v6956_v10 }
 0x1cf   :  { %939 = vmatpush.msra.mxu1 %v6957_v11  ;;  %959 = vmatpush.msra.mxu2 %v6958_v12 }
 0x1d0   :  { %865 = vmatpush.msra.mxu0 %v6959_v13 }
 0x1d1   :  { %940 = vmatpush.msra.mxu1 %v6960_v14  ;;  %960 = vmatpush.msra.mxu2 %v6961_v16 }
 0x22e   :  { %v597_v18 = vpop.f32.mrf.mxu0  ;;  %v617_v19 = vpop.f32.mrf.mxu1 }
 0x22f   :  { %v598_v29 = vadd.f32 %v597_v18, %v6966_v27  ;;  %v618_v31 = vadd.f32 %v617_v19, %v6967_v30  ;;  %v4962_v18 = vld [vmem:[#allocation7 + $0x178] sm:$0xff]  ;;  %v4965_v19 = vld [vmem:[#allocation7 + $0x168] sm:$0xff] }
 0x231   :  { %v640_v32 = vadd.f32 %v598_v29, %v165_v22  ;;  %v660_v33 = vadd.f32 %v618_v31, %v206_v25  ;;  %v4971_v22 = vld [vmem:[#allocation7 + $0x160] sm:$0xff]  ;;  %v4977_v25 = vld [vmem:[#allocation7 + $0x158] sm:$0xff]  ;;  %v4980_v29 = vld [vmem:[#allocation7 + $0x148] sm:$0xff] }
 0x232   :  { %v4983_v31 = vld [vmem:[#allocation7 + $0x138] sm:$0xff] }
 0x233   :  { %v3743_v34 = vmul.f32 -1.442695, %v640_v32  ;;  %v3744_v35 = vmul.f32 -1.442695, %v660_v33  ;;  %v4986_v32 = vld [vmem:[#allocation7 + $0x140] sm:$0xff]  ;;  %v4989_v33 = vld [vmem:[#allocation7 + $0x130] sm:$0xff] }
 0x235   :  { %3824 = vpow2.f32 %v3743_v34  ;;  %v637_v28 = vpop.f32.mrf.mxu2  ;;  %v4992_v34 = vld [vmem:[#allocation7 + $0x120] sm:$0xff] }
 0x236   :  { %3826 = vpow2.f32 %v3744_v35  ;;  %v638_v60 = vadd.f32 %v637_v28, %v4810_v26  ;;  %v4995_v35 = vld [vmem:[#allocation7 + $0x128] sm:$0xff]  ;;  %v5040_v28 = vld [vmem:[#allocation7 + $0xb0] sm:$0xff] }
 0x23b   :  { %v3825_v36 = vpop.eup %3824 }
 0x23c   :  { %v3827_v37 = vpop.eup %3826  ;;  %v644_v39 = vadd.f32 1.0, %v3825_v36  ;;  %v4998_v36 = vld [vmem:[#allocation7 + $0x118] sm:$0xff] }
 0x23d   :  { %v664_v40 = vadd.f32 1.0, %v3827_v37  ;;  %v5001_v37 = vld [vmem:[#allocation7 + $0x108] sm:$0xff] }
 0x23e   :  { %3828 = vrcp.f32 %v644_v39  ;;  %v656_v58 = vand.u32 2147483648, %v644_v39  ;;  %v654_v42 = vand.u32 2147483647, %v644_v39  ;;  %vm650_vm3 = vweird.f32 %v644_v39 }
 0x23f   :  { %3830 = vrcp.f32 %v664_v40  ;;  %v676_v5 = vand.u32 2147483648, %v664_v40  ;;  %vm670_vm7 = vweird.f32 %v664_v40  ;;  %v674_v59 = vand.u32 2147483647, %v664_v40 }
 0x240   :  { %v657_v2 = vor.u32 1.1754944e-38, %v656_v58  ;;  %vm655_vm5 = vcmp.eq.f32.partialorder %v654_v42, 8.507059e+37  ;;  %v5028_v58 = vld [vmem:[#allocation7 + $0xc0] sm:$0xff]  ;;  %v5034_v42 = vld [vmem:[#allocation7 + $0xb8] sm:$0xff] }
 0x241   :  { %v677_v3 = vor.u32 1.1754944e-38, %v676_v5  ;;  %vm675_vm9 = vcmp.eq.f32.partialorder %v674_v59, 8.507059e+37  ;;  %v5069_v5 = vld [vmem:[#allocation7 + $0x48] sm:$0xff]  ;;  %v5079_v59 = vld [vmem:[#allocation7 + $0x18] sm:$0xff] }
 0x244   :  { %v3829_v41 = vpop.eup %3828 }
 0x245   :  { %v3831_v43 = vpop.eup %3830  ;;  %v646_v45 = vmul.f32 %v3829_v41, %v644_v39  ;;  %vm651_vm2 = vweird.f32 %v3829_v41  ;;  %v5004_v39 = vld [vmem:[#allocation7 + $0x110] sm:$0xff] }
 0x246   :  { %v666_v46 = vmul.f32 %v3831_v43, %v664_v40  ;;  %vm652_vm4 = vmor %vm650_vm3, %vm651_vm2  ;;  %vm671_vm6 = vweird.f32 %v3831_v43  ;;  %v5007_v40 = vld [vmem:[#allocation7 + $0x100] sm:$0xff] }
 0x247   :  { %v647_v48 = vsub.f32 1.0, %v646_v45  ;;  %vm672_vm8 = vmor %vm670_vm7, %vm671_vm6  ;;  %v5016_v45 = vld [vmem:[#allocation7 + $0xe8] sm:$0xff] }
 0x248   :  { %v667_v49 = vsub.f32 1.0, %v666_v46  ;;  %v5019_v46 = vld [vmem:[#allocation7 + $0xd8] sm:$0xff] }
 0x249   :  { %v648_v44 = vmul.f32 %v3829_v41, %v647_v48  ;;  %v5022_v48 = vld [vmem:[#allocation7 + $0xe0] sm:$0xff] }
 0x24a   :  { %v668_v57 = vmul.f32 %v3831_v43, %v667_v49  ;;  %v5025_v49 = vld [vmem:[#allocation7 + $0xd0] sm:$0xff] }
 0x24b   :  { %v649_v17 = vadd.f32 %v3829_v41, %v648_v44  ;;  %v5031_v44 = vld [vmem:[#allocation7 + $0xc8] sm:$0xff] }
 0x24c   :  { %v669_v47 = vadd.f32 %v3831_v43, %v668_v57  ;;  %v5037_v57 = vld [vmem:[#allocation7 + $0xa8] sm:$0xff] }
 0x24d   :  { %v653_v55 = vsel %vm652_vm4, %v3829_v41, %v649_v17  ;;  %v5010_v41 = vld [vmem:[#allocation7 + $0xf0] sm:$0xff]  ;;  %v5043_v17 = vld [vmem:[#allocation7 + $0xa0] sm:$0xff] }
 0x24e   :  { %v658_v53 = vsel %vm655_vm5, %v657_v2, %v653_v55  ;;  %v673_v56 = vsel %vm672_vm8, %v3831_v43, %v669_v47  ;;  %v5013_v43 = vld [vmem:[#allocation7 + $0xf8] sm:$0xff]  ;;  %v5046_v2 = vld [vmem:[#allocation7 + $0x90] sm:$0xff]  ;;  %v5052_v55 = vld [vmem:[#allocation7 + $0x88] sm:$0xff] }
 0x24f   :  { %v680_v15 = vmul.f32 %v658_v53, %v638_v60  ;;  %v678_v54 = vsel %vm675_vm9, %v677_v3, %v673_v56  ;;  %v5049_v60 = vld [vmem:[#allocation7 + $0x98] sm:$0xff]  ;;  %v5058_v47 = vld [vmem:[#allocation7 + $0x80] sm:$0xff] }
 0x250   :  { %v683_v63 = vsub.f32 1.0, %v678_v54  ;;  %v685_v11 = vmul.f32 %v678_v54, %v4894_v38  ;;  %v5055_v53 = vld [vmem:[#allocation7 + $0x78] sm:$0xff] }
 0x251   :  { %v681_v6 = vadd.f32 %v680_v15, %v247_v0  ;;  %v5064_v0 = vld [vmem:[#allocation7 + $0x60] sm:$0xff]  ;;  %v5074_v15 = vld [vmem:[#allocation7 + $0x30] sm:$0xff]  ;;  %v6970_v3 = vld [vmem:[#allocation33_spill] sm:$0xff] }
 0x253   :  { %3832 = vtanh.f32 %v681_v6 }
 0x259   :  { %v3833_v61 = vpop.eup %3832 }
 0x25a   :  { %v684_v8 = vmul.f32 %v3833_v61, %v683_v63 }
 0x25c   :  { %v4957_v14 = vadd.f32 %v685_v11, %v684_v8 }
 0x25e   :  { %711 = vmatmul.f32.vlgmr.msra.gmra.mxu3 %v4957_v14  ;;  %731 = vmatmul.f32.vlgmr.msrb.gmra.mxu0 %v4957_v14 }
 0x25f   :  { %751 = vmatmul.f32.vlgmr.msrb.gmra.mxu1 %v4957_v14  ;;  %965 = vmatpush.msra.mxu3 %v4962_v18 }
 0x260   :  { %1040 = vmatpush.msrb.mxu0 %v4965_v19  ;;  %1060 = vmatpush.msrb.mxu1 %v4968_v21 }
 0x261   :  { %966 = vmatpush.msra.mxu3 %v4971_v22 }
 0x262   :  { %1041 = vmatpush.msrb.mxu0 %v4974_v24  ;;  %1061 = vmatpush.msrb.mxu1 %v4977_v25 }
 0x263   :  { %967 = vmatpush.msra.mxu3 %v4980_v29 }
 0x264   :  { %1042 = vmatpush.msrb.mxu0 %v4983_v31  ;;  %1062 = vmatpush.msrb.mxu1 %v4986_v32 }
 0x265   :  { %968 = vmatpush.msra.mxu3 %v4989_v33 }
 0x266   :  { %1043 = vmatpush.msrb.mxu0 %v4992_v34  ;;  %1063 = vmatpush.msrb.mxu1 %v4995_v35 }
 0x267   :  { %969 = vmatpush.msra.mxu3 %v4998_v36 }
 0x268   :  { %1044 = vmatpush.msrb.mxu0 %v5001_v37  ;;  %1064 = vmatpush.msrb.mxu1 %v5004_v39 }
 0x269   :  { %970 = vmatpush.msra.mxu3 %v5007_v40 }
 0x26a   :  { %1045 = vmatpush.msrb.mxu0 %v5010_v41  ;;  %1065 = vmatpush.msrb.mxu1 %v5013_v43 }
 0x26b   :  { %971 = vmatpush.msra.mxu3 %v5016_v45 }
 0x26c   :  { %1046 = vmatpush.msrb.mxu0 %v5019_v46  ;;  %1066 = vmatpush.msrb.mxu1 %v5022_v48 }
 0x26d   :  { %972 = vmatpush.msra.mxu3 %v5025_v49 }
 0x26e   :  { %1047 = vmatpush.msrb.mxu0 %v5028_v58  ;;  %1067 = vmatpush.msrb.mxu1 %v5031_v44 }
 0x26f   :  { %973 = vmatpush.msra.mxu3 %v5034_v42 }
 0x270   :  { %1048 = vmatpush.msrb.mxu0 %v5037_v57  ;;  %1068 = vmatpush.msrb.mxu1 %v5040_v28 }
 0x271   :  { %974 = vmatpush.msra.mxu3 %v5043_v17 }
 0x272   :  { %1049 = vmatpush.msrb.mxu0 %v5046_v2  ;;  %1069 = vmatpush.msrb.mxu1 %v5049_v60 }
 0x273   :  { %975 = vmatpush.msra.mxu3 %v5052_v55 }
 0x274   :  { %1050 = vmatpush.msrb.mxu0 %v5055_v53  ;;  %1070 = vmatpush.msrb.mxu1 %v5058_v47 }
 0x275   :  { %976 = vmatpush.msra.mxu3 %v5061_v50 }
 0x276   :  { %1051 = vmatpush.msrb.mxu0 %v5064_v0  ;;  %1071 = vmatpush.msrb.mxu1 %v4579_v51  ;;  %v5084_v51 = vld [vmem:[#allocation7] sm:$0xff] }
 0x277   :  { %977 = vmatpush.msra.mxu3 %v4581_v52 }
 0x278   :  { %1052 = vmatpush.msrb.mxu0 %v5069_v5  ;;  %1072 = vmatpush.msrb.mxu1 %v6952_v4  ;;  %v6969_v4 = vld [vmem:[#allocation44_spill] sm:$0xff] }
 0x279   :  { %978 = vmatpush.msra.mxu3 %v6953_v7  ;;  %v209_v7 = vadd.f32 %v6969_v4, %v6964_v23 }
 0x27a   :  { %1053 = vmatpush.msrb.mxu0 %v5074_v15  ;;  %1073 = vmatpush.msrb.mxu1 %v6955_v9 }
 0x27b   :  { %979 = vmatpush.msra.mxu3 %v6956_v10 }
 0x27c   :  { %1054 = vmatpush.msrb.mxu0 %v5079_v59  ;;  %1074 = vmatpush.msrb.mxu1 %v6958_v12  ;;  %v168_v12 = vadd.f32 %v6970_v3, %v6962_v20 }
 0x27d   :  { %980 = vmatpush.msra.mxu3 %v6959_v13 }
 0x27e   :  { %1055 = vmatpush.msrb.mxu0 %v5084_v51  ;;  %1075 = vmatpush.msrb.mxu1 %v6961_v16 }
 0x2db   :  { %v732_v52 = vpop.f32.mrf.mxu0 }
 0x2dc   :  { %v733_v9 = vadd.f32 %v732_v52, %v6967_v30 }
 0x2de   :  { %v775_v10 = vadd.f32 %v733_v9, %v209_v7 }
 0x2e0   :  { %v3746_v6 = vmul.f32 -1.442695, %v775_v10 }
 0x2e1   :  { %v712_v56 = vpop.f32.mrf.mxu3 }
 0x2e2   :  { %3834 = vpow2.f32 %v3746_v6  ;;  %v713_v13 = vadd.f32 %v712_v56, %v6966_v27 }
 0x2e4   :  { %v755_v54 = vadd.f32 %v713_v13, %v168_v12  ;;  %v752_v12 = vpop.f32.mrf.mxu1 }
 0x2e6   :  { %v3745_v63 = vmul.f32 -1.442695, %v755_v54 }
 0x2e8   :  { %v3835_v61 = vpop.eup %3834  ;;  %3836 = vpow2.f32 %v3745_v63  ;;  %v753_v63 = vadd.f32 %v752_v12, %v4810_v26 }
 0x2e9   :  { %v779_v16 = vadd.f32 1.0, %v3835_v61 }
 0x2eb   :  { %3838 = vrcp.f32 %v779_v16  ;;  %v791_v27 = vand.u32 2147483648, %v779_v16  ;;  %vm785_vm15 = vweird.f32 %v779_v16  ;;  %v789_v23 = vand.u32 2147483647, %v779_v16 }
 0x2ed   :  { %vm790_vm1 = vcmp.eq.f32.partialorder %v789_v23, 8.507059e+37  ;;  %v4083_v23 = vld [vmem:[#allocation7 + $0x68] sm:$0xff] }
 0x2ee   :  { %v3837_v8 = vpop.eup %3836 }
 0x2ef   :  { %v759_v11 = vadd.f32 1.0, %v3837_v8 }
 0x2f1   :  { %3840 = vrcp.f32 %v759_v11  ;;  %v3839_v4 = vpop.eup %3838  ;;  %v771_v62 = vand.u32 2147483648, %v759_v11  ;;  %v769_v6 = vand.u32 2147483647, %v759_v11  ;;  %vm765_vm11 = vweird.f32 %v759_v11 }
 0x2f2   :  { %v781_v52 = vmul.f32 %v3839_v4, %v779_v16  ;;  %vm786_vm14 = vweird.f32 %v3839_v4 }
 0x2f3   :  { %v772_v54 = vor.u32 1.1754944e-38, %v771_v62  ;;  %vm770_vm13 = vcmp.eq.f32.partialorder %v769_v6, 8.507059e+37  ;;  %vm787_vm0 = vmor %vm785_vm15, %vm786_vm14 }
 0x2f4   :  { %v782_v10 = vsub.f32 1.0, %v781_v52  ;;  %v6971_v52 = vld [vmem:[#allocation50_spill] sm:$0xff] }
 0x2f6   :  { %v783_v56 = vmul.f32 %v3839_v4, %v782_v10 }
 0x2f7   :  { %v3841_v7 = vpop.eup %3840 }
 0x2f8   :  { %v761_v9 = vmul.f32 %v3841_v7, %v759_v11  ;;  %vm766_vm10 = vweird.f32 %v3841_v7  ;;  %v784_v8 = vadd.f32 %v3839_v4, %v783_v56  ;;  %v792_v11 = vor.u32 1.1754944e-38, %v791_v27  ;;  %v5138_v27 = vld [vmem:[#allocation7 + $0x58] sm:$0xff] }
 0x2f9   :  { %vm767_vm12 = vmor %vm765_vm11, %vm766_vm10 }
 0x2fa   :  { %v762_v38 = vsub.f32 1.0, %v761_v9  ;;  %v250_v9 = vadd.f32 %v6971_v52, %v4813_v1 }
 0x2fc   :  { %v763_v3 = vmul.f32 %v3841_v7, %v762_v38 }
 0x2fe   :  { %v764_v13 = vadd.f32 %v3841_v7, %v763_v3  ;;  %v788_v3 = vsel %vm787_vm0, %v3839_v4, %v784_v8 }
 0x2ff   :  { %v793_v62 = vsel %vm790_vm1, %v792_v11, %v788_v3 }
 0x300   :  { %v768_v61 = vsel %vm767_vm12, %v3841_v7, %v764_v13  ;;  %v798_v12 = vsub.f32 1.0, %v793_v62  ;;  %v800_v6 = vmul.f32 %v793_v62, %v4957_v14 }
 0x301   :  { %v773_v30 = vsel %vm770_vm13, %v772_v54, %v768_v61 }
 0x302   :  { %v795_v38 = vmul.f32 %v773_v30, %v753_v63  ;;  %v4085_v30 = vld [vmem:[#allocation7 + $0x50] sm:$0xff] }
 0x304   :  { %v796_v10 = vadd.f32 %v795_v38, %v250_v9 }
 0x306   :  { %3842 = vtanh.f32 %v796_v10 }
 0x30c   :  { %v3843_v7 = vpop.eup %3842 }
 0x30d   :  { %v799_v56 = vmul.f32 %v3843_v7, %v798_v12 }
 0x30f   :  { %v5098_v13 = vadd.f32 %v800_v6, %v799_v56  ;;  %v6977_v6 = vld [vmem:[#allocation27_spill] sm:$0xff] }
 0x310   :  { %v253_v56 = vadd.f32 %v6977_v6, %v4813_v1 }
 0x311   :  { %826 = vmatmul.f32.vlgmr.msrb.gmra.mxu2 %v5098_v13  ;;  %846 = vmatmul.f32.vlgmr.msrb.gmra.mxu3 %v5098_v13 }
 0x312   :  { %866 = vmatmul.f32.vlgmr.msra.gmra.mxu0 %v5098_v13  ;;  %1080 = vmatpush.msrb.mxu2 %v4962_v18 }
 0x313   :  { %1155 = vmatpush.msrb.mxu3 %v4965_v19  ;;  %1175 = vmatpush.msra.mxu0 %v4968_v21  ;;  %v5142_v19 = vld [vmem:[#allocation7 + $0x40] sm:$0xff]  ;;  %v4087_v21 = vld [vmem:[#allocation7 + $0x38] sm:$0xff] }
 0x314   :  { %1081 = vmatpush.msrb.mxu2 %v4971_v22 }
 0x315   :  { %1156 = vmatpush.msrb.mxu3 %v4974_v24  ;;  %1176 = vmatpush.msra.mxu0 %v4977_v25  ;;  %v5146_v24 = vld [vmem:[#allocation7 + $0x28] sm:$0xff]  ;;  %v4089_v25 = vld [vmem:[#allocation7 + $0x20] sm:$0xff] }
 0x316   :  { %1082 = vmatpush.msrb.mxu2 %v4980_v29 }
 0x317   :  { %1157 = vmatpush.msrb.mxu3 %v4983_v31  ;;  %1177 = vmatpush.msra.mxu0 %v4986_v32  ;;  %v5150_v31 = vld [vmem:[#allocation7 + $0x10] sm:$0xff]  ;;  %v4091_v32 = vld [vmem:[#allocation7 + $0x8] sm:$0xff] }
 0x318   :  { %1083 = vmatpush.msrb.mxu2 %v4989_v33 }
 0x319   :  { %1158 = vmatpush.msrb.mxu3 %v4992_v34  ;;  %1178 = vmatpush.msra.mxu0 %v4995_v35 }
 0x31a   :  { %1084 = vmatpush.msrb.mxu2 %v4998_v36 }
 0x31b   :  { %1159 = vmatpush.msrb.mxu3 %v5001_v37  ;;  %1179 = vmatpush.msra.mxu0 %v5004_v39  ;;  %v6972_v37 = vld [vmem:[#allocation36_spill] sm:$0xff] }
 0x31c   :  { %1085 = vmatpush.msrb.mxu2 %v5007_v40  ;;  %v171_v39 = vadd.f32 %v6972_v37, %v6962_v20 }
 0x31d   :  { %1160 = vmatpush.msrb.mxu3 %v5010_v41  ;;  %1180 = vmatpush.msra.mxu0 %v5013_v43  ;;  %v6973_v41 = vld [vmem:[#allocation39_spill] sm:$0xff]  ;;  %v6974_v43 = vld [vmem:[#allocation45_spill] sm:$0xff] }
 0x31e   :  { %1086 = vmatpush.msrb.mxu2 %v5016_v45 }
 0x31f   :  { %1161 = vmatpush.msrb.mxu3 %v5019_v46  ;;  %1181 = vmatpush.msra.mxu0 %v5022_v48  ;;  %v212_v46 = vadd.f32 %v6974_v43, %v6973_v41  ;;  %v6975_v48 = vld [vmem:[#allocation35_spill] sm:$0xff] }
 0x320   :  { %1087 = vmatpush.msrb.mxu2 %v5025_v49 }
 0x321   :  { %1162 = vmatpush.msrb.mxu3 %v5028_v58  ;;  %1182 = vmatpush.msra.mxu0 %v5031_v44  ;;  %v6976_v44 = vld [vmem:[#allocation40_spill] sm:$0xff] }
 0x322   :  { %1088 = vmatpush.msrb.mxu2 %v5034_v42 }
 0x323   :  { %1163 = vmatpush.msrb.mxu3 %v5037_v57  ;;  %1183 = vmatpush.msra.mxu0 %v5040_v28 }
 0x324   :  { %1089 = vmatpush.msrb.mxu2 %v5043_v17 }
 0x325   :  { %1164 = vmatpush.msrb.mxu3 %v5046_v2  ;;  %1184 = vmatpush.msra.mxu0 %v5049_v60 }
 0x326   :  { %1090 = vmatpush.msrb.mxu2 %v5052_v55 }
 0x327   :  { %1165 = vmatpush.msrb.mxu3 %v5055_v53  ;;  %1185 = vmatpush.msra.mxu0 %v5058_v47 }
 0x328   :  { %1091 = vmatpush.msrb.mxu2 %v5061_v50 }
 0x329   :  { %1166 = vmatpush.msrb.mxu3 %v5064_v0  ;;  %1186 = vmatpush.msra.mxu0 %v4083_v23 }
 0x32a   :  { %1092 = vmatpush.msrb.mxu2 %v5138_v27 }
 0x32b   :  { %1167 = vmatpush.msrb.mxu3 %v5069_v5  ;;  %1187 = vmatpush.msra.mxu0 %v4085_v30 }
 0x32c   :  { %1093 = vmatpush.msrb.mxu2 %v5142_v19 }
 0x32d   :  { %1168 = vmatpush.msrb.mxu3 %v5074_v15  ;;  %1188 = vmatpush.msra.mxu0 %v4087_v21 }
 0x32e   :  { %1094 = vmatpush.msrb.mxu2 %v5146_v24 }
 0x32f   :  { %1169 = vmatpush.msrb.mxu3 %v5079_v59  ;;  %1189 = vmatpush.msra.mxu0 %v4089_v25 }
 0x330   :  { %1095 = vmatpush.msrb.mxu2 %v5150_v31 }
 0x331   :  { %1170 = vmatpush.msrb.mxu3 %v5084_v51  ;;  %1190 = vmatpush.msra.mxu0 %v4091_v32 }
 0x38f   :  { %v867_v9 = vpop.f32.mrf.mxu0 }
 0x390   :  { %v868_v11 = vadd.f32 %v867_v9, %v4810_v26 }
 0x394   :  { %v827_v34 = vpop.f32.mrf.mxu2  ;;  %v847_v35 = vpop.f32.mrf.mxu3 }
 0x395   :  { %v828_v58 = vadd.f32 %v827_v34, %v6975_v48  ;;  %v848_v57 = vadd.f32 %v847_v35, %v6976_v44 }
 0x397   :  { %v870_v28 = vadd.f32 %v828_v58, %v171_v39  ;;  %v890_v2 = vadd.f32 %v848_v57, %v212_v46 }
 0x399   :  { %v3747_v60 = vmul.f32 -1.442695, %v870_v28  ;;  %v3748_v53 = vmul.f32 -1.442695, %v890_v2  ;;  %v1297_v28 = vld [vmem:[#allocation4 + $0xc0] sm:$0xff] }
 0x39b   :  { %3844 = vpow2.f32 %v3747_v60  ;;  %v1294_v60 = vld [vmem:[#allocation4 + $0xa8] sm:$0xff] }
 0x39c   :  { %3846 = vpow2.f32 %v3748_v53 }
 0x3a1   :  { %v3845_v47 = vpop.eup %3844 }
 0x3a2   :  { %v3847_v0 = vpop.eup %3846  ;;  %v874_v5 = vadd.f32 1.0, %v3845_v47  ;;  %v1291_v47 = vld [vmem:[#allocation4 + $0x90] sm:$0xff] }
 0x3a3   :  { %v894_v15 = vadd.f32 1.0, %v3847_v0 }
 0x3a4   :  { %3848 = vrcp.f32 %v874_v5  ;;  %v886_v63 = vand.u32 2147483648, %v874_v5  ;;  %v884_v52 = vand.u32 2147483647, %v874_v5  ;;  %vm880_vm3 = vweird.f32 %v874_v5 }
 0x3a5   :  { %3850 = vrcp.f32 %v894_v15  ;;  %v906_v30 = vand.u32 2147483648, %v894_v15  ;;  %vm900_vm7 = vweird.f32 %v894_v15  ;;  %v904_v21 = vand.u32 2147483647, %v894_v15 }
 0x3a6   :  { %v887_v3 = vor.u32 1.1754944e-38, %v886_v63  ;;  %vm885_vm5 = vcmp.eq.f32.partialorder %v884_v52, 8.507059e+37 }
 0x3a7   :  { %v907_v34 = vor.u32 1.1754944e-38, %v906_v30  ;;  %vm905_vm9 = vcmp.eq.f32.partialorder %v904_v21, 8.507059e+37  ;;  %v6980_v21 = vld [vmem:[#allocation29_spill] sm:$0xff] }
 0x3aa   :  { %v3849_v59 = vpop.eup %3848 }
 0x3ab   :  { %v3851_v51 = vpop.eup %3850  ;;  %v876_v16 = vmul.f32 %v3849_v59, %v874_v5  ;;  %vm881_vm2 = vweird.f32 %v3849_v59  ;;  %v1288_v5 = vld [vmem:[#allocation4 + $0x78] sm:$0xff] }
 0x3ac   :  { %v896_v4 = vmul.f32 %v3851_v51, %v894_v15  ;;  %vm882_vm4 = vmor %vm880_vm3, %vm881_vm2  ;;  %vm901_vm6 = vweird.f32 %v3851_v51 }
 0x3ad   :  { %v877_v54 = vsub.f32 1.0, %v876_v16  ;;  %vm902_vm8 = vmor %vm900_vm7, %vm901_vm6  ;;  %v1279_v16 = vld [vmem:[#allocation4 + $0x30] sm:$0xff] }
 0x3ae   :  { %v897_v61 = vsub.f32 1.0, %v896_v4 }
 0x3af   :  { %v878_v8 = vmul.f32 %v3849_v59, %v877_v54  ;;  %v1276_v54 = vld [vmem:[#allocation4 + $0x18] sm:$0xff] }
 0x3b0   :  { %v898_v38 = vmul.f32 %v3851_v51, %v897_v61  ;;  %v1273_v61 = vld [vmem:[#allocation4] sm:$0xff] }
 0x3b1   :  { %v879_v10 = vadd.f32 %v3849_v59, %v878_v8 }
 0x3b2   :  { %v899_v7 = vadd.f32 %v3851_v51, %v898_v38 }
 0x3b3   :  { %v883_v62 = vsel %vm882_vm4, %v3849_v59, %v879_v10  ;;  %v1285_v59 = vld [vmem:[#allocation4 + $0x60] sm:$0xff] }
 0x3b4   :  { %v888_v12 = vsel %vm885_vm5, %v887_v3, %v883_v62  ;;  %v903_v32 = vsel %vm902_vm8, %v3851_v51, %v899_v7  ;;  %v1282_v51 = vld [vmem:[#allocation4 + $0x48] sm:$0xff] }
 0x3b5   :  { %v910_v23 = vmul.f32 %v888_v12, %v868_v11  ;;  %v908_v35 = vsel %vm905_vm9, %v907_v34, %v903_v32 }
 0x3b6   :  { %v913_v37 = vsub.f32 1.0, %v908_v35  ;;  %v915_v46 = vmul.f32 %v908_v35, %v5098_v13 }
 0x3b7   :  { %v911_v25 = vadd.f32 %v910_v23, %v253_v56 }
 0x3b9   :  { %3852 = vtanh.f32 %v911_v25  ;;  %v256_v25 = vadd.f32 %v6980_v21, %v4813_v1  ;;  %v5242_v21 = vld [vmem:[#allocation7 + $0x1f8] sm:$0xff] }
 0x3bf   :  { %v3853_v39 = vpop.eup %3852 }
 0x3c0   :  { %v914_v43 = vmul.f32 %v3853_v39, %v913_v37 }
 0x3c2   :  { %v5164_v58 = vadd.f32 %v915_v46, %v914_v43 }
 0x3c4   :  { %941 = vmatmul.f32.vlgmr.msra.gmra.mxu1 %v5164_v58  ;;  %961 = vmatmul.f32.vlgmr.msra.gmra.mxu2 %v5164_v58 }
 0x3c5   :  { %981 = vmatmul.f32.vlgmr.msra.gmra.mxu3 %v5164_v58  ;;  %1195 = vmatpush.msra.mxu1 %v4962_v18  ;;  %v1318_v18 = vld [vmem:[#allocation4 + $0x168] sm:$0xff] }
 0x3c6   :  { %1330 = vmatpush.msra.mxu2 %v1318_v18 }
 0x3c7   :  { %1196 = vmatpush.msra.mxu1 %v4971_v22  ;;  %v1315_v22 = vld [vmem:[#allocation4 + $0x150] sm:$0xff] }
 0x3c8   :  { %1331 = vmatpush.msra.mxu2 %v1315_v22 }
 0x3c9   :  { %1197 = vmatpush.msra.mxu1 %v4980_v29  ;;  %v1312_v29 = vld [vmem:[#allocation4 + $0x138] sm:$0xff] }
 0x3ca   :  { %1332 = vmatpush.msra.mxu2 %v1312_v29 }
 0x3cb   :  { %1198 = vmatpush.msra.mxu1 %v4989_v33  ;;  %v1309_v33 = vld [vmem:[#allocation4 + $0x120] sm:$0xff] }
 0x3cc   :  { %1333 = vmatpush.msra.mxu2 %v1309_v33 }
 0x3cd   :  { %1199 = vmatpush.msra.mxu1 %v4998_v36 }
 0x3cf   :  { %1200 = vmatpush.msra.mxu1 %v5007_v40  ;;  %v6978_v40 = vld [vmem:[#allocation37_spill] sm:$0xff] }
 0x3d1   :  { %1201 = vmatpush.msra.mxu1 %v5016_v45  ;;  %v174_v45 = vadd.f32 %v6978_v40, %v6962_v20 }
 0x3d3   :  { %1202 = vmatpush.msra.mxu1 %v5025_v49 }
 0x3d5   :  { %1203 = vmatpush.msra.mxu1 %v5034_v42  ;;  %v1306_v42 = vld [vmem:[#allocation4 + $0x108] sm:$0xff] }
 0x3d6   :  { %1334 = vmatpush.msra.mxu2 %v1306_v42  ;;  %v6981_v42 = vld [vmem:[#allocation42_spill] sm:$0xff] }
 0x3d7   :  { %1204 = vmatpush.msra.mxu1 %v5043_v17 }
 0x3d9   :  { %1205 = vmatpush.msra.mxu1 %v5052_v55  ;;  %v1303_v55 = vld [vmem:[#allocation4 + $0xf0] sm:$0xff] }
 0x3da   :  { %1335 = vmatpush.msra.mxu2 %v1303_v55  ;;  %v5206_v55 = vld [vmem:[#allocation7 + $0x2e8] sm:$0xff] }
 0x3db   :  { %1206 = vmatpush.msra.mxu1 %v5061_v50 }
 0x3dd   :  { %1207 = vmatpush.msra.mxu1 %v5138_v27  ;;  %v1300_v27 = vld [vmem:[#allocation4 + $0xd8] sm:$0xff] }
 0x3de   :  { %1336 = vmatpush.msra.mxu2 %v1300_v27  ;;  %v5212_v27 = vld [vmem:[#allocation7 + $0x2b8] sm:$0xff] }
 0x3df   :  { %1208 = vmatpush.msra.mxu1 %v5142_v19 }
 0x3e0   :  { %1337 = vmatpush.msra.mxu2 %v1297_v28  ;;  %v1316_v28 = vld [vmem:[#allocation4 + $0x158] sm:$0xff] }
 0x3e1   :  { %1209 = vmatpush.msra.mxu1 %v5146_v24  ;;  %v6979_v24 = vld [vmem:[#allocation46_spill] sm:$0xff] }
 0x3e2   :  { %1338 = vmatpush.msra.mxu2 %v1294_v60  ;;  %v5221_v60 = vld [vmem:[#allocation7 + $0x270] sm:$0xff] }
 0x3e3   :  { %1210 = vmatpush.msra.mxu1 %v5150_v31  ;;  %v215_v31 = vadd.f32 %v6979_v24, %v6973_v41  ;;  %v1319_v24 = vld [vmem:[#allocation4 + $0x170] sm:$0xff] }
 0x3e4   :  { %1339 = vmatpush.msra.mxu2 %v1291_v47  ;;  %1371 = vmatpush.msra.mxu3 %v1319_v24  ;;  %v1314_v47 = vld [vmem:[#allocation4 + $0x148] sm:$0xff] }
 0x3e6   :  { %1340 = vmatpush.msra.mxu2 %v1288_v5  ;;  %1372 = vmatpush.msra.mxu3 %v1316_v28  ;;  %v1287_v28 = vld [vmem:[#allocation4 + $0x70] sm:$0xff] }
 0x3e8   :  { %1341 = vmatpush.msra.mxu2 %v1285_v59  ;;  %v6983_v59 = vld [vmem:[#allocation38_spill] sm:$0xff] }
 0x3ea   :  { %1342 = vmatpush.msra.mxu2 %v1282_v51  ;;  %v177_v51 = vadd.f32 %v6983_v59, %v6962_v20 }
 0x3ec   :  { %1343 = vmatpush.msra.mxu2 %v1279_v16  ;;  %v6984_v16 = vld [vmem:[#allocation47_spill] sm:$0xff] }
 0x3ee   :  { %1344 = vmatpush.msra.mxu2 %v1276_v54 }
 0x3f0   :  { %1345 = vmatpush.msra.mxu2 %v1273_v61  ;;  %v1310_v61 = vld [vmem:[#allocation4 + $0x128] sm:$0xff] }
 0x441   :  { %v942_v36 = vpop.f32.mrf.mxu1 }
 0x442   :  { %v943_v49 = vadd.f32 %v942_v36, %v6975_v48 }
 0x444   :  { %v985_v17 = vadd.f32 %v943_v49, %v174_v45 }
 0x446   :  { %v3749_v50 = vmul.f32 -1.442695, %v985_v17  ;;  %v6982_v17 = vld [vmem:[#allocation28_spill] sm:$0xff] }
 0x447   :  { %v962_v19 = vpop.f32.mrf.mxu2 }
 0x448   :  { %3854 = vpow2.f32 %v3749_v50  ;;  %v963_v57 = vadd.f32 %v962_v19, %v6976_v44  ;;  %v982_v62 = vpop.f32.mrf.mxu3  ;;  %v5209_v50 = vld [vmem:[#allocation7 + $0x2d0] sm:$0xff]  ;;  %v5215_v19 = vld [vmem:[#allocation7 + $0x2a0] sm:$0xff] }
 0x449   :  { %v983_v23 = vadd.f32 %v982_v62, %v4810_v26 }
 0x44a   :  { %v1005_v2 = vadd.f32 %v963_v57, %v215_v31  ;;  %v1320_v31 = vld [vmem:[#allocation4 + $0x178] sm:$0xff]  ;;  %v5218_v57 = vld [vmem:[#allocation7 + $0x288] sm:$0xff] }
 0x44c   :  { %v3750_v53 = vmul.f32 -1.442695, %v1005_v2  ;;  %v1317_v2 = vld [vmem:[#allocation4 + $0x160] sm:$0xff] }
 0x44e   :  { %v3855_v0 = vpop.eup %3854  ;;  %3856 = vpow2.f32 %v3750_v53  ;;  %v1313_v53 = vld [vmem:[#allocation4 + $0x140] sm:$0xff] }
 0x44f   :  { %v989_v15 = vadd.f32 1.0, %v3855_v0  ;;  %v5224_v0 = vld [vmem:[#allocation7 + $0x258] sm:$0xff]  ;;  %1373 = vmatpush.msra.mxu3 %v1313_v53  ;;  %v1283_v53 = vld [vmem:[#allocation4 + $0x50] sm:$0xff] }
 0x451   :  { %3858 = vrcp.f32 %v989_v15  ;;  %v1001_v38 = vand.u32 2147483648, %v989_v15  ;;  %v999_v3 = vand.u32 2147483647, %v989_v15  ;;  %vm995_vm11 = vweird.f32 %v989_v15  ;;  %1374 = vmatpush.msra.mxu3 %v1310_v61  ;;  %v1274_v61 = vld [vmem:[#allocation4 + $0x8] sm:$0xff] }
 0x453   :  { %v1002_v6 = vor.u32 1.1754944e-38, %v1001_v38  ;;  %vm1000_vm13 = vcmp.eq.f32.partialorder %v999_v3, 8.507059e+37  ;;  %v1308_v3 = vld [vmem:[#allocation4 + $0x118] sm:$0xff] }
 0x454   :  { %v3857_v4 = vpop.eup %3856 }
 0x455   :  { %v1009_v63 = vadd.f32 1.0, %v3857_v4  ;;  %v218_v4 = vadd.f32 %v6984_v16, %v6973_v41  ;;  %v1278_v16 = vld [vmem:[#allocation4 + $0x28] sm:$0xff] }
 0x457   :  { %v3859_v8 = vpop.eup %3858  ;;  %3860 = vrcp.f32 %v1009_v63  ;;  %v1021_v35 = vand.u32 2147483648, %v1009_v63  ;;  %v1019_v39 = vand.u32 2147483647, %v1009_v63  ;;  %vm1015_vm15 = vweird.f32 %v1009_v63 }
 0x458   :  { %v991_v52 = vmul.f32 %v3859_v8, %v989_v15  ;;  %vm996_vm10 = vweird.f32 %v3859_v8 }
 0x459   :  { %vm997_vm12 = vmor %vm995_vm11, %vm996_vm10  ;;  %v1022_v22 = vor.u32 1.1754944e-38, %v1021_v35  ;;  %vm1020_vm1 = vcmp.eq.f32.partialorder %v1019_v39, 8.507059e+37  ;;  %v1295_v35 = vld [vmem:[#allocation4 + $0xb0] sm:$0xff]  ;;  %v5248_v39 = vld [vmem:[#allocation7 + $0x1c8] sm:$0xff] }
 0x45a   :  { %v992_v9 = vsub.f32 1.0, %v991_v52  ;;  %v5233_v52 = vld [vmem:[#allocation7 + $0x240] sm:$0xff] }
 0x45c   :  { %v993_v10 = vmul.f32 %v3859_v8, %v992_v9 }
 0x45d   :  { %v3861_v11 = vpop.eup %3860 }
 0x45e   :  { %v1011_v12 = vmul.f32 %v3861_v11, %v1009_v63  ;;  %v994_v7 = vadd.f32 %v3859_v8, %v993_v10  ;;  %vm1016_vm14 = vweird.f32 %v3861_v11  ;;  %v1307_v10 = vld [vmem:[#allocation4 + $0x110] sm:$0xff] }
 0x45f   :  { %vm1017_vm0 = vmor %vm1015_vm15, %vm1016_vm14  ;;  %1375 = vmatpush.msra.mxu3 %v1307_v10 }
 0x460   :  { %v1012_v56 = vsub.f32 1.0, %v1011_v12  ;;  %v998_v30 = vsel %vm997_vm12, %v3859_v8, %v994_v7  ;;  %v1311_v8 = vld [vmem:[#allocation4 + $0x130] sm:$0xff]  ;;  %v1304_v7 = vld [vmem:[#allocation4 + $0xf8] sm:$0xff] }
 0x461   :  { %v1003_v32 = vsel %vm1000_vm13, %v1002_v6, %v998_v30  ;;  %v1305_v6 = vld [vmem:[#allocation4 + $0x100] sm:$0xff]  ;;  %1376 = vmatpush.msra.mxu3 %v1304_v7  ;;  %v1302_v30 = vld [vmem:[#allocation4 + $0xe8] sm:$0xff] }
 0x462   :  { %v1013_v34 = vmul.f32 %v3861_v11, %v1012_v56  ;;  %v1025_v37 = vmul.f32 %v1003_v32, %v983_v23  ;;  %v5239_v56 = vld [vmem:[#allocation7 + $0x210] sm:$0xff]  ;;  %v1301_v23 = vld [vmem:[#allocation4 + $0xe0] sm:$0xff] }
 0x463   :  { %1377 = vmatpush.msra.mxu3 %v1301_v23  ;;  %v1299_v32 = vld [vmem:[#allocation4 + $0xd0] sm:$0xff] }
 0x464   :  { %v1014_v43 = vadd.f32 %v3861_v11, %v1013_v34  ;;  %v1026_v46 = vadd.f32 %v1025_v37, %v256_v25  ;;  %v1298_v25 = vld [vmem:[#allocation4 + $0xc8] sm:$0xff]  ;;  %v5245_v34 = vld [vmem:[#allocation7 + $0x1e0] sm:$0xff]  ;;  %v1296_v37 = vld [vmem:[#allocation4 + $0xb8] sm:$0xff] }
 0x465   :  { %1378 = vmatpush.msra.mxu3 %v1298_v25 }
 0x466   :  { %v1018_v18 = vsel %vm1017_vm0, %v3861_v11, %v1014_v43  ;;  %3862 = vtanh.f32 %v1026_v46  ;;  %v5236_v11 = vld [vmem:[#allocation7 + $0x228] sm:$0xff]  ;;  %v1292_v46 = vld [vmem:[#allocation4 + $0x98] sm:$0xff] }
 0x467   :  { %v1023_v29 = vsel %vm1020_vm1, %v1022_v22, %v1018_v18  ;;  %1379 = vmatpush.msra.mxu3 %v1295_v35  ;;  %v1293_v18 = vld [vmem:[#allocation4 + $0xa0] sm:$0xff]  ;;  %v5251_v22 = vld [vmem:[#allocation7 + $0x1b0] sm:$0xff] }
 0x468   :  { %v1028_v33 = vsub.f32 1.0, %v1023_v29  ;;  %v1030_v45 = vmul.f32 %v1023_v29, %v5164_v58 }
 0x469   :  { %1380 = vmatpush.msra.mxu3 %v1292_v46 }
 0x46c   :  { %v3863_v36 = vpop.eup %3862 }
 0x46d   :  { %v1029_v40 = vmul.f32 %v3863_v36, %v1028_v33  ;;  %v1289_v36 = vld [vmem:[#allocation4 + $0x80] sm:$0xff] }
 0x46e   :  { %1381 = vmatpush.msra.mxu3 %v1289_v36 }
 0x46f   :  { %v5195_v49 = vadd.f32 %v1030_v45, %v1029_v40  ;;  %v1290_v40 = vld [vmem:[#allocation4 + $0x88] sm:$0xff]  ;;  %v5253_v45 = vld [vmem:[#allocation7 + $0x198] sm:$0xff] }
 0x470   :  { %6985 = vst [vmem:[#allocation23_spill] sm:$0xff] %v5253_v45 }
 0x471   :  { %1056 = vmatmul.f32.vlgmr.msrb.gmra.mxu0 %v5195_v49  ;;  %1076 = vmatmul.f32.vlgmr.msrb.gmra.mxu1 %v5195_v49 }
 0x472   :  { %1096 = vmatmul.f32.vlgmr.msrb.gmra.mxu2 %v5195_v49  ;;  %1540 = vmatpush.msrb.mxu1 %v5206_v55 }
 0x473   :  { %1412 = vmatpush.msrb.mxu0 %v1320_v31  ;;  %v1286_v31 = vld [vmem:[#allocation4 + $0x68] sm:$0xff] }
 0x474   :  { %1541 = vmatpush.msrb.mxu1 %v5209_v50  ;;  %1382 = vmatpush.msra.mxu3 %v1286_v31 }
 0x475   :  { %1413 = vmatpush.msrb.mxu0 %v1317_v2  ;;  %v5256_v2 = vld [vmem:[#allocation7 + $0x180] sm:$0xff] }
 0x476   :  { %1542 = vmatpush.msrb.mxu1 %v5212_v27  ;;  %6986 = vst [vmem:[#allocation20_spill] sm:$0xff] %v5256_v2  ;;  %1383 = vmatpush.msra.mxu3 %v1283_v53 }
 0x477   :  { %1414 = vmatpush.msrb.mxu0 %v1314_v47  ;;  %v1284_v47 = vld [vmem:[#allocation4 + $0x58] sm:$0xff] }
 0x478   :  { %1543 = vmatpush.msrb.mxu1 %v5215_v19 }
 0x479   :  { %1415 = vmatpush.msrb.mxu0 %v1311_v8 }
 0x47a   :  { %1346 = vmatmul.f32.vlgmr.msra.gmra.mxu2 %v6981_v42  ;;  %1544 = vmatpush.msrb.mxu1 %v5218_v57 }
 0x47b   :  { %1416 = vmatpush.msrb.mxu0 %v1308_v3 }
 0x47c   :  { %1545 = vmatpush.msrb.mxu1 %v5221_v60 }
 0x47d   :  { %1417 = vmatpush.msrb.mxu0 %v1305_v6 }
 0x47e   :  { %1546 = vmatpush.msrb.mxu1 %v5224_v0 }
 0x47f   :  { %1418 = vmatpush.msrb.mxu0 %v1302_v30 }
 0x480   :  { %1547 = vmatpush.msrb.mxu1 %v5233_v52 }
 0x481   :  { %1419 = vmatpush.msrb.mxu0 %v1299_v32 }
 0x482   :  { %1349 = vmatmul.f32.gmra.mxu2 %v6982_v17  ;;  %1548 = vmatpush.msrb.mxu1 %v5236_v11 }
 0x483   :  { %1420 = vmatpush.msrb.mxu0 %v1296_v37  ;;  %v6987_v37 = vld [vmem:[#allocation31_spill] sm:$0xff] }
 0x484   :  { %1549 = vmatpush.msrb.mxu1 %v5239_v56 }
 0x485   :  { %1421 = vmatpush.msrb.mxu0 %v1293_v18 }
 0x486   :  { %1550 = vmatpush.msrb.mxu1 %v5242_v21 }
 0x487   :  { %1422 = vmatpush.msrb.mxu0 %v1290_v40 }
 0x488   :  { %1551 = vmatpush.msrb.mxu1 %v5245_v34 }
 0x489   :  { %1423 = vmatpush.msrb.mxu0 %v1287_v28 }
 0x48a   :  { %1352 = vmatmul.f32.gmra.mxu2 %v4957_v14  ;;  %1552 = vmatpush.msrb.mxu1 %v5248_v39 }
 0x48b   :  { %1424 = vmatpush.msrb.mxu0 %v1284_v47 }
 0x48c   :  { %1553 = vmatpush.msrb.mxu1 %v5251_v22 }
 0x48e   :  { %1554 = vmatpush.msrb.mxu1 %v5253_v45 }
 0x490   :  { %1555 = vmatpush.msrb.mxu1 %v5256_v2 }
 0x492   :  { %1355 = vmatmul.f32.gmra.mxu2 %v5098_v13 }
 0x49a   :  { %1358 = vmatmul.f32.gmra.mxu2 %v5164_v58 }
 0x4a2   :  { %1361 = vmatmul.f32.gmra.mxu2 %v5195_v49 }
 0x4ee   :  { %v1057_v5 = vpop.f32.mrf.mxu0  ;;  %v1077_v15 = vpop.f32.mrf.mxu1 }
 0x4ef   :  { %v1058_v54 = vadd.f32 %v1057_v5, %v6975_v48  ;;  %v1078_v63 = vadd.f32 %v1077_v15, %v6976_v44  ;;  %v1280_v5 = vld [vmem:[#allocation4 + $0x38] sm:$0xff]  ;;  %v1281_v15 = vld [vmem:[#allocation4 + $0x40] sm:$0xff] }
 0x4f0   :  { %1384 = vmatpush.msra.mxu3 %v1280_v5  ;;  %1425 = vmatpush.msrb.mxu0 %v1281_v15 }
 0x4f1   :  { %v1100_v9 = vadd.f32 %v1058_v54, %v177_v51  ;;  %v1120_v38 = vadd.f32 %v1078_v63, %v218_v4  ;;  %v1277_v51 = vld [vmem:[#allocation4 + $0x20] sm:$0xff] }
 0x4f2   :  { %1385 = vmatpush.msra.mxu3 %v1277_v51  ;;  %1426 = vmatpush.msrb.mxu0 %v1278_v16  ;;  %v5276_v51 = vld [vmem:[#allocation7 + $0x2c0] sm:$0xff]  ;;  %v5281_v16 = vld [vmem:[#allocation7 + $0x2a8] sm:$0xff] }
 0x4f3   :  { %v3751_v62 = vmul.f32 -1.442695, %v1100_v9  ;;  %v3752_v12 = vmul.f32 -1.442695, %v1120_v38  ;;  %v1275_v9 = vld [vmem:[#allocation4 + $0x10] sm:$0xff] }
 0x4f4   :  { %1386 = vmatpush.msra.mxu3 %v1274_v61  ;;  %1427 = vmatpush.msrb.mxu0 %v1275_v9  ;;  %v5302_v61 = vld [vmem:[#allocation7 + $0x260] sm:$0xff]  ;;  %v5318_v9 = vld [vmem:[#allocation7 + $0x218] sm:$0xff] }
 0x4f5   :  { %3864 = vpow2.f32 %v3751_v62  ;;  %v1097_v7 = vpop.f32.mrf.mxu2 }
 0x4f6   :  { %3866 = vpow2.f32 %v3752_v12  ;;  %v1098_v30 = vadd.f32 %v1097_v7, %v4810_v26  ;;  %v5351_v7 = vld [vmem:[#allocation7 + $0x188] sm:$0xff] }
 0x4f7   :  { %6989 = vst [vmem:[#allocation24_spill] sm:$0xff] %v5351_v7 }
 0x4fb   :  { %v3865_v43 = vpop.eup %3864 }
 0x4fc   :  { %v3867_v29 = vpop.eup %3866  ;;  %v1104_v33 = vadd.f32 1.0, %v3865_v43  ;;  %v259_v43 = vadd.f32 %v6987_v37, %v4813_v1  ;;  %v6991_v37 = vld [vmem:[#allocation41_spill] sm:$0xff] }
 0x4fd   :  { %v1124_v24 = vadd.f32 1.0, %v3867_v29 }
 0x4fe   :  { %3868 = vrcp.f32 %v1104_v33  ;;  %v1116_v10 = vand.u32 2147483648, %v1104_v33  ;;  %v1114_v62 = vand.u32 2147483647, %v1104_v33  ;;  %vm1110_vm3 = vweird.f32 %v1104_v33 }
 0x4ff   :  { %3870 = vrcp.f32 %v1124_v24  ;;  %v1136_v46 = vand.u32 2147483648, %v1124_v24  ;;  %vm1130_vm7 = vweird.f32 %v1124_v24  ;;  %v1134_v29 = vand.u32 2147483647, %v1124_v24 }
 0x500   :  { %v1117_v23 = vor.u32 1.1754944e-38, %v1116_v10  ;;  %vm1115_vm5 = vcmp.eq.f32.partialorder %v1114_v62, 8.507059e+37  ;;  %v5328_v10 = vld [vmem:[#allocation7 + $0x1e8] sm:$0xff]  ;;  %v5341_v62 = vld [vmem:[#allocation7 + $0x2f8] sm:$0xff] }
 0x501   :  { %vm1135_vm9 = vcmp.eq.f32.partialorder %v1134_v29, 8.507059e+37  ;;  %1580 = vmatpush.msrb.mxu2 %v5341_v62  ;;  %v5419_v29 = vld [vmem:[#allocation7 + $0x268] sm:$0xff] }
 0x504   :  { %v3869_v59 = vpop.eup %3868 }
 0x505   :  { %v3871_v4 = vpop.eup %3870  ;;  %v1106_v54 = vmul.f32 %v3869_v59, %v1104_v33  ;;  %vm1111_vm2 = vweird.f32 %v3869_v59  ;;  %v1137_v33 = vor.u32 1.1754944e-38, %v1136_v46 }
 0x506   :  { %v1126_v63 = vmul.f32 %v3871_v4, %v1124_v24  ;;  %vm1112_vm4 = vmor %vm1110_vm3, %vm1111_vm2  ;;  %vm1131_vm6 = vweird.f32 %v3871_v4  ;;  %v5272_v24 = vld [vmem:[#allocation7 + $0x2d8] sm:$0xff] }
 0x507   :  { %v1107_v8 = vsub.f32 1.0, %v1106_v54  ;;  %vm1132_vm8 = vmor %vm1130_vm7, %vm1131_vm6  ;;  %v5291_v54 = vld [vmem:[#allocation7 + $0x290] sm:$0xff] }
 0x508   :  { %v1127_v38 = vsub.f32 1.0, %v1126_v63  ;;  %v5298_v63 = vld [vmem:[#allocation7 + $0x278] sm:$0xff] }
 0x509   :  { %v1108_v3 = vmul.f32 %v3869_v59, %v1107_v8  ;;  %v5307_v8 = vld [vmem:[#allocation7 + $0x248] sm:$0xff] }
 0x50a   :  { %v1128_v12 = vmul.f32 %v3871_v4, %v1127_v38  ;;  %v5323_v38 = vld [vmem:[#allocation7 + $0x200] sm:$0xff] }
 0x50b   :  { %v1109_v6 = vadd.f32 %v3869_v59, %v1108_v3  ;;  %v5339_v3 = vld [vmem:[#allocation7 + $0x1b8] sm:$0xff] }
 0x50c   :  { %v1129_v32 = vadd.f32 %v3871_v4, %v1128_v12  ;;  %v5346_v12 = vld [vmem:[#allocation7 + $0x1a0] sm:$0xff] }
 0x50d   :  { %v1113_v25 = vsel %vm1112_vm4, %v3869_v59, %v1109_v6  ;;  %v5266_v59 = vld [vmem:[#allocation7 + $0x2f0] sm:$0xff]  ;;  %6988 = vst [vmem:[#allocation17_spill] sm:$0xff] %v5346_v12 }
 0x50e   :  { %v1118_v35 = vsel %vm1115_vm5, %v1117_v23, %v1113_v25  ;;  %v1133_v40 = vsel %vm1132_vm8, %v3871_v4, %v1129_v32  ;;  %v5288_v4 = vld [vmem:[%s6814_s1 + $0x8] sm:$0xff]  ;;  %v5400_v25 = vld [vmem:[#allocation7 + $0x2c8] sm:$0xff]  ;;  %v5402_v32 = vld [vmem:[#allocation7 + $0x2b0] sm:$0xff] }
 0x50f   :  { %v1140_v18 = vmul.f32 %v1118_v35, %v1098_v30  ;;  %v1138_v31 = vsel %vm1135_vm9, %v1137_v33, %v1133_v40  ;;  %v5431_v33 = vld [vmem:[#allocation7 + $0x238] sm:$0xff] }
 0x510   :  { %v1143_v28 = vsub.f32 1.0, %v1138_v31  ;;  %v1145_v5 = vmul.f32 %v1138_v31, %v5195_v49 }
 0x511   :  { %v1141_v36 = vadd.f32 %v1140_v18, %v259_v43  ;;  %v180_v43 = vadd.f32 %v6991_v37, %v6962_v20  ;;  %v5414_v18 = vld [vmem:[#allocation7 + $0x280] sm:$0xff] }
 0x513   :  { %3872 = vtanh.f32 %v1141_v36  ;;  %v5424_v36 = vld [vmem:[#allocation7 + $0x250] sm:$0xff] }
 0x519   :  { %v3873_v53 = vpop.eup %3872 }
 0x51a   :  { %v1144_v47 = vmul.f32 %v3873_v53, %v1143_v28  ;;  %v5440_v28 = vld [vmem:[#allocation7 + $0x220] sm:$0xff] }
 0x51c   :  { %v5264_v15 = vadd.f32 %v1145_v5, %v1144_v47  ;;  %v5445_v47 = vld [vmem:[#allocation7 + $0x208] sm:$0xff] }
 0x51e   :  { %1171 = vmatmul.f32.vlgmr.msrb.gmra.mxu3 %v5264_v15  ;;  %1191 = vmatmul.f32.vlgmr.msra.gmra.mxu0 %v5264_v15 }
 0x51f   :  { %1211 = vmatmul.f32.vlgmr.msra.gmra.mxu1 %v5264_v15  ;;  %1364 = vmatmul.f32.gmra.mxu2 %v5264_v15 }
 0x520   :  { %1560 = vmatpush.msra.mxu1 %v5266_v59  ;;  %1651 = vmatpush.msrb.mxu3 %v5206_v55 }
 0x521   :  { %1671 = vmatpush.msra.mxu0 %v5266_v59 }
 0x522   :  { %1561 = vmatpush.msra.mxu1 %v5272_v24  ;;  %1652 = vmatpush.msrb.mxu3 %v5209_v50 }
 0x523   :  { %1672 = vmatpush.msra.mxu0 %v5272_v24 }
 0x524   :  { %1562 = vmatpush.msra.mxu1 %v5276_v51  ;;  %1653 = vmatpush.msrb.mxu3 %v5212_v27 }
 0x525   :  { %1673 = vmatpush.msra.mxu0 %v5276_v51 }
 0x526   :  { %1563 = vmatpush.msra.mxu1 %v5281_v16  ;;  %1387 = vmatmul.f32.vlgmr.msra.gmra.mxu3 %v6981_v42 }
 0x527   :  { %1428 = vmatmul.f32.vlgmr.msrb.gmra.mxu0 %v6981_v42  ;;  %1556 = vmatmul.f32.vlgmr.msrb.gmra.mxu1 %v5288_v4  ;;  %v5312_v42 = vld [vmem:[#allocation7 + $0x230] sm:$0xff] }
 0x528   :  { %1564 = vmatpush.msra.mxu1 %v5291_v54  ;;  %1654 = vmatpush.msrb.mxu3 %v5215_v19 }
 0x529   :  { %1674 = vmatpush.msra.mxu0 %v5281_v16 }
 0x52a   :  { %1565 = vmatpush.msra.mxu1 %v5298_v63  ;;  %1655 = vmatpush.msrb.mxu3 %v5218_v57 }
 0x52b   :  { %1675 = vmatpush.msra.mxu0 %v5291_v54 }
 0x52c   :  { %1566 = vmatpush.msra.mxu1 %v5302_v61  ;;  %1656 = vmatpush.msrb.mxu3 %v5221_v60 }
 0x52d   :  { %1676 = vmatpush.msra.mxu0 %v5298_v63 }
 0x52e   :  { %1567 = vmatpush.msra.mxu1 %v5307_v8  ;;  %1390 = vmatmul.f32.gmra.mxu3 %v6982_v17 }
 0x52f   :  { %1431 = vmatmul.f32.gmra.mxu0 %v6982_v17  ;;  %1657 = vmatpush.msrb.mxu3 %v5224_v0  ;;  %v5333_v17 = vld [vmem:[#allocation7 + $0x1d0] sm:$0xff] }
 0x530   :  { %1568 = vmatpush.msra.mxu1 %v5312_v42  ;;  %1677 = vmatpush.msra.mxu0 %v5302_v61 }
 0x531   :  { %1658 = vmatpush.msrb.mxu3 %v5233_v52 }
 0x532   :  { %1569 = vmatpush.msra.mxu1 %v5318_v9  ;;  %1678 = vmatpush.msra.mxu0 %v5307_v8 }
 0x533   :  { %1659 = vmatpush.msrb.mxu3 %v5236_v11 }
 0x534   :  { %1570 = vmatpush.msra.mxu1 %v5323_v38  ;;  %1679 = vmatpush.msra.mxu0 %v5312_v42 }
 0x535   :  { %1660 = vmatpush.msrb.mxu3 %v5239_v56 }
 0x536   :  { %1571 = vmatpush.msra.mxu1 %v5328_v10  ;;  %1393 = vmatmul.f32.gmra.mxu3 %v4957_v14 }
 0x537   :  { %1434 = vmatmul.f32.gmra.mxu0 %v4957_v14  ;;  %1661 = vmatpush.msrb.mxu3 %v5242_v21  ;;  %v5392_v14 = vld [vmem:[#allocation7 + $0x2e0] sm:$0xff] }
 0x538   :  { %1572 = vmatpush.msra.mxu1 %v5333_v17  ;;  %1680 = vmatpush.msra.mxu0 %v5318_v9 }
 0x539   :  { %1662 = vmatpush.msrb.mxu3 %v5245_v34  ;;  %1581 = vmatpush.msrb.mxu2 %v5392_v14 }
 0x53a   :  { %1573 = vmatpush.msra.mxu1 %v5339_v3  ;;  %1681 = vmatpush.msra.mxu0 %v5323_v38 }
 0x53b   :  { %1663 = vmatpush.msrb.mxu3 %v5248_v39  ;;  %1582 = vmatpush.msrb.mxu2 %v5400_v25 }
 0x53c   :  { %1574 = vmatpush.msra.mxu1 %v5346_v12  ;;  %1682 = vmatpush.msra.mxu0 %v5328_v10 }
 0x53d   :  { %1664 = vmatpush.msrb.mxu3 %v5251_v22  ;;  %1583 = vmatpush.msrb.mxu2 %v5402_v32 }
 0x53e   :  { %1575 = vmatpush.msra.mxu1 %v5351_v7  ;;  %1396 = vmatmul.f32.gmra.mxu3 %v5098_v13 }
 0x53f   :  { %1576 = vmatmul.f32.vlgmr.msra.gmra.mxu1 %v5288_v4  ;;  %1437 = vmatmul.f32.gmra.mxu0 %v5098_v13 }
 0x540   :  { %1691 = vmatpush.msrb.mxu1 %v5341_v62  ;;  %1665 = vmatpush.msrb.mxu3 %v5253_v45 }
 0x541   :  { %1683 = vmatpush.msra.mxu0 %v5333_v17 }
 0x542   :  { %1666 = vmatpush.msrb.mxu3 %v5256_v2  ;;  %1692 = vmatpush.msrb.mxu1 %v5392_v14 }
 0x543   :  { %1684 = vmatpush.msra.mxu0 %v5339_v3 }
 0x544   :  { %1782 = vmatpush.msra.mxu3 %v5266_v59  ;;  %1693 = vmatpush.msrb.mxu1 %v5400_v25 }
 0x545   :  { %1685 = vmatpush.msra.mxu0 %v5346_v12 }
 0x546   :  { %1783 = vmatpush.msra.mxu3 %v5272_v24  ;;  %1694 = vmatpush.msrb.mxu1 %v5402_v32 }
 0x547   :  { %1399 = vmatmul.f32.gmra.mxu3 %v5164_v58  ;;  %1440 = vmatmul.f32.gmra.mxu0 %v5164_v58  ;;  %v6990_v58 = vld [vmem:[#allocation49_spill] sm:$0xff] }
 0x548   :  { %1784 = vmatpush.msra.mxu3 %v5276_v51  ;;  %1686 = vmatpush.msra.mxu0 %v5351_v7 }
 0x54a   :  { %1802 = vmatpush.msrb.mxu0 %v5341_v62  ;;  %1785 = vmatpush.msra.mxu3 %v5281_v16 }
 0x54c   :  { %1786 = vmatpush.msra.mxu3 %v5291_v54  ;;  %1803 = vmatpush.msrb.mxu0 %v5392_v14 }
 0x54e   :  { %1787 = vmatpush.msra.mxu3 %v5298_v63  ;;  %1804 = vmatpush.msrb.mxu0 %v5400_v25 }
 0x54f   :  { %1402 = vmatmul.f32.gmra.mxu3 %v5195_v49  ;;  %1443 = vmatmul.f32.gmra.mxu0 %v5195_v49  ;;  %v221_v49 = vadd.f32 %v6990_v58, %v6973_v41  ;;  %v5409_v41 = vld [vmem:[#allocation7 + $0x298] sm:$0xff] }
 0x550   :  { %1788 = vmatpush.msra.mxu3 %v5302_v61  ;;  %1805 = vmatpush.msrb.mxu0 %v5402_v32  ;;  %v5457_v58 = vld [vmem:[#allocation7 + $0x1d8] sm:$0xff] }
 0x551   :  { %1584 = vmatpush.msrb.mxu2 %v5409_v41  ;;  %1695 = vmatpush.msrb.mxu1 %v5409_v41  ;;  %6992 = vst [vmem:[#allocation21_spill] sm:$0xff] %v5457_v58 }
 0x552   :  { %1789 = vmatpush.msra.mxu3 %v5307_v8  ;;  %1806 = vmatpush.msrb.mxu0 %v5409_v41 }
 0x553   :  { %1585 = vmatpush.msrb.mxu2 %v5414_v18  ;;  %1696 = vmatpush.msrb.mxu1 %v5414_v18 }
 0x554   :  { %1790 = vmatpush.msra.mxu3 %v5312_v42  ;;  %1807 = vmatpush.msrb.mxu0 %v5414_v18 }
 0x555   :  { %1586 = vmatpush.msrb.mxu2 %v5419_v29  ;;  %1697 = vmatpush.msrb.mxu1 %v5419_v29 }
 0x556   :  { %1791 = vmatpush.msra.mxu3 %v5318_v9  ;;  %1808 = vmatpush.msrb.mxu0 %v5419_v29 }
 0x557   :  { %1405 = vmatmul.f32.gmra.mxu3 %v5264_v15  ;;  %1446 = vmatmul.f32.gmra.mxu0 %v5264_v15 }
 0x558   :  { %1792 = vmatpush.msra.mxu3 %v5323_v38  ;;  %1587 = vmatpush.msrb.mxu2 %v5424_v36 }
 0x559   :  { %1698 = vmatpush.msrb.mxu1 %v5424_v36  ;;  %1809 = vmatpush.msrb.mxu0 %v5424_v36 }
 0x55a   :  { %1793 = vmatpush.msra.mxu3 %v5328_v10  ;;  %1588 = vmatpush.msrb.mxu2 %v5431_v33 }
 0x55b   :  { %1699 = vmatpush.msrb.mxu1 %v5431_v33  ;;  %1810 = vmatpush.msrb.mxu0 %v5431_v33 }
 0x55c   :  { %1794 = vmatpush.msra.mxu3 %v5333_v17  ;;  %1589 = vmatpush.msrb.mxu2 %v5440_v28 }
 0x55d   :  { %1700 = vmatpush.msrb.mxu1 %v5440_v28  ;;  %1811 = vmatpush.msrb.mxu0 %v5440_v28 }
 0x55e   :  { %1795 = vmatpush.msra.mxu3 %v5339_v3  ;;  %1590 = vmatpush.msrb.mxu2 %v5445_v47 }
 0x55f   :  { %1701 = vmatpush.msrb.mxu1 %v5445_v47  ;;  %1812 = vmatpush.msrb.mxu0 %v5445_v47 }
 0x560   :  { %1796 = vmatpush.msra.mxu3 %v5346_v12 }
 0x562   :  { %1797 = vmatpush.msra.mxu3 %v5351_v7 }
 0x59b   :  { %v1192_v13 = vpop.f32.mrf.mxu0 }
 0x59c   :  { %v1193_v6 = vadd.f32 %v1192_v13, %v6976_v44  ;;  %v5452_v13 = vld [vmem:[#allocation7 + $0x1f0] sm:$0xff] }
 0x59d   :  { %1591 = vmatpush.msrb.mxu2 %v5452_v13  ;;  %1702 = vmatpush.msrb.mxu1 %v5452_v13 }
 0x59e   :  { %v1235_v23 = vadd.f32 %v1193_v6, %v221_v49  ;;  %1813 = vmatpush.msrb.mxu0 %v5452_v13  ;;  %v5464_v6 = vld [vmem:[#allocation7 + $0x1c0] sm:$0xff] }
 0x59f   :  { %1592 = vmatpush.msrb.mxu2 %v5457_v58  ;;  %1703 = vmatpush.msrb.mxu1 %v5457_v58  ;;  %6993 = vst [vmem:[#allocation18_spill] sm:$0xff] %v5464_v6 }
 0x5a0   :  { %v3754_v30 = vmul.f32 -1.442695, %v1235_v23  ;;  %1814 = vmatpush.msrb.mxu0 %v5457_v58 }
 0x5a1   :  { %v1172_v35 = vpop.f32.mrf.mxu3  ;;  %1593 = vmatpush.msrb.mxu2 %v5464_v6  ;;  %1704 = vmatpush.msrb.mxu1 %v5464_v6 }
 0x5a2   :  { %3874 = vpow2.f32 %v3754_v30  ;;  %v1173_v46 = vadd.f32 %v1172_v35, %v6975_v48  ;;  %v5469_v35 = vld [vmem:[#allocation7 + $0x1a8] sm:$0xff]  ;;  %1815 = vmatpush.msrb.mxu0 %v5464_v6 }
 0x5a3   :  { %6994 = vst [vmem:[#allocation25_spill] sm:$0xff] %v5469_v35  ;;  %1594 = vmatpush.msrb.mxu2 %v5469_v35  ;;  %1705 = vmatpush.msrb.mxu1 %v5469_v35 }
 0x5a4   :  { %v1215_v44 = vadd.f32 %v1173_v46, %v180_v43  ;;  %v5473_v43 = vld [vmem:[#allocation7 + $0x190] sm:$0xff]  ;;  %1816 = vmatpush.msrb.mxu0 %v5469_v35 }
 0x5a5   :  { %6995 = vst [vmem:[#allocation22_spill] sm:$0xff] %v5473_v43  ;;  %1595 = vmatpush.msrb.mxu2 %v5473_v43  ;;  %1706 = vmatpush.msrb.mxu1 %v5473_v43 }
 0x5a6   :  { %v3753_v20 = vmul.f32 -1.442695, %v1215_v44  ;;  %1817 = vmatpush.msrb.mxu0 %v5473_v43 }
 0x5a7   :  { %1762 = vmatpush.msra.mxu2 %v5206_v55  ;;  %1873 = vmatpush.msra.mxu1 %v5206_v55 }
 0x5a8   :  { %v3875_v48 = vpop.eup %3874  ;;  %3876 = vpow2.f32 %v3753_v20 }
 0x5a9   :  { %v5427_v40 = vadd.f32 1.0, %v3875_v48  ;;  %1763 = vmatpush.msra.mxu2 %v5209_v50  ;;  %1874 = vmatpush.msra.mxu1 %v5209_v50 }
 0x5ab   :  { %3878 = vrcp.f32 %v5427_v40  ;;  %1764 = vmatpush.msra.mxu2 %v5212_v27  ;;  %1875 = vmatpush.msra.mxu1 %v5212_v27  ;;  %vm1245_vm15 = vweird.f32 %v5427_v40 }
 0x5ad   :  { %1765 = vmatpush.msra.mxu2 %v5215_v19  ;;  %1876 = vmatpush.msra.mxu1 %v5215_v19 }
 0x5ae   :  { %v3877_v31 = vpop.eup %3876 }
 0x5af   :  { %v1219_v53 = vadd.f32 1.0, %v3877_v31  ;;  %v1212_v31 = vpop.f32.mrf.mxu1  ;;  %1766 = vmatpush.msra.mxu2 %v5218_v57  ;;  %1877 = vmatpush.msra.mxu1 %v5218_v57 }
 0x5b1   :  { %3880 = vrcp.f32 %v1219_v53  ;;  %v5450_v5 = vpop.eup %3878  ;;  %v1231_v44 = vand.u32 2147483648, %v1219_v53  ;;  %v1229_v48 = vand.u32 2147483647, %v1219_v53  ;;  %vm1225_vm11 = vweird.f32 %v1219_v53  ;;  %1767 = vmatpush.msra.mxu2 %v5221_v60  ;;  %1878 = vmatpush.msra.mxu1 %v5221_v60 }
 0x5b2   :  { %v1241_v49 = vmul.f32 %v5450_v5, %v5427_v40  ;;  %vm1246_vm14 = vweird.f32 %v5450_v5 }
 0x5b3   :  { %v1232_v35 = vor.u32 1.1754944e-38, %v1231_v44  ;;  %vm1230_vm13 = vcmp.eq.f32.partialorder %v1229_v48, 8.507059e+37  ;;  %v1251_v44 = vand.u32 2147483648, %v5427_v40  ;;  %vm1247_vm0 = vmor %vm1245_vm15, %vm1246_vm14  ;;  %1768 = vmatpush.msra.mxu2 %v5224_v0  ;;  %1879 = vmatpush.msra.mxu1 %v5224_v0 }
 0x5b4   :  { %v1242_v37 = vsub.f32 1.0, %v1241_v49 }
 0x5b5   :  { %1769 = vmatpush.msra.mxu2 %v5233_v52  ;;  %1880 = vmatpush.msra.mxu1 %v5233_v52 }
 0x5b6   :  { %v1243_v49 = vmul.f32 %v5450_v5, %v1242_v37 }
 0x5b7   :  { %v3881_v23 = vpop.eup %3880  ;;  %1770 = vmatpush.msra.mxu2 %v5236_v11  ;;  %1881 = vmatpush.msra.mxu1 %v5236_v11 }
 0x5b8   :  { %v1221_v30 = vmul.f32 %v3881_v23, %v1219_v53  ;;  %vm1226_vm10 = vweird.f32 %v3881_v23  ;;  %v1244_v58 = vadd.f32 %v5450_v5, %v1243_v49  ;;  %v6996_v53 = vld [vmem:[#allocation32_spill] sm:$0xff]  ;;  %v3756_v49 = vld [vmem:[%s6819_s6 + $0x3] sm:$0x7] }
 0x5b9   :  { %vm1227_vm12 = vmor %vm1225_vm11, %vm1226_vm10  ;;  %v262_v37 = vadd.f32 %v6996_v53, %v4813_v1  ;;  %v1252_v1 = vor.u32 1.1754944e-38, %v1251_v44  ;;  %1771 = vmatpush.msra.mxu2 %v5239_v56  ;;  %1882 = vmatpush.msra.mxu1 %v5239_v56  ;;  %v1557_v53 = vpop.f32.mrf.mxu1 }
 0x5ba   :  { %v1222_v46 = vsub.f32 1.0, %v1221_v30 }
 0x5bb   :  { %1772 = vmatpush.msra.mxu2 %v5242_v21  ;;  %1883 = vmatpush.msra.mxu1 %v5242_v21 }
 0x5bc   :  { %v1223_v20 = vmul.f32 %v3881_v23, %v1222_v46  ;;  %v1213_v46 = vadd.f32 %v1212_v31, %v4810_v26  ;;  %v1249_v26 = vand.u32 2147483647, %v5427_v40 }
 0x5bd   :  { %1773 = vmatpush.msra.mxu2 %v5245_v34  ;;  %1884 = vmatpush.msra.mxu1 %v5245_v34 }
 0x5be   :  { %v1224_v30 = vadd.f32 %v3881_v23, %v1223_v20  ;;  %vm1250_vm1 = vcmp.eq.f32.partialorder %v1249_v26, 8.507059e+37 }
 0x5bf   :  { %1774 = vmatpush.msra.mxu2 %v5248_v39  ;;  %1885 = vmatpush.msra.mxu1 %v5248_v39 }
 0x5c0   :  { %v1228_v6 = vsel %vm1227_vm12, %v3881_v23, %v1224_v30  ;;  %v1248_v23 = vsel %vm1247_vm0, %v5450_v5, %v1244_v58  ;;  %v3755_v30 = vld [vmem:[%s6818_s5 + $0x3] sm:$0x7] }
 0x5c1   :  { %v1233_v43 = vsel %vm1230_vm13, %v1232_v35, %v1228_v6  ;;  %v1253_v35 = vsel %vm1250_vm1, %v1252_v1, %v1248_v23  ;;  %1775 = vmatpush.msra.mxu2 %v5251_v22  ;;  %1886 = vmatpush.msra.mxu1 %v5251_v22  ;;  %v5552_v44 = vperm.slane %v3755_v30, 0  ;;  %v1577_v1 = vpop.f32.mrf.mxu1 }
 0x5c2   :  { %v1255_v20 = vmul.f32 %v1233_v43, %v1213_v46  ;;  %v1258_v40 = vsub.f32 1.0, %v1253_v35  ;;  %v1260_v43 = vmul.f32 %v1253_v35, %v5264_v15  ;;  %v1347_v15 = vpop.f32.mrf.mxu2  ;;  %v5548_v46 = vperm.slane %v3756_v49, 0 }
 0x5c3   :  { %1776 = vmatpush.msra.mxu2 %v5253_v45  ;;  %1887 = vmatpush.msra.mxu1 %v5253_v45  ;;  %7000 = vst [vmem:[#allocation30_spill] sm:$0xff] %v5552_v44  ;;  %v1348_v26 = vadd.f32 %v1347_v15, %v5552_v44  ;;  %v5558_v35 = vperm.slane %v3755_v30, 1 }
 0x5c4   :  { %v1256_v6 = vadd.f32 %v1255_v20, %v262_v37  ;;  %6998 = vst [vmem:[#allocation26_spill] sm:$0xff] %v5548_v46  ;;  %v1558_v20 = vadd.f32 %v1557_v53, %v5548_v46 }
 0x5c5   :  { %1777 = vmatpush.msra.mxu2 %v5256_v2  ;;  %1888 = vmatpush.msra.mxu1 %v5256_v2  ;;  %7002 = vst [vmem:[#allocation48_spill] sm:$0xff] %v5558_v35 }
 0x5c6   :  { %3882 = vtanh.f32 %v1256_v6  ;;  %v5556_v6 = vperm.slane %v3756_v49, 1  ;;  %v1600_v23 = vadd.f32 %v1558_v20, %v1348_v26 }
 0x5c8   :  { %7001 = vst [vmem:[#allocation43_spill] sm:$0xff] %v5556_v6 }
 0x5ca   :  { %v5540_v31 = vpop.f32.mrf.mxu2 }
 0x5cb   :  { %6997 = vst [vmem:[#allocation19_spill] sm:$0xff] %v5540_v31 }
 0x5cc   :  { %v3883_v5 = vpop.eup %3882 }
 0x5cd   :  { %v1259_v58 = vmul.f32 %v3883_v5, %v1258_v40  ;;  %v1388_v40 = vpop.f32.mrf.mxu3 }
 0x5cf   :  { %v1261_v48 = vadd.f32 %v1260_v43, %v1259_v58  ;;  %v1578_v58 = vadd.f32 %v1577_v1, %v5556_v6  ;;  %v3758_v43 = vmul.f32 -1.442695, %v1600_v23  ;;  %v5574_v6 = vperm.slane %v3755_v30, 2 }
 0x5d1   :  { %1367 = vmatmul.f32.gmra.mxu2 %v1261_v48  ;;  %1264 = vst [vmem:[#allocation11] sm:$0xff] %v1261_v48  ;;  %1408 = vmatmul.f32.gmra.mxu3 %v1261_v48  ;;  %3884 = vpow2.f32 %v3758_v43 }
 0x5d2   :  { %1449 = vmatmul.f32.gmra.mxu0 %v1261_v48  ;;  %v5550_v37 = vpop.f32.mrf.mxu2  ;;  %v1389_v48 = vadd.f32 %v1388_v40, %v5558_v35 }
 0x5d3   :  { %6999 = vst [vmem:[#allocation34_spill] sm:$0xff] %v5550_v37 }
 0x5d4   :  { %v1620_v37 = vadd.f32 %v1578_v58, %v1389_v48 }
 0x5d6   :  { %v3759_v31 = vmul.f32 -1.442695, %v1620_v37 }
 0x5d7   :  { %v3885_v15 = vpop.eup %3884 }
 0x5d8   :  { %3886 = vpow2.f32 %v3759_v31  ;;  %v1604_v46 = vadd.f32 1.0, %v3885_v15  ;;  %v5572_v15 = vperm.slane %v3756_v49, 2 }
 0x5d9   :  { %1596 = vmatmul.f32.vlgmr.msrb.gmra.mxu2 %v5288_v4 }
 0x5da   :  { %1893 = vmatpush.msrb.mxu2 %v5266_v59  ;;  %v5560_v5 = vpop.f32.mrf.mxu2  ;;  %3888 = vrcp.f32 %v1604_v46  ;;  %v1616_v31 = vand.u32 2147483648, %v1604_v46  ;;  %vm1610_vm3 = vweird.f32 %v1604_v46 }
 0x5db   :  { %7003 = vst [vmem:[#allocation44_spill] sm:$0xff] %v5560_v5 }
 0x5dc   :  { %1894 = vmatpush.msrb.mxu2 %v5272_v24 }
 0x5de   :  { %1895 = vmatpush.msrb.mxu2 %v5276_v51  ;;  %v3887_v20 = vpop.eup %3886 }
 0x5df   :  { %v1624_v44 = vadd.f32 1.0, %v3887_v20 }
 0x5e0   :  { %1896 = vmatpush.msrb.mxu2 %v5281_v16 }
 0x5e1   :  { %3890 = vrcp.f32 %v1624_v44  ;;  %v1636_v49 = vand.u32 2147483648, %v1624_v44  ;;  %vm1630_vm7 = vweird.f32 %v1624_v44 }
 0x5e2   :  { %1897 = vmatpush.msrb.mxu2 %v5291_v54  ;;  %v5564_v53 = vpop.f32.mrf.mxu2 }
 0x5e3   :  { %7004 = vst [vmem:[#allocation33_spill] sm:$0xff] %v5564_v53  ;;  %v1637_v45 = vor.u32 1.1754944e-38, %v1636_v49 }
 0x5e4   :  { %1898 = vmatpush.msrb.mxu2 %v5298_v63 }
 0x5e6   :  { %1899 = vmatpush.msrb.mxu2 %v5302_v61 }
 0x5e8   :  { %1900 = vmatpush.msrb.mxu2 %v5307_v8 }
 0x5ea   :  { %1901 = vmatpush.msrb.mxu2 %v5312_v42  ;;  %v5566_v26 = vpop.f32.mrf.mxu2 }
 0x5eb   :  { %7005 = vst [vmem:[#allocation50_spill] sm:$0xff] %v5566_v26  ;;  %v1614_v26 = vand.u32 2147483647, %v1604_v46 }
 0x5ec   :  { %1902 = vmatpush.msrb.mxu2 %v5318_v9 }
 0x5ed   :  { %vm1615_vm5 = vcmp.eq.f32.partialorder %v1614_v26, 8.507059e+37 }
 0x5ee   :  { %1903 = vmatpush.msrb.mxu2 %v5323_v38 }
 0x5f0   :  { %1904 = vmatpush.msrb.mxu2 %v5328_v10 }
 0x5f2   :  { %1905 = vmatpush.msrb.mxu2 %v5333_v17  ;;  %v5568_v1 = vpop.f32.mrf.mxu2 }
 0x5f3   :  { %7006 = vst [vmem:[#allocation36_spill] sm:$0xff] %v5568_v1  ;;  %v1429_v1 = vpop.f32.mrf.mxu0 }
 0x5f4   :  { %1906 = vmatpush.msrb.mxu2 %v5339_v3 }
 0x5f6   :  { %1907 = vmatpush.msrb.mxu2 %v5346_v12 }
 0x5f8   :  { %1908 = vmatpush.msrb.mxu2 %v5351_v7  ;;  %v3889_v7 = vpop.eup %3888 }
 0x5f9   :  { %v1606_v5 = vmul.f32 %v3889_v7, %v1604_v46  ;;  %v3891_v23 = vpop.eup %3890  ;;  %vm1611_vm2 = vweird.f32 %v3889_v7  ;;  %v1634_v46 = vand.u32 2147483647, %v1624_v44 }
 0x5fa   :  { %v1626_v58 = vmul.f32 %v3891_v23, %v1624_v44  ;;  %vm1612_vm4 = vmor %vm1610_vm3, %vm1611_vm2  ;;  %vm1631_vm6 = vweird.f32 %v3891_v23 }
 0x5fb   :  { %v1607_v40 = vsub.f32 1.0, %v1606_v5  ;;  %v1617_v5 = vor.u32 1.1754944e-38, %v1616_v31  ;;  %vm1632_vm8 = vmor %vm1630_vm7, %vm1631_vm6  ;;  %vm1635_vm9 = vcmp.eq.f32.partialorder %v1634_v46, 8.507059e+37 }
 0x5fc   :  { %v1627_v48 = vsub.f32 1.0, %v1626_v58 }
 0x5fd   :  { %v1608_v43 = vmul.f32 %v3889_v7, %v1607_v40 }
 0x5fe   :  { %v1628_v20 = vmul.f32 %v3891_v23, %v1627_v48 }
 0x5ff   :  { %v1609_v53 = vadd.f32 %v3889_v7, %v1608_v43  ;;  %v1430_v43 = vadd.f32 %v1429_v1, %v5574_v6 }
 0x601   :  { %v1613_v35 = vsel %vm1612_vm4, %v3889_v7, %v1609_v53 }
 0x602   :  { %v1618_v58 = vsel %vm1615_vm5, %v1617_v5, %v1613_v35 }
 0x654   :  { %v5570_v37 = vpop.f32.mrf.mxu2 }
 0x655   :  { %7007 = vst [vmem:[#allocation39_spill] sm:$0xff] %v5570_v37  ;;  %v1629_v37 = vadd.f32 %v3891_v23, %v1628_v20 }
 0x657   :  { %v1633_v30 = vsel %vm1632_vm8, %v3891_v23, %v1629_v37 }
 0x658   :  { %v1638_v7 = vsel %vm1635_vm9, %v1637_v45, %v1633_v30 }
 0x659   :  { %v1643_v53 = vsub.f32 1.0, %v1638_v7  ;;  %v1645_v26 = vmul.f32 %v5288_v4, %v1638_v7  ;;  %v7027_v7 = vld [vmem:[#allocation30_spill] sm:$0xff] }
 0x65c   :  { %v1597_v2 = vpop.f32.mrf.mxu2 }
 0x65d   :  { %v1598_v40 = vadd.f32 %v1597_v2, %v5572_v15 }
 0x65f   :  { %v1640_v12 = vmul.f32 %v1618_v58, %v1598_v40  ;;  %v7025_v40 = vld [vmem:[#allocation48_spill] sm:$0xff] }
 0x661   :  { %v1641_v48 = vadd.f32 %v1640_v12, %v1430_v43  ;;  %v7026_v43 = vld [vmem:[#allocation43_spill] sm:$0xff] }
 0x663   :  { %3892 = vtanh.f32 %v1641_v48 }
 0x669   :  { %v3893_v31 = vpop.eup %3892 }
 0x66a   :  { %v1644_v2 = vmul.f32 %v3893_v31, %v1643_v53  ;;  %v7028_v53 = vld [vmem:[#allocation19_spill] sm:$0xff] }
 0x66b   :  { %v1351_v31 = vadd.f32 %v7028_v53, %v7027_v7 }
 0x66c   :  { %v5579_v20 = vadd.f32 %v1645_v26, %v1644_v2  ;;  %v7029_v2 = vld [vmem:[#allocation26_spill] sm:$0xff] }
 0x66e   :  { %1667 = vmatmul.f32.vlgmr.msrb.gmra.mxu3 %v5579_v20  ;;  %1687 = vmatmul.f32.vlgmr.msra.gmra.mxu0 %v5579_v20 }
 0x66f   :  { %1707 = vmatmul.f32.vlgmr.msrb.gmra.mxu1 %v5579_v20  ;;  %1913 = vmatpush.msrb.mxu3 %v5341_v62 }
 0x670   :  { %1984 = vmatpush.msra.mxu0 %v5206_v55  ;;  %2004 = vmatpush.msrb.mxu1 %v5266_v59  ;;  %v7008_v55 = vld [vmem:[#allocation21_spill] sm:$0xff] }
 0x671   :  { %1914 = vmatpush.msrb.mxu3 %v5392_v14 }
 0x672   :  { %1985 = vmatpush.msra.mxu0 %v5209_v50  ;;  %2005 = vmatpush.msrb.mxu1 %v5272_v24  ;;  %v7009_v50 = vld [vmem:[#allocation18_spill] sm:$0xff] }
 0x673   :  { %1915 = vmatpush.msrb.mxu3 %v5400_v25 }
 0x674   :  { %1986 = vmatpush.msra.mxu0 %v5212_v27  ;;  %2006 = vmatpush.msrb.mxu1 %v5276_v51  ;;  %v7010_v27 = vld [vmem:[#allocation25_spill] sm:$0xff] }
 0x675   :  { %1916 = vmatpush.msrb.mxu3 %v5402_v32 }
 0x676   :  { %1987 = vmatpush.msra.mxu0 %v5215_v19  ;;  %2007 = vmatpush.msrb.mxu1 %v5281_v16  ;;  %v7011_v19 = vld [vmem:[#allocation23_spill] sm:$0xff] }
 0x677   :  { %1917 = vmatpush.msrb.mxu3 %v5409_v41 }
 0x678   :  { %1988 = vmatpush.msra.mxu0 %v5218_v57  ;;  %2008 = vmatpush.msrb.mxu1 %v5291_v54  ;;  %v7012_v57 = vld [vmem:[#allocation17_spill] sm:$0xff] }
 0x679   :  { %1918 = vmatpush.msrb.mxu3 %v5414_v18 }
 0x67a   :  { %1989 = vmatpush.msra.mxu0 %v5221_v60  ;;  %2009 = vmatpush.msrb.mxu1 %v5298_v63  ;;  %v7013_v60 = vld [vmem:[#allocation22_spill] sm:$0xff] }
 0x67b   :  { %1919 = vmatpush.msrb.mxu3 %v5419_v29 }
 0x67c   :  { %1990 = vmatpush.msra.mxu0 %v5224_v0  ;;  %2010 = vmatpush.msrb.mxu1 %v5302_v61  ;;  %v7014_v0 = vld [vmem:[#allocation20_spill] sm:$0xff] }
 0x67d   :  { %1920 = vmatpush.msrb.mxu3 %v5424_v36 }
 0x67e   :  { %1991 = vmatpush.msra.mxu0 %v5233_v52  ;;  %2011 = vmatpush.msrb.mxu1 %v5307_v8  ;;  %v7015_v52 = vld [vmem:[#allocation24_spill] sm:$0xff] }
 0x67f   :  { %1921 = vmatpush.msrb.mxu3 %v5431_v33 }
 0x680   :  { %1992 = vmatpush.msra.mxu0 %v5236_v11  ;;  %2012 = vmatpush.msrb.mxu1 %v5312_v42  ;;  %v1432_v11 = vpop.f32.mrf.mxu0 }
 0x681   :  { %1922 = vmatpush.msrb.mxu3 %v5440_v28 }
 0x682   :  { %1993 = vmatpush.msra.mxu0 %v5239_v56  ;;  %2013 = vmatpush.msrb.mxu1 %v5318_v9  ;;  %v1391_v56 = vpop.f32.mrf.mxu3 }
 0x683   :  { %1923 = vmatpush.msrb.mxu3 %v5445_v47  ;;  %v1392_v58 = vadd.f32 %v1391_v56, %v7025_v40 }
 0x684   :  { %1994 = vmatpush.msra.mxu0 %v5242_v21  ;;  %2014 = vmatpush.msrb.mxu1 %v5323_v38 }
 0x685   :  { %1924 = vmatpush.msrb.mxu3 %v5452_v13 }
 0x686   :  { %1995 = vmatpush.msra.mxu0 %v5245_v34  ;;  %2015 = vmatpush.msrb.mxu1 %v5328_v10 }
 0x687   :  { %1925 = vmatpush.msrb.mxu3 %v7008_v55 }
 0x688   :  { %1996 = vmatpush.msra.mxu0 %v5248_v39  ;;  %2016 = vmatpush.msrb.mxu1 %v5333_v17  ;;  %v5632_v21 = vpop.f32.mrf.mxu0 }
 0x689   :  { %1926 = vmatpush.msrb.mxu3 %v7009_v50 }
 0x68a   :  { %1997 = vmatpush.msra.mxu0 %v5251_v22  ;;  %2017 = vmatpush.msrb.mxu1 %v5339_v3  ;;  %v5634_v34 = vpop.f32.mrf.mxu3 }
 0x68b   :  { %1927 = vmatpush.msrb.mxu3 %v7010_v27 }
 0x68c   :  { %1998 = vmatpush.msra.mxu0 %v7011_v19  ;;  %2018 = vmatpush.msrb.mxu1 %v7012_v57 }
 0x68d   :  { %1928 = vmatpush.msrb.mxu3 %v7013_v60 }
 0x68e   :  { %1999 = vmatpush.msra.mxu0 %v7014_v0  ;;  %2019 = vmatpush.msrb.mxu1 %v7015_v52 }
 0x690   :  { %v5636_v39 = vpop.f32.mrf.mxu0 }
 0x691   :  { %7016 = vst [vmem:[#allocation45_spill] sm:$0xff] %v5636_v39 }
 0x692   :  { %v5638_v22 = vpop.f32.mrf.mxu3 }
 0x698   :  { %v5640_v45 = vpop.f32.mrf.mxu0 }
 0x699   :  { %7017 = vst [vmem:[#allocation35_spill] sm:$0xff] %v5640_v45 }
 0x69a   :  { %v5642_v4 = vpop.f32.mrf.mxu3 }
 0x69b   :  { %7018 = vst [vmem:[#allocation40_spill] sm:$0xff] %v5642_v4 }
 0x6a0   :  { %v5644_v12 = vpop.f32.mrf.mxu0 }
 0x6a1   :  { %7019 = vst [vmem:[#allocation27_spill] sm:$0xff] %v5644_v12 }
 0x6a2   :  { %v5646_v44 = vpop.f32.mrf.mxu3 }
 0x6a3   :  { %7020 = vst [vmem:[#allocation37_spill] sm:$0xff] %v5646_v44 }
 0x6a8   :  { %v5648_v35 = vpop.f32.mrf.mxu0 }
 0x6a9   :  { %7021 = vst [vmem:[#allocation46_spill] sm:$0xff] %v5648_v35 }
 0x6aa   :  { %v5650_v1 = vpop.f32.mrf.mxu3 }
 0x6ab   :  { %7022 = vst [vmem:[#allocation29_spill] sm:$0xff] %v5650_v1 }
 0x6b0   :  { %v5652_v23 = vpop.f32.mrf.mxu0 }
 0x6b1   :  { %7023 = vst [vmem:[#allocation42_spill] sm:$0xff] %v5652_v23 }
 0x6b2   :  { %v5654_v37 = vpop.f32.mrf.mxu3 }
 0x6b3   :  { %7024 = vst [vmem:[#allocation28_spill] sm:$0xff] %v5654_v37 }
 0x6eb   :  { %v1688_v5 = vpop.f32.mrf.mxu0 }
 0x6ec   :  { %v1689_v49 = vadd.f32 %v1688_v5, %v7026_v43 }
 0x6ee   :  { %v1731_v46 = vadd.f32 %v1689_v49, %v1392_v58 }
 0x6f0   :  { %v3761_v48 = vmul.f32 -1.442695, %v1731_v46 }
 0x6f1   :  { %v1668_v30 = vpop.f32.mrf.mxu3 }
 0x6f2   :  { %3894 = vpow2.f32 %v3761_v48  ;;  %v1669_v26 = vadd.f32 %v1668_v30, %v7029_v2 }
 0x6f4   :  { %v1711_v19 = vadd.f32 %v1669_v26, %v1351_v31  ;;  %v1708_v31 = vpop.f32.mrf.mxu1 }
 0x6f6   :  { %v3760_v0 = vmul.f32 -1.442695, %v1711_v19  ;;  %v1709_v19 = vadd.f32 %v1708_v31, %v5572_v15 }
 0x6f8   :  { %v3895_v35 = vpop.eup %3894  ;;  %3896 = vpow2.f32 %v3760_v0 }
 0x6f9   :  { %v1735_v23 = vadd.f32 1.0, %v3895_v35 }
 0x6fb   :  { %3898 = vrcp.f32 %v1735_v23  ;;  %vm1741_vm15 = vweird.f32 %v1735_v23 }
 0x6fe   :  { %v3897_v37 = vpop.eup %3896 }
 0x6ff   :  { %v1715_v1 = vadd.f32 1.0, %v3897_v37 }
 0x701   :  { %3900 = vrcp.f32 %v1715_v1  ;;  %v3899_v56 = vpop.eup %3898  ;;  %v1727_v44 = vand.u32 2147483648, %v1715_v1  ;;  %v1725_v48 = vand.u32 2147483647, %v1715_v1  ;;  %vm1721_vm11 = vweird.f32 %v1715_v1 }
 0x702   :  { %v1737_v5 = vmul.f32 %v3899_v56, %v1735_v23  ;;  %vm1742_vm14 = vweird.f32 %v3899_v56 }
 0x703   :  { %v1728_v35 = vor.u32 1.1754944e-38, %v1727_v44  ;;  %vm1726_vm13 = vcmp.eq.f32.partialorder %v1725_v48, 8.507059e+37  ;;  %vm1743_vm0 = vmor %vm1741_vm15, %vm1742_vm14 }
 0x704   :  { %v1738_v46 = vsub.f32 1.0, %v1737_v5  ;;  %v1433_v5 = vadd.f32 %v1432_v11, %v5574_v6  ;;  %v5670_v11 = vld [vmem:[#allocation7 + $0x2e8] sm:$0xff] }
 0x706   :  { %v1739_v30 = vmul.f32 %v3899_v56, %v1738_v46 }
 0x707   :  { %v3901_v58 = vpop.eup %3900 }
 0x708   :  { %v1717_v49 = vmul.f32 %v3901_v58, %v1715_v1  ;;  %vm1722_vm10 = vweird.f32 %v3901_v58  ;;  %v1740_v0 = vadd.f32 %v3899_v56, %v1739_v30 }
 0x709   :  { %vm1723_vm12 = vmor %vm1721_vm11, %vm1722_vm10 }
 0x70a   :  { %v1718_v12 = vsub.f32 1.0, %v1717_v49  ;;  %v1747_v49 = vand.u32 2147483648, %v1735_v23  ;;  %v1744_v39 = vsel %vm1743_vm0, %v3899_v56, %v1740_v0  ;;  %v1395_v56 = vadd.f32 %v5634_v34, %v7025_v40 }
 0x70c   :  { %v1719_v53 = vmul.f32 %v3901_v58, %v1718_v12  ;;  %v1745_v12 = vand.u32 2147483647, %v1735_v23 }
 0x70e   :  { %v1720_v26 = vadd.f32 %v3901_v58, %v1719_v53  ;;  %v1748_v53 = vor.u32 1.1754944e-38, %v1747_v49  ;;  %vm1746_vm1 = vcmp.eq.f32.partialorder %v1745_v12, 8.507059e+37 }
 0x710   :  { %v1724_v37 = vsel %vm1723_vm12, %v3901_v58, %v1720_v26  ;;  %v1749_v44 = vsel %vm1746_vm1, %v1748_v53, %v1744_v39  ;;  %v5675_v39 = vld [vmem:[#allocation7 + $0x2d0] sm:$0xff] }
 0x711   :  { %v1729_v45 = vsel %vm1726_vm13, %v1728_v35, %v1724_v37  ;;  %v1754_v1 = vsub.f32 1.0, %v1749_v44  ;;  %v1756_v58 = vmul.f32 %v1749_v44, %v5579_v20 }
 0x712   :  { %v1751_v4 = vmul.f32 %v1729_v45, %v1709_v19  ;;  %v5680_v45 = vld [vmem:[#allocation7 + $0x2b8] sm:$0xff] }
 0x714   :  { %v1752_v46 = vadd.f32 %v1751_v4, %v1433_v5 }
 0x716   :  { %3902 = vtanh.f32 %v1752_v46 }
 0x71c   :  { %v3903_v31 = vpop.eup %3902 }
 0x71d   :  { %v1755_v48 = vmul.f32 %v3903_v31, %v1754_v1 }
 0x71f   :  { %v5664_v30 = vadd.f32 %v1756_v58, %v1755_v48 }
 0x721   :  { %1778 = vmatmul.f32.vlgmr.msra.gmra.mxu2 %v5664_v30  ;;  %1798 = vmatmul.f32.vlgmr.msra.gmra.mxu3 %v5664_v30 }
 0x722   :  { %1818 = vmatmul.f32.vlgmr.msrb.gmra.mxu0 %v5664_v30  ;;  %2024 = vmatpush.msra.mxu2 %v5341_v62  ;;  %v5685_v62 = vld [vmem:[#allocation7 + $0x2a0] sm:$0xff] }
 0x723   :  { %2095 = vmatpush.msra.mxu3 %v5670_v11  ;;  %2115 = vmatpush.msrb.mxu0 %v5266_v59  ;;  %v5690_v59 = vld [vmem:[#allocation7 + $0x288] sm:$0xff] }
 0x724   :  { %2025 = vmatpush.msra.mxu2 %v5392_v14 }
 0x725   :  { %2096 = vmatpush.msra.mxu3 %v5675_v39  ;;  %2116 = vmatpush.msrb.mxu0 %v5272_v24  ;;  %v5695_v24 = vld [vmem:[#allocation7 + $0x270] sm:$0xff] }
 0x726   :  { %2026 = vmatpush.msra.mxu2 %v5400_v25 }
 0x727   :  { %2097 = vmatpush.msra.mxu3 %v5680_v45  ;;  %2117 = vmatpush.msrb.mxu0 %v5276_v51  ;;  %v5700_v51 = vld [vmem:[#allocation7 + $0x258] sm:$0xff] }
 0x728   :  { %2027 = vmatpush.msra.mxu2 %v5402_v32 }
 0x729   :  { %2098 = vmatpush.msra.mxu3 %v5685_v62  ;;  %2118 = vmatpush.msrb.mxu0 %v5281_v16  ;;  %v5705_v16 = vld [vmem:[#allocation7 + $0x240] sm:$0xff] }
 0x72a   :  { %2028 = vmatpush.msra.mxu2 %v5409_v41 }
 0x72b   :  { %2099 = vmatpush.msra.mxu3 %v5690_v59  ;;  %2119 = vmatpush.msrb.mxu0 %v5291_v54  ;;  %v5710_v54 = vld [vmem:[#allocation7 + $0x228] sm:$0xff] }
 0x72c   :  { %2029 = vmatpush.msra.mxu2 %v5414_v18 }
 0x72d   :  { %2100 = vmatpush.msra.mxu3 %v5695_v24  ;;  %2120 = vmatpush.msrb.mxu0 %v5298_v63  ;;  %v5715_v63 = vld [vmem:[#allocation7 + $0x210] sm:$0xff] }
 0x72e   :  { %2030 = vmatpush.msra.mxu2 %v5419_v29 }
 0x72f   :  { %2101 = vmatpush.msra.mxu3 %v5700_v51  ;;  %2121 = vmatpush.msrb.mxu0 %v5302_v61  ;;  %v5720_v61 = vld [vmem:[#allocation7 + $0x1f8] sm:$0xff] }
 0x730   :  { %2031 = vmatpush.msra.mxu2 %v5424_v36 }
 0x731   :  { %2102 = vmatpush.msra.mxu3 %v5705_v16  ;;  %2122 = vmatpush.msrb.mxu0 %v5307_v8  ;;  %v5725_v8 = vld [vmem:[#allocation7 + $0x1e0] sm:$0xff] }
 0x732   :  { %2032 = vmatpush.msra.mxu2 %v5431_v33 }
 0x733   :  { %2103 = vmatpush.msra.mxu3 %v5710_v54  ;;  %2123 = vmatpush.msrb.mxu0 %v5312_v42  ;;  %v5730_v42 = vld [vmem:[#allocation7 + $0x1c8] sm:$0xff] }
 0x734   :  { %2033 = vmatpush.msra.mxu2 %v5440_v28 }
 0x735   :  { %2104 = vmatpush.msra.mxu3 %v5715_v63  ;;  %2124 = vmatpush.msrb.mxu0 %v5318_v9  ;;  %v5735_v9 = vld [vmem:[#allocation7 + $0x1b0] sm:$0xff] }
 0x736   :  { %2034 = vmatpush.msra.mxu2 %v5445_v47 }
 0x737   :  { %2105 = vmatpush.msra.mxu3 %v5720_v61  ;;  %2125 = vmatpush.msrb.mxu0 %v5323_v38  ;;  %v5740_v38 = vld [vmem:[#allocation7 + $0x198] sm:$0xff] }
 0x738   :  { %2035 = vmatpush.msra.mxu2 %v5452_v13 }
 0x739   :  { %2106 = vmatpush.msra.mxu3 %v5725_v8  ;;  %2126 = vmatpush.msrb.mxu0 %v5328_v10  ;;  %v5745_v10 = vld [vmem:[#allocation7 + $0x180] sm:$0xff] }
 0x73a   :  { %2036 = vmatpush.msra.mxu2 %v7008_v55 }
 0x73b   :  { %2107 = vmatpush.msra.mxu3 %v5730_v42  ;;  %2127 = vmatpush.msrb.mxu0 %v5333_v17 }
 0x73c   :  { %2037 = vmatpush.msra.mxu2 %v7009_v50 }
 0x73d   :  { %2108 = vmatpush.msra.mxu3 %v5735_v9  ;;  %2128 = vmatpush.msrb.mxu0 %v5339_v3  ;;  %v7030_v3 = vld [vmem:[#allocation34_spill] sm:$0xff] }
 0x73e   :  { %2038 = vmatpush.msra.mxu2 %v7010_v27  ;;  %v1354_v23 = vadd.f32 %v7030_v3, %v7027_v7 }
 0x73f   :  { %2109 = vmatpush.msra.mxu3 %v5740_v38  ;;  %2129 = vmatpush.msrb.mxu0 %v7012_v57 }
 0x740   :  { %2039 = vmatpush.msra.mxu2 %v7013_v60 }
 0x741   :  { %2110 = vmatpush.msra.mxu3 %v5745_v10  ;;  %2130 = vmatpush.msrb.mxu0 %v7015_v52 }
 0x7a4   :  { %v1779_v17 = vpop.f32.mrf.mxu2  ;;  %v1799_v4 = vpop.f32.mrf.mxu3 }
 0x7a5   :  { %v1780_v26 = vadd.f32 %v1779_v17, %v7029_v2  ;;  %v1800_v57 = vadd.f32 %v1799_v4, %v7026_v43  ;;  %v1819_v4 = vpop.f32.mrf.mxu0 }
 0x7a7   :  { %v1822_v35 = vadd.f32 %v1780_v26, %v1354_v23  ;;  %v1842_v19 = vadd.f32 %v1800_v57, %v1395_v56  ;;  %v1820_v26 = vadd.f32 %v1819_v4, %v5572_v15  ;;  %v5778_v4 = vld [vmem:[#allocation7 + $0x2c0] sm:$0xff] }
 0x7a9   :  { %v3762_v37 = vmul.f32 -1.442695, %v1822_v35  ;;  %v3763_v0 = vmul.f32 -1.442695, %v1842_v19 }
 0x7ab   :  { %3904 = vpow2.f32 %v3762_v37  ;;  %v1436_v37 = vadd.f32 %v5632_v21, %v5574_v6  ;;  %v5764_v21 = vld [vmem:[#allocation7 + $0x2f8] sm:$0xff] }
 0x7ac   :  { %3906 = vpow2.f32 %v3763_v0 }
 0x7b1   :  { %v3905_v5 = vpop.eup %3904 }
 0x7b2   :  { %v3907_v52 = vpop.eup %3906  ;;  %v1826_v49 = vadd.f32 1.0, %v3905_v5 }
 0x7b3   :  { %v1846_v12 = vadd.f32 1.0, %v3907_v52 }
 0x7b4   :  { %3908 = vrcp.f32 %v1826_v49  ;;  %v1838_v31 = vand.u32 2147483648, %v1826_v49  ;;  %v1836_v17 = vand.u32 2147483647, %v1826_v49  ;;  %vm1832_vm3 = vweird.f32 %v1826_v49 }
 0x7b5   :  { %3910 = vrcp.f32 %v1846_v12  ;;  %v1858_v5 = vand.u32 2147483648, %v1846_v12  ;;  %vm1852_vm7 = vweird.f32 %v1846_v12  ;;  %v1856_v52 = vand.u32 2147483647, %v1846_v12 }
 0x7b6   :  { %v1839_v56 = vor.u32 1.1754944e-38, %v1838_v31  ;;  %vm1837_vm5 = vcmp.eq.f32.partialorder %v1836_v17, 8.507059e+37 }
 0x7b7   :  { %vm1857_vm9 = vcmp.eq.f32.partialorder %v1856_v52, 8.507059e+37 }
 0x7ba   :  { %v3909_v46 = vpop.eup %3908 }
 0x7bb   :  { %v3911_v53 = vpop.eup %3910  ;;  %v1828_v44 = vmul.f32 %v3909_v46, %v1826_v49  ;;  %vm1833_vm2 = vweird.f32 %v3909_v46  ;;  %v1859_v49 = vor.u32 1.1754944e-38, %v1858_v5 }
 0x7bc   :  { %v1848_v34 = vmul.f32 %v3911_v53, %v1846_v12  ;;  %vm1834_vm4 = vmor %vm1832_vm3, %vm1833_vm2  ;;  %vm1853_vm6 = vweird.f32 %v3911_v53  ;;  %v5768_v12 = vld [vmem:[#allocation7 + $0x2f0] sm:$0xff] }
 0x7bd   :  { %v1829_v1 = vsub.f32 1.0, %v1828_v44  ;;  %vm1854_vm8 = vmor %vm1852_vm7, %vm1853_vm6 }
 0x7be   :  { %v1849_v58 = vsub.f32 1.0, %v1848_v34 }
 0x7bf   :  { %v1830_v48 = vmul.f32 %v3909_v46, %v1829_v1 }
 0x7c0   :  { %v1850_v3 = vmul.f32 %v3911_v53, %v1849_v58 }
 0x7c1   :  { %v1831_v23 = vadd.f32 %v3909_v46, %v1830_v48 }
 0x7c2   :  { %v1851_v19 = vadd.f32 %v3911_v53, %v1850_v3  ;;  %v5783_v3 = vld [vmem:[#allocation7 + $0x2a8] sm:$0xff] }
 0x7c3   :  { %v1835_v57 = vsel %vm1834_vm4, %v3909_v46, %v1831_v23  ;;  %v7031_v23 = vld [vmem:[#allocation44_spill] sm:$0xff] }
 0x7c4   :  { %v1840_v35 = vsel %vm1837_vm5, %v1839_v56, %v1835_v57  ;;  %v1855_v34 = vsel %vm1854_vm8, %v3911_v53, %v1851_v19  ;;  %v5773_v53 = vld [vmem:[#allocation7 + $0x2d8] sm:$0xff]  ;;  %v1357_v56 = vadd.f32 %v7031_v23, %v7027_v7  ;;  %v1398_v19 = vadd.f32 %v5638_v22, %v7025_v40 }
 0x7c5   :  { %v1862_v0 = vmul.f32 %v1840_v35, %v1820_v26  ;;  %v1860_v1 = vsel %vm1857_vm9, %v1859_v49, %v1855_v34 }
 0x7c6   :  { %v1865_v31 = vsub.f32 1.0, %v1860_v1  ;;  %v1867_v48 = vmul.f32 %v1860_v1, %v5664_v30 }
 0x7c7   :  { %v1863_v44 = vadd.f32 %v1862_v0, %v1436_v37 }
 0x7c9   :  { %3912 = vtanh.f32 %v1863_v44 }
 0x7cf   :  { %v3913_v46 = vpop.eup %3912 }
 0x7d0   :  { %v1866_v58 = vmul.f32 %v3913_v46, %v1865_v31 }
 0x7d2   :  { %v5759_v17 = vadd.f32 %v1867_v48, %v1866_v58 }
 0x7d4   :  { %1889 = vmatmul.f32.vlgmr.msra.gmra.mxu1 %v5759_v17  ;;  %1909 = vmatmul.f32.vlgmr.msrb.gmra.mxu2 %v5759_v17 }
 0x7d5   :  { %1929 = vmatmul.f32.vlgmr.msrb.gmra.mxu3 %v5759_v17  ;;  %2135 = vmatpush.msra.mxu1 %v5764_v21 }
 0x7d6   :  { %2206 = vmatpush.msrb.mxu2 %v5670_v11  ;;  %2226 = vmatpush.msrb.mxu3 %v5768_v12 }
 0x7d7   :  { %2136 = vmatpush.msra.mxu1 %v5392_v14  ;;  %v5788_v14 = vld [vmem:[#allocation7 + $0x290] sm:$0xff] }
 0x7d8   :  { %2207 = vmatpush.msrb.mxu2 %v5675_v39  ;;  %2227 = vmatpush.msrb.mxu3 %v5773_v53 }
 0x7d9   :  { %2137 = vmatpush.msra.mxu1 %v5400_v25  ;;  %v5793_v25 = vld [vmem:[#allocation7 + $0x278] sm:$0xff] }
 0x7da   :  { %2208 = vmatpush.msrb.mxu2 %v5680_v45  ;;  %2228 = vmatpush.msrb.mxu3 %v5778_v4 }
 0x7db   :  { %2138 = vmatpush.msra.mxu1 %v5402_v32  ;;  %v5798_v32 = vld [vmem:[#allocation7 + $0x260] sm:$0xff] }
 0x7dc   :  { %2209 = vmatpush.msrb.mxu2 %v5685_v62  ;;  %2229 = vmatpush.msrb.mxu3 %v5783_v3 }
 0x7dd   :  { %2139 = vmatpush.msra.mxu1 %v5409_v41  ;;  %v5803_v41 = vld [vmem:[#allocation7 + $0x248] sm:$0xff] }
 0x7de   :  { %2210 = vmatpush.msrb.mxu2 %v5690_v59  ;;  %2230 = vmatpush.msrb.mxu3 %v5788_v14 }
 0x7df   :  { %2140 = vmatpush.msra.mxu1 %v5414_v18  ;;  %v5808_v18 = vld [vmem:[#allocation7 + $0x230] sm:$0xff] }
 0x7e0   :  { %2211 = vmatpush.msrb.mxu2 %v5695_v24  ;;  %2231 = vmatpush.msrb.mxu3 %v5793_v25 }
 0x7e1   :  { %2141 = vmatpush.msra.mxu1 %v5419_v29  ;;  %v5813_v29 = vld [vmem:[#allocation7 + $0x218] sm:$0xff] }
 0x7e2   :  { %2212 = vmatpush.msrb.mxu2 %v5700_v51  ;;  %2232 = vmatpush.msrb.mxu3 %v5798_v32 }
 0x7e3   :  { %2142 = vmatpush.msra.mxu1 %v5424_v36  ;;  %v5818_v36 = vld [vmem:[#allocation7 + $0x200] sm:$0xff] }
 0x7e4   :  { %2213 = vmatpush.msrb.mxu2 %v5705_v16  ;;  %2233 = vmatpush.msrb.mxu3 %v5803_v41 }
 0x7e5   :  { %2143 = vmatpush.msra.mxu1 %v5431_v33  ;;  %v5823_v33 = vld [vmem:[#allocation7 + $0x1e8] sm:$0xff] }
 0x7e6   :  { %2214 = vmatpush.msrb.mxu2 %v5710_v54  ;;  %2234 = vmatpush.msrb.mxu3 %v5808_v18 }
 0x7e7   :  { %2144 = vmatpush.msra.mxu1 %v5440_v28  ;;  %v5828_v28 = vld [vmem:[#allocation7 + $0x1d0] sm:$0xff] }
 0x7e8   :  { %2215 = vmatpush.msrb.mxu2 %v5715_v63  ;;  %2235 = vmatpush.msrb.mxu3 %v5813_v29 }
 0x7e9   :  { %2145 = vmatpush.msra.mxu1 %v5445_v47  ;;  %v5833_v47 = vld [vmem:[#allocation7 + $0x1b8] sm:$0xff] }
 0x7ea   :  { %2216 = vmatpush.msrb.mxu2 %v5720_v61  ;;  %2236 = vmatpush.msrb.mxu3 %v5818_v36 }
 0x7eb   :  { %2146 = vmatpush.msra.mxu1 %v5452_v13  ;;  %v5838_v13 = vld [vmem:[#allocation7 + $0x1a0] sm:$0xff] }
 0x7ec   :  { %2217 = vmatpush.msrb.mxu2 %v5725_v8  ;;  %2237 = vmatpush.msrb.mxu3 %v5823_v33 }
 0x7ed   :  { %2147 = vmatpush.msra.mxu1 %v7008_v55  ;;  %v5843_v55 = vld [vmem:[#allocation7 + $0x188] sm:$0xff] }
 0x7ee   :  { %2218 = vmatpush.msrb.mxu2 %v5730_v42  ;;  %2238 = vmatpush.msrb.mxu3 %v5828_v28 }
 0x7ef   :  { %2148 = vmatpush.msra.mxu1 %v7009_v50 }
 0x7f0   :  { %2219 = vmatpush.msrb.mxu2 %v5735_v9  ;;  %2239 = vmatpush.msrb.mxu3 %v5833_v47 }
 0x7f1   :  { %2149 = vmatpush.msra.mxu1 %v7010_v27 }
 0x7f2   :  { %2220 = vmatpush.msrb.mxu2 %v5740_v38  ;;  %2240 = vmatpush.msrb.mxu3 %v5838_v13 }
 0x7f3   :  { %2150 = vmatpush.msra.mxu1 %v7013_v60 }
 0x7f4   :  { %2221 = vmatpush.msrb.mxu2 %v5745_v10  ;;  %2241 = vmatpush.msrb.mxu3 %v5843_v55 }
 0x851   :  { %v1890_v50 = vpop.f32.mrf.mxu1 }
 0x852   :  { %v1891_v27 = vadd.f32 %v1890_v50, %v7029_v2 }
 0x854   :  { %v1933_v26 = vadd.f32 %v1891_v27, %v1357_v56 }
 0x856   :  { %v3764_v57 = vmul.f32 -1.442695, %v1933_v26 }
 0x857   :  { %v1910_v35 = vpop.f32.mrf.mxu2 }
 0x858   :  { %3914 = vpow2.f32 %v3764_v57  ;;  %v1911_v60 = vadd.f32 %v1910_v35, %v7026_v43  ;;  %v1930_v50 = vpop.f32.mrf.mxu3 }
 0x859   :  { %v1931_v57 = vadd.f32 %v1930_v50, %v5572_v15 }
 0x85a   :  { %v1953_v37 = vadd.f32 %v1911_v60, %v1398_v19  ;;  %v7032_v19 = vld [vmem:[#allocation45_spill] sm:$0xff] }
 0x85b   :  { %v1439_v60 = vadd.f32 %v7032_v19, %v5574_v6 }
 0x85c   :  { %v3765_v0 = vmul.f32 -1.442695, %v1953_v37 }
 0x85e   :  { %v3915_v5 = vpop.eup %3914  ;;  %3916 = vpow2.f32 %v3765_v0 }
 0x85f   :  { %v1937_v52 = vadd.f32 1.0, %v3915_v5 }
 0x861   :  { %3918 = vrcp.f32 %v1937_v52  ;;  %v1949_v46 = vand.u32 2147483648, %v1937_v52  ;;  %v1947_v48 = vand.u32 2147483647, %v1937_v52  ;;  %vm1943_vm11 = vweird.f32 %v1937_v52 }
 0x863   :  { %v1950_v27 = vor.u32 1.1754944e-38, %v1949_v46  ;;  %vm1948_vm13 = vcmp.eq.f32.partialorder %v1947_v48, 8.507059e+37 }
 0x864   :  { %v3917_v44 = vpop.eup %3916 }
 0x865   :  { %v1957_v34 = vadd.f32 1.0, %v3917_v44 }
 0x867   :  { %v3919_v49 = vpop.eup %3918  ;;  %3920 = vrcp.f32 %v1957_v34  ;;  %v1969_v5 = vand.u32 2147483648, %v1957_v34  ;;  %vm1963_vm15 = vweird.f32 %v1957_v34 }
 0x868   :  { %v1939_v1 = vmul.f32 %v3919_v49, %v1937_v52  ;;  %vm1944_vm10 = vweird.f32 %v3919_v49 }
 0x869   :  { %vm1945_vm12 = vmor %vm1943_vm11, %vm1944_vm10  ;;  %v1970_v46 = vor.u32 1.1754944e-38, %v1969_v5 }
 0x86a   :  { %v1940_v31 = vsub.f32 1.0, %v1939_v1  ;;  %v1967_v1 = vand.u32 2147483647, %v1957_v34 }
 0x86c   :  { %v1941_v58 = vmul.f32 %v3919_v49, %v1940_v31  ;;  %vm1968_vm1 = vcmp.eq.f32.partialorder %v1967_v1, 8.507059e+37 }
 0x86d   :  { %v3921_v22 = vpop.eup %3920 }
 0x86e   :  { %v1959_v23 = vmul.f32 %v3921_v22, %v1957_v34  ;;  %v1942_v56 = vadd.f32 %v3919_v49, %v1941_v58  ;;  %vm1964_vm14 = vweird.f32 %v3921_v22  ;;  %v5864_v34 = vld [vmem:[#allocation7 + $0x2e0] sm:$0xff] }
 0x86f   :  { %vm1965_vm0 = vmor %vm1963_vm15, %vm1964_vm14 }
 0x870   :  { %v1960_v26 = vsub.f32 1.0, %v1959_v23  ;;  %v1946_v35 = vsel %vm1945_vm12, %v3919_v49, %v1942_v56 }
 0x871   :  { %v1951_v37 = vsel %vm1948_vm13, %v1950_v27, %v1946_v35 }
 0x872   :  { %v1961_v0 = vmul.f32 %v3921_v22, %v1960_v26  ;;  %v1973_v44 = vmul.f32 %v1951_v37, %v1931_v57  ;;  %v5874_v26 = vld [vmem:[#allocation7 + $0x2b0] sm:$0xff] }
 0x874   :  { %v1962_v31 = vadd.f32 %v3921_v22, %v1961_v0  ;;  %v1974_v58 = vadd.f32 %v1973_v44, %v1439_v60 }
 0x876   :  { %v1966_v52 = vsel %vm1965_vm0, %v3921_v22, %v1962_v31  ;;  %3922 = vtanh.f32 %v1974_v58  ;;  %v5869_v22 = vld [vmem:[#allocation7 + $0x2c8] sm:$0xff] }
 0x877   :  { %v1971_v50 = vsel %vm1968_vm1, %v1970_v46, %v1966_v52 }
 0x878   :  { %v1976_v49 = vsub.f32 1.0, %v1971_v50  ;;  %v1978_v56 = vmul.f32 %v1971_v50, %v5759_v17  ;;  %v7035_v50 = vld [vmem:[#allocation35_spill] sm:$0xff] }
 0x87c   :  { %v3923_v48 = vpop.eup %3922 }
 0x87d   :  { %v1977_v23 = vmul.f32 %v3923_v48, %v1976_v49  ;;  %v1442_v49 = vadd.f32 %v7035_v50, %v5574_v6 }
 0x87f   :  { %v5856_v27 = vadd.f32 %v1978_v56, %v1977_v23 }
 0x881   :  { %2000 = vmatmul.f32.vlgmr.msra.gmra.mxu0 %v5856_v27  ;;  %2020 = vmatmul.f32.vlgmr.msrb.gmra.mxu1 %v5856_v27 }
 0x882   :  { %2040 = vmatmul.f32.vlgmr.msra.gmra.mxu2 %v5856_v27  ;;  %2246 = vmatpush.msra.mxu0 %v5764_v21 }
 0x883   :  { %2317 = vmatpush.msrb.mxu1 %v5670_v11  ;;  %2337 = vmatpush.msra.mxu2 %v5768_v12  ;;  %v5879_v11 = vld [vmem:[#allocation7 + $0x298] sm:$0xff] }
 0x884   :  { %2247 = vmatpush.msra.mxu0 %v5864_v34  ;;  %v7033_v12 = vld [vmem:[#allocation33_spill] sm:$0xff] }
 0x885   :  { %2318 = vmatpush.msrb.mxu1 %v5675_v39  ;;  %2338 = vmatpush.msra.mxu2 %v5773_v53  ;;  %v5884_v39 = vld [vmem:[#allocation7 + $0x280] sm:$0xff]  ;;  %v1360_v53 = vadd.f32 %v7033_v12, %v7027_v7 }
 0x886   :  { %2248 = vmatpush.msra.mxu0 %v5869_v22 }
 0x887   :  { %2319 = vmatpush.msrb.mxu1 %v5680_v45  ;;  %2339 = vmatpush.msra.mxu2 %v5778_v4  ;;  %v5889_v45 = vld [vmem:[#allocation7 + $0x268] sm:$0xff]  ;;  %v7034_v4 = vld [vmem:[#allocation40_spill] sm:$0xff] }
 0x888   :  { %2249 = vmatpush.msra.mxu0 %v5874_v26 }
 0x889   :  { %2320 = vmatpush.msrb.mxu1 %v5685_v62  ;;  %2340 = vmatpush.msra.mxu2 %v5783_v3  ;;  %v5894_v62 = vld [vmem:[#allocation7 + $0x250] sm:$0xff]  ;;  %v1401_v3 = vadd.f32 %v7034_v4, %v7025_v40 }
 0x88a   :  { %2250 = vmatpush.msra.mxu0 %v5879_v11 }
 0x88b   :  { %2321 = vmatpush.msrb.mxu1 %v5690_v59  ;;  %2341 = vmatpush.msra.mxu2 %v5788_v14  ;;  %v5899_v59 = vld [vmem:[#allocation7 + $0x238] sm:$0xff] }
 0x88c   :  { %2251 = vmatpush.msra.mxu0 %v5884_v39 }
 0x88d   :  { %2322 = vmatpush.msrb.mxu1 %v5695_v24  ;;  %2342 = vmatpush.msra.mxu2 %v5793_v25  ;;  %v5904_v24 = vld [vmem:[#allocation7 + $0x220] sm:$0xff] }
 0x88e   :  { %2252 = vmatpush.msra.mxu0 %v5889_v45 }
 0x88f   :  { %2323 = vmatpush.msrb.mxu1 %v5700_v51  ;;  %2343 = vmatpush.msra.mxu2 %v5798_v32  ;;  %v5909_v51 = vld [vmem:[#allocation7 + $0x208] sm:$0xff] }
 0x890   :  { %2253 = vmatpush.msra.mxu0 %v5894_v62 }
 0x891   :  { %2324 = vmatpush.msrb.mxu1 %v5705_v16  ;;  %2344 = vmatpush.msra.mxu2 %v5803_v41  ;;  %v5914_v16 = vld [vmem:[#allocation7 + $0x1f0] sm:$0xff] }
 0x892   :  { %2254 = vmatpush.msra.mxu0 %v5899_v59 }
 0x893   :  { %2325 = vmatpush.msrb.mxu1 %v5710_v54  ;;  %2345 = vmatpush.msra.mxu2 %v5808_v18  ;;  %v5919_v54 = vld [vmem:[#allocation7 + $0x1d8] sm:$0xff] }
 0x894   :  { %2255 = vmatpush.msra.mxu0 %v5904_v24 }
 0x895   :  { %2326 = vmatpush.msrb.mxu1 %v5715_v63  ;;  %2346 = vmatpush.msra.mxu2 %v5813_v29  ;;  %v5924_v63 = vld [vmem:[#allocation7 + $0x1c0] sm:$0xff] }
 0x896   :  { %2256 = vmatpush.msra.mxu0 %v5909_v51 }
 0x897   :  { %2327 = vmatpush.msrb.mxu1 %v5720_v61  ;;  %2347 = vmatpush.msra.mxu2 %v5818_v36  ;;  %v5929_v61 = vld [vmem:[#allocation7 + $0x1a8] sm:$0xff] }
 0x898   :  { %2257 = vmatpush.msra.mxu0 %v5914_v16 }
 0x899   :  { %2328 = vmatpush.msrb.mxu1 %v5725_v8  ;;  %2348 = vmatpush.msra.mxu2 %v5823_v33  ;;  %v5934_v8 = vld [vmem:[#allocation7 + $0x190] sm:$0xff] }
 0x89a   :  { %2258 = vmatpush.msra.mxu0 %v5919_v54 }
 0x89b   :  { %2329 = vmatpush.msrb.mxu1 %v5730_v42  ;;  %2349 = vmatpush.msra.mxu2 %v5828_v28 }
 0x89c   :  { %2259 = vmatpush.msra.mxu0 %v5924_v63 }
 0x89d   :  { %2330 = vmatpush.msrb.mxu1 %v5735_v9  ;;  %2350 = vmatpush.msra.mxu2 %v5833_v47 }
 0x89e   :  { %2260 = vmatpush.msra.mxu0 %v5929_v61 }
 0x89f   :  { %2331 = vmatpush.msrb.mxu1 %v5740_v38  ;;  %2351 = vmatpush.msra.mxu2 %v5838_v13 }
 0x8a0   :  { %2261 = vmatpush.msra.mxu0 %v5934_v8 }
 0x8a1   :  { %2332 = vmatpush.msrb.mxu1 %v5745_v10  ;;  %2352 = vmatpush.msra.mxu2 %v5843_v55 }
 0x8fe   :  { %v2001_v42 = vpop.f32.mrf.mxu0  ;;  %v2021_v9 = vpop.f32.mrf.mxu1 }
 0x8ff   :  { %v2002_v38 = vadd.f32 %v2001_v42, %v7029_v2  ;;  %v2022_v14 = vadd.f32 %v2021_v9, %v7026_v43 }
 0x901   :  { %v2044_v25 = vadd.f32 %v2002_v38, %v1360_v53  ;;  %v2064_v32 = vadd.f32 %v2022_v14, %v1401_v3 }
 0x903   :  { %v3766_v41 = vmul.f32 -1.442695, %v2044_v25  ;;  %v3767_v18 = vmul.f32 -1.442695, %v2064_v32 }
 0x905   :  { %3924 = vpow2.f32 %v3766_v41  ;;  %v2041_v5 = vpop.f32.mrf.mxu2  ;;  %v2466_v41 = vld [vmem:[#allocation4 + $0x270] sm:$0xff] }
 0x906   :  { %3926 = vpow2.f32 %v3767_v18  ;;  %v2042_v31 = vadd.f32 %v2041_v5, %v5572_v15  ;;  %v2463_v18 = vld [vmem:[#allocation4 + $0x258] sm:$0xff] }
 0x90b   :  { %v3925_v10 = vpop.eup %3924 }
 0x90c   :  { %v3927_v29 = vpop.eup %3926  ;;  %v2048_v36 = vadd.f32 1.0, %v3925_v10 }
 0x90d   :  { %v2068_v33 = vadd.f32 1.0, %v3927_v29  ;;  %v2460_v29 = vld [vmem:[#allocation4 + $0x240] sm:$0xff] }
 0x90e   :  { %3928 = vrcp.f32 %v2048_v36  ;;  %v2060_v19 = vand.u32 2147483648, %v2048_v36  ;;  %v2058_v37 = vand.u32 2147483647, %v2048_v36  ;;  %vm2054_vm3 = vweird.f32 %v2048_v36 }
 0x90f   :  { %3930 = vrcp.f32 %v2068_v33  ;;  %v2080_v48 = vand.u32 2147483648, %v2068_v33  ;;  %vm2074_vm7 = vweird.f32 %v2068_v33  ;;  %v2078_v56 = vand.u32 2147483647, %v2068_v33 }
 0x910   :  { %v2061_v1 = vor.u32 1.1754944e-38, %v2060_v19  ;;  %vm2059_vm5 = vcmp.eq.f32.partialorder %v2058_v37, 8.507059e+37  ;;  %v2445_v19 = vld [vmem:[#allocation4 + $0x1c8] sm:$0xff] }
 0x911   :  { %v2081_v12 = vor.u32 1.1754944e-38, %v2080_v48  ;;  %vm2079_vm9 = vcmp.eq.f32.partialorder %v2078_v56, 8.507059e+37 }
 0x914   :  { %v3929_v28 = vpop.eup %3928 }
 0x915   :  { %v3931_v47 = vpop.eup %3930  ;;  %v2050_v13 = vmul.f32 %v3929_v28, %v2048_v36  ;;  %vm2055_vm2 = vweird.f32 %v3929_v28 }
 0x916   :  { %v2070_v55 = vmul.f32 %v3931_v47, %v2068_v33  ;;  %vm2056_vm4 = vmor %vm2054_vm3, %vm2055_vm2  ;;  %vm2075_vm6 = vweird.f32 %v3931_v47  ;;  %v2457_v33 = vld [vmem:[#allocation4 + $0x228] sm:$0xff] }
 0x917   :  { %v2051_v57 = vsub.f32 1.0, %v2050_v13  ;;  %vm2076_vm8 = vmor %vm2074_vm7, %vm2075_vm6  ;;  %v2451_v13 = vld [vmem:[#allocation4 + $0x1f8] sm:$0xff] }
 0x918   :  { %v2071_v35 = vsub.f32 1.0, %v2070_v55 }
 0x919   :  { %v2052_v60 = vmul.f32 %v3929_v28, %v2051_v57  ;;  %v2448_v57 = vld [vmem:[#allocation4 + $0x1e0] sm:$0xff] }
 0x91a   :  { %v2072_v0 = vmul.f32 %v3931_v47, %v2071_v35 }
 0x91b   :  { %v2053_v44 = vadd.f32 %v3929_v28, %v2052_v60  ;;  %v2442_v60 = vld [vmem:[#allocation4 + $0x1b0] sm:$0xff] }
 0x91c   :  { %v2073_v46 = vadd.f32 %v3931_v47, %v2072_v0  ;;  %v2439_v0 = vld [vmem:[#allocation4 + $0x198] sm:$0xff] }
 0x91d   :  { %v2057_v58 = vsel %vm2056_vm4, %v3929_v28, %v2053_v44  ;;  %v2454_v28 = vld [vmem:[#allocation4 + $0x210] sm:$0xff] }
 0x91e   :  { %v2062_v52 = vsel %vm2059_vm5, %v2061_v1, %v2057_v58  ;;  %v2077_v9 = vsel %vm2076_vm8, %v3931_v47, %v2073_v46  ;;  %v2436_v1 = vld [vmem:[#allocation4 + $0x180] sm:$0xff] }
 0x91f   :  { %v2084_v23 = vmul.f32 %v2062_v52, %v2042_v31  ;;  %v2082_v53 = vsel %vm2079_vm9, %v2081_v12, %v2077_v9 }
 0x920   :  { %v2087_v4 = vsub.f32 1.0, %v2082_v53  ;;  %v2089_v14 = vmul.f32 %v2082_v53, %v5856_v27 }
 0x921   :  { %v2085_v42 = vadd.f32 %v2084_v23, %v1442_v49 }
 0x923   :  { %3932 = vtanh.f32 %v2085_v42 }
 0x929   :  { %v3933_v3 = vpop.eup %3932 }
 0x92a   :  { %v2088_v38 = vmul.f32 %v3933_v3, %v2087_v4  ;;  %v7038_v4 = vld [vmem:[#allocation27_spill] sm:$0xff] }
 0x92b   :  { %v1445_v3 = vadd.f32 %v7038_v4, %v5574_v6  ;;  %v6030_v4 = vld [vmem:[#allocation7 + $0x360] sm:$0xff] }
 0x92c   :  { %v5949_v25 = vadd.f32 %v2089_v14, %v2088_v38 }
 0x92e   :  { %2111 = vmatmul.f32.vlgmr.msra.gmra.mxu3 %v5949_v25  ;;  %2131 = vmatmul.f32.vlgmr.msrb.gmra.mxu0 %v5949_v25 }
 0x92f   :  { %2151 = vmatmul.f32.vlgmr.msra.gmra.mxu1 %v5949_v25  ;;  %2357 = vmatpush.msra.mxu3 %v5764_v21 }
 0x931   :  { %2358 = vmatpush.msra.mxu3 %v5864_v34  ;;  %v7036_v34 = vld [vmem:[#allocation37_spill] sm:$0xff] }
 0x933   :  { %2359 = vmatpush.msra.mxu3 %v5869_v22  ;;  %v1404_v22 = vadd.f32 %v7036_v34, %v7025_v40 }
 0x935   :  { %2360 = vmatpush.msra.mxu3 %v5874_v26 }
 0x937   :  { %2361 = vmatpush.msra.mxu3 %v5879_v11  ;;  %v2481_v11 = vld [vmem:[#allocation4 + $0x2e8] sm:$0xff] }
 0x938   :  { %2493 = vmatpush.msrb.mxu0 %v2481_v11 }
 0x939   :  { %2362 = vmatpush.msra.mxu3 %v5884_v39 }
 0x93b   :  { %2363 = vmatpush.msra.mxu3 %v5889_v45  ;;  %v2478_v45 = vld [vmem:[#allocation4 + $0x2d0] sm:$0xff] }
 0x93c   :  { %2494 = vmatpush.msrb.mxu0 %v2478_v45 }
 0x93d   :  { %2364 = vmatpush.msra.mxu3 %v5894_v62 }
 0x93f   :  { %2365 = vmatpush.msra.mxu3 %v5899_v59  ;;  %v2475_v59 = vld [vmem:[#allocation4 + $0x2b8] sm:$0xff] }
 0x940   :  { %2495 = vmatpush.msrb.mxu0 %v2475_v59 }
 0x941   :  { %2366 = vmatpush.msra.mxu3 %v5904_v24 }
 0x943   :  { %2367 = vmatpush.msra.mxu3 %v5909_v51  ;;  %v7037_v51 = vld [vmem:[#allocation50_spill] sm:$0xff] }
 0x945   :  { %2368 = vmatpush.msra.mxu3 %v5914_v16  ;;  %v1363_v16 = vadd.f32 %v7037_v51, %v7027_v7  ;;  %v5991_v51 = vld [vmem:[#allocation7 + $0x468] sm:$0xff] }
 0x947   :  { %2369 = vmatpush.msra.mxu3 %v5919_v54 }
 0x949   :  { %2370 = vmatpush.msra.mxu3 %v5924_v63  ;;  %v2472_v63 = vld [vmem:[#allocation4 + $0x2a0] sm:$0xff] }
 0x94a   :  { %2496 = vmatpush.msrb.mxu0 %v2472_v63  ;;  %v6000_v63 = vld [vmem:[#allocation7 + $0x420] sm:$0xff] }
 0x94b   :  { %2371 = vmatpush.msra.mxu3 %v5929_v61 }
 0x94d   :  { %2372 = vmatpush.msra.mxu3 %v5934_v8  ;;  %v2469_v8 = vld [vmem:[#allocation4 + $0x288] sm:$0xff] }
 0x94e   :  { %2497 = vmatpush.msrb.mxu0 %v2469_v8  ;;  %v2483_v8 = vld [vmem:[#allocation4 + $0x2f8] sm:$0xff] }
 0x950   :  { %2498 = vmatpush.msrb.mxu0 %v2466_v41  ;;  %v2479_v41 = vld [vmem:[#allocation4 + $0x2d8] sm:$0xff] }
 0x952   :  { %2499 = vmatpush.msrb.mxu0 %v2463_v18  ;;  %v2480_v18 = vld [vmem:[#allocation4 + $0x2e0] sm:$0xff] }
 0x954   :  { %2500 = vmatpush.msrb.mxu0 %v2460_v29  ;;  %v2476_v29 = vld [vmem:[#allocation4 + $0x2c0] sm:$0xff] }
 0x956   :  { %2501 = vmatpush.msrb.mxu0 %v2457_v33  ;;  %v6009_v33 = vld [vmem:[#allocation7 + $0x3d8] sm:$0xff] }
 0x958   :  { %2502 = vmatpush.msrb.mxu0 %v2454_v28 }
 0x95a   :  { %2503 = vmatpush.msrb.mxu0 %v2451_v13  ;;  %v7039_v13 = vld [vmem:[#allocation36_spill] sm:$0xff] }
 0x95c   :  { %2504 = vmatpush.msrb.mxu0 %v2448_v57  ;;  %v7040_v57 = vld [vmem:[#allocation29_spill] sm:$0xff] }
 0x95e   :  { %2505 = vmatpush.msrb.mxu0 %v2445_v19 }
 0x960   :  { %2506 = vmatpush.msrb.mxu0 %v2442_v60 }
 0x962   :  { %2507 = vmatpush.msrb.mxu0 %v2439_v0  ;;  %v2474_v0 = vld [vmem:[#allocation4 + $0x2b0] sm:$0xff] }
 0x964   :  { %2508 = vmatpush.msrb.mxu0 %v2436_v1 }
 0x9ab   :  { %v2132_v21 = vpop.f32.mrf.mxu0 }
 0x9ac   :  { %v2133_v26 = vadd.f32 %v2132_v21, %v7026_v43  ;;  %v2152_v48 = vpop.f32.mrf.mxu1 }
 0x9ad   :  { %v2153_v42 = vadd.f32 %v2152_v48, %v5572_v15  ;;  %v2468_v48 = vld [vmem:[#allocation4 + $0x280] sm:$0xff] }
 0x9ae   :  { %v2175_v39 = vadd.f32 %v2133_v26, %v1404_v22 }
 0x9b0   :  { %v3769_v62 = vmul.f32 -1.442695, %v2175_v39 }
 0x9b1   :  { %v2112_v24 = vpop.f32.mrf.mxu3 }
 0x9b2   :  { %3934 = vpow2.f32 %v3769_v62  ;;  %v2113_v54 = vadd.f32 %v2112_v24, %v7029_v2 }
 0x9b4   :  { %v2155_v61 = vadd.f32 %v2113_v54, %v1363_v16  ;;  %v5994_v16 = vld [vmem:[#allocation7 + $0x450] sm:$0xff]  ;;  %v5997_v54 = vld [vmem:[#allocation7 + $0x438] sm:$0xff] }
 0x9b6   :  { %v3768_v32 = vmul.f32 -1.442695, %v2155_v61  ;;  %v2482_v61 = vld [vmem:[#allocation4 + $0x2f0] sm:$0xff] }
 0x9b7   :  { %2534 = vmatpush.msra.mxu1 %v2482_v61 }
 0x9b8   :  { %v3935_v10 = vpop.eup %3934  ;;  %3936 = vpow2.f32 %v3768_v32  ;;  %v6003_v32 = vld [vmem:[#allocation7 + $0x408] sm:$0xff] }
 0x9b9   :  { %v2179_v36 = vadd.f32 1.0, %v3935_v10  ;;  %v6006_v10 = vld [vmem:[#allocation7 + $0x3f0] sm:$0xff]  ;;  %2535 = vmatpush.msra.mxu1 %v2479_v41 }
 0x9ba   :  { %v2450_v41 = vld [vmem:[#allocation4 + $0x1f0] sm:$0xff] }
 0x9bb   :  { %3938 = vrcp.f32 %v2179_v36  ;;  %v2191_v38 = vand.u32 2147483648, %v2179_v36  ;;  %vm2185_vm15 = vweird.f32 %v2179_v36  ;;  %v2189_v21 = vand.u32 2147483647, %v2179_v36  ;;  %2536 = vmatpush.msra.mxu1 %v2476_v29  ;;  %v2446_v29 = vld [vmem:[#allocation4 + $0x1d0] sm:$0xff] }
 0x9bd   :  { %v2192_v26 = vor.u32 1.1754944e-38, %v2191_v38  ;;  %vm2190_vm1 = vcmp.eq.f32.partialorder %v2189_v21, 8.507059e+37  ;;  %v2459_v38 = vld [vmem:[#allocation4 + $0x238] sm:$0xff] }
 0x9be   :  { %v3937_v47 = vpop.eup %3936 }
 0x9bf   :  { %v2159_v55 = vadd.f32 1.0, %v3937_v47 }
 0x9c1   :  { %3940 = vrcp.f32 %v2159_v55  ;;  %v3939_v35 = vpop.eup %3938  ;;  %v2171_v52 = vand.u32 2147483648, %v2159_v55  ;;  %v2169_v50 = vand.u32 2147483647, %v2159_v55  ;;  %vm2165_vm11 = vweird.f32 %v2159_v55 }
 0x9c2   :  { %v2181_v37 = vmul.f32 %v3939_v35, %v2179_v36  ;;  %vm2186_vm14 = vweird.f32 %v3939_v35  ;;  %v2477_v36 = vld [vmem:[#allocation4 + $0x2c8] sm:$0xff] }
 0x9c3   :  { %v2172_v56 = vor.u32 1.1754944e-38, %v2171_v52  ;;  %vm2170_vm13 = vcmp.eq.f32.partialorder %v2169_v50, 8.507059e+37  ;;  %vm2187_vm0 = vmor %vm2185_vm15, %vm2186_vm14  ;;  %v6021_v52 = vld [vmem:[#allocation7 + $0x3a8] sm:$0xff] }
 0x9c4   :  { %v2182_v31 = vsub.f32 1.0, %v2181_v37  ;;  %v2473_v37 = vld [vmem:[#allocation4 + $0x2a8] sm:$0xff] }
 0x9c5   :  { %2537 = vmatpush.msra.mxu1 %v2473_v37  ;;  %v2437_v37 = vld [vmem:[#allocation4 + $0x188] sm:$0xff] }
 0x9c6   :  { %v2183_v49 = vmul.f32 %v3939_v35, %v2182_v31  ;;  %v2470_v31 = vld [vmem:[#allocation4 + $0x290] sm:$0xff] }
 0x9c7   :  { %v3941_v5 = vpop.eup %3940  ;;  %2538 = vmatpush.msra.mxu1 %v2470_v31 }
 0x9c8   :  { %v2161_v44 = vmul.f32 %v3941_v5, %v2159_v55  ;;  %vm2166_vm10 = vweird.f32 %v3941_v5  ;;  %v2184_v12 = vadd.f32 %v3939_v35, %v2183_v49  ;;  %v1366_v55 = vadd.f32 %v7039_v13, %v7027_v7  ;;  %v2467_v49 = vld [vmem:[#allocation4 + $0x278] sm:$0xff] }
 0x9c9   :  { %vm2167_vm12 = vmor %vm2165_vm11, %vm2166_vm10  ;;  %2539 = vmatpush.msra.mxu1 %v2467_v49 }
 0x9ca   :  { %v2162_v58 = vsub.f32 1.0, %v2161_v44  ;;  %v2188_v22 = vsel %vm2187_vm0, %v3939_v35, %v2184_v12  ;;  %v1407_v35 = vadd.f32 %v7040_v57, %v7025_v40  ;;  %v2461_v12 = vld [vmem:[#allocation4 + $0x248] sm:$0xff] }
 0x9cb   :  { %v2193_v11 = vsel %vm2190_vm1, %v2192_v26, %v2188_v22  ;;  %v2456_v22 = vld [vmem:[#allocation4 + $0x220] sm:$0xff]  ;;  %v6036_v26 = vld [vmem:[#allocation7 + $0x330] sm:$0xff]  ;;  %v2441_v57 = vld [vmem:[#allocation4 + $0x1a8] sm:$0xff] }
 0x9cc   :  { %v2163_v46 = vmul.f32 %v3941_v5, %v2162_v58  ;;  %v2198_v39 = vsub.f32 1.0, %v2193_v11  ;;  %v2200_v62 = vmul.f32 %v2193_v11, %v5949_v25  ;;  %v2471_v58 = vld [vmem:[#allocation4 + $0x298] sm:$0xff] }
 0x9ce   :  { %v2164_v23 = vadd.f32 %v3941_v5, %v2163_v46 }
 0x9d0   :  { %v2168_v9 = vsel %vm2167_vm12, %v3941_v5, %v2164_v23  ;;  %v6018_v5 = vld [vmem:[#allocation7 + $0x3c0] sm:$0xff]  ;;  %v6024_v23 = vld [vmem:[#allocation7 + $0x390] sm:$0xff] }
 0x9d1   :  { %v2173_v53 = vsel %vm2170_vm13, %v2172_v56, %v2168_v9  ;;  %v2464_v56 = vld [vmem:[#allocation4 + $0x260] sm:$0xff]  ;;  %v6027_v9 = vld [vmem:[#allocation7 + $0x378] sm:$0xff] }
 0x9d2   :  { %v2195_v14 = vmul.f32 %v2173_v53, %v2153_v42  ;;  %v2465_v42 = vld [vmem:[#allocation4 + $0x268] sm:$0xff]  ;;  %2540 = vmatpush.msra.mxu1 %v2464_v56  ;;  %v2462_v53 = vld [vmem:[#allocation4 + $0x250] sm:$0xff] }
 0x9d4   :  { %v2196_v34 = vadd.f32 %v2195_v14, %v1445_v3  ;;  %2541 = vmatpush.msra.mxu1 %v2461_v12  ;;  %v2458_v3 = vld [vmem:[#allocation4 + $0x230] sm:$0xff]  ;;  %v6033_v14 = vld [vmem:[#allocation7 + $0x348] sm:$0xff] }
 0x9d6   :  { %3942 = vtanh.f32 %v2196_v34  ;;  %2542 = vmatpush.msra.mxu1 %v2458_v3  ;;  %v2455_v34 = vld [vmem:[#allocation4 + $0x218] sm:$0xff] }
 0x9d8   :  { %2543 = vmatpush.msra.mxu1 %v2455_v34 }
 0x9dc   :  { %v3943_v45 = vpop.eup %3942 }
 0x9dd   :  { %v2199_v59 = vmul.f32 %v3943_v45, %v2198_v39  ;;  %v2452_v45 = vld [vmem:[#allocation4 + $0x200] sm:$0xff] }
 0x9de   :  { %2544 = vmatpush.msra.mxu1 %v2452_v45 }
 0x9df   :  { %v5980_v24 = vadd.f32 %v2200_v62, %v2199_v59  ;;  %v2453_v62 = vld [vmem:[#allocation4 + $0x208] sm:$0xff]  ;;  %v6038_v59 = vld [vmem:[#allocation7 + $0x318] sm:$0xff] }
 0x9e1   :  { %2222 = vmatmul.f32.vlgmr.msrb.gmra.mxu2 %v5980_v24  ;;  %2242 = vmatmul.f32.vlgmr.msrb.gmra.mxu3 %v5980_v24 }
 0x9e2   :  { %2262 = vmatmul.f32.vlgmr.msra.gmra.mxu0 %v5980_v24  ;;  %2703 = vmatpush.msrb.mxu3 %v5991_v51 }
 0x9e3   :  { %2575 = vmatpush.msrb.mxu2 %v2483_v8  ;;  %v2449_v8 = vld [vmem:[#allocation4 + $0x1e8] sm:$0xff] }
 0x9e4   :  { %2704 = vmatpush.msrb.mxu3 %v5994_v16  ;;  %2545 = vmatpush.msra.mxu1 %v2449_v8 }
 0x9e5   :  { %2576 = vmatpush.msrb.mxu2 %v2480_v18  ;;  %v6041_v18 = vld [vmem:[#allocation7 + $0x300] sm:$0xff] }
 0x9e6   :  { %2705 = vmatpush.msrb.mxu3 %v5997_v54  ;;  %7041 = vst [vmem:[#allocation38_spill] sm:$0xff] %v6041_v18  ;;  %2546 = vmatpush.msra.mxu1 %v2446_v29 }
 0x9e7   :  { %2577 = vmatpush.msrb.mxu2 %v2477_v36  ;;  %v2447_v36 = vld [vmem:[#allocation4 + $0x1d8] sm:$0xff] }
 0x9e8   :  { %2706 = vmatpush.msrb.mxu3 %v6000_v63 }
 0x9e9   :  { %2578 = vmatpush.msrb.mxu2 %v2474_v0  ;;  %v2438_v0 = vld [vmem:[#allocation4 + $0x190] sm:$0xff] }
 0x9ea   :  { %2509 = vmatmul.f32.vlgmr.msrb.gmra.mxu0 %v5579_v20  ;;  %2707 = vmatpush.msrb.mxu3 %v6003_v32 }
 0x9eb   :  { %2579 = vmatpush.msrb.mxu2 %v2471_v58 }
 0x9ec   :  { %2708 = vmatpush.msrb.mxu3 %v6006_v10 }
 0x9ed   :  { %2580 = vmatpush.msrb.mxu2 %v2468_v48 }
 0x9ee   :  { %2709 = vmatpush.msrb.mxu3 %v6009_v33 }
 0x9ef   :  { %2581 = vmatpush.msrb.mxu2 %v2465_v42 }
 0x9f0   :  { %2710 = vmatpush.msrb.mxu3 %v6018_v5 }
 0x9f1   :  { %2582 = vmatpush.msrb.mxu2 %v2462_v53 }
 0x9f2   :  { %2512 = vmatmul.f32.gmra.mxu0 %v5664_v30  ;;  %2711 = vmatpush.msrb.mxu3 %v6021_v52 }
 0x9f3   :  { %2583 = vmatpush.msrb.mxu2 %v2459_v38  ;;  %v7042_v38 = vld [vmem:[#allocation46_spill] sm:$0xff] }
 0x9f4   :  { %2712 = vmatpush.msrb.mxu3 %v6024_v23 }
 0x9f5   :  { %2584 = vmatpush.msrb.mxu2 %v2456_v22 }
 0x9f6   :  { %2713 = vmatpush.msrb.mxu3 %v6027_v9 }
 0x9f7   :  { %2585 = vmatpush.msrb.mxu2 %v2453_v62 }
 0x9f8   :  { %2714 = vmatpush.msrb.mxu3 %v6030_v4 }
 0x9f9   :  { %2586 = vmatpush.msrb.mxu2 %v2450_v41 }
 0x9fa   :  { %2515 = vmatmul.f32.gmra.mxu0 %v5759_v17  ;;  %2715 = vmatpush.msrb.mxu3 %v6033_v14 }
 0x9fb   :  { %2587 = vmatpush.msrb.mxu2 %v2447_v36 }
 0x9fc   :  { %2716 = vmatpush.msrb.mxu3 %v6036_v26 }
 0x9fe   :  { %2717 = vmatpush.msrb.mxu3 %v6038_v59 }
 0xa00   :  { %2718 = vmatpush.msrb.mxu3 %v6041_v18 }
 0xa02   :  { %2518 = vmatmul.f32.gmra.mxu0 %v5856_v27 }
 0xa0a   :  { %2521 = vmatmul.f32.gmra.mxu0 %v5949_v25 }
 0xa12   :  { %2524 = vmatmul.f32.gmra.mxu0 %v5980_v24 }
 0xa64   :  { %v2223_v28 = vpop.f32.mrf.mxu2  ;;  %v2243_v47 = vpop.f32.mrf.mxu3 }
 0xa65   :  { %v2224_v19 = vadd.f32 %v2223_v28, %v7029_v2  ;;  %v2244_v60 = vadd.f32 %v2243_v47, %v7026_v43  ;;  %v2443_v28 = vld [vmem:[#allocation4 + $0x1b8] sm:$0xff]  ;;  %v2444_v47 = vld [vmem:[#allocation4 + $0x1c0] sm:$0xff] }
 0xa66   :  { %2547 = vmatpush.msra.mxu1 %v2443_v28  ;;  %2588 = vmatpush.msrb.mxu2 %v2444_v47 }
 0xa67   :  { %v2266_v44 = vadd.f32 %v2224_v19, %v1366_v55  ;;  %v2286_v1 = vadd.f32 %v2244_v60, %v1407_v35  ;;  %v2440_v55 = vld [vmem:[#allocation4 + $0x1a0] sm:$0xff] }
 0xa68   :  { %2548 = vmatpush.msra.mxu1 %v2440_v55  ;;  %2589 = vmatpush.msrb.mxu2 %v2441_v57  ;;  %v6061_v55 = vld [vmem:[#allocation7 + $0x440] sm:$0xff]  ;;  %v6066_v57 = vld [vmem:[#allocation7 + $0x428] sm:$0xff] }
 0xa69   :  { %v3770_v46 = vmul.f32 -1.442695, %v2266_v44  ;;  %v3771_v50 = vmul.f32 -1.442695, %v2286_v1 }
 0xa6a   :  { %2549 = vmatpush.msra.mxu1 %v2437_v37  ;;  %2590 = vmatpush.msrb.mxu2 %v2438_v0  ;;  %v6087_v37 = vld [vmem:[#allocation7 + $0x3e0] sm:$0xff]  ;;  %v6092_v0 = vld [vmem:[#allocation7 + $0x3c8] sm:$0xff] }
 0xa6b   :  { %3944 = vpow2.f32 %v3770_v46 }
 0xa6c   :  { %3946 = vpow2.f32 %v3771_v50  ;;  %v2263_v50 = vpop.f32.mrf.mxu0 }
 0xa6d   :  { %v2264_v42 = vadd.f32 %v2263_v50, %v5572_v15  ;;  %v6128_v50 = vld [vmem:[#allocation7 + $0x460] sm:$0xff] }
 0xa71   :  { %v3945_v21 = vpop.eup %3944 }
 0xa72   :  { %v3947_v11 = vpop.eup %3946  ;;  %v2270_v39 = vadd.f32 1.0, %v3945_v21  ;;  %v1448_v21 = vadd.f32 %v7042_v38, %v5574_v6  ;;  %v6199_v38 = vld [vmem:[#allocation7 + $0x400] sm:$0xff] }
 0xa73   :  { %v2290_v61 = vadd.f32 1.0, %v3947_v11 }
 0xa74   :  { %3948 = vrcp.f32 %v2270_v39  ;;  %v2282_v1 = vand.u32 2147483648, %v2270_v39  ;;  %v2280_v46 = vand.u32 2147483647, %v2270_v39  ;;  %vm2276_vm3 = vweird.f32 %v2270_v39 }
 0xa75   :  { %3950 = vrcp.f32 %v2290_v61  ;;  %v2302_v22 = vand.u32 2147483648, %v2290_v61  ;;  %vm2296_vm7 = vweird.f32 %v2290_v61  ;;  %v2300_v11 = vand.u32 2147483647, %v2290_v61 }
 0xa76   :  { %v2283_v56 = vor.u32 1.1754944e-38, %v2282_v1  ;;  %vm2281_vm5 = vcmp.eq.f32.partialorder %v2280_v46, 8.507059e+37  ;;  %v6108_v1 = vld [vmem:[#allocation7 + $0x380] sm:$0xff]  ;;  %v6126_v46 = vld [vmem:[#allocation7 + $0x478] sm:$0xff] }
 0xa77   :  { %vm2301_vm9 = vcmp.eq.f32.partialorder %v2300_v11, 8.507059e+37  ;;  %2743 = vmatpush.msra.mxu0 %v6126_v46  ;;  %v6209_v11 = vld [vmem:[#allocation7 + $0x3d0] sm:$0xff] }
 0xa79   :  { %2744 = vmatpush.msra.mxu0 %v6128_v50 }
 0xa7a   :  { %v3949_v13 = vpop.eup %3948 }
 0xa7b   :  { %v3951_v35 = vpop.eup %3950  ;;  %v2272_v19 = vmul.f32 %v3949_v13, %v2270_v39  ;;  %vm2277_vm2 = vweird.f32 %v3949_v13  ;;  %v2303_v39 = vor.u32 1.1754944e-38, %v2302_v22 }
 0xa7c   :  { %v2292_v60 = vmul.f32 %v3951_v35, %v2290_v61  ;;  %vm2278_vm4 = vmor %vm2276_vm3, %vm2277_vm2  ;;  %vm2297_vm6 = vweird.f32 %v3951_v35  ;;  %v6057_v61 = vld [vmem:[#allocation7 + $0x458] sm:$0xff] }
 0xa7d   :  { %v2273_v44 = vsub.f32 1.0, %v2272_v19  ;;  %vm2298_vm8 = vmor %vm2296_vm7, %vm2297_vm6  ;;  %v6076_v19 = vld [vmem:[#allocation7 + $0x410] sm:$0xff] }
 0xa7e   :  { %v2293_v31 = vsub.f32 1.0, %v2292_v60  ;;  %v6083_v60 = vld [vmem:[#allocation7 + $0x3f8] sm:$0xff] }
 0xa7f   :  { %v2274_v58 = vmul.f32 %v3949_v13, %v2273_v44  ;;  %v6103_v44 = vld [vmem:[#allocation7 + $0x398] sm:$0xff] }
 0xa80   :  { %v2294_v49 = vmul.f32 %v3951_v35, %v2293_v31  ;;  %v6113_v31 = vld [vmem:[#allocation7 + $0x368] sm:$0xff] }
 0xa81   :  { %v2275_v48 = vadd.f32 %v3949_v13, %v2274_v58  ;;  %v6124_v58 = vld [vmem:[#allocation7 + $0x338] sm:$0xff] }
 0xa82   :  { %v2295_v3 = vadd.f32 %v3951_v35, %v2294_v49  ;;  %v6133_v49 = vld [vmem:[#allocation7 + $0x320] sm:$0xff] }
 0xa83   :  { %v2279_v12 = vsel %vm2278_vm4, %v3949_v13, %v2275_v48  ;;  %v6051_v13 = vld [vmem:[#allocation7 + $0x470] sm:$0xff]  ;;  %v7044_v48 = vld [vmem:[#allocation39_spill] sm:$0xff] }
 0xa84   :  { %v2284_v53 = vsel %vm2281_vm5, %v2283_v56, %v2279_v12  ;;  %v2299_v62 = vsel %vm2298_vm8, %v3951_v35, %v2295_v3  ;;  %v6073_v35 = vld [vmem:[%s6814_s1 + $0x10] sm:$0xff]  ;;  %v1369_v56 = vadd.f32 %v7044_v48, %v7027_v7  ;;  %v7045_v7 = vld [vmem:[#allocation28_spill] sm:$0xff]  ;;  %v6242_v48 = vld [vmem:[#allocation7 + $0x340] sm:$0xff] }
 0xa85   :  { %v2306_v34 = vmul.f32 %v2284_v53, %v2264_v42  ;;  %v2304_v8 = vsel %vm2301_vm9, %v2303_v39, %v2299_v62  ;;  %v6195_v53 = vld [vmem:[#allocation7 + $0x418] sm:$0xff]  ;;  %v6219_v39 = vld [vmem:[#allocation7 + $0x3a0] sm:$0xff]  ;;  %7049 = vst [vmem:[#allocation32_spill] sm:$0xff] %v6242_v48 }
 0xa86   :  { %v2309_v41 = vsub.f32 1.0, %v2304_v8  ;;  %v2311_v28 = vmul.f32 %v2304_v8, %v5980_v24  ;;  %v6214_v62 = vld [vmem:[#allocation7 + $0x3b8] sm:$0xff]  ;;  %v6224_v8 = vld [vmem:[#allocation7 + $0x388] sm:$0xff] }
 0xa87   :  { %v2307_v45 = vadd.f32 %v2306_v34, %v1448_v21  ;;  %v6201_v21 = vld [vmem:[#allocation7 + $0x3e8] sm:$0xff]  ;;  %7046 = vst [vmem:[#allocation31_spill] sm:$0xff] %v6224_v8 }
 0xa89   :  { %3952 = vtanh.f32 %v2307_v45 }
 0xa8f   :  { %v3953_v29 = vpop.eup %3952 }
 0xa90   :  { %v2310_v36 = vmul.f32 %v3953_v29, %v2309_v41  ;;  %v6229_v29 = vld [vmem:[#allocation7 + $0x370] sm:$0xff] }
 0xa91   :  { %7047 = vst [vmem:[#allocation49_spill] sm:$0xff] %v6229_v29 }
 0xa92   :  { %v6049_v47 = vadd.f32 %v2311_v28, %v2310_v36  ;;  %v6237_v28 = vld [vmem:[#allocation7 + $0x358] sm:$0xff] }
 0xa93   :  { %7048 = vst [vmem:[#allocation41_spill] sm:$0xff] %v6237_v28 }
 0xa94   :  { %2333 = vmatmul.f32.vlgmr.msrb.gmra.mxu1 %v6049_v47  ;;  %2353 = vmatmul.f32.vlgmr.msra.gmra.mxu2 %v6049_v47 }
 0xa95   :  { %2373 = vmatmul.f32.vlgmr.msra.gmra.mxu3 %v6049_v47  ;;  %2527 = vmatmul.f32.gmra.mxu0 %v6049_v47 }
 0xa96   :  { %2723 = vmatpush.msra.mxu3 %v6051_v13  ;;  %2814 = vmatpush.msrb.mxu1 %v5991_v51 }
 0xa97   :  { %2834 = vmatpush.msra.mxu2 %v6051_v13 }
 0xa98   :  { %2724 = vmatpush.msra.mxu3 %v6057_v61  ;;  %2815 = vmatpush.msrb.mxu1 %v5994_v16 }
 0xa99   :  { %2835 = vmatpush.msra.mxu2 %v6057_v61 }
 0xa9a   :  { %2725 = vmatpush.msra.mxu3 %v6061_v55  ;;  %2816 = vmatpush.msrb.mxu1 %v5997_v54 }
 0xa9b   :  { %2836 = vmatpush.msra.mxu2 %v6061_v55 }
 0xa9c   :  { %2726 = vmatpush.msra.mxu3 %v6066_v57  ;;  %2550 = vmatmul.f32.vlgmr.msra.gmra.mxu1 %v5579_v20 }
 0xa9d   :  { %2591 = vmatmul.f32.vlgmr.msrb.gmra.mxu2 %v5579_v20  ;;  %2719 = vmatmul.f32.vlgmr.msrb.gmra.mxu3 %v6073_v35  ;;  %v6097_v20 = vld [vmem:[#allocation7 + $0x3b0] sm:$0xff] }
 0xa9e   :  { %2727 = vmatpush.msra.mxu3 %v6076_v19  ;;  %2817 = vmatpush.msrb.mxu1 %v6000_v63 }
 0xa9f   :  { %2837 = vmatpush.msra.mxu2 %v6066_v57 }
 0xaa0   :  { %2728 = vmatpush.msra.mxu3 %v6083_v60  ;;  %2818 = vmatpush.msrb.mxu1 %v6003_v32 }
 0xaa1   :  { %2838 = vmatpush.msra.mxu2 %v6076_v19 }
 0xaa2   :  { %2729 = vmatpush.msra.mxu3 %v6087_v37  ;;  %2819 = vmatpush.msrb.mxu1 %v6006_v10 }
 0xaa3   :  { %2839 = vmatpush.msra.mxu2 %v6083_v60 }
 0xaa4   :  { %2730 = vmatpush.msra.mxu3 %v6092_v0  ;;  %2553 = vmatmul.f32.gmra.mxu1 %v5664_v30 }
 0xaa5   :  { %2594 = vmatmul.f32.gmra.mxu2 %v5664_v30  ;;  %2820 = vmatpush.msrb.mxu1 %v6009_v33  ;;  %v6118_v30 = vld [vmem:[#allocation7 + $0x350] sm:$0xff] }
 0xaa6   :  { %2731 = vmatpush.msra.mxu3 %v6097_v20  ;;  %2840 = vmatpush.msra.mxu2 %v6087_v37 }
 0xaa7   :  { %2821 = vmatpush.msrb.mxu1 %v6018_v5 }
 0xaa8   :  { %2732 = vmatpush.msra.mxu3 %v6103_v44  ;;  %2841 = vmatpush.msra.mxu2 %v6092_v0 }
 0xaa9   :  { %2822 = vmatpush.msrb.mxu1 %v6021_v52 }
 0xaaa   :  { %2733 = vmatpush.msra.mxu3 %v6108_v1  ;;  %2842 = vmatpush.msra.mxu2 %v6097_v20 }
 0xaab   :  { %2823 = vmatpush.msrb.mxu1 %v6024_v23 }
 0xaac   :  { %2734 = vmatpush.msra.mxu3 %v6113_v31  ;;  %2556 = vmatmul.f32.gmra.mxu1 %v5759_v17 }
 0xaad   :  { %2597 = vmatmul.f32.gmra.mxu2 %v5759_v17  ;;  %2824 = vmatpush.msrb.mxu1 %v6027_v9  ;;  %v6139_v17 = vld [vmem:[#allocation7 + $0x308] sm:$0xff] }
 0xaae   :  { %2735 = vmatpush.msra.mxu3 %v6118_v30  ;;  %2843 = vmatpush.msra.mxu2 %v6103_v44  ;;  %7043 = vst [vmem:[#allocation47_spill] sm:$0xff] %v6139_v17 }
 0xaaf   :  { %2825 = vmatpush.msrb.mxu1 %v6030_v4 }
 0xab0   :  { %2736 = vmatpush.msra.mxu3 %v6124_v58  ;;  %2844 = vmatpush.msra.mxu2 %v6108_v1 }
 0xab1   :  { %2826 = vmatpush.msrb.mxu1 %v6033_v14 }
 0xab2   :  { %2737 = vmatpush.msra.mxu3 %v6133_v49  ;;  %2845 = vmatpush.msra.mxu2 %v6113_v31 }
 0xab3   :  { %2827 = vmatpush.msrb.mxu1 %v6036_v26 }
 0xab4   :  { %2738 = vmatpush.msra.mxu3 %v6139_v17  ;;  %2559 = vmatmul.f32.gmra.mxu1 %v5856_v27 }
 0xab5   :  { %2739 = vmatmul.f32.vlgmr.msra.gmra.mxu3 %v6073_v35  ;;  %2600 = vmatmul.f32.gmra.mxu2 %v5856_v27  ;;  %v6182_v27 = vld [vmem:[#allocation7 + $0x448] sm:$0xff] }
 0xab6   :  { %2854 = vmatpush.msrb.mxu3 %v6126_v46  ;;  %2846 = vmatpush.msra.mxu2 %v6118_v30 }
 0xab7   :  { %2828 = vmatpush.msrb.mxu1 %v6038_v59  ;;  %2745 = vmatpush.msra.mxu0 %v6182_v27 }
 0xab8   :  { %2855 = vmatpush.msrb.mxu3 %v6128_v50  ;;  %2847 = vmatpush.msra.mxu2 %v6124_v58 }
 0xab9   :  { %2829 = vmatpush.msrb.mxu1 %v6041_v18 }
 0xaba   :  { %2848 = vmatpush.msra.mxu2 %v6133_v49  ;;  %2856 = vmatpush.msrb.mxu3 %v6182_v27 }
 0xabb   :  { %2945 = vmatpush.msra.mxu1 %v6051_v13 }
 0xabc   :  { %2562 = vmatmul.f32.gmra.mxu1 %v5949_v25  ;;  %2849 = vmatpush.msra.mxu2 %v6139_v17 }
 0xabd   :  { %2603 = vmatmul.f32.gmra.mxu2 %v5949_v25  ;;  %2946 = vmatpush.msra.mxu1 %v6057_v61  ;;  %v6184_v25 = vld [vmem:[#allocation7 + $0x430] sm:$0xff] }
 0xabe   :  { %2965 = vmatpush.msrb.mxu2 %v6126_v46  ;;  %2746 = vmatpush.msra.mxu0 %v6184_v25 }
 0xabf   :  { %2947 = vmatpush.msra.mxu1 %v6061_v55  ;;  %2857 = vmatpush.msrb.mxu3 %v6184_v25 }
 0xac0   :  { %2966 = vmatpush.msrb.mxu2 %v6128_v50  ;;  %2747 = vmatpush.msra.mxu0 %v6195_v53 }
 0xac1   :  { %2948 = vmatpush.msra.mxu1 %v6066_v57  ;;  %2858 = vmatpush.msrb.mxu3 %v6195_v53 }
 0xac2   :  { %2967 = vmatpush.msrb.mxu2 %v6182_v27  ;;  %2748 = vmatpush.msra.mxu0 %v6199_v38 }
 0xac3   :  { %2949 = vmatpush.msra.mxu1 %v6076_v19  ;;  %2859 = vmatpush.msrb.mxu3 %v6199_v38 }
 0xac4   :  { %2565 = vmatmul.f32.gmra.mxu1 %v5980_v24  ;;  %2968 = vmatpush.msrb.mxu2 %v6184_v25 }
 0xac5   :  { %2606 = vmatmul.f32.gmra.mxu2 %v5980_v24  ;;  %2950 = vmatpush.msra.mxu1 %v6083_v60 }
 0xac6   :  { %2969 = vmatpush.msrb.mxu2 %v6195_v53  ;;  %2749 = vmatpush.msra.mxu0 %v6201_v21 }
 0xac7   :  { %2951 = vmatpush.msra.mxu1 %v6087_v37  ;;  %2860 = vmatpush.msrb.mxu3 %v6201_v21 }
 0xac8   :  { %2970 = vmatpush.msrb.mxu2 %v6199_v38  ;;  %2750 = vmatpush.msra.mxu0 %v6209_v11 }
 0xac9   :  { %2952 = vmatpush.msra.mxu1 %v6092_v0  ;;  %2861 = vmatpush.msrb.mxu3 %v6209_v11 }
 0xaca   :  { %2971 = vmatpush.msrb.mxu2 %v6201_v21  ;;  %2751 = vmatpush.msra.mxu0 %v6214_v62 }
 0xacb   :  { %2953 = vmatpush.msra.mxu1 %v6097_v20  ;;  %2862 = vmatpush.msrb.mxu3 %v6214_v62 }
 0xacc   :  { %2568 = vmatmul.f32.gmra.mxu1 %v6049_v47  ;;  %2972 = vmatpush.msrb.mxu2 %v6209_v11 }
 0xacd   :  { %2609 = vmatmul.f32.gmra.mxu2 %v6049_v47  ;;  %2954 = vmatpush.msra.mxu1 %v6103_v44 }
 0xace   :  { %2973 = vmatpush.msrb.mxu2 %v6214_v62  ;;  %2752 = vmatpush.msra.mxu0 %v6219_v39 }
 0xacf   :  { %2955 = vmatpush.msra.mxu1 %v6108_v1  ;;  %2863 = vmatpush.msrb.mxu3 %v6219_v39 }
 0xad0   :  { %2974 = vmatpush.msrb.mxu2 %v6219_v39  ;;  %2753 = vmatpush.msra.mxu0 %v6224_v8 }
 0xad1   :  { %2956 = vmatpush.msra.mxu1 %v6113_v31  ;;  %2864 = vmatpush.msrb.mxu3 %v6224_v8 }
 0xad2   :  { %2975 = vmatpush.msrb.mxu2 %v6224_v8  ;;  %2754 = vmatpush.msra.mxu0 %v6229_v29 }
 0xad3   :  { %2957 = vmatpush.msra.mxu1 %v6118_v30  ;;  %2865 = vmatpush.msrb.mxu3 %v6229_v29 }
 0xad4   :  { %2976 = vmatpush.msrb.mxu2 %v6229_v29  ;;  %2755 = vmatpush.msra.mxu0 %v6237_v28 }
 0xad5   :  { %2958 = vmatpush.msra.mxu1 %v6124_v58  ;;  %2866 = vmatpush.msrb.mxu3 %v6237_v28 }
 0xad6   :  { %2977 = vmatpush.msrb.mxu2 %v6237_v28  ;;  %2756 = vmatpush.msra.mxu0 %v6242_v48 }
 0xad7   :  { %2959 = vmatpush.msra.mxu1 %v6133_v49  ;;  %2867 = vmatpush.msrb.mxu3 %v6242_v48 }
 0xad8   :  { %2978 = vmatpush.msrb.mxu2 %v6242_v48 }
 0xad9   :  { %2960 = vmatpush.msra.mxu1 %v6139_v17 }
 0xb11   :  { %v2334_v24 = vpop.f32.mrf.mxu1 }
 0xb12   :  { %v2335_v42 = vadd.f32 %v2334_v24, %v7029_v2  ;;  %v1410_v2 = vadd.f32 %v7045_v7, %v7025_v40 }
 0xb14   :  { %v2377_v12 = vadd.f32 %v2335_v42, %v1369_v56 }
 0xb16   :  { %v3772_v3 = vmul.f32 -1.442695, %v2377_v12  ;;  %v6247_v12 = vld [vmem:[#allocation7 + $0x328] sm:$0xff] }
 0xb17   :  { %v2354_v34 = vpop.f32.mrf.mxu2  ;;  %7050 = vst [vmem:[#allocation21_spill] sm:$0xff] %v6247_v12  ;;  %2757 = vmatpush.msra.mxu0 %v6247_v12  ;;  %2868 = vmatpush.msrb.mxu3 %v6247_v12 }
 0xb18   :  { %3954 = vpow2.f32 %v3772_v3  ;;  %v2355_v22 = vadd.f32 %v2354_v34, %v7026_v43  ;;  %v6252_v34 = vld [vmem:[#allocation7 + $0x310] sm:$0xff]  ;;  %2979 = vmatpush.msrb.mxu2 %v6247_v12 }
 0xb19   :  { %7051 = vst [vmem:[#allocation18_spill] sm:$0xff] %v6252_v34  ;;  %2758 = vmatpush.msra.mxu0 %v6252_v34  ;;  %2869 = vmatpush.msrb.mxu3 %v6252_v34 }
 0xb1a   :  { %v2397_v45 = vadd.f32 %v2355_v22, %v1410_v2  ;;  %2980 = vmatpush.msrb.mxu2 %v6252_v34  ;;  %v7052_v34 = vld [vmem:[#allocation42_spill] sm:$0xff] }
 0xb1b   :  { %2925 = vmatpush.msrb.mxu0 %v5991_v51  ;;  %3036 = vmatpush.msra.mxu3 %v5991_v51  ;;  %v1451_v28 = vadd.f32 %v7052_v34, %v5574_v6 }
 0xb1c   :  { %v3773_v40 = vmul.f32 -1.442695, %v2397_v45 }
 0xb1d   :  { %2926 = vmatpush.msrb.mxu0 %v5994_v16  ;;  %3037 = vmatpush.msra.mxu3 %v5994_v16 }
 0xb1e   :  { %v3955_v43 = vpop.eup %3954  ;;  %3956 = vpow2.f32 %v3773_v40  ;;  %v2374_v40 = vpop.f32.mrf.mxu3 }
 0xb1f   :  { %v2381_v41 = vadd.f32 1.0, %v3955_v43  ;;  %v2375_v12 = vadd.f32 %v2374_v40, %v5572_v15  ;;  %2927 = vmatpush.msrb.mxu0 %v5997_v54  ;;  %3038 = vmatpush.msra.mxu3 %v5997_v54  ;;  %v3774_v40 = vld [vmem:[%s6818_s5 + $0x6] sm:$0x7] }
 0xb21   :  { %3958 = vrcp.f32 %v2381_v41  ;;  %v2393_v7 = vand.u32 2147483648, %v2381_v41  ;;  %v2391_v22 = vand.u32 2147483647, %v2381_v41  ;;  %vm2387_vm11 = vweird.f32 %v2381_v41  ;;  %2928 = vmatpush.msrb.mxu0 %v6000_v63  ;;  %3039 = vmatpush.msra.mxu3 %v6000_v63 }
 0xb23   :  { %vm2392_vm13 = vcmp.eq.f32.partialorder %v2391_v22, 8.507059e+37  ;;  %2929 = vmatpush.msrb.mxu0 %v6003_v32  ;;  %3040 = vmatpush.msra.mxu3 %v6003_v32 }
 0xb24   :  { %v3957_v36 = vpop.eup %3956 }
 0xb25   :  { %v2401_v24 = vadd.f32 1.0, %v3957_v36  ;;  %2930 = vmatpush.msrb.mxu0 %v6006_v10  ;;  %3041 = vmatpush.msra.mxu3 %v6006_v10 }
 0xb27   :  { %v3959_v56 = vpop.eup %3958  ;;  %3960 = vrcp.f32 %v2401_v24  ;;  %v2413_v8 = vand.u32 2147483648, %v2401_v24  ;;  %vm2407_vm15 = vweird.f32 %v2401_v24  ;;  %2931 = vmatpush.msrb.mxu0 %v6009_v33  ;;  %3042 = vmatpush.msra.mxu3 %v6009_v33 }
 0xb28   :  { %v2383_v42 = vmul.f32 %v3959_v56, %v2381_v41  ;;  %vm2388_vm10 = vweird.f32 %v3959_v56 }
 0xb29   :  { %vm2389_vm12 = vmor %vm2387_vm11, %vm2388_vm10  ;;  %2932 = vmatpush.msrb.mxu0 %v6018_v5  ;;  %3043 = vmatpush.msra.mxu3 %v6018_v5 }
 0xb2a   :  { %v2384_v3 = vsub.f32 1.0, %v2383_v42  ;;  %v2394_v42 = vor.u32 1.1754944e-38, %v2393_v7  ;;  %v2411_v7 = vand.u32 2147483647, %v2401_v24 }
 0xb2b   :  { %2933 = vmatpush.msrb.mxu0 %v6021_v52  ;;  %3044 = vmatpush.msra.mxu3 %v6021_v52 }
 0xb2c   :  { %v2385_v2 = vmul.f32 %v3959_v56, %v2384_v3  ;;  %vm2412_vm1 = vcmp.eq.f32.partialorder %v2411_v7, 8.507059e+37 }
 0xb2d   :  { %v3961_v45 = vpop.eup %3960  ;;  %2934 = vmatpush.msrb.mxu0 %v6024_v23  ;;  %3045 = vmatpush.msra.mxu3 %v6024_v23 }
 0xb2e   :  { %v2403_v43 = vmul.f32 %v3961_v45, %v2401_v24  ;;  %v2386_v36 = vadd.f32 %v3959_v56, %v2385_v2  ;;  %vm2408_vm14 = vweird.f32 %v3961_v45 }
 0xb2f   :  { %vm2409_vm0 = vmor %vm2407_vm15, %vm2408_vm14  ;;  %2935 = vmatpush.msrb.mxu0 %v6027_v9  ;;  %3046 = vmatpush.msra.mxu3 %v6027_v9 }
 0xb30   :  { %v2404_v3 = vsub.f32 1.0, %v2403_v43  ;;  %v2390_v48 = vsel %vm2389_vm12, %v3959_v56, %v2386_v36  ;;  %v2720_v36 = vpop.f32.mrf.mxu3 }
 0xb31   :  { %v2395_v29 = vsel %vm2392_vm13, %v2394_v42, %v2390_v48  ;;  %v2414_v48 = vor.u32 1.1754944e-38, %v2413_v8  ;;  %2936 = vmatpush.msrb.mxu0 %v6030_v4  ;;  %3047 = vmatpush.msra.mxu3 %v6030_v4 }
 0xb32   :  { %v2417_v41 = vmul.f32 %v2395_v29, %v2375_v12  ;;  %v2405_v2 = vmul.f32 %v3961_v45, %v2404_v3  ;;  %v6323_v3 = vperm.slane %v3774_v40, 0 }
 0xb33   :  { %2937 = vmatpush.msrb.mxu0 %v6033_v14  ;;  %3048 = vmatpush.msra.mxu3 %v6033_v14 }
 0xb34   :  { %v2418_v15 = vadd.f32 %v2417_v41, %v1451_v28  ;;  %v2406_v56 = vadd.f32 %v3961_v45, %v2405_v2  ;;  %7056 = vst [vmem:[#allocation22_spill] sm:$0xff] %v6323_v3 }
 0xb35   :  { %2938 = vmatpush.msrb.mxu0 %v6036_v26  ;;  %3049 = vmatpush.msra.mxu3 %v6036_v26 }
 0xb36   :  { %3962 = vtanh.f32 %v2418_v15  ;;  %v2410_v6 = vsel %vm2409_vm0, %v3961_v45, %v2406_v56  ;;  %v3775_v45 = vld [vmem:[%s6819_s6 + $0x6] sm:$0x7] }
 0xb37   :  { %v2415_v29 = vsel %vm2412_vm1, %v2414_v48, %v2410_v6  ;;  %2939 = vmatpush.msrb.mxu0 %v6038_v59  ;;  %3050 = vmatpush.msra.mxu3 %v6038_v59  ;;  %v6319_v43 = vperm.slane %v3775_v45, 0  ;;  %v6327_v7 = vperm.slane %v3775_v45, 1  ;;  %v6329_v6 = vperm.slane %v3774_v40, 1  ;;  %v2551_v48 = vpop.f32.mrf.mxu1 }
 0xb38   :  { %v2420_v28 = vsub.f32 1.0, %v2415_v29  ;;  %v2422_v8 = vmul.f32 %v2415_v29, %v6049_v47  ;;  %v2510_v47 = vpop.f32.mrf.mxu0  ;;  %v2740_v56 = vpop.f32.mrf.mxu3 }
 0xb39   :  { %2940 = vmatpush.msrb.mxu0 %v6041_v18  ;;  %3051 = vmatpush.msra.mxu3 %v6041_v18  ;;  %7054 = vst [vmem:[#allocation23_spill] sm:$0xff] %v6319_v43  ;;  %v2721_v41 = vadd.f32 %v2720_v36, %v6319_v43  ;;  %v2511_v2 = vadd.f32 %v2510_v47, %v6323_v3 }
 0xb3a   :  { %7057 = vst [vmem:[#allocation20_spill] sm:$0xff] %v6327_v7 }
 0xb3b   :  { %v2763_v15 = vadd.f32 %v2721_v41, %v2511_v2  ;;  %7058 = vst [vmem:[#allocation24_spill] sm:$0xff] %v6329_v6 }
 0xb3c   :  { %v3963_v24 = vpop.eup %3962 }
 0xb3d   :  { %v2421_v12 = vmul.f32 %v3963_v24, %v2420_v28  ;;  %v2741_v28 = vadd.f32 %v2740_v56, %v6327_v7  ;;  %v3777_v24 = vmul.f32 -1.442695, %v2763_v15  ;;  %v6345_v7 = vperm.slane %v3774_v40, 2 }
 0xb3f   :  { %v2423_v34 = vadd.f32 %v2422_v8, %v2421_v12  ;;  %v2552_v12 = vadd.f32 %v2551_v48, %v6329_v6  ;;  %3964 = vpow2.f32 %v3777_v24 }
 0xb40   :  { %v6311_v22 = vpop.f32.mrf.mxu0 }
 0xb41   :  { %2530 = vmatmul.f32.gmra.mxu0 %v2423_v34  ;;  %2426 = vst [vmem:[#allocation11 + $0x8] sm:$0xff] %v2423_v34  ;;  %2571 = vmatmul.f32.gmra.mxu1 %v2423_v34  ;;  %v2783_v8 = vadd.f32 %v2741_v28, %v2552_v12 }
 0xb42   :  { %2612 = vmatmul.f32.gmra.mxu2 %v2423_v34  ;;  %7053 = vst [vmem:[#allocation25_spill] sm:$0xff] %v6311_v22 }
 0xb43   :  { %v3778_v34 = vmul.f32 -1.442695, %v2783_v8 }
 0xb45   :  { %v3965_v47 = vpop.eup %3964  ;;  %3966 = vpow2.f32 %v3778_v34 }
 0xb48   :  { %v6321_v42 = vpop.f32.mrf.mxu0 }
 0xb49   :  { %2759 = vmatmul.f32.vlgmr.msra.gmra.mxu0 %v6073_v35  ;;  %7055 = vst [vmem:[#allocation17_spill] sm:$0xff] %v6321_v42  ;;  %v2767_v42 = vadd.f32 1.0, %v3965_v47  ;;  %v6343_v47 = vperm.slane %v3775_v45, 2 }
 0xb4a   :  { %3056 = vmatpush.msra.mxu0 %v6051_v13 }
 0xb4b   :  { %v3967_v41 = vpop.eup %3966  ;;  %3968 = vrcp.f32 %v2767_v42  ;;  %v2779_v34 = vand.u32 2147483648, %v2767_v42  ;;  %vm2773_vm3 = vweird.f32 %v2767_v42 }
 0xb4c   :  { %3057 = vmatpush.msra.mxu0 %v6057_v61  ;;  %v2787_v43 = vadd.f32 1.0, %v3967_v41 }
 0xb4e   :  { %3058 = vmatpush.msra.mxu0 %v6061_v55  ;;  %3970 = vrcp.f32 %v2787_v43  ;;  %v2799_v45 = vand.u32 2147483648, %v2787_v43  ;;  %vm2793_vm7 = vweird.f32 %v2787_v43 }
 0xb50   :  { %3059 = vmatpush.msra.mxu0 %v6066_v57  ;;  %v6331_v29 = vpop.f32.mrf.mxu0  ;;  %v2800_v18 = vor.u32 1.1754944e-38, %v2799_v45 }
 0xb51   :  { %7059 = vst [vmem:[#allocation48_spill] sm:$0xff] %v6331_v29  ;;  %v3969_v22 = vpop.eup %3968 }
 0xb52   :  { %3060 = vmatpush.msra.mxu0 %v6076_v19  ;;  %v2769_v29 = vmul.f32 %v3969_v22, %v2767_v42  ;;  %vm2774_vm2 = vweird.f32 %v3969_v22 }
 0xb53   :  { %vm2775_vm4 = vmor %vm2773_vm3, %vm2774_vm2 }
 0xb54   :  { %3061 = vmatpush.msra.mxu0 %v6083_v60  ;;  %v3971_v15 = vpop.eup %3970  ;;  %v2770_v48 = vsub.f32 1.0, %v2769_v29  ;;  %v2780_v29 = vor.u32 1.1754944e-38, %v2779_v34 }
 0xb55   :  { %v2789_v28 = vmul.f32 %v3971_v15, %v2787_v43  ;;  %vm2794_vm6 = vweird.f32 %v3971_v15 }
 0xb56   :  { %3062 = vmatpush.msra.mxu0 %v6087_v37  ;;  %v2771_v24 = vmul.f32 %v3969_v22, %v2770_v48  ;;  %vm2795_vm8 = vmor %vm2793_vm7, %vm2794_vm6 }
 0xb57   :  { %v2790_v8 = vsub.f32 1.0, %v2789_v28 }
 0xb58   :  { %3063 = vmatpush.msra.mxu0 %v6092_v0  ;;  %v6335_v36 = vpop.f32.mrf.mxu0 }
 0xb59   :  { %7060 = vst [vmem:[#allocation43_spill] sm:$0xff] %v6335_v36  ;;  %v2772_v36 = vadd.f32 %v3969_v22, %v2771_v24  ;;  %v2791_v41 = vmul.f32 %v3971_v15, %v2790_v8 }
 0xb5a   :  { %3064 = vmatpush.msra.mxu0 %v6097_v20 }
 0xb5b   :  { %v2776_v6 = vsel %vm2775_vm4, %v3969_v22, %v2772_v36  ;;  %v2792_v24 = vadd.f32 %v3971_v15, %v2791_v41 }
 0xb5c   :  { %3065 = vmatpush.msra.mxu0 %v6103_v44 }
 0xb5d   :  { %v2796_v40 = vsel %vm2795_vm8, %v3971_v15, %v2792_v24  ;;  %v7084_v24 = vld [vmem:[#allocation23_spill] sm:$0xff] }
 0xb5e   :  { %3066 = vmatpush.msra.mxu0 %v6108_v1 }
 0xb60   :  { %3067 = vmatpush.msra.mxu0 %v6113_v31  ;;  %v6337_v2 = vpop.f32.mrf.mxu0 }
 0xb61   :  { %7061 = vst [vmem:[#allocation30_spill] sm:$0xff] %v6337_v2  ;;  %v2777_v2 = vand.u32 2147483647, %v2767_v42  ;;  %v2797_v42 = vand.u32 2147483647, %v2787_v43 }
 0xb62   :  { %3068 = vmatpush.msra.mxu0 %v6118_v30 }
 0xb63   :  { %vm2778_vm5 = vcmp.eq.f32.partialorder %v2777_v2, 8.507059e+37  ;;  %vm2798_vm9 = vcmp.eq.f32.partialorder %v2797_v42, 8.507059e+37 }
 0xb64   :  { %3069 = vmatpush.msra.mxu0 %v6124_v58  ;;  %v2781_v28 = vsel %vm2778_vm5, %v2780_v29, %v2776_v6  ;;  %v2801_v22 = vsel %vm2798_vm9, %v2800_v18, %v2796_v40  ;;  %v7082_v29 = vld [vmem:[#allocation22_spill] sm:$0xff] }
 0xb65   :  { %v2806_v36 = vsub.f32 1.0, %v2801_v22  ;;  %v2808_v2 = vmul.f32 %v6073_v35, %v2801_v22  ;;  %v7085_v22 = vld [vmem:[#allocation24_spill] sm:$0xff] }
 0xb66   :  { %3070 = vmatpush.msra.mxu0 %v6133_v49 }
 0xb68   :  { %3071 = vmatpush.msra.mxu0 %v6139_v17  ;;  %v6339_v56 = vpop.f32.mrf.mxu0 }
 0xb69   :  { %7062 = vst [vmem:[#allocation19_spill] sm:$0xff] %v6339_v56  ;;  %v2592_v56 = vpop.f32.mrf.mxu2 }
 0xbbe   :  { %v6341_v12 = vpop.f32.mrf.mxu0 }
 0xbbf   :  { %7063 = vst [vmem:[#allocation26_spill] sm:$0xff] %v6341_v12  ;;  %v2593_v12 = vadd.f32 %v2592_v56, %v6345_v7 }
 0xbc6   :  { %v2760_v3 = vpop.f32.mrf.mxu0 }
 0xbc7   :  { %v2761_v48 = vadd.f32 %v2760_v3, %v6343_v47 }
 0xbc9   :  { %v2803_v17 = vmul.f32 %v2781_v28, %v2761_v48  ;;  %v7083_v48 = vld [vmem:[#allocation25_spill] sm:$0xff] }
 0xbca   :  { %v2514_v28 = vadd.f32 %v7083_v48, %v7082_v29 }
 0xbcb   :  { %v2804_v8 = vadd.f32 %v2803_v17, %v2593_v12 }
 0xbcd   :  { %3972 = vtanh.f32 %v2804_v8 }
 0xbd3   :  { %v3973_v34 = vpop.eup %3972 }
 0xbd4   :  { %v2807_v3 = vmul.f32 %v3973_v34, %v2806_v36  ;;  %v7086_v34 = vld [vmem:[#allocation20_spill] sm:$0xff] }
 0xbd6   :  { %v6350_v6 = vadd.f32 %v2808_v2, %v2807_v3 }
 0xbd8   :  { %2830 = vmatmul.f32.vlgmr.msrb.gmra.mxu1 %v6350_v6  ;;  %2850 = vmatmul.f32.vlgmr.msra.gmra.mxu2 %v6350_v6 }
 0xbd9   :  { %2870 = vmatmul.f32.vlgmr.msrb.gmra.mxu3 %v6350_v6  ;;  %3076 = vmatpush.msrb.mxu1 %v6126_v46 }
 0xbda   :  { %3147 = vmatpush.msra.mxu2 %v5991_v51  ;;  %3167 = vmatpush.msrb.mxu3 %v6051_v13  ;;  %v7064_v51 = vld [vmem:[#allocation31_spill] sm:$0xff] }
 0xbdb   :  { %3077 = vmatpush.msrb.mxu1 %v6128_v50 }
 0xbdc   :  { %3148 = vmatpush.msra.mxu2 %v5994_v16  ;;  %3168 = vmatpush.msrb.mxu3 %v6057_v61  ;;  %v7065_v16 = vld [vmem:[#allocation49_spill] sm:$0xff] }
 0xbdd   :  { %3078 = vmatpush.msrb.mxu1 %v6182_v27 }
 0xbde   :  { %3149 = vmatpush.msra.mxu2 %v5997_v54  ;;  %3169 = vmatpush.msrb.mxu3 %v6061_v55  ;;  %v7066_v54 = vld [vmem:[#allocation41_spill] sm:$0xff] }
 0xbdf   :  { %3079 = vmatpush.msrb.mxu1 %v6184_v25 }
 0xbe0   :  { %3150 = vmatpush.msra.mxu2 %v6000_v63  ;;  %3170 = vmatpush.msrb.mxu3 %v6066_v57  ;;  %v7067_v63 = vld [vmem:[#allocation32_spill] sm:$0xff] }
 0xbe1   :  { %3080 = vmatpush.msrb.mxu1 %v6195_v53 }
 0xbe2   :  { %3151 = vmatpush.msra.mxu2 %v6003_v32  ;;  %3171 = vmatpush.msrb.mxu3 %v6076_v19  ;;  %v7068_v32 = vld [vmem:[#allocation21_spill] sm:$0xff] }
 0xbe3   :  { %3081 = vmatpush.msrb.mxu1 %v6199_v38 }
 0xbe4   :  { %3152 = vmatpush.msra.mxu2 %v6006_v10  ;;  %3172 = vmatpush.msrb.mxu3 %v6083_v60  ;;  %v7069_v10 = vld [vmem:[#allocation18_spill] sm:$0xff] }
 0xbe5   :  { %3082 = vmatpush.msrb.mxu1 %v6201_v21 }
 0xbe6   :  { %3153 = vmatpush.msra.mxu2 %v6009_v33  ;;  %3173 = vmatpush.msrb.mxu3 %v6087_v37  ;;  %v7070_v33 = vld [vmem:[#allocation38_spill] sm:$0xff] }
 0xbe7   :  { %3083 = vmatpush.msrb.mxu1 %v6209_v11 }
 0xbe8   :  { %3154 = vmatpush.msra.mxu2 %v6018_v5  ;;  %3174 = vmatpush.msrb.mxu3 %v6092_v0  ;;  %v7071_v5 = vld [vmem:[#allocation47_spill] sm:$0xff] }
 0xbe9   :  { %3084 = vmatpush.msrb.mxu1 %v6214_v62 }
 0xbea   :  { %3155 = vmatpush.msra.mxu2 %v6021_v52  ;;  %3175 = vmatpush.msrb.mxu3 %v6097_v20  ;;  %v2554_v52 = vpop.f32.mrf.mxu1 }
 0xbeb   :  { %3085 = vmatpush.msrb.mxu1 %v6219_v39  ;;  %v2555_v36 = vadd.f32 %v2554_v52, %v7085_v22 }
 0xbec   :  { %3156 = vmatpush.msra.mxu2 %v6024_v23  ;;  %3176 = vmatpush.msrb.mxu3 %v6103_v44  ;;  %v2595_v23 = vpop.f32.mrf.mxu2 }
 0xbed   :  { %3086 = vmatpush.msrb.mxu1 %v7064_v51 }
 0xbee   :  { %3157 = vmatpush.msra.mxu2 %v6027_v9  ;;  %3177 = vmatpush.msrb.mxu3 %v6108_v1 }
 0xbef   :  { %3087 = vmatpush.msrb.mxu1 %v7065_v16 }
 0xbf0   :  { %3158 = vmatpush.msra.mxu2 %v6030_v4  ;;  %3178 = vmatpush.msrb.mxu3 %v6113_v31 }
 0xbf1   :  { %3088 = vmatpush.msrb.mxu1 %v7066_v54 }
 0xbf2   :  { %3159 = vmatpush.msra.mxu2 %v6033_v14  ;;  %3179 = vmatpush.msrb.mxu3 %v6118_v30  ;;  %v6403_v9 = vpop.f32.mrf.mxu1 }
 0xbf3   :  { %3089 = vmatpush.msrb.mxu1 %v7067_v63 }
 0xbf4   :  { %3160 = vmatpush.msra.mxu2 %v6036_v26  ;;  %3180 = vmatpush.msrb.mxu3 %v6124_v58  ;;  %v6405_v4 = vpop.f32.mrf.mxu2 }
 0xbf5   :  { %3090 = vmatpush.msrb.mxu1 %v7068_v32 }
 0xbf6   :  { %3161 = vmatpush.msra.mxu2 %v6038_v59  ;;  %3181 = vmatpush.msrb.mxu3 %v6133_v49 }
 0xbf7   :  { %3091 = vmatpush.msrb.mxu1 %v7069_v10 }
 0xbf8   :  { %3162 = vmatpush.msra.mxu2 %v7070_v33  ;;  %3182 = vmatpush.msrb.mxu3 %v7071_v5 }
 0xbfa   :  { %v6407_v14 = vpop.f32.mrf.mxu1 }
 0xbfb   :  { %7072 = vst [vmem:[#allocation34_spill] sm:$0xff] %v6407_v14 }
 0xbfc   :  { %v6409_v26 = vpop.f32.mrf.mxu2 }
 0xbfd   :  { %7073 = vst [vmem:[#allocation44_spill] sm:$0xff] %v6409_v26 }
 0xc02   :  { %v6411_v18 = vpop.f32.mrf.mxu1 }
 0xc03   :  { %7074 = vst [vmem:[#allocation45_spill] sm:$0xff] %v6411_v18 }
 0xc04   :  { %v6413_v59 = vpop.f32.mrf.mxu2 }
 0xc05   :  { %7075 = vst [vmem:[#allocation33_spill] sm:$0xff] %v6413_v59 }
 0xc0a   :  { %v6415_v35 = vpop.f32.mrf.mxu1 }
 0xc0b   :  { %7076 = vst [vmem:[#allocation40_spill] sm:$0xff] %v6415_v35 }
 0xc0c   :  { %v6417_v17 = vpop.f32.mrf.mxu2 }
 0xc0d   :  { %7077 = vst [vmem:[#allocation35_spill] sm:$0xff] %v6417_v17 }
 0xc12   :  { %v6419_v43 = vpop.f32.mrf.mxu1 }
 0xc13   :  { %7078 = vst [vmem:[#allocation37_spill] sm:$0xff] %v6419_v43 }
 0xc14   :  { %v6421_v56 = vpop.f32.mrf.mxu2 }
 0xc15   :  { %7079 = vst [vmem:[#allocation50_spill] sm:$0xff] %v6421_v56 }
 0xc1a   :  { %v6423_v15 = vpop.f32.mrf.mxu1 }
 0xc1b   :  { %7080 = vst [vmem:[#allocation27_spill] sm:$0xff] %v6423_v15 }
 0xc1c   :  { %v6425_v12 = vpop.f32.mrf.mxu2 }
 0xc1d   :  { %7081 = vst [vmem:[#allocation36_spill] sm:$0xff] %v6425_v12 }
 0xc55   :  { %v2831_v41 = vpop.f32.mrf.mxu1 }
 0xc56   :  { %v2832_v45 = vadd.f32 %v2831_v41, %v7084_v24 }
 0xc58   :  { %v2874_v42 = vadd.f32 %v2832_v45, %v2514_v28 }
 0xc5a   :  { %v3779_v8 = vmul.f32 -1.442695, %v2874_v42 }
 0xc5b   :  { %v2851_v40 = vpop.f32.mrf.mxu2 }
 0xc5c   :  { %3974 = vpow2.f32 %v3779_v8  ;;  %v2852_v3 = vadd.f32 %v2851_v40, %v7086_v34  ;;  %v2871_v8 = vpop.f32.mrf.mxu3 }
 0xc5e   :  { %v2894_v2 = vadd.f32 %v2852_v3, %v2555_v36 }
 0xc60   :  { %v3780_v33 = vmul.f32 -1.442695, %v2894_v2 }
 0xc62   :  { %v3975_v56 = vpop.eup %3974  ;;  %3976 = vpow2.f32 %v3780_v33 }
 0xc63   :  { %v2878_v15 = vadd.f32 1.0, %v3975_v56  ;;  %v2872_v56 = vadd.f32 %v2871_v8, %v6343_v47 }
 0xc65   :  { %3978 = vrcp.f32 %v2878_v15  ;;  %v2890_v28 = vand.u32 2147483648, %v2878_v15  ;;  %v2888_v42 = vand.u32 2147483647, %v2878_v15  ;;  %vm2884_vm11 = vweird.f32 %v2878_v15 }
 0xc67   :  { %v2891_v36 = vor.u32 1.1754944e-38, %v2890_v28  ;;  %vm2889_vm13 = vcmp.eq.f32.partialorder %v2888_v42, 8.507059e+37 }
 0xc68   :  { %v3977_v12 = vpop.eup %3976 }
 0xc69   :  { %v2898_v43 = vadd.f32 1.0, %v3977_v12  ;;  %v2596_v12 = vadd.f32 %v2595_v23, %v6345_v7 }
 0xc6b   :  { %v3979_v17 = vpop.eup %3978  ;;  %3980 = vrcp.f32 %v2898_v43  ;;  %v2908_v18 = vand.u32 2147483647, %v2898_v43  ;;  %vm2904_vm15 = vweird.f32 %v2898_v43 }
 0xc6c   :  { %v2880_v48 = vmul.f32 %v3979_v17, %v2878_v15  ;;  %vm2885_vm10 = vweird.f32 %v3979_v17 }
 0xc6d   :  { %vm2886_vm12 = vmor %vm2884_vm11, %vm2885_vm10  ;;  %vm2909_vm1 = vcmp.eq.f32.partialorder %v2908_v18, 8.507059e+37 }
 0xc6e   :  { %v2881_v41 = vsub.f32 1.0, %v2880_v48 }
 0xc70   :  { %v2882_v45 = vmul.f32 %v3979_v17, %v2881_v41  ;;  %v2910_v41 = vand.u32 2147483648, %v2898_v43 }
 0xc71   :  { %v3981_v52 = vpop.eup %3980 }
 0xc72   :  { %v2900_v35 = vmul.f32 %v3981_v52, %v2898_v43  ;;  %v2883_v40 = vadd.f32 %v3979_v17, %v2882_v45  ;;  %vm2905_vm14 = vweird.f32 %v3981_v52  ;;  %v2911_v15 = vor.u32 1.1754944e-38, %v2910_v41 }
 0xc73   :  { %vm2906_vm0 = vmor %vm2904_vm15, %vm2905_vm14  ;;  %v2558_v43 = vadd.f32 %v6403_v9, %v7085_v22 }
 0xc74   :  { %v2901_v3 = vsub.f32 1.0, %v2900_v35  ;;  %v2887_v2 = vsel %vm2886_vm12, %v3979_v17, %v2883_v40 }
 0xc75   :  { %v2892_v33 = vsel %vm2889_vm13, %v2891_v36, %v2887_v2 }
 0xc76   :  { %v2902_v48 = vmul.f32 %v3981_v52, %v2901_v3  ;;  %v2914_v59 = vmul.f32 %v2892_v33, %v2872_v56 }
 0xc78   :  { %v2903_v26 = vadd.f32 %v3981_v52, %v2902_v48  ;;  %v2915_v14 = vadd.f32 %v2914_v59, %v2596_v12  ;;  %v6441_v59 = vld [vmem:[#allocation7 + $0x468] sm:$0xff] }
 0xc7a   :  { %v2907_v45 = vsel %vm2906_vm0, %v3981_v52, %v2903_v26  ;;  %3982 = vtanh.f32 %v2915_v14  ;;  %v6446_v14 = vld [vmem:[#allocation7 + $0x450] sm:$0xff]  ;;  %v6451_v26 = vld [vmem:[#allocation7 + $0x438] sm:$0xff] }
 0xc7b   :  { %v2912_v35 = vsel %vm2909_vm1, %v2911_v15, %v2907_v45 }
 0xc7c   :  { %v2917_v28 = vsub.f32 1.0, %v2912_v35  ;;  %v2919_v23 = vmul.f32 %v2912_v35, %v6350_v6 }
 0xc80   :  { %v3983_v17 = vpop.eup %3982 }
 0xc81   :  { %v2918_v42 = vmul.f32 %v3983_v17, %v2917_v28 }
 0xc83   :  { %v6435_v8 = vadd.f32 %v2919_v23, %v2918_v42 }
 0xc85   :  { %2941 = vmatmul.f32.vlgmr.msrb.gmra.mxu0 %v6435_v8  ;;  %2961 = vmatmul.f32.vlgmr.msra.gmra.mxu1 %v6435_v8 }
 0xc86   :  { %2981 = vmatmul.f32.vlgmr.msrb.gmra.mxu2 %v6435_v8  ;;  %3187 = vmatpush.msrb.mxu0 %v6126_v46  ;;  %v6456_v46 = vld [vmem:[#allocation7 + $0x420] sm:$0xff] }
 0xc87   :  { %3258 = vmatpush.msra.mxu1 %v6441_v59  ;;  %3278 = vmatpush.msrb.mxu2 %v6051_v13  ;;  %v6461_v13 = vld [vmem:[#allocation7 + $0x408] sm:$0xff] }
 0xc88   :  { %3188 = vmatpush.msrb.mxu0 %v6128_v50 }
 0xc89   :  { %3259 = vmatpush.msra.mxu1 %v6446_v14  ;;  %3279 = vmatpush.msrb.mxu2 %v6057_v61  ;;  %v6466_v61 = vld [vmem:[#allocation7 + $0x3f0] sm:$0xff] }
 0xc8a   :  { %3189 = vmatpush.msrb.mxu0 %v6182_v27 }
 0xc8b   :  { %3260 = vmatpush.msra.mxu1 %v6451_v26  ;;  %3280 = vmatpush.msrb.mxu2 %v6061_v55  ;;  %v6471_v55 = vld [vmem:[#allocation7 + $0x3d8] sm:$0xff] }
 0xc8c   :  { %3190 = vmatpush.msrb.mxu0 %v6184_v25 }
 0xc8d   :  { %3261 = vmatpush.msra.mxu1 %v6456_v46  ;;  %3281 = vmatpush.msrb.mxu2 %v6066_v57  ;;  %v6476_v57 = vld [vmem:[#allocation7 + $0x3c0] sm:$0xff] }
 0xc8e   :  { %3191 = vmatpush.msrb.mxu0 %v6195_v53 }
 0xc8f   :  { %3262 = vmatpush.msra.mxu1 %v6461_v13  ;;  %3282 = vmatpush.msrb.mxu2 %v6076_v19  ;;  %v6481_v19 = vld [vmem:[#allocation7 + $0x3a8] sm:$0xff] }
 0xc90   :  { %3192 = vmatpush.msrb.mxu0 %v6199_v38 }
 0xc91   :  { %3263 = vmatpush.msra.mxu1 %v6466_v61  ;;  %3283 = vmatpush.msrb.mxu2 %v6083_v60  ;;  %v6486_v60 = vld [vmem:[#allocation7 + $0x390] sm:$0xff] }
 0xc92   :  { %3193 = vmatpush.msrb.mxu0 %v6201_v21 }
 0xc93   :  { %3264 = vmatpush.msra.mxu1 %v6471_v55  ;;  %3284 = vmatpush.msrb.mxu2 %v6087_v37  ;;  %v6491_v37 = vld [vmem:[#allocation7 + $0x378] sm:$0xff] }
 0xc94   :  { %3194 = vmatpush.msrb.mxu0 %v6209_v11 }
 0xc95   :  { %3265 = vmatpush.msra.mxu1 %v6476_v57  ;;  %3285 = vmatpush.msrb.mxu2 %v6092_v0  ;;  %v6496_v0 = vld [vmem:[#allocation7 + $0x360] sm:$0xff] }
 0xc96   :  { %3195 = vmatpush.msrb.mxu0 %v6214_v62 }
 0xc97   :  { %3266 = vmatpush.msra.mxu1 %v6481_v19  ;;  %3286 = vmatpush.msrb.mxu2 %v6097_v20  ;;  %v6501_v20 = vld [vmem:[#allocation7 + $0x348] sm:$0xff] }
 0xc98   :  { %3196 = vmatpush.msrb.mxu0 %v6219_v39 }
 0xc99   :  { %3267 = vmatpush.msra.mxu1 %v6486_v60  ;;  %3287 = vmatpush.msrb.mxu2 %v6103_v44  ;;  %v6506_v44 = vld [vmem:[#allocation7 + $0x330] sm:$0xff] }
 0xc9a   :  { %3197 = vmatpush.msrb.mxu0 %v7064_v51 }
 0xc9b   :  { %3268 = vmatpush.msra.mxu1 %v6491_v37  ;;  %3288 = vmatpush.msrb.mxu2 %v6108_v1  ;;  %v6511_v1 = vld [vmem:[#allocation7 + $0x318] sm:$0xff] }
 0xc9c   :  { %3198 = vmatpush.msrb.mxu0 %v7065_v16 }
 0xc9d   :  { %3269 = vmatpush.msra.mxu1 %v6496_v0  ;;  %3289 = vmatpush.msrb.mxu2 %v6113_v31  ;;  %v6516_v31 = vld [vmem:[#allocation7 + $0x300] sm:$0xff] }
 0xc9e   :  { %3199 = vmatpush.msrb.mxu0 %v7066_v54 }
 0xc9f   :  { %3270 = vmatpush.msra.mxu1 %v6501_v20  ;;  %3290 = vmatpush.msrb.mxu2 %v6118_v30 }
 0xca0   :  { %3200 = vmatpush.msrb.mxu0 %v7067_v63 }
 0xca1   :  { %3271 = vmatpush.msra.mxu1 %v6506_v44  ;;  %3291 = vmatpush.msrb.mxu2 %v6124_v58  ;;  %v7087_v58 = vld [vmem:[#allocation17_spill] sm:$0xff] }
 0xca2   :  { %3201 = vmatpush.msrb.mxu0 %v7068_v32  ;;  %v2517_v18 = vadd.f32 %v7087_v58, %v7082_v29 }
 0xca3   :  { %3272 = vmatpush.msra.mxu1 %v6511_v1  ;;  %3292 = vmatpush.msrb.mxu2 %v6133_v49 }
 0xca4   :  { %3202 = vmatpush.msrb.mxu0 %v7069_v10 }
 0xca5   :  { %3273 = vmatpush.msra.mxu1 %v6516_v31  ;;  %3293 = vmatpush.msrb.mxu2 %v7071_v5 }
 0xd02   :  { %v2942_v30 = vpop.f32.mrf.mxu0  ;;  %v2962_v50 = vpop.f32.mrf.mxu1 }
 0xd03   :  { %v2943_v52 = vadd.f32 %v2942_v30, %v7084_v24  ;;  %v2963_v49 = vadd.f32 %v2962_v50, %v7086_v34 }
 0xd05   :  { %v2985_v40 = vadd.f32 %v2943_v52, %v2517_v18  ;;  %v3005_v36 = vadd.f32 %v2963_v49, %v2558_v43 }
 0xd07   :  { %v3781_v3 = vmul.f32 -1.442695, %v2985_v40  ;;  %v3782_v56 = vmul.f32 -1.442695, %v3005_v36  ;;  %v2599_v40 = vadd.f32 %v6405_v4, %v6345_v7  ;;  %v6535_v4 = vld [vmem:[#allocation7 + $0x478] sm:$0xff] }
 0xd09   :  { %3984 = vpow2.f32 %v3781_v3  ;;  %v2982_v30 = vpop.f32.mrf.mxu2 }
 0xd0a   :  { %3986 = vpow2.f32 %v3782_v56  ;;  %v2983_v18 = vadd.f32 %v2982_v30, %v6343_v47  ;;  %v6561_v30 = vld [vmem:[#allocation7 + $0x410] sm:$0xff] }
 0xd0f   :  { %v3985_v2 = vpop.eup %3984 }
 0xd10   :  { %v3987_v5 = vpop.eup %3986  ;;  %v2989_v12 = vadd.f32 1.0, %v3985_v2 }
 0xd11   :  { %v3009_v33 = vadd.f32 1.0, %v3987_v5 }
 0xd12   :  { %3988 = vrcp.f32 %v2989_v12  ;;  %v3001_v28 = vand.u32 2147483648, %v2989_v12  ;;  %v2999_v42 = vand.u32 2147483647, %v2989_v12  ;;  %vm2995_vm3 = vweird.f32 %v2989_v12 }
 0xd13   :  { %3990 = vrcp.f32 %v3009_v33  ;;  %v3021_v36 = vand.u32 2147483648, %v3009_v33  ;;  %vm3015_vm7 = vweird.f32 %v3009_v33  ;;  %v3019_v56 = vand.u32 2147483647, %v3009_v33 }
 0xd14   :  { %v3002_v58 = vor.u32 1.1754944e-38, %v3001_v28  ;;  %vm3000_vm5 = vcmp.eq.f32.partialorder %v2999_v42, 8.507059e+37  ;;  %v6551_v42 = vld [vmem:[#allocation7 + $0x440] sm:$0xff] }
 0xd15   :  { %vm3020_vm9 = vcmp.eq.f32.partialorder %v3019_v56, 8.507059e+37 }
 0xd18   :  { %v3989_v48 = vpop.eup %3988 }
 0xd19   :  { %v3991_v41 = vpop.eup %3990  ;;  %v2991_v15 = vmul.f32 %v3989_v48, %v2989_v12  ;;  %vm2996_vm2 = vweird.f32 %v3989_v48  ;;  %v3022_v12 = vor.u32 1.1754944e-38, %v3021_v36 }
 0xd1a   :  { %v3011_v9 = vmul.f32 %v3991_v41, %v3009_v33  ;;  %vm2997_vm4 = vmor %vm2995_vm3, %vm2996_vm2  ;;  %vm3016_vm6 = vweird.f32 %v3991_v41  ;;  %v6539_v33 = vld [vmem:[#allocation7 + $0x470] sm:$0xff] }
 0xd1b   :  { %v2992_v45 = vsub.f32 1.0, %v2991_v15  ;;  %vm3017_vm8 = vmor %vm3015_vm7, %vm3016_vm6 }
 0xd1c   :  { %v3012_v35 = vsub.f32 1.0, %v3011_v9 }
 0xd1d   :  { %v2993_v17 = vmul.f32 %v3989_v48, %v2992_v45 }
 0xd1e   :  { %v3013_v23 = vmul.f32 %v3991_v41, %v3012_v35 }
 0xd1f   :  { %v2994_v50 = vadd.f32 %v3989_v48, %v2993_v17  ;;  %v6546_v17 = vld [vmem:[#allocation7 + $0x458] sm:$0xff] }
 0xd20   :  { %v3014_v49 = vadd.f32 %v3991_v41, %v3013_v23  ;;  %v6556_v23 = vld [vmem:[#allocation7 + $0x428] sm:$0xff] }
 0xd21   :  { %v2998_v43 = vsel %vm2997_vm4, %v3989_v48, %v2994_v50  ;;  %v7088_v50 = vld [vmem:[#allocation34_spill] sm:$0xff] }
 0xd22   :  { %v3003_v52 = vsel %vm3000_vm5, %v3002_v58, %v2998_v43  ;;  %v3018_v5 = vsel %vm3017_vm8, %v3991_v41, %v3014_v49  ;;  %v6542_v41 = vld [vmem:[#allocation7 + $0x460] sm:$0xff]  ;;  %v2561_v58 = vadd.f32 %v7088_v50, %v7085_v22  ;;  %v7089_v49 = vld [vmem:[#allocation48_spill] sm:$0xff] }
 0xd23   :  { %v3025_v3 = vmul.f32 %v3003_v52, %v2983_v18  ;;  %v3023_v15 = vsel %vm3020_vm9, %v3022_v12, %v3018_v5 }
 0xd24   :  { %v3028_v9 = vsub.f32 1.0, %v3023_v15  ;;  %v3030_v35 = vmul.f32 %v3023_v15, %v6435_v8 }
 0xd25   :  { %v3026_v2 = vadd.f32 %v3025_v3, %v2599_v40  ;;  %v2520_v40 = vadd.f32 %v7089_v49, %v7082_v29 }
 0xd27   :  { %3992 = vtanh.f32 %v3026_v2 }
 0xd2d   :  { %v3993_v48 = vpop.eup %3992 }
 0xd2e   :  { %v3029_v45 = vmul.f32 %v3993_v48, %v3028_v9 }
 0xd30   :  { %v6530_v28 = vadd.f32 %v3030_v35, %v3029_v45 }
 0xd32   :  { %3052 = vmatmul.f32.vlgmr.msra.gmra.mxu3 %v6530_v28  ;;  %3072 = vmatmul.f32.vlgmr.msra.gmra.mxu0 %v6530_v28 }
 0xd33   :  { %3092 = vmatmul.f32.vlgmr.msrb.gmra.mxu1 %v6530_v28  ;;  %3298 = vmatpush.msra.mxu3 %v6535_v4 }
 0xd34   :  { %3369 = vmatpush.msra.mxu0 %v6441_v59  ;;  %3389 = vmatpush.msrb.mxu1 %v6539_v33 }
 0xd35   :  { %3299 = vmatpush.msra.mxu3 %v6542_v41 }
 0xd36   :  { %3370 = vmatpush.msra.mxu0 %v6446_v14  ;;  %3390 = vmatpush.msrb.mxu1 %v6546_v17 }
 0xd37   :  { %3300 = vmatpush.msra.mxu3 %v6182_v27  ;;  %v6566_v27 = vld [vmem:[#allocation7 + $0x3f8] sm:$0xff] }
 0xd38   :  { %3371 = vmatpush.msra.mxu0 %v6451_v26  ;;  %3391 = vmatpush.msrb.mxu1 %v6551_v42 }
 0xd39   :  { %3301 = vmatpush.msra.mxu3 %v6184_v25  ;;  %v6571_v25 = vld [vmem:[#allocation7 + $0x3e0] sm:$0xff] }
 0xd3a   :  { %3372 = vmatpush.msra.mxu0 %v6456_v46  ;;  %3392 = vmatpush.msrb.mxu1 %v6556_v23 }
 0xd3b   :  { %3302 = vmatpush.msra.mxu3 %v6195_v53  ;;  %v6576_v53 = vld [vmem:[#allocation7 + $0x3c8] sm:$0xff] }
 0xd3c   :  { %3373 = vmatpush.msra.mxu0 %v6461_v13  ;;  %3393 = vmatpush.msrb.mxu1 %v6561_v30 }
 0xd3d   :  { %3303 = vmatpush.msra.mxu3 %v6199_v38  ;;  %v6581_v38 = vld [vmem:[#allocation7 + $0x3b0] sm:$0xff] }
 0xd3e   :  { %3374 = vmatpush.msra.mxu0 %v6466_v61  ;;  %3394 = vmatpush.msrb.mxu1 %v6566_v27 }
 0xd3f   :  { %3304 = vmatpush.msra.mxu3 %v6201_v21  ;;  %v6586_v21 = vld [vmem:[#allocation7 + $0x398] sm:$0xff] }
 0xd40   :  { %3375 = vmatpush.msra.mxu0 %v6471_v55  ;;  %3395 = vmatpush.msrb.mxu1 %v6571_v25 }
 0xd41   :  { %3305 = vmatpush.msra.mxu3 %v6209_v11  ;;  %v6591_v11 = vld [vmem:[#allocation7 + $0x380] sm:$0xff] }
 0xd42   :  { %3376 = vmatpush.msra.mxu0 %v6476_v57  ;;  %3396 = vmatpush.msrb.mxu1 %v6576_v53 }
 0xd43   :  { %3306 = vmatpush.msra.mxu3 %v6214_v62  ;;  %v6596_v62 = vld [vmem:[#allocation7 + $0x368] sm:$0xff] }
 0xd44   :  { %3377 = vmatpush.msra.mxu0 %v6481_v19  ;;  %3397 = vmatpush.msrb.mxu1 %v6581_v38 }
 0xd45   :  { %3307 = vmatpush.msra.mxu3 %v6219_v39  ;;  %v6601_v39 = vld [vmem:[#allocation7 + $0x350] sm:$0xff] }
 0xd46   :  { %3378 = vmatpush.msra.mxu0 %v6486_v60  ;;  %3398 = vmatpush.msrb.mxu1 %v6586_v21 }
 0xd47   :  { %3308 = vmatpush.msra.mxu3 %v7064_v51  ;;  %v6606_v51 = vld [vmem:[#allocation7 + $0x338] sm:$0xff] }
 0xd48   :  { %3379 = vmatpush.msra.mxu0 %v6491_v37  ;;  %3399 = vmatpush.msrb.mxu1 %v6591_v11 }
 0xd49   :  { %3309 = vmatpush.msra.mxu3 %v7065_v16  ;;  %v6611_v16 = vld [vmem:[#allocation7 + $0x320] sm:$0xff] }
 0xd4a   :  { %3380 = vmatpush.msra.mxu0 %v6496_v0  ;;  %3400 = vmatpush.msrb.mxu1 %v6596_v62 }
 0xd4b   :  { %3310 = vmatpush.msra.mxu3 %v7066_v54  ;;  %v6616_v54 = vld [vmem:[#allocation7 + $0x308] sm:$0xff] }
 0xd4c   :  { %3381 = vmatpush.msra.mxu0 %v6501_v20  ;;  %3401 = vmatpush.msrb.mxu1 %v6601_v39 }
 0xd4d   :  { %3311 = vmatpush.msra.mxu3 %v7067_v63 }
 0xd4e   :  { %3382 = vmatpush.msra.mxu0 %v6506_v44  ;;  %3402 = vmatpush.msrb.mxu1 %v6606_v51 }
 0xd4f   :  { %3312 = vmatpush.msra.mxu3 %v7068_v32 }
 0xd50   :  { %3383 = vmatpush.msra.mxu0 %v6511_v1  ;;  %3403 = vmatpush.msrb.mxu1 %v6611_v16 }
 0xd51   :  { %3313 = vmatpush.msra.mxu3 %v7069_v10 }
 0xd52   :  { %3384 = vmatpush.msra.mxu0 %v6516_v31  ;;  %3404 = vmatpush.msrb.mxu1 %v6616_v54 }
 0xdaf   :  { %v3073_v63 = vpop.f32.mrf.mxu0 }
 0xdb0   :  { %v3074_v32 = vadd.f32 %v3073_v63, %v7086_v34 }
 0xdb2   :  { %v3116_v18 = vadd.f32 %v3074_v32, %v2561_v58 }
 0xdb4   :  { %v3784_v43 = vmul.f32 -1.442695, %v3116_v18 }
 0xdb5   :  { %v3053_v52 = vpop.f32.mrf.mxu3 }
 0xdb6   :  { %3994 = vpow2.f32 %v3784_v43  ;;  %v3054_v10 = vadd.f32 %v3053_v52, %v7084_v24  ;;  %v3093_v43 = vpop.f32.mrf.mxu1 }
 0xdb8   :  { %v3096_v36 = vadd.f32 %v3054_v10, %v2520_v40  ;;  %v3094_v40 = vadd.f32 %v3093_v43, %v6343_v47 }
 0xdba   :  { %v3783_v3 = vmul.f32 -1.442695, %v3096_v36 }
 0xdbc   :  { %v3995_v56 = vpop.eup %3994  ;;  %3996 = vpow2.f32 %v3783_v3 }
 0xdbd   :  { %v3120_v2 = vadd.f32 1.0, %v3995_v56  ;;  %v7090_v56 = vld [vmem:[#allocation44_spill] sm:$0xff] }
 0xdbf   :  { %3998 = vrcp.f32 %v3120_v2  ;;  %vm3126_vm15 = vweird.f32 %v3120_v2 }
 0xdc2   :  { %v3997_v5 = vpop.eup %3996 }
 0xdc3   :  { %v3100_v12 = vadd.f32 1.0, %v3997_v5  ;;  %v2602_v5 = vadd.f32 %v7090_v56, %v6345_v7 }
 0xdc5   :  { %4000 = vrcp.f32 %v3100_v12  ;;  %v3999_v15 = vpop.eup %3998  ;;  %v3112_v50 = vand.u32 2147483648, %v3100_v12  ;;  %v3110_v32 = vand.u32 2147483647, %v3100_v12  ;;  %vm3106_vm11 = vweird.f32 %v3100_v12 }
 0xdc6   :  { %v3122_v9 = vmul.f32 %v3999_v15, %v3120_v2  ;;  %vm3127_vm14 = vweird.f32 %v3999_v15 }
 0xdc7   :  { %v3113_v49 = vor.u32 1.1754944e-38, %v3112_v50  ;;  %vm3111_vm13 = vcmp.eq.f32.partialorder %v3110_v32, 8.507059e+37  ;;  %vm3128_vm0 = vmor %vm3126_vm15, %vm3127_vm14 }
 0xdc8   :  { %v3123_v35 = vsub.f32 1.0, %v3122_v9  ;;  %v3132_v9 = vand.u32 2147483648, %v3120_v2 }
 0xdca   :  { %v3124_v18 = vmul.f32 %v3999_v15, %v3123_v35 }
 0xdcb   :  { %v4001_v48 = vpop.eup %4000 }
 0xdcc   :  { %v3102_v45 = vmul.f32 %v4001_v48, %v3100_v12  ;;  %vm3107_vm10 = vweird.f32 %v4001_v48  ;;  %v3125_v3 = vadd.f32 %v3999_v15, %v3124_v18  ;;  %v3133_v12 = vor.u32 1.1754944e-38, %v3132_v9 }
 0xdcd   :  { %vm3108_vm12 = vmor %vm3106_vm11, %vm3107_vm10 }
 0xdce   :  { %v3103_v63 = vsub.f32 1.0, %v3102_v45 }
 0xdd0   :  { %v3104_v58 = vmul.f32 %v4001_v48, %v3103_v63  ;;  %v3130_v63 = vand.u32 2147483647, %v3120_v2  ;;  %v6640_v2 = vld [vmem:[#allocation7 + $0x448] sm:$0xff] }
 0xdd2   :  { %v3105_v52 = vadd.f32 %v4001_v48, %v3104_v58  ;;  %v3129_v58 = vsel %vm3128_vm0, %v3999_v15, %v3125_v3  ;;  %vm3131_vm1 = vcmp.eq.f32.partialorder %v3130_v63, 8.507059e+37  ;;  %v6645_v15 = vld [vmem:[#allocation7 + $0x430] sm:$0xff] }
 0xdd3   :  { %v3134_v50 = vsel %vm3131_vm1, %v3133_v12, %v3129_v58 }
 0xdd4   :  { %v3109_v10 = vsel %vm3108_vm12, %v4001_v48, %v3105_v52  ;;  %v3139_v43 = vsub.f32 1.0, %v3134_v50  ;;  %v3141_v52 = vmul.f32 %v3134_v50, %v6530_v28  ;;  %v7093_v50 = vld [vmem:[#allocation33_spill] sm:$0xff] }
 0xdd5   :  { %v3114_v36 = vsel %vm3111_vm13, %v3113_v49, %v3109_v10 }
 0xdd6   :  { %v3136_v45 = vmul.f32 %v3114_v36, %v3094_v40 }
 0xdd8   :  { %v3137_v35 = vadd.f32 %v3136_v45, %v2602_v5 }
 0xdda   :  { %4002 = vtanh.f32 %v3137_v35 }
 0xde0   :  { %v4003_v48 = vpop.eup %4002 }
 0xde1   :  { %v3140_v32 = vmul.f32 %v4003_v48, %v3139_v43  ;;  %v2605_v43 = vadd.f32 %v7093_v50, %v6345_v7 }
 0xde3   :  { %v6629_v18 = vadd.f32 %v3141_v52, %v3140_v32 }
 0xde5   :  { %3163 = vmatmul.f32.vlgmr.msra.gmra.mxu2 %v6629_v18  ;;  %3183 = vmatmul.f32.vlgmr.msrb.gmra.mxu3 %v6629_v18 }
 0xde6   :  { %3203 = vmatmul.f32.vlgmr.msrb.gmra.mxu0 %v6629_v18  ;;  %3409 = vmatpush.msra.mxu2 %v6535_v4 }
 0xde7   :  { %3480 = vmatpush.msrb.mxu3 %v6441_v59  ;;  %3500 = vmatpush.msrb.mxu0 %v6539_v33  ;;  %v6650_v59 = vld [vmem:[#allocation7 + $0x418] sm:$0xff]  ;;  %v7091_v33 = vld [vmem:[#allocation43_spill] sm:$0xff] }
 0xde8   :  { %3410 = vmatpush.msra.mxu2 %v6542_v41 }
 0xde9   :  { %3481 = vmatpush.msrb.mxu3 %v6446_v14  ;;  %3501 = vmatpush.msrb.mxu0 %v6546_v17  ;;  %v6655_v14 = vld [vmem:[#allocation7 + $0x400] sm:$0xff]  ;;  %v2523_v17 = vadd.f32 %v7091_v33, %v7082_v29 }
 0xdea   :  { %3411 = vmatpush.msra.mxu2 %v6640_v2 }
 0xdeb   :  { %3482 = vmatpush.msrb.mxu3 %v6451_v26  ;;  %3502 = vmatpush.msrb.mxu0 %v6551_v42  ;;  %v6660_v26 = vld [vmem:[#allocation7 + $0x3e8] sm:$0xff]  ;;  %v7092_v42 = vld [vmem:[#allocation45_spill] sm:$0xff] }
 0xdec   :  { %3412 = vmatpush.msra.mxu2 %v6645_v15 }
 0xded   :  { %3483 = vmatpush.msrb.mxu3 %v6456_v46  ;;  %3503 = vmatpush.msrb.mxu0 %v6556_v23  ;;  %v6665_v46 = vld [vmem:[#allocation7 + $0x3d0] sm:$0xff]  ;;  %v2564_v23 = vadd.f32 %v7092_v42, %v7085_v22 }
 0xdee   :  { %3413 = vmatpush.msra.mxu2 %v6650_v59 }
 0xdef   :  { %3484 = vmatpush.msrb.mxu3 %v6461_v13  ;;  %3504 = vmatpush.msrb.mxu0 %v6561_v30  ;;  %v6670_v13 = vld [vmem:[#allocation7 + $0x3b8] sm:$0xff] }
 0xdf0   :  { %3414 = vmatpush.msra.mxu2 %v6655_v14 }
 0xdf1   :  { %3485 = vmatpush.msrb.mxu3 %v6466_v61  ;;  %3505 = vmatpush.msrb.mxu0 %v6566_v27  ;;  %v6675_v61 = vld [vmem:[#allocation7 + $0x3a0] sm:$0xff] }
 0xdf2   :  { %3415 = vmatpush.msra.mxu2 %v6660_v26 }
 0xdf3   :  { %3486 = vmatpush.msrb.mxu3 %v6471_v55  ;;  %3506 = vmatpush.msrb.mxu0 %v6571_v25  ;;  %v6680_v55 = vld [vmem:[#allocation7 + $0x388] sm:$0xff] }
 0xdf4   :  { %3416 = vmatpush.msra.mxu2 %v6665_v46 }
 0xdf5   :  { %3487 = vmatpush.msrb.mxu3 %v6476_v57  ;;  %3507 = vmatpush.msrb.mxu0 %v6576_v53  ;;  %v6685_v57 = vld [vmem:[#allocation7 + $0x370] sm:$0xff] }
 0xdf6   :  { %3417 = vmatpush.msra.mxu2 %v6670_v13 }
 0xdf7   :  { %3488 = vmatpush.msrb.mxu3 %v6481_v19  ;;  %3508 = vmatpush.msrb.mxu0 %v6581_v38  ;;  %v6690_v19 = vld [vmem:[#allocation7 + $0x358] sm:$0xff] }
 0xdf8   :  { %3418 = vmatpush.msra.mxu2 %v6675_v61 }
 0xdf9   :  { %3489 = vmatpush.msrb.mxu3 %v6486_v60  ;;  %3509 = vmatpush.msrb.mxu0 %v6586_v21  ;;  %v6695_v60 = vld [vmem:[#allocation7 + $0x340] sm:$0xff] }
 0xdfa   :  { %3419 = vmatpush.msra.mxu2 %v6680_v55 }
 0xdfb   :  { %3490 = vmatpush.msrb.mxu3 %v6491_v37  ;;  %3510 = vmatpush.msrb.mxu0 %v6591_v11  ;;  %v6700_v37 = vld [vmem:[#allocation7 + $0x328] sm:$0xff] }
 0xdfc   :  { %3420 = vmatpush.msra.mxu2 %v6685_v57 }
 0xdfd   :  { %3491 = vmatpush.msrb.mxu3 %v6496_v0  ;;  %3511 = vmatpush.msrb.mxu0 %v6596_v62  ;;  %v6705_v0 = vld [vmem:[#allocation7 + $0x310] sm:$0xff] }
 0xdfe   :  { %3421 = vmatpush.msra.mxu2 %v6690_v19 }
 0xdff   :  { %3492 = vmatpush.msrb.mxu3 %v6501_v20  ;;  %3512 = vmatpush.msrb.mxu0 %v6601_v39 }
 0xe00   :  { %3422 = vmatpush.msra.mxu2 %v6695_v60 }
 0xe01   :  { %3493 = vmatpush.msrb.mxu3 %v6506_v44  ;;  %3513 = vmatpush.msrb.mxu0 %v6606_v51 }
 0xe02   :  { %3423 = vmatpush.msra.mxu2 %v6700_v37 }
 0xe03   :  { %3494 = vmatpush.msrb.mxu3 %v6511_v1  ;;  %3514 = vmatpush.msrb.mxu0 %v6611_v16 }
 0xe04   :  { %3424 = vmatpush.msra.mxu2 %v6705_v0 }
 0xe05   :  { %3495 = vmatpush.msrb.mxu3 %v6516_v31  ;;  %3515 = vmatpush.msrb.mxu0 %v6616_v54 }
 0xe63   :  { %v3204_v56 = vpop.f32.mrf.mxu0 }
 0xe64   :  { %v3205_v63 = vadd.f32 %v3204_v56, %v6343_v47 }
 0xe68   :  { %v3164_v20 = vpop.f32.mrf.mxu2  ;;  %v3184_v44 = vpop.f32.mrf.mxu3 }
 0xe69   :  { %v3165_v1 = vadd.f32 %v3164_v20, %v7084_v24  ;;  %v3185_v30 = vadd.f32 %v3184_v44, %v7086_v34 }
 0xe6b   :  { %v3207_v27 = vadd.f32 %v3165_v1, %v2523_v17  ;;  %v3227_v25 = vadd.f32 %v3185_v30, %v2564_v23 }
 0xe6d   :  { %v3785_v53 = vmul.f32 -1.442695, %v3207_v27  ;;  %v3786_v38 = vmul.f32 -1.442695, %v3227_v25  ;;  %v3607_v25 = vld [vmem:[#allocation9 + $0x48] sm:$0xff] }
 0xe6f   :  { %4004 = vpow2.f32 %v3785_v53 }
 0xe70   :  { %4006 = vpow2.f32 %v3786_v38  ;;  %v3606_v38 = vld [vmem:[#allocation9 + $0x40] sm:$0xff] }
 0xe75   :  { %v4005_v31 = vpop.eup %4004 }
 0xe76   :  { %v4007_v21 = vpop.eup %4006  ;;  %v3211_v11 = vadd.f32 1.0, %v4005_v31 }
 0xe77   :  { %v3231_v62 = vadd.f32 1.0, %v4007_v21  ;;  %v3605_v21 = vld [vmem:[#allocation9 + $0x38] sm:$0xff] }
 0xe78   :  { %4008 = vrcp.f32 %v3211_v11  ;;  %v3223_v40 = vand.u32 2147483648, %v3211_v11  ;;  %v3221_v3 = vand.u32 2147483647, %v3211_v11  ;;  %vm3217_vm3 = vweird.f32 %v3211_v11 }
 0xe79   :  { %4010 = vrcp.f32 %v3231_v62  ;;  %v3243_v32 = vand.u32 2147483648, %v3231_v62  ;;  %vm3237_vm7 = vweird.f32 %v3231_v62  ;;  %v3241_v52 = vand.u32 2147483647, %v3231_v62 }
 0xe7a   :  { %v3224_v45 = vor.u32 1.1754944e-38, %v3223_v40  ;;  %vm3222_vm5 = vcmp.eq.f32.partialorder %v3221_v3, 8.507059e+37  ;;  %v3599_v3 = vld [vmem:[#allocation9 + $0x8] sm:$0xff] }
 0xe7b   :  { %v3244_v33 = vor.u32 1.1754944e-38, %v3243_v32  ;;  %vm3242_vm9 = vcmp.eq.f32.partialorder %v3241_v52, 8.507059e+37 }
 0xe7e   :  { %v4009_v39 = vpop.eup %4008 }
 0xe7f   :  { %v4011_v51 = vpop.eup %4010  ;;  %v3213_v16 = vmul.f32 %v4009_v39, %v3211_v11  ;;  %vm3218_vm2 = vweird.f32 %v4009_v39  ;;  %v3604_v11 = vld [vmem:[#allocation9 + $0x30] sm:$0xff] }
 0xe80   :  { %v3233_v54 = vmul.f32 %v4011_v51, %v3231_v62  ;;  %vm3219_vm4 = vmor %vm3217_vm3, %vm3218_vm2  ;;  %vm3238_vm6 = vweird.f32 %v4011_v51 }
 0xe81   :  { %v3214_v49 = vsub.f32 1.0, %v3213_v16  ;;  %vm3239_vm8 = vmor %vm3237_vm7, %vm3238_vm6  ;;  %v3602_v16 = vld [vmem:[#allocation9 + $0x20] sm:$0xff] }
 0xe82   :  { %v3234_v10 = vsub.f32 1.0, %v3233_v54  ;;  %v3601_v54 = vld [vmem:[#allocation9 + $0x18] sm:$0xff] }
 0xe83   :  { %v3215_v36 = vmul.f32 %v4009_v39, %v3214_v49 }
 0xe84   :  { %v3235_v5 = vmul.f32 %v4011_v51, %v3234_v10  ;;  %v3600_v10 = vld [vmem:[#allocation9 + $0x10] sm:$0xff] }
 0xe85   :  { %v3216_v9 = vadd.f32 %v4009_v39, %v3215_v36 }
 0xe86   :  { %v3236_v12 = vadd.f32 %v4011_v51, %v3235_v5  ;;  %v3598_v5 = vld [vmem:[#allocation9] sm:$0xff] }
 0xe87   :  { %v3220_v35 = vsel %vm3219_vm4, %v4009_v39, %v3216_v9 }
 0xe88   :  { %v3225_v58 = vsel %vm3222_vm5, %v3224_v45, %v3220_v35  ;;  %v3240_v44 = vsel %vm3239_vm8, %v4011_v51, %v3236_v12  ;;  %v3603_v51 = vld [vmem:[#allocation9 + $0x28] sm:$0xff] }
 0xe89   :  { %v3247_v48 = vmul.f32 %v3225_v58, %v3205_v63  ;;  %v3245_v17 = vsel %vm3242_vm9, %v3244_v33, %v3240_v44  ;;  %v7096_v44 = vld [vmem:[#allocation35_spill] sm:$0xff] }
 0xe8a   :  { %v3250_v42 = vsub.f32 1.0, %v3245_v17  ;;  %v3252_v30 = vmul.f32 %v3245_v17, %v6629_v18  ;;  %v2608_v33 = vadd.f32 %v7096_v44, %v6345_v7 }
 0xe8b   :  { %v3248_v20 = vadd.f32 %v3247_v48, %v2605_v43 }
 0xe8d   :  { %4012 = vtanh.f32 %v3248_v20 }
 0xe93   :  { %v4013_v23 = vpop.eup %4012 }
 0xe94   :  { %v3251_v1 = vmul.f32 %v4013_v23, %v3250_v42 }
 0xe96   :  { %v6720_v27 = vadd.f32 %v3252_v30, %v3251_v1 }
 0xe98   :  { %3274 = vmatmul.f32.vlgmr.msra.gmra.mxu1 %v6720_v27  ;;  %3294 = vmatmul.f32.vlgmr.msrb.gmra.mxu2 %v6720_v27 }
 0xe99   :  { %3314 = vmatmul.f32.vlgmr.msra.gmra.mxu3 %v6720_v27  ;;  %3520 = vmatpush.msra.mxu1 %v6535_v4  ;;  %v3613_v4 = vld [vmem:[#allocation9 + $0x78] sm:$0xff] }
 0xe9a   :  { %3618 = vmatpush.msrb.mxu2 %v3613_v4 }
 0xe9b   :  { %3521 = vmatpush.msra.mxu1 %v6542_v41  ;;  %v3612_v41 = vld [vmem:[#allocation9 + $0x70] sm:$0xff] }
 0xe9c   :  { %3619 = vmatpush.msrb.mxu2 %v3612_v41 }
 0xe9d   :  { %3522 = vmatpush.msra.mxu1 %v6640_v2 }
 0xe9f   :  { %3523 = vmatpush.msra.mxu1 %v6645_v15  ;;  %v3611_v15 = vld [vmem:[#allocation9 + $0x68] sm:$0xff] }
 0xea0   :  { %3620 = vmatpush.msrb.mxu2 %v3611_v15 }
 0xea1   :  { %3524 = vmatpush.msra.mxu1 %v6650_v59  ;;  %v7094_v59 = vld [vmem:[#allocation30_spill] sm:$0xff] }
 0xea3   :  { %3525 = vmatpush.msra.mxu1 %v6655_v14  ;;  %v2526_v14 = vadd.f32 %v7094_v59, %v7082_v29 }
 0xea5   :  { %3526 = vmatpush.msra.mxu1 %v6660_v26 }
 0xea7   :  { %3527 = vmatpush.msra.mxu1 %v6665_v46  ;;  %v3610_v46 = vld [vmem:[#allocation9 + $0x60] sm:$0xff] }
 0xea8   :  { %3621 = vmatpush.msrb.mxu2 %v3610_v46 }
 0xea9   :  { %3528 = vmatpush.msra.mxu1 %v6670_v13 }
 0xeab   :  { %3529 = vmatpush.msra.mxu1 %v6675_v61  ;;  %v3609_v61 = vld [vmem:[#allocation9 + $0x58] sm:$0xff] }
 0xeac   :  { %3622 = vmatpush.msrb.mxu2 %v3609_v61 }
 0xead   :  { %3530 = vmatpush.msra.mxu1 %v6680_v55 }
 0xeaf   :  { %3531 = vmatpush.msra.mxu1 %v6685_v57 }
 0xeb1   :  { %3532 = vmatpush.msra.mxu1 %v6690_v19  ;;  %v3608_v19 = vld [vmem:[#allocation9 + $0x50] sm:$0xff] }
 0xeb2   :  { %3623 = vmatpush.msrb.mxu2 %v3608_v19  ;;  %v7097_v19 = vld [vmem:[#allocation19_spill] sm:$0xff] }
 0xeb3   :  { %3533 = vmatpush.msra.mxu1 %v6695_v60  ;;  %v7095_v60 = vld [vmem:[#allocation40_spill] sm:$0xff] }
 0xeb4   :  { %3624 = vmatpush.msrb.mxu2 %v3607_v25 }
 0xeb5   :  { %3534 = vmatpush.msra.mxu1 %v6700_v37  ;;  %v2567_v37 = vadd.f32 %v7095_v60, %v7085_v22  ;;  %v2529_v60 = vadd.f32 %v7097_v19, %v7082_v29 }
 0xeb6   :  { %3625 = vmatpush.msrb.mxu2 %v3606_v38 }
 0xeb7   :  { %3535 = vmatpush.msra.mxu1 %v6705_v0 }
 0xeb8   :  { %3626 = vmatpush.msrb.mxu2 %v3605_v21 }
 0xeba   :  { %3627 = vmatpush.msrb.mxu2 %v3604_v11  ;;  %v6771_v11 = vld [vmem:[%s6821_s8] ss:$0 sm:$0xff]  ;;  %s4323_s8 = smov [#allocation11]  }
 0xebb   :  { %s3684_s22 = sshll.u32 %s4323_s8, 4  ;;  %s3685_s22 = int_to_ptr.vmem [resolvable:$true] %s3684_s22 }
 0xebc   :  { %3628 = vmatpush.msrb.mxu2 %v3603_v51 }
 0xebe   :  { %3629 = vmatpush.msrb.mxu2 %v3602_v16 }
 0xec0   :  { %3630 = vmatpush.msrb.mxu2 %v3601_v54 }
 0xec2   :  { %3631 = vmatpush.msrb.mxu2 %v3600_v10 }
 0xec4   :  { %3632 = vmatpush.msrb.mxu2 %v3599_v3 }
 0xec6   :  { %3633 = vmatpush.msrb.mxu2 %v3598_v5 }
 0xf15   :  { %v3275_v2 = vpop.f32.mrf.mxu1 }
 0xf16   :  { %v3276_v26 = vadd.f32 %v3275_v2, %v7084_v24 }
 0xf18   :  { %v3318_v13 = vadd.f32 %v3276_v26, %v2526_v14 }
 0xf1a   :  { %v3787_v55 = vmul.f32 -1.442695, %v3318_v13 }
 0xf1b   :  { %v3295_v57 = vpop.f32.mrf.mxu2 }
 0xf1c   :  { %4014 = vpow2.f32 %v3787_v55  ;;  %v3296_v0 = vadd.f32 %v3295_v57, %v7086_v34  ;;  %v3315_v12 = vpop.f32.mrf.mxu3 }
 0xf1d   :  { %v3316_v52 = vadd.f32 %v3315_v12, %v6343_v47 }
 0xf1e   :  { %v3338_v53 = vadd.f32 %v3296_v0, %v2567_v37  ;;  %v7098_v37 = vld [vmem:[#allocation37_spill] sm:$0xff] }
 0xf1f   :  { %v2570_v0 = vadd.f32 %v7098_v37, %v7085_v22 }
 0xf20   :  { %v3788_v31 = vmul.f32 -1.442695, %v3338_v53 }
 0xf22   :  { %v4015_v62 = vpop.eup %4014  ;;  %4016 = vpow2.f32 %v3788_v31 }
 0xf23   :  { %v3322_v39 = vadd.f32 1.0, %v4015_v62 }
 0xf25   :  { %4018 = vrcp.f32 %v3322_v39  ;;  %v3334_v45 = vand.u32 2147483648, %v3322_v39  ;;  %v3332_v35 = vand.u32 2147483647, %v3322_v39  ;;  %vm3328_vm11 = vweird.f32 %v3322_v39 }
 0xf27   :  { %v3335_v48 = vor.u32 1.1754944e-38, %v3334_v45  ;;  %vm3333_vm13 = vcmp.eq.f32.partialorder %v3332_v35, 8.507059e+37 }
 0xf28   :  { %v4017_v49 = vpop.eup %4016 }
 0xf29   :  { %v3342_v40 = vadd.f32 1.0, %v4017_v49 }
 0xf2b   :  { %v4019_v36 = vpop.eup %4018  ;;  %4020 = vrcp.f32 %v3342_v40  ;;  %v3354_v23 = vand.u32 2147483648, %v3342_v40  ;;  %v3352_v30 = vand.u32 2147483647, %v3342_v40  ;;  %vm3348_vm15 = vweird.f32 %v3342_v40 }
 0xf2c   :  { %v3324_v56 = vmul.f32 %v4019_v36, %v3322_v39  ;;  %vm3329_vm10 = vweird.f32 %v4019_v36 }
 0xf2d   :  { %vm3330_vm12 = vmor %vm3328_vm11, %vm3329_vm10  ;;  %v3355_v2 = vor.u32 1.1754944e-38, %v3354_v23  ;;  %vm3353_vm1 = vcmp.eq.f32.partialorder %v3352_v30, 8.507059e+37 }
 0xf2e   :  { %v3325_v9 = vsub.f32 1.0, %v3324_v56 }
 0xf30   :  { %v3326_v63 = vmul.f32 %v4019_v36, %v3325_v9 }
 0xf31   :  { %v4021_v58 = vpop.eup %4020 }
 0xf32   :  { %v3344_v50 = vmul.f32 %v4021_v58, %v3342_v40  ;;  %v3327_v43 = vadd.f32 %v4019_v36, %v3326_v63  ;;  %vm3349_vm14 = vweird.f32 %v4021_v58 }
 0xf33   :  { %vm3350_vm0 = vmor %vm3348_vm15, %vm3349_vm14 }
 0xf34   :  { %v3345_v32 = vsub.f32 1.0, %v3344_v50  ;;  %v3331_v20 = vsel %vm3330_vm12, %v4019_v36, %v3327_v43 }
 0xf35   :  { %v3336_v17 = vsel %vm3333_vm13, %v3335_v48, %v3331_v20  ;;  %v7099_v20 = vld [vmem:[#allocation50_spill] sm:$0xff] }
 0xf36   :  { %v3346_v42 = vmul.f32 %v4021_v58, %v3345_v32  ;;  %v3358_v1 = vmul.f32 %v3336_v17, %v3316_v52  ;;  %v2611_v44 = vadd.f32 %v7099_v20, %v6345_v7 }
 0xf38   :  { %v3347_v4 = vadd.f32 %v4021_v58, %v3346_v42  ;;  %v3359_v41 = vadd.f32 %v3358_v1, %v2608_v33 }
 0xf3a   :  { %v3351_v15 = vsel %vm3350_vm0, %v4021_v58, %v3347_v4  ;;  %4022 = vtanh.f32 %v3359_v41 }
 0xf3b   :  { %v3356_v59 = vsel %vm3353_vm1, %v3355_v2, %v3351_v15 }
 0xf3c   :  { %v3361_v14 = vsub.f32 1.0, %v3356_v59  ;;  %v3363_v13 = vmul.f32 %v3356_v59, %v6720_v27 }
 0xf40   :  { %v4023_v26 = vpop.eup %4022 }
 0xf41   :  { %v3362_v46 = vmul.f32 %v4023_v26, %v3361_v14 }
 0xf43   :  { %v6751_v61 = vadd.f32 %v3363_v13, %v3362_v46 }
 0xf45   :  { %3385 = vmatmul.f32.vlgmr.msra.gmra.mxu0 %v6751_v61  ;;  %3405 = vmatmul.f32.vlgmr.msrb.gmra.mxu1 %v6751_v61 }
 0xf46   :  { %3425 = vmatmul.f32.vlgmr.msra.gmra.mxu2 %v6751_v61 }
 0xf4e   :  { %3634 = vmatmul.f32.vlgmr.msrb.gmra.mxu2 %v6350_v6 }
 0xf56   :  { %3637 = vmatmul.f32.gmra.mxu2 %v6435_v8 }
 0xf5e   :  { %3640 = vmatmul.f32.gmra.mxu2 %v6530_v28 }
 0xf66   :  { %3643 = vmatmul.f32.gmra.mxu2 %v6629_v18 }
 0xf6e   :  { %3646 = vmatmul.f32.gmra.mxu2 %v6720_v27 }
 0xf76   :  { %3649 = vmatmul.f32.gmra.mxu2 %v6751_v61 }
 0xfc2   :  { %v3386_v55 = vpop.f32.mrf.mxu0  ;;  %v3406_v57 = vpop.f32.mrf.mxu1 }
 0xfc3   :  { %v3387_v6 = vadd.f32 %v3386_v55, %v7084_v24  ;;  %v3407_v8 = vadd.f32 %v3406_v57, %v7086_v34 }
 0xfc5   :  { %v3429_v25 = vadd.f32 %v3387_v6, %v2529_v60  ;;  %v3449_v28 = vadd.f32 %v3407_v8, %v2570_v0 }
 0xfc7   :  { %v3789_v53 = vmul.f32 -1.442695, %v3429_v25  ;;  %v3790_v18 = vmul.f32 -1.442695, %v3449_v28  ;;  %v7101_v28 = vld [vmem:[#allocation26_spill] sm:$0xff] }
 0xfc9   :  { %4024 = vpow2.f32 %v3789_v53  ;;  %v3426_v27 = vpop.f32.mrf.mxu2  ;;  %v2532_v53 = vadd.f32 %v7101_v28, %v7082_v29 }
 0xfca   :  { %4026 = vpow2.f32 %v3790_v18  ;;  %v3427_v12 = vadd.f32 %v3426_v27, %v6343_v47 }
 0xfcf   :  { %v4025_v38 = vpop.eup %4024 }
 0xfd0   :  { %v4027_v31 = vpop.eup %4026  ;;  %v3433_v21 = vadd.f32 1.0, %v4025_v38 }
 0xfd1   :  { %v3453_v62 = vadd.f32 1.0, %v4027_v31  ;;  %v3635_v39 = vpop.f32.mrf.mxu2 }
 0xfd2   :  { %4028 = vrcp.f32 %v3433_v21  ;;  %v3636_v51 = vadd.f32 %v6771_v11, %v3635_v39  ;;  %v3445_v5 = vand.u32 2147483648, %v3433_v21  ;;  %v3443_v45 = vand.u32 2147483647, %v3433_v21 }
 0xfd3   :  { %4030 = vrcp.f32 %v3453_v62  ;;  %vm3439_vm3 = vweird.f32 %v3433_v21  ;;  %v3465_v33 = vand.u32 2147483648, %v3453_v62  ;;  %vm3459_vm7 = vweird.f32 %v3453_v62 }
 0xfd4   :  { %3659 = vst [vmem:[#allocation10] sm:$0xff] %v3636_v51  ;;  %v3446_v58 = vor.u32 1.1754944e-38, %v3445_v5  ;;  %vm3444_vm5 = vcmp.eq.f32.partialorder %v3443_v45, 8.507059e+37  ;;  %v3463_v42 = vand.u32 2147483647, %v3453_v62 }
 0xfd5   :  { %v3466_v30 = vor.u32 1.1754944e-38, %v3465_v33 }
 0xfd6   :  { %vm3464_vm9 = vcmp.eq.f32.partialorder %v3463_v42, 8.507059e+37 }
 0xfd8   :  { %v4029_v16 = vpop.eup %4028 }
 0xfd9   :  { %v4031_v54 = vpop.eup %4030  ;;  %v3435_v49 = vmul.f32 %v4029_v16, %v3433_v21  ;;  %v3638_v40 = vpop.f32.mrf.mxu2  ;;  %vm3440_vm2 = vweird.f32 %v4029_v16 }
 0xfda   :  { %v3455_v10 = vmul.f32 %v4031_v54, %v3453_v62  ;;  %v3639_v36 = vadd.f32 %v6771_v11, %v3638_v40  ;;  %vm3441_vm4 = vmor %vm3439_vm3, %vm3440_vm2  ;;  %vm3460_vm6 = vweird.f32 %v4031_v54 }
 0xfdb   :  { %v3436_v3 = vsub.f32 1.0, %v3435_v49  ;;  %vm3461_vm8 = vmor %vm3459_vm7, %vm3460_vm6 }
 0xfdc   :  { %v3456_v56 = vsub.f32 1.0, %v3455_v10  ;;  %3660 = vst [vmem:[#allocation10 + $0x8] sm:$0xff] %v3639_v36 }
 0xfdd   :  { %v3437_v9 = vmul.f32 %v4029_v16, %v3436_v3 }
 0xfde   :  { %v3457_v63 = vmul.f32 %v4031_v54, %v3456_v56 }
 0xfdf   :  { %v3438_v35 = vadd.f32 %v4029_v16, %v3437_v9 }
 0xfe0   :  { %v3458_v32 = vadd.f32 %v4031_v54, %v3457_v63 }
 0xfe1   :  { %v3442_v50 = vsel %vm3441_vm4, %v4029_v16, %v3438_v35  ;;  %v3641_v43 = vpop.f32.mrf.mxu2 }
 0xfe2   :  { %v3447_v48 = vsel %vm3444_vm5, %v3446_v58, %v3442_v50  ;;  %v3642_v52 = vadd.f32 %v6771_v11, %v3641_v43  ;;  %v3462_v1 = vsel %vm3461_vm8, %v4031_v54, %v3458_v32 }
 0xfe3   :  { %v3469_v17 = vmul.f32 %v3447_v48, %v3427_v12  ;;  %v3467_v4 = vsel %vm3464_vm9, %v3466_v30, %v3462_v1  ;;  %v7102_v12 = vld [vmem:[#allocation36_spill] sm:$0xff] }
 0xfe4   :  { %3661 = vst [vmem:[#allocation10 + $0x10] sm:$0xff] %v3642_v52  ;;  %v3472_v15 = vsub.f32 1.0, %v3467_v4  ;;  %v3474_v26 = vmul.f32 %v3467_v4, %v6751_v61  ;;  %v7100_v61 = vld [vmem:[#allocation27_spill] sm:$0xff]  ;;  %v2614_v50 = vadd.f32 %v7102_v12, %v6345_v7 }
 0xfe5   :  { %v3470_v23 = vadd.f32 %v3469_v17, %v2611_v44  ;;  %v2573_v37 = vadd.f32 %v7100_v61, %v7085_v22 }
 0xfe7   :  { %4032 = vtanh.f32 %v3470_v23 }
 0xfe9   :  { %v3644_v41 = vpop.f32.mrf.mxu2 }
 0xfea   :  { %v3645_v2 = vadd.f32 %v6771_v11, %v3644_v41 }
 0xfec   :  { %3662 = vst [vmem:[#allocation10 + $0x18] sm:$0xff] %v3645_v2 }
 0xfed   :  { %v4033_v59 = vpop.eup %4032 }
 0xfee   :  { %v3473_v14 = vmul.f32 %v4033_v59, %v3472_v15 }
 0xff0   :  { %v6781_v46 = vadd.f32 %v3474_v26, %v3473_v14 }
 0xff1   :  { %v3647_v13 = vpop.f32.mrf.mxu2 }
 0xff2   :  { %v3648_v55 = vadd.f32 %v6771_v11, %v3647_v13  ;;  %3496 = vmatmul.f32.vlgmr.msrb.gmra.mxu3 %v6781_v46  ;;  %3516 = vmatmul.f32.vlgmr.msrb.gmra.mxu0 %v6781_v46 }
 0xff3   :  { %3536 = vmatmul.f32.vlgmr.msra.gmra.mxu1 %v6781_v46  ;;  %3652 = vmatmul.f32.gmra.mxu2 %v6781_v46 }
 0xff4   :  { %3663 = vst [vmem:[#allocation10 + $0x20] sm:$0xff] %v3648_v55 }
 0xff9   :  { %v3650_v57 = vpop.f32.mrf.mxu2 }
 0xffa   :  { %v3651_v19 = vadd.f32 %v6771_v11, %v3650_v57 }
 0xffc   :  { %3664 = vst [vmem:[#allocation10 + $0x28] sm:$0xff] %v3651_v19 }
0x106f   :  { %v3517_v60 = vpop.f32.mrf.mxu0 }
0x1070   :  { %v3518_v0 = vadd.f32 %v3517_v60, %v7086_v34  ;;  %v3537_v3 = vpop.f32.mrf.mxu1 }
0x1071   :  { %v3538_v45 = vadd.f32 %v3537_v3, %v6343_v47 }
0x1072   :  { %v3560_v6 = vadd.f32 %v3518_v0, %v2573_v37 }
0x1074   :  { %v3792_v8 = vmul.f32 -1.442695, %v3560_v6 }
0x1075   :  { %v3497_v25 = vpop.f32.mrf.mxu3 }
0x1076   :  { %4034 = vpow2.f32 %v3792_v8  ;;  %v3498_v18 = vadd.f32 %v3497_v25, %v7084_v24  ;;  %v3653_v27 = vpop.f32.mrf.mxu2 }
0x1077   :  { %v3654_v38 = vadd.f32 %v6771_v11, %v3653_v27 }
0x1078   :  { %v3540_v31 = vadd.f32 %v3498_v18, %v2532_v53 }
0x1079   :  { %3665 = vst [vmem:[#allocation10 + $0x30] sm:$0xff] %v3654_v38 }
0x107a   :  { %v3791_v21 = vmul.f32 -1.442695, %v3540_v31 }
0x107c   :  { %v4035_v62 = vpop.eup %4034  ;;  %4036 = vpow2.f32 %v3791_v21 }
0x107d   :  { %v3564_v22 = vadd.f32 1.0, %v4035_v62 }
0x107f   :  { %4038 = vrcp.f32 %v3564_v22  ;;  %v3576_v43 = vand.u32 2147483648, %v3564_v22  ;;  %vm3570_vm15 = vweird.f32 %v3564_v22  ;;  %v3574_v32 = vand.u32 2147483647, %v3564_v22 }
0x1081   :  { %v3577_v44 = vor.u32 1.1754944e-38, %v3576_v43  ;;  %vm3575_vm1 = vcmp.eq.f32.partialorder %v3574_v32, 8.507059e+37 }
0x1082   :  { %v4037_v34 = vpop.eup %4036 }
0x1083   :  { %v3544_v39 = vadd.f32 1.0, %v4037_v34 }
0x1085   :  { %4040 = vrcp.f32 %v3544_v39  ;;  %v4039_v51 = vpop.eup %4038  ;;  %v3556_v24 = vand.u32 2147483648, %v3544_v39  ;;  %v3554_v36 = vand.u32 2147483647, %v3544_v39  ;;  %vm3550_vm11 = vweird.f32 %v3544_v39 }
0x1086   :  { %v3566_v16 = vmul.f32 %v4039_v51, %v3564_v22  ;;  %vm3571_vm14 = vweird.f32 %v4039_v51 }
0x1087   :  { %v3557_v9 = vor.u32 1.1754944e-38, %v3556_v24  ;;  %vm3555_vm13 = vcmp.eq.f32.partialorder %v3554_v36, 8.507059e+37  ;;  %vm3572_vm0 = vmor %vm3570_vm15, %vm3571_vm14 }
0x1088   :  { %v3567_v49 = vsub.f32 1.0, %v3566_v16 }
0x108a   :  { %v3568_v56 = vmul.f32 %v4039_v51, %v3567_v49 }
0x108b   :  { %v4041_v54 = vpop.eup %4040 }
0x108c   :  { %v3546_v29 = vmul.f32 %v4041_v54, %v3544_v39  ;;  %vm3551_vm10 = vweird.f32 %v4041_v54  ;;  %v3569_v58 = vadd.f32 %v4039_v51, %v3568_v56 }
0x108d   :  { %vm3552_vm12 = vmor %vm3550_vm11, %vm3551_vm10 }
0x108e   :  { %v3547_v40 = vsub.f32 1.0, %v3546_v29  ;;  %v3573_v20 = vsel %vm3572_vm0, %v4039_v51, %v3569_v58 }
0x108f   :  { %v3578_v33 = vsel %vm3575_vm1, %v3577_v44, %v3573_v20 }
0x1090   :  { %v3548_v10 = vmul.f32 %v4041_v54, %v3547_v40  ;;  %v3583_v47 = vsub.f32 1.0, %v3578_v33  ;;  %v3585_v23 = vmul.f32 %v3578_v33, %v6781_v46 }
0x1092   :  { %v3549_v5 = vadd.f32 %v4041_v54, %v3548_v10 }
0x1094   :  { %v3553_v63 = vsel %vm3552_vm12, %v4041_v54, %v3549_v5 }
0x1095   :  { %v3558_v35 = vsel %vm3555_vm13, %v3557_v9, %v3553_v63 }
0x1096   :  { %v3580_v48 = vmul.f32 %v3558_v35, %v3538_v45 }
0x1098   :  { %v3581_v52 = vadd.f32 %v3580_v48, %v2614_v50 }
0x109a   :  { %4042 = vtanh.f32 %v3581_v52 }
0x10a0   :  { %v4043_v17 = vpop.eup %4042 }
0x10a1   :  { %v3584_v42 = vmul.f32 %v4043_v17, %v3583_v47 }
0x10a3   :  { %v3586_v1 = vadd.f32 %v3585_v23, %v3584_v42 }
0x10a5   :  { %3589 = vst [vmem:[#allocation11 + $0x10] sm:$0xff] %v3586_v1  ;;  %3655 = vmatmul.f32.gmra.mxu2 %v3586_v1 }
0x10a6   :  { %3692 = dma.vmem_to_hbm [thread:$0]  %s3685_s22, 384, %s3687_s25, [#allocation12], %s4321_s29, %s4321_s29, %s4322_s30  }
0x1128   :  { %v3656_v7 = vpop.f32.mrf.mxu2 }
0x1129   :  { %v3657_v30 = vadd.f32 %v6771_v11, %v3656_v7 }
0x112b   :  { %3666 = vst [vmem:[#allocation10 + $0x38] sm:$0xff] %v3657_v30 }
0x112c   :  { %3679 = dma.vmem_to_hbm [thread:$0]  %s3672_s27, 1024, %s3674_s28, [#allocation6], %s4321_s29, %s4321_s29, %s4322_s30  }
0x112d   :  { %4312 = dma.done.wait [#allocation6], 1024  }
0x112e   :  { %4313 = vsyncadd [#allocation6], 4294966272 }
0x112f   :  { %4314 = dma.done.wait [#allocation12], 384  }
0x1130   :  { %4315 = vsyncadd [#allocation12], 4294966912 }
0x1131   :  { %3701 = vsyncpa [#allocation5], 1 }
0x1132   :  { %3702 = vsyncpa [#allocation8], 1 }
0x1133   :  { %3703 = vsyncpa [#allocation6], 1 }
0x1134   :  { %3704 = vsyncpa [#allocation12], 1 }

</bundles_post_ra>
